<compile_context>
chip_gen: v7x
topology: tpu7x:2x2x1
jax: 0.10.0
libtpu: 0.0.40
codegen_flags: <defaults>
</compile_context>

<pallas_src>
import functools
import math

import numpy as np
import jax
import jax.numpy as jnp
from jax import lax
from jax.experimental import pallas as pl
from jax.experimental.pallas import tpu as pltpu


# -----------------------------------------------------------------------------
# In-kernel math helpers (operate on values already loaded from VMEM refs)
# -----------------------------------------------------------------------------
def _dot(a, b):
    return jnp.dot(a, b, preferred_element_type=jnp.float32)


def _dot_tn(a, b):
    """a.T @ b without materializing the transpose (contract axis 0 of both)."""
    return lax.dot_general(a, b, (((0,), (0,)), ((), ())),
                           preferred_element_type=jnp.float32)


def _dot_nt(a, b):
    """a @ b.T without materializing the transpose (contract axis 1 of both)."""
    return lax.dot_general(a, b, (((1,), (1,)), ((), ())),
                           preferred_element_type=jnp.float32)


def _gelu(x):
    # TODO(synk): torch nn.GELU defaults to the exact erf formulation; the tanh
    # approximation is used so the activation lowers cleanly to the TPU EUP.
    return 0.5 * x * (1.0 + jnp.tanh(0.7978845608028654 * (x + 0.044715 * x * x * x)))


def _leaky_relu(x):
    return jnp.where(x > 0, x, 0.2 * x)


def _layernorm(x, g, b):
    mean = jnp.mean(x, axis=-1, keepdims=True)
    xc = x - mean
    var = jnp.mean(xc * xc, axis=-1, keepdims=True)
    return xc * lax.rsqrt(var + 1e-5) * g + b


def _lin_pieces(pieces, w, b):
    """y = concat(pieces, axis=1) @ w + b without materializing the concat."""
    acc = b
    off = 0
    for p in pieces:
        width = p.shape[1]
        acc = acc + _dot(p, w[off:off + width, :])
        off += width
    return acc


def _segment_softmax_mean_aggregate(aw, nupd, snk_oh, nheads):
    """Per-sink-segment softmax over edges (vectorized over heads), mean over
    heads, then ONE aggregation matmul.

    aw:     (E, H) attention logits, heads in lanes
    nupd:   (E, D) per-edge node update (head-independent)
    snk_oh: (E, N) one-hot of each edge's sink node

    Matches torch_scatter semantics including the +1e-12 per-edge epsilon.
    All gathers/scatters run on the MXU; only the per-segment MAX needs a
    per-head masked reduction (max is not linear).
    """
    snk_on = snk_oh > 0.5
    seg_max_rows = []
    for h in range(nheads):                                    # H is tiny & static
        awh = aw[:, h:h + 1]                                   # static lane slice (E,1)
        masked = jnp.where(snk_on, awh, -1e30)                 # (E, N)
        seg_max_rows.append(jnp.max(masked, axis=0, keepdims=True))   # (1, N)
    seg_max = jnp.concatenate(seg_max_rows, axis=0)            # (H, N)
    seg_max_e = _dot_nt(snk_oh, seg_max)                       # (E, H) gather max -> edges (MXU)
    att = jnp.exp(aw - seg_max_e)                              # (E, H)
    seg_sum = _dot_tn(snk_oh, att + 1e-12)                     # (N, H) scatter-sum (MXU)
    seg_sum_e = _dot(snk_oh, seg_sum)                          # (E, H) gather back (MXU)
    att = att / seg_sum_e
    # mean over heads first (nupd is head-independent), then ONE aggregation matmul
    att_mean = jnp.mean(att, axis=1, keepdims=True)            # (E, 1)
    return _dot_tn(snk_oh, att_mean * nupd)                    # (N, D)


def _gat_node_block(bb, pieces, snk_oh, w, nheads):
    """Shared GATv2 block: stacked-head attention + scatter-softmax mean
    aggregation + residual/LN/FFN/LN (node_norm1 applied twice, residual is
    the aggregated update -- exactly as in the PyTorch reference)."""
    hw = _leaky_relu(_lin_pieces(pieces, w["attW"], w["attWb"]))   # (E, H*D) all heads in one matmul
    aw = _dot(hw, w["attA"]) + w["attAb"]                          # (E, H) block-diagonal per-head aA
    nupd = _gelu(_lin_pieces(pieces, w["nw1"], w["nb1"]))
    nupd = _gelu(_dot(nupd, w["nw2"]) + w["nb2"])
    nupd = _dot(nupd, w["nw3"]) + w["nb3"]                         # (E, D)
    upd = _segment_softmax_mean_aggregate(aw, nupd, snk_oh, nheads)
    x = _layernorm(bb + upd, w["lng"], w["lnb"])
    x = _gelu(_dot(x, w["dw1"]) + w["db1"])
    x = _dot(x, w["dw2"]) + w["db2"]
    return _layernorm(x + upd, w["lng"], w["lnb"])


def _argmax_encode(logits, encmat):
    """Re-encode the argmax chi bin without an explicit argmax: first-max
    one-hot (matches torch argmax tie-breaking) times a (B, B) basis matrix."""
    nbins = logits.shape[1]
    m = jnp.max(logits, axis=1, keepdims=True)
    lane = lax.broadcasted_iota(jnp.int32, logits.shape, 1).astype(jnp.float32)
    cand = jnp.where(logits >= m, lane, float(nbins))
    first = jnp.min(cand, axis=1, keepdims=True)
    onehot = (lane == first).astype(jnp.float32)
    return _dot(onehot, encmat)


# -----------------------------------------------------------------------------
# Fused Pallas kernels
# -----------------------------------------------------------------------------
_ENC_KEYS = ("attW", "attWb", "attA", "attAb",
             "nw1", "nb1", "nw2", "nb2", "nw3", "nb3",
             "dw1", "db1", "dw2", "db2",
             "ew1", "eb1", "ew2", "eb2", "ew3", "eb3",
             "lng", "lnb", "elng", "elnb")

_CHI_KEYS = ("attW", "attWb", "attA", "attAb",
             "nw1", "nb1", "nw2", "nb2", "nw3", "nb3",
             "dw1", "db1", "dw2", "db2",
             "lng", "lnb", "ow", "ob")

_DENSE_KEYS = ("w1", "b1", "w2", "b2", "w3", "b3", "ow", "ob")


def _encoder_stack_kernel(bb0_ref, dist_ref, rep_ref, mu_ref, eew_ref, eeb_ref,
                          src_oh_ref, snk_oh_ref, sel_ns_ref, *rest,
                          nheads, nlayers):
    enc_refs = dict(zip(_ENC_KEYS, rest[:len(_ENC_KEYS)]))
    bb_out_ref, eattr_ns_out_ref = rest[len(_ENC_KEYS):]

    # --- RBF distance encoding + edge-embedding linear (fused in) ---
    # rep/mu are pre-scaled by 1/sigma so no per-element divide is needed.
    d_scaled = _dot(dist_ref[...], rep_ref[...])                   # (E, M*nbins)
    rbf = jnp.exp(-((d_scaled - mu_ref[...]) ** 2)) + 1e-8
    eattr = _dot(rbf, eew_ref[...]) + eeb_ref[...]                 # (E, Ed)

    bb = bb0_ref[...]
    src_oh = src_oh_ref[...]
    snk_oh = snk_oh_ref[...]

    for l in range(nlayers):                                       # static unroll over layers
        w = {k: enc_refs[k][l] for k in _ENC_KEYS}
        # gather source/sink node embeddings via one-hot matmuls (MXU)
        pieces = [_dot(src_oh, bb), _dot(snk_oh, bb), eattr]
        bb = _gat_node_block(bb, pieces, snk_oh, w, nheads)
        # edge update with the NEW node embeddings
        epieces = [_dot(src_oh, bb), _dot(snk_oh, bb), eattr]
        eupd = _gelu(_lin_pieces(epieces, w["ew1"], w["eb1"]))
        eupd = _gelu(_dot(eupd, w["ew2"]) + w["eb2"])
        eupd = _dot(eupd, w["ew3"]) + w["eb3"]
        eattr = _layernorm(eattr + eupd, w["elng"], w["elnb"])

    bb_out_ref[...] = bb
    # no-self edge gather for the chi stage, also kept on the MXU
    eattr_ns_out_ref[...] = _dot(sel_ns_ref[...], eattr)


def _chi_chain_kernel(bb_ref, eattr_ref, chienc_ref, src_oh_ref, snk_oh_ref, encmat_ref,
                      *rest, nheads, num_dense):
    n_c, n_d = len(_CHI_KEYS), len(_DENSE_KEYS)
    cw = {k: r[...] for k, r in zip(_CHI_KEYS, rest[:n_c])}
    dref = dict(zip(_DENSE_KEYS, rest[n_c:n_c + n_d]))
    (logits_out_ref,) = rest[n_c + n_d:]

    bb = bb_ref[...]
    eattr = eattr_ref[...]                   # (E_ns, Ed) no-self edge attrs
    chienc = chienc_ref[...]                 # (N, 4*B) encoded ground-truth chi angles
    src_oh = src_oh_ref[...]
    snk_oh = snk_oh_ref[...]
    encmat = encmat_ref[...]

    # --- ChiPredictionLayer (chi 0), teacher forcing disabled ---
    # TODO(synk): the prev_chi[snk] feature piece is omitted -- it is zero-width
    # for the first chi layer, the only ChiPredictionLayer when use_dense_chi_layer=True.
    pieces = [_dot(src_oh, bb), _dot(snk_oh, bb), _dot(src_oh, chienc), eattr]
    bb_cur = _gat_node_block(bb, pieces, snk_oh, cw, nheads)
    lg = _dot(bb_cur, cw["ow"]) + cw["ob"]                         # (N, B)

    logits_pieces = [lg]
    chi_encs = [_argmax_encode(lg, encmat)]                        # autoregressive re-encode

    # --- DenseChiLayers (chi 1..3), autoregressive on own predictions ---
    for i in range(num_dense):
        w = {k: dref[k][i] for k in _DENSE_KEYS}
        x = _gelu(_lin_pieces([bb_cur] + chi_encs, w["w1"], w["b1"]))
        x = _gelu(_dot(x, w["w2"]) + w["b2"])
        bb_cur = _dot(x, w["w3"]) + w["b3"]                        # no residual, per reference
        lg = _dot(_gelu(bb_cur), w["ow"]) + w["ob"]
        logits_pieces.append(lg)
        if i + 1 < num_dense:
            chi_encs.append(_argmax_encode(lg, encmat))

    # single lane-dense (N, 4*B) logits slab
    logits_out_ref[...] = jnp.concatenate(logits_pieces, axis=1)


# -----------------------------------------------------------------------------
# pallas_call wrappers (no grid: single invocation, whole arrays in VMEM)
# -----------------------------------------------------------------------------
_VMEM_SPEC = pl.BlockSpec(memory_space=pltpu.MemorySpace.VMEM)
_COMPILER_PARAMS = pltpu.CompilerParams(vmem_limit_bytes=32 * 1024 * 1024)


def _fused_call(kernel, out_shapes, args):
    return pl.pallas_call(
        kernel,
        out_shape=tuple(out_shapes),
        in_specs=[_VMEM_SPEC] * len(args),
        out_specs=tuple(_VMEM_SPEC for _ in out_shapes),
        compiler_params=_COMPILER_PARAMS,
    )(*args)


def encoder_stack_forward(params, consts, bb0, d_pad):
    N, D = bb0.shape
    enc = params["encoders"]
    E_ns = consts["sel_ns"].shape[0]
    Ed = params["edge_embed_w"].shape[1]
    kernel = functools.partial(_encoder_stack_kernel,
                               nheads=int(enc["attA"].shape[2]),
                               nlayers=int(enc["attW"].shape[0]))
    args = (bb0, d_pad, consts["rbf_rep"], consts["rbf_mu_row"],
            params["edge_embed_w"], params["edge_embed_b"],
            consts["src_oh"], consts["snk_oh"], consts["sel_ns"],
            *(enc[k] for k in _ENC_KEYS))
    out_shapes = (jax.ShapeDtypeStruct((N, D), jnp.float32),
                  jax.ShapeDtypeStruct((E_ns, Ed), jnp.float32))
    return _fused_call(kernel, out_shapes, args)


def chi_chain_forward(params, consts, bb, eattr_ns, enc_chi):
    N = bb.shape[0]
    chi = params["chi_pred"]
    dense = params["dense_chi"]
    nbins = int(chi["ob"].shape[1])
    num_dense = int(dense["w1"].shape[0])
    kernel = functools.partial(_chi_chain_kernel,
                               nheads=int(chi["attA"].shape[1]),
                               num_dense=num_dense)
    args = (bb, eattr_ns, enc_chi, consts["src_oh_ns"], consts["snk_oh_ns"], consts["encmat"],
            *(chi[k] for k in _CHI_KEYS),
            *(dense[k] for k in _DENSE_KEYS))
    out_shapes = (jax.ShapeDtypeStruct((N, (1 + num_dense) * nbins), jnp.float32),)
    return _fused_call(kernel, out_shapes, args)[0]


# -----------------------------------------------------------------------------
# RotamerBuilder stand-in + jit-friendly basis function
# -----------------------------------------------------------------------------
def _binned_basis(chi_deg, bins, sigma):
    diff = chi_deg[..., None] - bins
    diff = (diff + 180.0) % 360.0 - 180.0
    return jnp.exp(-((diff / sigma) ** 2))


class RotamerBuilder:
    # TODO(synk): reference RotamerBuilder source is not provided; this is a
    # deterministic periodic-RBF binning of degree angles with the same interface.
    def __init__(self, num_chi_bins=8, **kwargs):
        self.num_chi_bins = num_chi_bins
        step = 360.0 / num_chi_bins
        self.index_to_degree_bin = jnp.arange(num_chi_bins, dtype=jnp.float32) * step - 180.0
        self._sigma = step

    def compute_binned_degree_basis_function(self, chi_deg):
        return _binned_basis(chi_deg, self.index_to_degree_bin, self._sigma)


# -----------------------------------------------------------------------------
# Parameter initialization / packing (torch-Linear-like uniform init)
# -----------------------------------------------------------------------------
class KeyGen:
    def __init__(self, key):
        self.key = key

    def __call__(self):
        self.key, sub = jax.random.split(self.key)
        return sub


def row(b):
    return b.reshape(1, -1)


def init_linear(key, fin, fout):
    kw, kb = jax.random.split(key)
    bound = 1.0 / math.sqrt(fin)
    w = jax.random.uniform(kw, (fin, fout), jnp.float32, -bound, bound)
    b = jax.random.uniform(kb, (fout,), jnp.float32, -bound, bound)
    return w, b


def pack_attention(aW_list, aA_list, D):
    """Stack per-head aW into (cin, H*D) and aA into a block-diagonal (H*D, H)."""
    attW = jnp.concatenate([w for w, _ in aW_list], axis=1)
    attWb = jnp.concatenate([row(b) for _, b in aW_list], axis=1)
    H = len(aA_list)
    attA = jnp.zeros((H * D, H), jnp.float32)
    for h, (w, _) in enumerate(aA_list):
        attA = attA.at[h * D:(h + 1) * D, h].set(w[:, 0])
    attAb = jnp.concatenate([b.reshape(1, 1) for _, b in aA_list], axis=1)
    return attW, attWb, attA, attAb


def init_gat_common(kg, cin, D, H):
    aW = [init_linear(kg(), cin, D) for _ in range(H)]
    aA = [init_linear(kg(), D, 1) for _ in range(H)]
    attW, attWb, attA, attAb = pack_attention(aW, aA, D)
    nw1, nb1 = init_linear(kg(), cin, D)
    nw2, nb2 = init_linear(kg(), D, D)
    nw3, nb3 = init_linear(kg(), D, D)
    dw1, db1 = init_linear(kg(), D, 4 * D)
    dw2, db2 = init_linear(kg(), 4 * D, D)
    return dict(attW=attW, attWb=attWb, attA=attA, attAb=attAb,
                nw1=nw1, nb1=row(nb1), nw2=nw2, nb2=row(nb2), nw3=nw3, nb3=row(nb3),
                dw1=dw1, db1=row(db1), dw2=dw2, db2=row(db2),
                lng=jnp.ones((1, D), jnp.float32), lnb=jnp.zeros((1, D), jnp.float32))


def init_encoder_layer(kg, D, Ed, H):
    cin = 2 * D + Ed
    p = init_gat_common(kg, cin, D, H)
    ew1, eb1 = init_linear(kg(), cin, Ed)
    ew2, eb2 = init_linear(kg(), Ed, Ed)
    ew3, eb3 = init_linear(kg(), Ed, Ed)
    p.update(ew1=ew1, eb1=row(eb1), ew2=ew2, eb2=row(eb2), ew3=ew3, eb3=row(eb3),
             elng=jnp.ones((1, Ed), jnp.float32), elnb=jnp.zeros((1, Ed), jnp.float32))
    return p


def init_chi_pred(kg, D, Ed, H, num_chi_bins):
    cin = 2 * D + 4 * num_chi_bins + Ed   # concat_feature_dimension
    p = init_gat_common(kg, cin, D, H)
    ow, ob = init_linear(kg(), D, num_chi_bins)
    p.update(ow=ow, ob=row(ob))
    return p


def init_dense_chi_stack(kg, D, num_chi_bins, num_dense=3):
    layers = []
    max_prev = num_chi_bins * num_dense
    for i in range(num_dense):
        chi_idx = i + 1
        w1, b1 = init_linear(kg(), D + num_chi_bins * chi_idx, D)
        # zero-pad unused prev-chi rows so the 3 layers stack into one ref
        w1 = jnp.pad(w1, ((0, max_prev - num_chi_bins * chi_idx), (0, 0)))
        w2, b2 = init_linear(kg(), D, D)
        w3, b3 = init_linear(kg(), D, D)
        ow, ob = init_linear(kg(), D, num_chi_bins)
        layers.append(dict(w1=w1, b1=row(b1), w2=w2, b2=row(b2), w3=w3, b3=row(b3),
                           ow=ow, ob=row(ob)))
    return {k: jnp.stack([l[k] for l in layers]) for k in _DENSE_KEYS}


def stack_layers(layers, keys):
    return {k: jnp.stack([l[k] for l in layers]) for k in keys}


def build_constants(edge_index, edge_index_noself, noself_pos, num_nodes,
                    m_dist, rbf_mu, rbf_sigma, rb):
    """Host-side, once-per-graph constants: one-hot gather/scatter matrices,
    self-edge selection matrix, pre-scaled RBF repeat/mu, chi basis tables."""
    E = edge_index.shape[1]
    nbins_rbf = rbf_mu.shape[0]
    F = m_dist * nbins_rbf
    m_pad = ((m_dist + 7) // 8) * 8
    eye_n = np.eye(num_nodes, dtype=np.float32)
    rep = np.zeros((m_pad, F), np.float32)
    rep[:m_dist] = np.repeat(np.eye(m_dist, dtype=np.float32), nbins_rbf, axis=1)
    mu_row = np.tile(np.asarray(rbf_mu, np.float32), (m_dist,)).reshape(1, F)
    inv_sigma = 1.0 / float(rbf_sigma)
    bins = np.asarray(rb.index_to_degree_bin, np.float32)
    encmat = np.asarray(
        rb.compute_binned_degree_basis_function(jnp.asarray(bins)[:, None]))[:, 0, :]
    return dict(
        src_oh=jnp.asarray(eye_n[edge_index[0]]),
        snk_oh=jnp.asarray(eye_n[edge_index[1]]),
        src_oh_ns=jnp.asarray(eye_n[edge_index_noself[0]]),
        snk_oh_ns=jnp.asarray(eye_n[edge_index_noself[1]]),
        sel_ns=jnp.asarray(np.eye(E, dtype=np.float32)[noself_pos]),
        rbf_rep=jnp.asarray(rep * inv_sigma),
        rbf_mu_row=jnp.asarray(mu_row * inv_sigma),
        chi_bins=jnp.asarray(bins),
        chi_sigma=jnp.float32(rb._sigma),
        encmat=jnp.asarray(encmat, jnp.float32),
    )


# -----------------------------------------------------------------------------
# Forward pass (eval mode: dropout identity, teacher_force = False), jitted
# -----------------------------------------------------------------------------
def _forward_impl(params, consts, sequence_indices, chi_angles, edge_distance):
    N = sequence_indices.shape[0]
    nbins = consts["chi_bins"].shape[0]

    bb0 = params["seq_embedding"][sequence_indices]               # (N, D)
    enc_chi = jnp.nan_to_num(
        _binned_basis(chi_angles, consts["chi_bins"], consts["chi_sigma"])
    ).reshape(N, -1)                                              # (N, 4*B)

    m_pad = consts["rbf_rep"].shape[0]
    d_pad = jnp.pad(edge_distance, ((0, 0), (0, m_pad - edge_distance.shape[1])))

    bb, eattr_ns = encoder_stack_forward(params, consts, bb0, d_pad)
    logits_flat = chi_chain_forward(params, consts, bb, eattr_ns, enc_chi)

    n_chi = 1 + params["dense_chi"]["w1"].shape[0]
    chi_logits = logits_flat.reshape(N, n_chi, nbins)
    sampled = consts["chi_bins"][jnp.argmax(chi_logits, axis=-1)]
    return chi_logits, sampled


reinforcemer_repacker_forward = jax.jit(_forward_impl)


# -----------------------------------------------------------------------------
# Main
# -----------------------------------------------------------------------------
if __name__ == "__main__":
    kg = KeyGen(jax.random.PRNGKey(0))

    # small config
    N, D, Ed, H = 16, 32, 32, 2
    num_chi_bins = 8
    num_encoder_layers = 2
    M_dist = 5
    rbf_cfg = dict(num_bins=8, bin_min=2.0, bin_max=22.0)

    rb = RotamerBuilder(num_chi_bins=num_chi_bins)

    # graph: each node connects to itself + 4 neighbours
    src, dst = [], []
    for i in range(N):
        for off in range(5):
            src.append(i)
            dst.append((i + off) % N)
    edge_index_np = np.stack([np.asarray(src), np.asarray(dst)]).astype(np.int32)
    keep = edge_index_np[0] != edge_index_np[1]            # self-edge filtering (static host glue)
    noself_pos_np = np.nonzero(keep)[0].astype(np.int32)
    edge_index_noself_np = edge_index_np[:, keep]
    E = edge_index_np.shape[1]

    chi_angles = jax.random.uniform(kg(), (N, 4), jnp.float32, -180.0, 180.0)
    chi_angles = chi_angles.at[3, 2].set(jnp.nan)          # exercise nan_to_num path

    sequence_indices = jax.random.randint(kg(), (N,), 0, 21)
    edge_distance = jax.random.uniform(kg(), (E, M_dist), jnp.float32, 2.0, 22.0)

    rbf_mu = np.linspace(rbf_cfg["bin_min"], rbf_cfg["bin_max"],
                         rbf_cfg["num_bins"]).astype(np.float32)
    rbf_sigma = (rbf_cfg["bin_max"] - rbf_cfg["bin_min"]) / rbf_cfg["num_bins"]

    consts = build_constants(edge_index_np, edge_index_noself_np, noself_pos_np, N,
                             M_dist, rbf_mu, rbf_sigma, rb)

    eew, eeb = init_linear(kg(), M_dist * rbf_cfg["num_bins"], Ed)
    params = dict(
        seq_embedding=jax.random.normal(kg(), (21, D), jnp.float32),
        edge_embed_w=eew, edge_embed_b=row(eeb),
        encoders=stack_layers(
            [init_encoder_layer(kg, D, Ed, H) for _ in range(num_encoder_layers)], _ENC_KEYS),
        chi_pred=init_chi_pred(kg, D, Ed, H, num_chi_bins),
        dense_chi=init_dense_chi_stack(kg, D, num_chi_bins, 3),
    )

    chi_logits, sampled_chi_angles = reinforcemer_repacker_forward(
        params, consts, sequence_indices, chi_angles, edge_distance)
    jax.block_until_ready((chi_logits, sampled_chi_angles))

    assert chi_logits.shape == (N, 4, num_chi_bins)
    assert sampled_chi_angles.shape == (N, 4)
    assert bool(jnp.all(jnp.isfinite(chi_logits)))
    assert bool(jnp.all(jnp.isfinite(sampled_chi_angles)))
    print("KERNEL_OK")
</pallas_src>

<mosaic_0001>
module attributes {stable_mosaic.version = 11 : i64} {
  func.func @_encoder_stack_kernel(%arg0: memref<16x32xf32, #tpu.memory_space<vmem>>, %arg1: memref<80x8xf32, #tpu.memory_space<vmem>>, %arg2: memref<8x40xf32, #tpu.memory_space<vmem>>, %arg3: memref<1x40xf32, #tpu.memory_space<vmem>>, %arg4: memref<40x32xf32, #tpu.memory_space<vmem>>, %arg5: memref<1x32xf32, #tpu.memory_space<vmem>>, %arg6: memref<80x16xf32, #tpu.memory_space<vmem>>, %arg7: memref<80x16xf32, #tpu.memory_space<vmem>>, %arg8: memref<64x80xf32, #tpu.memory_space<vmem>>, %arg9: memref<2x96x64xf32, #tpu.memory_space<vmem>>, %arg10: memref<2x1x64xf32, #tpu.memory_space<vmem>>, %arg11: memref<2x64x2xf32, #tpu.memory_space<vmem>>, %arg12: memref<2x1x2xf32, #tpu.memory_space<vmem>>, %arg13: memref<2x96x32xf32, #tpu.memory_space<vmem>>, %arg14: memref<2x1x32xf32, #tpu.memory_space<vmem>>, %arg15: memref<2x32x32xf32, #tpu.memory_space<vmem>>, %arg16: memref<2x1x32xf32, #tpu.memory_space<vmem>>, %arg17: memref<2x32x32xf32, #tpu.memory_space<vmem>>, %arg18: memref<2x1x32xf32, #tpu.memory_space<vmem>>, %arg19: memref<2x32x128xf32, #tpu.memory_space<vmem>>, %arg20: memref<2x1x128xf32, #tpu.memory_space<vmem>>, %arg21: memref<2x128x32xf32, #tpu.memory_space<vmem>>, %arg22: memref<2x1x32xf32, #tpu.memory_space<vmem>>, %arg23: memref<2x96x32xf32, #tpu.memory_space<vmem>>, %arg24: memref<2x1x32xf32, #tpu.memory_space<vmem>>, %arg25: memref<2x32x32xf32, #tpu.memory_space<vmem>>, %arg26: memref<2x1x32xf32, #tpu.memory_space<vmem>>, %arg27: memref<2x32x32xf32, #tpu.memory_space<vmem>>, %arg28: memref<2x1x32xf32, #tpu.memory_space<vmem>>, %arg29: memref<2x1x32xf32, #tpu.memory_space<vmem>>, %arg30: memref<2x1x32xf32, #tpu.memory_space<vmem>>, %arg31: memref<2x1x32xf32, #tpu.memory_space<vmem>>, %arg32: memref<2x1x32xf32, #tpu.memory_space<vmem>>, %arg33: memref<16x32xf32, #tpu.memory_space<vmem>>, %arg34: memref<64x32xf32, #tpu.memory_space<vmem>>) attributes {dimension_semantics = [], scalar_prefetch = 0 : i64, scratch_operands = 0 : i64, tpu.core_type = #tpu.core_type<tc>} {
    %c0 = arith.constant 0 : index
    %c0_0 = arith.constant 0 : index
    %0 = vector.load %arg1[%c0, %c0_0] : memref<80x8xf32, #tpu.memory_space<vmem>>, vector<80x8xf32>
    %c0_1 = arith.constant 0 : index
    %c0_2 = arith.constant 0 : index
    %1 = vector.load %arg2[%c0_1, %c0_2] : memref<8x40xf32, #tpu.memory_space<vmem>>, vector<8x40xf32>
    %cst = arith.constant dense<0.000000e+00> : vector<80x40xf32>
    %2 = tpu.matmul %0, %1, %cst {dimension_numbers = #tpu.dot_dimension_numbers<[1], [0], [0], [1], [0, 0, 1, 1], [], []>} : vector<80x8xf32>, vector<8x40xf32>, vector<80x40xf32> -> vector<80x40xf32>
    %c0_3 = arith.constant 0 : index
    %c0_4 = arith.constant 0 : index
    %3 = vector.load %arg3[%c0_3, %c0_4] : memref<1x40xf32, #tpu.memory_space<vmem>>, vector<1x40xf32>
    %4 = vector.broadcast %3 : vector<1x40xf32> to vector<80x40xf32>
    %5 = arith.subf %2, %4 : vector<80x40xf32>
    %6 = arith.mulf %5, %5 : vector<80x40xf32>
    %cst_5 = arith.constant 0.000000e+00 : f32
    %7 = vector.broadcast %cst_5 : f32 to vector<80x40xf32>
    %8 = arith.subf %7, %6 : vector<80x40xf32>
    %9 = math.exp %8 : vector<80x40xf32>
    %cst_6 = arith.constant 9.99999993E-9 : f32
    %10 = vector.broadcast %cst_6 : f32 to vector<80x40xf32>
    %11 = arith.addf %9, %10 : vector<80x40xf32>
    %c0_7 = arith.constant 0 : index
    %c0_8 = arith.constant 0 : index
    %12 = vector.load %arg4[%c0_7, %c0_8] : memref<40x32xf32, #tpu.memory_space<vmem>>, vector<40x32xf32>
    %cst_9 = arith.constant dense<0.000000e+00> : vector<80x32xf32>
    %13 = tpu.matmul %11, %12, %cst_9 {dimension_numbers = #tpu.dot_dimension_numbers<[1], [0], [0], [1], [0, 0, 1, 1], [], []>} : vector<80x40xf32>, vector<40x32xf32>, vector<80x32xf32> -> vector<80x32xf32>
    %c0_10 = arith.constant 0 : index
    %c0_11 = arith.constant 0 : index
    %14 = vector.load %arg5[%c0_10, %c0_11] : memref<1x32xf32, #tpu.memory_space<vmem>>, vector<1x32xf32>
    %15 = vector.broadcast %14 : vector<1x32xf32> to vector<80x32xf32>
    %16 = arith.addf %13, %15 : vector<80x32xf32>
    %c0_12 = arith.constant 0 : index
    %c0_13 = arith.constant 0 : index
    %17 = vector.load %arg0[%c0_12, %c0_13] : memref<16x32xf32, #tpu.memory_space<vmem>>, vector<16x32xf32>
    %c0_14 = arith.constant 0 : index
    %c0_15 = arith.constant 0 : index
    %18 = vector.load %arg6[%c0_14, %c0_15] : memref<80x16xf32, #tpu.memory_space<vmem>>, vector<80x16xf32>
    %c0_16 = arith.constant 0 : index
    %c0_17 = arith.constant 0 : index
    %19 = vector.load %arg7[%c0_16, %c0_17] : memref<80x16xf32, #tpu.memory_space<vmem>>, vector<80x16xf32>
    %c0_18 = arith.constant 0 : index
    %c0_19 = arith.constant 0 : index
    %c0_20 = arith.constant 0 : index
    %20 = vector.load %arg9[%c0_18, %c0_19, %c0_20] : memref<2x96x64xf32, #tpu.memory_space<vmem>>, vector<1x96x64xf32>
    %21 = vector.shape_cast %20 : vector<1x96x64xf32> to vector<96x64xf32>
    %c0_21 = arith.constant 0 : index
    %c0_22 = arith.constant 0 : index
    %c0_23 = arith.constant 0 : index
    %22 = vector.load %arg10[%c0_21, %c0_22, %c0_23] : memref<2x1x64xf32, #tpu.memory_space<vmem>>, vector<1x1x64xf32>
    %23 = vector.shape_cast %22 : vector<1x1x64xf32> to vector<1x64xf32>
    %c0_24 = arith.constant 0 : index
    %c0_25 = arith.constant 0 : index
    %c0_26 = arith.constant 0 : index
    %24 = vector.load %arg11[%c0_24, %c0_25, %c0_26] : memref<2x64x2xf32, #tpu.memory_space<vmem>>, vector<1x64x2xf32>
    %25 = vector.shape_cast %24 : vector<1x64x2xf32> to vector<64x2xf32>
    %c0_27 = arith.constant 0 : index
    %c0_28 = arith.constant 0 : index
    %c0_29 = arith.constant 0 : index
    %26 = vector.load %arg12[%c0_27, %c0_28, %c0_29] : memref<2x1x2xf32, #tpu.memory_space<vmem>>, vector<1x1x2xf32>
    %27 = vector.shape_cast %26 : vector<1x1x2xf32> to vector<1x2xf32>
    %c0_30 = arith.constant 0 : index
    %c0_31 = arith.constant 0 : index
    %c0_32 = arith.constant 0 : index
    %28 = vector.load %arg13[%c0_30, %c0_31, %c0_32] : memref<2x96x32xf32, #tpu.memory_space<vmem>>, vector<1x96x32xf32>
    %29 = vector.shape_cast %28 : vector<1x96x32xf32> to vector<96x32xf32>
    %c0_33 = arith.constant 0 : index
    %c0_34 = arith.constant 0 : index
    %c0_35 = arith.constant 0 : index
    %30 = vector.load %arg14[%c0_33, %c0_34, %c0_35] : memref<2x1x32xf32, #tpu.memory_space<vmem>>, vector<1x1x32xf32>
    %31 = vector.shape_cast %30 : vector<1x1x32xf32> to vector<1x32xf32>
    %c0_36 = arith.constant 0 : index
    %c0_37 = arith.constant 0 : index
    %c0_38 = arith.constant 0 : index
    %32 = vector.load %arg15[%c0_36, %c0_37, %c0_38] : memref<2x32x32xf32, #tpu.memory_space<vmem>>, vector<1x32x32xf32>
    %33 = vector.shape_cast %32 : vector<1x32x32xf32> to vector<32x32xf32>
    %c0_39 = arith.constant 0 : index
    %c0_40 = arith.constant 0 : index
    %c0_41 = arith.constant 0 : index
    %34 = vector.load %arg16[%c0_39, %c0_40, %c0_41] : memref<2x1x32xf32, #tpu.memory_space<vmem>>, vector<1x1x32xf32>
    %35 = vector.shape_cast %34 : vector<1x1x32xf32> to vector<1x32xf32>
    %c0_42 = arith.constant 0 : index
    %c0_43 = arith.constant 0 : index
    %c0_44 = arith.constant 0 : index
    %36 = vector.load %arg17[%c0_42, %c0_43, %c0_44] : memref<2x32x32xf32, #tpu.memory_space<vmem>>, vector<1x32x32xf32>
    %37 = vector.shape_cast %36 : vector<1x32x32xf32> to vector<32x32xf32>
    %c0_45 = arith.constant 0 : index
    %c0_46 = arith.constant 0 : index
    %c0_47 = arith.constant 0 : index
    %38 = vector.load %arg18[%c0_45, %c0_46, %c0_47] : memref<2x1x32xf32, #tpu.memory_space<vmem>>, vector<1x1x32xf32>
    %39 = vector.shape_cast %38 : vector<1x1x32xf32> to vector<1x32xf32>
    %c0_48 = arith.constant 0 : index
    %c0_49 = arith.constant 0 : index
    %c0_50 = arith.constant 0 : index
    %40 = vector.load %arg19[%c0_48, %c0_49, %c0_50] : memref<2x32x128xf32, #tpu.memory_space<vmem>>, vector<1x32x128xf32>
    %41 = vector.shape_cast %40 : vector<1x32x128xf32> to vector<32x128xf32>
    %c0_51 = arith.constant 0 : index
    %c0_52 = arith.constant 0 : index
    %c0_53 = arith.constant 0 : index
    %42 = vector.load %arg20[%c0_51, %c0_52, %c0_53] : memref<2x1x128xf32, #tpu.memory_space<vmem>>, vector<1x1x128xf32>
    %43 = vector.shape_cast %42 : vector<1x1x128xf32> to vector<1x128xf32>
    %c0_54 = arith.constant 0 : index
    %c0_55 = arith.constant 0 : index
    %c0_56 = arith.constant 0 : index
    %44 = vector.load %arg21[%c0_54, %c0_55, %c0_56] : memref<2x128x32xf32, #tpu.memory_space<vmem>>, vector<1x128x32xf32>
    %45 = vector.shape_cast %44 : vector<1x128x32xf32> to vector<128x32xf32>
    %c0_57 = arith.constant 0 : index
    %c0_58 = arith.constant 0 : index
    %c0_59 = arith.constant 0 : index
    %46 = vector.load %arg22[%c0_57, %c0_58, %c0_59] : memref<2x1x32xf32, #tpu.memory_space<vmem>>, vector<1x1x32xf32>
    %47 = vector.shape_cast %46 : vector<1x1x32xf32> to vector<1x32xf32>
    %c0_60 = arith.constant 0 : index
    %c0_61 = arith.constant 0 : index
    %c0_62 = arith.constant 0 : index
    %48 = vector.load %arg23[%c0_60, %c0_61, %c0_62] : memref<2x96x32xf32, #tpu.memory_space<vmem>>, vector<1x96x32xf32>
    %49 = vector.shape_cast %48 : vector<1x96x32xf32> to vector<96x32xf32>
    %c0_63 = arith.constant 0 : index
    %c0_64 = arith.constant 0 : index
    %c0_65 = arith.constant 0 : index
    %50 = vector.load %arg24[%c0_63, %c0_64, %c0_65] : memref<2x1x32xf32, #tpu.memory_space<vmem>>, vector<1x1x32xf32>
    %51 = vector.shape_cast %50 : vector<1x1x32xf32> to vector<1x32xf32>
    %c0_66 = arith.constant 0 : index
    %c0_67 = arith.constant 0 : index
    %c0_68 = arith.constant 0 : index
    %52 = vector.load %arg25[%c0_66, %c0_67, %c0_68] : memref<2x32x32xf32, #tpu.memory_space<vmem>>, vector<1x32x32xf32>
    %53 = vector.shape_cast %52 : vector<1x32x32xf32> to vector<32x32xf32>
    %c0_69 = arith.constant 0 : index
    %c0_70 = arith.constant 0 : index
    %c0_71 = arith.constant 0 : index
    %54 = vector.load %arg26[%c0_69, %c0_70, %c0_71] : memref<2x1x32xf32, #tpu.memory_space<vmem>>, vector<1x1x32xf32>
    %55 = vector.shape_cast %54 : vector<1x1x32xf32> to vector<1x32xf32>
    %c0_72 = arith.constant 0 : index
    %c0_73 = arith.constant 0 : index
    %c0_74 = arith.constant 0 : index
    %56 = vector.load %arg27[%c0_72, %c0_73, %c0_74] : memref<2x32x32xf32, #tpu.memory_space<vmem>>, vector<1x32x32xf32>
    %57 = vector.shape_cast %56 : vector<1x32x32xf32> to vector<32x32xf32>
    %c0_75 = arith.constant 0 : index
    %c0_76 = arith.constant 0 : index
    %c0_77 = arith.constant 0 : index
    %58 = vector.load %arg28[%c0_75, %c0_76, %c0_77] : memref<2x1x32xf32, #tpu.memory_space<vmem>>, vector<1x1x32xf32>
    %59 = vector.shape_cast %58 : vector<1x1x32xf32> to vector<1x32xf32>
    %c0_78 = arith.constant 0 : index
    %c0_79 = arith.constant 0 : index
    %c0_80 = arith.constant 0 : index
    %60 = vector.load %arg29[%c0_78, %c0_79, %c0_80] : memref<2x1x32xf32, #tpu.memory_space<vmem>>, vector<1x1x32xf32>
    %61 = vector.shape_cast %60 : vector<1x1x32xf32> to vector<1x32xf32>
    %c0_81 = arith.constant 0 : index
    %c0_82 = arith.constant 0 : index
    %c0_83 = arith.constant 0 : index
    %62 = vector.load %arg30[%c0_81, %c0_82, %c0_83] : memref<2x1x32xf32, #tpu.memory_space<vmem>>, vector<1x1x32xf32>
    %63 = vector.shape_cast %62 : vector<1x1x32xf32> to vector<1x32xf32>
    %c0_84 = arith.constant 0 : index
    %c0_85 = arith.constant 0 : index
    %c0_86 = arith.constant 0 : index
    %64 = vector.load %arg31[%c0_84, %c0_85, %c0_86] : memref<2x1x32xf32, #tpu.memory_space<vmem>>, vector<1x1x32xf32>
    %65 = vector.shape_cast %64 : vector<1x1x32xf32> to vector<1x32xf32>
    %c0_87 = arith.constant 0 : index
    %c0_88 = arith.constant 0 : index
    %c0_89 = arith.constant 0 : index
    %66 = vector.load %arg32[%c0_87, %c0_88, %c0_89] : memref<2x1x32xf32, #tpu.memory_space<vmem>>, vector<1x1x32xf32>
    %67 = vector.shape_cast %66 : vector<1x1x32xf32> to vector<1x32xf32>
    %cst_90 = arith.constant dense<0.000000e+00> : vector<80x32xf32>
    %68 = tpu.matmul %18, %17, %cst_90 {dimension_numbers = #tpu.dot_dimension_numbers<[1], [0], [0], [1], [0, 0, 1, 1], [], []>} : vector<80x16xf32>, vector<16x32xf32>, vector<80x32xf32> -> vector<80x32xf32>
    %cst_91 = arith.constant dense<0.000000e+00> : vector<80x32xf32>
    %69 = tpu.matmul %19, %17, %cst_91 {dimension_numbers = #tpu.dot_dimension_numbers<[1], [0], [0], [1], [0, 0, 1, 1], [], []>} : vector<80x16xf32>, vector<16x32xf32>, vector<80x32xf32> -> vector<80x32xf32>
    %70 = vector.extract_strided_slice %21 {offsets = [0, 0], sizes = [32, 64], strides = [1, 1]} : vector<96x64xf32> to vector<32x64xf32>
    %cst_92 = arith.constant dense<0.000000e+00> : vector<80x64xf32>
    %71 = tpu.matmul %68, %70, %cst_92 {dimension_numbers = #tpu.dot_dimension_numbers<[1], [0], [0], [1], [0, 0, 1, 1], [], []>} : vector<80x32xf32>, vector<32x64xf32>, vector<80x64xf32> -> vector<80x64xf32>
    %72 = vector.broadcast %23 : vector<1x64xf32> to vector<80x64xf32>
    %73 = arith.addf %72, %71 : vector<80x64xf32>
    %74 = vector.extract_strided_slice %21 {offsets = [32, 0], sizes = [32, 64], strides = [1, 1]} : vector<96x64xf32> to vector<32x64xf32>
    %cst_93 = arith.constant dense<0.000000e+00> : vector<80x64xf32>
    %75 = tpu.matmul %69, %74, %cst_93 {dimension_numbers = #tpu.dot_dimension_numbers<[1], [0], [0], [1], [0, 0, 1, 1], [], []>} : vector<80x32xf32>, vector<32x64xf32>, vector<80x64xf32> -> vector<80x64xf32>
    %76 = arith.addf %73, %75 : vector<80x64xf32>
    %77 = vector.extract_strided_slice %21 {offsets = [64, 0], sizes = [32, 64], strides = [1, 1]} : vector<96x64xf32> to vector<32x64xf32>
    %cst_94 = arith.constant dense<0.000000e+00> : vector<80x64xf32>
    %78 = tpu.matmul %16, %77, %cst_94 {dimension_numbers = #tpu.dot_dimension_numbers<[1], [0], [0], [1], [0, 0, 1, 1], [], []>} : vector<80x32xf32>, vector<32x64xf32>, vector<80x64xf32> -> vector<80x64xf32>
    %79 = arith.addf %76, %78 : vector<80x64xf32>
    %cst_95 = arith.constant 0.000000e+00 : f32
    %80 = vector.broadcast %cst_95 : f32 to vector<80x64xf32>
    %81 = arith.cmpf ogt, %79, %80 : vector<80x64xf32>
    %cst_96 = arith.constant 2.000000e-01 : f32
    %82 = vector.broadcast %cst_96 : f32 to vector<80x64xf32>
    %83 = arith.mulf %82, %79 : vector<80x64xf32>
    %84 = arith.select %81, %79, %83 : vector<80x64xi1>, vector<80x64xf32>
    %cst_97 = arith.constant dense<0.000000e+00> : vector<80x2xf32>
    %85 = tpu.matmul %84, %25, %cst_97 {dimension_numbers = #tpu.dot_dimension_numbers<[1], [0], [0], [1], [0, 0, 1, 1], [], []>} : vector<80x64xf32>, vector<64x2xf32>, vector<80x2xf32> -> vector<80x2xf32>
    %86 = vector.broadcast %27 : vector<1x2xf32> to vector<80x2xf32>
    %87 = arith.addf %85, %86 : vector<80x2xf32>
    %88 = vector.extract_strided_slice %29 {offsets = [0, 0], sizes = [32, 32], strides = [1, 1]} : vector<96x32xf32> to vector<32x32xf32>
    %cst_98 = arith.constant dense<0.000000e+00> : vector<80x32xf32>
    %89 = tpu.matmul %68, %88, %cst_98 {dimension_numbers = #tpu.dot_dimension_numbers<[1], [0], [0], [1], [0, 0, 1, 1], [], []>} : vector<80x32xf32>, vector<32x32xf32>, vector<80x32xf32> -> vector<80x32xf32>
    %90 = vector.broadcast %31 : vector<1x32xf32> to vector<80x32xf32>
    %91 = arith.addf %90, %89 : vector<80x32xf32>
    %92 = vector.extract_strided_slice %29 {offsets = [32, 0], sizes = [32, 32], strides = [1, 1]} : vector<96x32xf32> to vector<32x32xf32>
    %cst_99 = arith.constant dense<0.000000e+00> : vector<80x32xf32>
    %93 = tpu.matmul %69, %92, %cst_99 {dimension_numbers = #tpu.dot_dimension_numbers<[1], [0], [0], [1], [0, 0, 1, 1], [], []>} : vector<80x32xf32>, vector<32x32xf32>, vector<80x32xf32> -> vector<80x32xf32>
    %94 = arith.addf %91, %93 : vector<80x32xf32>
    %95 = vector.extract_strided_slice %29 {offsets = [64, 0], sizes = [32, 32], strides = [1, 1]} : vector<96x32xf32> to vector<32x32xf32>
    %cst_100 = arith.constant dense<0.000000e+00> : vector<80x32xf32>
    %96 = tpu.matmul %16, %95, %cst_100 {dimension_numbers = #tpu.dot_dimension_numbers<[1], [0], [0], [1], [0, 0, 1, 1], [], []>} : vector<80x32xf32>, vector<32x32xf32>, vector<80x32xf32> -> vector<80x32xf32>
    %97 = arith.addf %94, %96 : vector<80x32xf32>
    %cst_101 = arith.constant 5.000000e-01 : f32
    %98 = vector.broadcast %cst_101 : f32 to vector<80x32xf32>
    %99 = arith.mulf %98, %97 : vector<80x32xf32>
    %cst_102 = arith.constant 4.471500e-02 : f32
    %100 = vector.broadcast %cst_102 : f32 to vector<80x32xf32>
    %101 = arith.mulf %100, %97 : vector<80x32xf32>
    %102 = arith.mulf %101, %97 : vector<80x32xf32>
    %103 = arith.mulf %102, %97 : vector<80x32xf32>
    %104 = arith.addf %97, %103 : vector<80x32xf32>
    %cst_103 = arith.constant 0.797884583 : f32
    %105 = vector.broadcast %cst_103 : f32 to vector<80x32xf32>
    %106 = arith.mulf %105, %104 : vector<80x32xf32>
    %107 = math.tanh %106 : vector<80x32xf32>
    %cst_104 = arith.constant 1.000000e+00 : f32
    %108 = vector.broadcast %cst_104 : f32 to vector<80x32xf32>
    %109 = arith.addf %108, %107 : vector<80x32xf32>
    %110 = arith.mulf %99, %109 : vector<80x32xf32>
    %cst_105 = arith.constant dense<0.000000e+00> : vector<80x32xf32>
    %111 = tpu.matmul %110, %33, %cst_105 {dimension_numbers = #tpu.dot_dimension_numbers<[1], [0], [0], [1], [0, 0, 1, 1], [], []>} : vector<80x32xf32>, vector<32x32xf32>, vector<80x32xf32> -> vector<80x32xf32>
    %112 = vector.broadcast %35 : vector<1x32xf32> to vector<80x32xf32>
    %113 = arith.addf %111, %112 : vector<80x32xf32>
    %cst_106 = arith.constant 5.000000e-01 : f32
    %114 = vector.broadcast %cst_106 : f32 to vector<80x32xf32>
    %115 = arith.mulf %114, %113 : vector<80x32xf32>
    %cst_107 = arith.constant 4.471500e-02 : f32
    %116 = vector.broadcast %cst_107 : f32 to vector<80x32xf32>
    %117 = arith.mulf %116, %113 : vector<80x32xf32>
    %118 = arith.mulf %117, %113 : vector<80x32xf32>
    %119 = arith.mulf %118, %113 : vector<80x32xf32>
    %120 = arith.addf %113, %119 : vector<80x32xf32>
    %cst_108 = arith.constant 0.797884583 : f32
    %121 = vector.broadcast %cst_108 : f32 to vector<80x32xf32>
    %122 = arith.mulf %121, %120 : vector<80x32xf32>
    %123 = math.tanh %122 : vector<80x32xf32>
    %cst_109 = arith.constant 1.000000e+00 : f32
    %124 = vector.broadcast %cst_109 : f32 to vector<80x32xf32>
    %125 = arith.addf %124, %123 : vector<80x32xf32>
    %126 = arith.mulf %115, %125 : vector<80x32xf32>
    %cst_110 = arith.constant dense<0.000000e+00> : vector<80x32xf32>
    %127 = tpu.matmul %126, %37, %cst_110 {dimension_numbers = #tpu.dot_dimension_numbers<[1], [0], [0], [1], [0, 0, 1, 1], [], []>} : vector<80x32xf32>, vector<32x32xf32>, vector<80x32xf32> -> vector<80x32xf32>
    %128 = vector.broadcast %39 : vector<1x32xf32> to vector<80x32xf32>
    %129 = arith.addf %127, %128 : vector<80x32xf32>
    %cst_111 = arith.constant 5.000000e-01 : f32
    %130 = vector.broadcast %cst_111 : f32 to vector<80x16xf32>
    %131 = arith.cmpf ogt, %19, %130 : vector<80x16xf32>
    %132 = vector.extract_strided_slice %87 {offsets = [0, 0], sizes = [80, 1], strides = [1, 1]} : vector<80x2xf32> to vector<80x1xf32>
    %cst_112 = arith.constant -1.000000e+30 : f32
    %133 = vector.shape_cast %132 : vector<80x1xf32> to vector<80x1xf32>
    %134 = vector.broadcast %133 : vector<80x1xf32> to vector<80x16xf32>
    %135 = vector.broadcast %cst_112 : f32 to vector<80x16xf32>
    %136 = arith.select %131, %134, %135 : vector<80x16xi1>, vector<80x16xf32>
    %cst_113 = arith.constant dense<0xFF800000> : vector<16xf32>
    %137 = vector.multi_reduction <maximumf>, %136, %cst_113 [0] : vector<80x16xf32> to vector<16xf32>
    %138 = vector.shape_cast %137 : vector<16xf32> to vector<1x16xf32>
    %139 = vector.extract_strided_slice %87 {offsets = [0, 1], sizes = [80, 1], strides = [1, 1]} : vector<80x2xf32> to vector<80x1xf32>
    %cst_114 = arith.constant -1.000000e+30 : f32
    %140 = vector.shape_cast %139 : vector<80x1xf32> to vector<80x1xf32>
    %141 = vector.broadcast %140 : vector<80x1xf32> to vector<80x16xf32>
    %142 = vector.broadcast %cst_114 : f32 to vector<80x16xf32>
    %143 = arith.select %131, %141, %142 : vector<80x16xi1>, vector<80x16xf32>
    %cst_115 = arith.constant dense<0xFF800000> : vector<16xf32>
    %144 = vector.multi_reduction <maximumf>, %143, %cst_115 [0] : vector<80x16xf32> to vector<16xf32>
    %145 = vector.shape_cast %144 : vector<16xf32> to vector<1x16xf32>
    %146 = tpu.concatenate %138, %145 in 0 : vector<1x16xf32>, vector<1x16xf32> -> vector<2x16xf32>
    %cst_116 = arith.constant dense<0.000000e+00> : vector<80x2xf32>
    %147 = tpu.matmul %19, %146, %cst_116 {dimension_numbers = #tpu.dot_dimension_numbers<[1], [1], [0], [0], [0, 0, 1, 0], [], []>} : vector<80x16xf32>, vector<2x16xf32>, vector<80x2xf32> -> vector<80x2xf32>
    %148 = arith.subf %87, %147 : vector<80x2xf32>
    %149 = math.exp %148 : vector<80x2xf32>
    %cst_117 = arith.constant 9.99999996E-13 : f32
    %150 = vector.broadcast %cst_117 : f32 to vector<80x2xf32>
    %151 = arith.addf %149, %150 : vector<80x2xf32>
    %cst_118 = arith.constant dense<0.000000e+00> : vector<16x2xf32>
    %152 = tpu.matmul %19, %151, %cst_118 {dimension_numbers = #tpu.dot_dimension_numbers<[0], [0], [1], [1], [0, 1, 1, 1], [], []>} : vector<80x16xf32>, vector<80x2xf32>, vector<16x2xf32> -> vector<16x2xf32>
    %cst_119 = arith.constant dense<0.000000e+00> : vector<80x2xf32>
    %153 = tpu.matmul %19, %152, %cst_119 {dimension_numbers = #tpu.dot_dimension_numbers<[1], [0], [0], [1], [0, 0, 1, 1], [], []>} : vector<80x16xf32>, vector<16x2xf32>, vector<80x2xf32> -> vector<80x2xf32>
    %154 = arith.divf %149, %153 : vector<80x2xf32>
    %cst_120 = arith.constant dense<0.000000e+00> : vector<80xf32>
    %155 = vector.multi_reduction <add>, %154, %cst_120 [1] : vector<80x2xf32> to vector<80xf32>
    %156 = vector.shape_cast %155 : vector<80xf32> to vector<80x1xf32>
    %cst_121 = arith.constant 2.000000e+00 : f32
    %157 = vector.broadcast %cst_121 : f32 to vector<80x1xf32>
    %158 = arith.divf %156, %157 : vector<80x1xf32>
    %159 = vector.broadcast %158 : vector<80x1xf32> to vector<80x32xf32>
    %160 = arith.mulf %159, %129 : vector<80x32xf32>
    %cst_122 = arith.constant dense<0.000000e+00> : vector<16x32xf32>
    %161 = tpu.matmul %19, %160, %cst_122 {dimension_numbers = #tpu.dot_dimension_numbers<[0], [0], [1], [1], [0, 1, 1, 1], [], []>} : vector<80x16xf32>, vector<80x32xf32>, vector<16x32xf32> -> vector<16x32xf32>
    %162 = arith.addf %17, %161 : vector<16x32xf32>
    %cst_123 = arith.constant dense<0.000000e+00> : vector<16xf32>
    %163 = vector.multi_reduction <add>, %162, %cst_123 [1] : vector<16x32xf32> to vector<16xf32>
    %164 = vector.shape_cast %163 : vector<16xf32> to vector<16x1xf32>
    %cst_124 = arith.constant 3.200000e+01 : f32
    %165 = vector.broadcast %cst_124 : f32 to vector<16x1xf32>
    %166 = arith.divf %164, %165 : vector<16x1xf32>
    %167 = vector.broadcast %166 : vector<16x1xf32> to vector<16x32xf32>
    %168 = arith.subf %162, %167 : vector<16x32xf32>
    %169 = arith.mulf %168, %168 : vector<16x32xf32>
    %cst_125 = arith.constant dense<0.000000e+00> : vector<16xf32>
    %170 = vector.multi_reduction <add>, %169, %cst_125 [1] : vector<16x32xf32> to vector<16xf32>
    %171 = vector.shape_cast %170 : vector<16xf32> to vector<16x1xf32>
    %cst_126 = arith.constant 3.200000e+01 : f32
    %172 = vector.broadcast %cst_126 : f32 to vector<16x1xf32>
    %173 = arith.divf %171, %172 : vector<16x1xf32>
    %cst_127 = arith.constant 9.99999974E-6 : f32
    %174 = vector.broadcast %cst_127 : f32 to vector<16x1xf32>
    %175 = arith.addf %173, %174 : vector<16x1xf32>
    %176 = math.rsqrt %175 : vector<16x1xf32>
    %177 = vector.broadcast %176 : vector<16x1xf32> to vector<16x32xf32>
    %178 = arith.mulf %168, %177 : vector<16x32xf32>
    %179 = vector.broadcast %61 : vector<1x32xf32> to vector<16x32xf32>
    %180 = arith.mulf %178, %179 : vector<16x32xf32>
    %181 = vector.broadcast %63 : vector<1x32xf32> to vector<16x32xf32>
    %182 = arith.addf %180, %181 : vector<16x32xf32>
    %cst_128 = arith.constant dense<0.000000e+00> : vector<16x128xf32>
    %183 = tpu.matmul %182, %41, %cst_128 {dimension_numbers = #tpu.dot_dimension_numbers<[1], [0], [0], [1], [0, 0, 1, 1], [], []>} : vector<16x32xf32>, vector<32x128xf32>, vector<16x128xf32> -> vector<16x128xf32>
    %184 = vector.broadcast %43 : vector<1x128xf32> to vector<16x128xf32>
    %185 = arith.addf %183, %184 : vector<16x128xf32>
    %cst_129 = arith.constant 5.000000e-01 : f32
    %186 = vector.broadcast %cst_129 : f32 to vector<16x128xf32>
    %187 = arith.mulf %186, %185 : vector<16x128xf32>
    %cst_130 = arith.constant 4.471500e-02 : f32
    %188 = vector.broadcast %cst_130 : f32 to vector<16x128xf32>
    %189 = arith.mulf %188, %185 : vector<16x128xf32>
    %190 = arith.mulf %189, %185 : vector<16x128xf32>
    %191 = arith.mulf %190, %185 : vector<16x128xf32>
    %192 = arith.addf %185, %191 : vector<16x128xf32>
    %cst_131 = arith.constant 0.797884583 : f32
    %193 = vector.broadcast %cst_131 : f32 to vector<16x128xf32>
    %194 = arith.mulf %193, %192 : vector<16x128xf32>
    %195 = math.tanh %194 : vector<16x128xf32>
    %cst_132 = arith.constant 1.000000e+00 : f32
    %196 = vector.broadcast %cst_132 : f32 to vector<16x128xf32>
    %197 = arith.addf %196, %195 : vector<16x128xf32>
    %198 = arith.mulf %187, %197 : vector<16x128xf32>
    %cst_133 = arith.constant dense<0.000000e+00> : vector<16x32xf32>
    %199 = tpu.matmul %198, %45, %cst_133 {dimension_numbers = #tpu.dot_dimension_numbers<[1], [0], [0], [1], [0, 0, 1, 1], [], []>} : vector<16x128xf32>, vector<128x32xf32>, vector<16x32xf32> -> vector<16x32xf32>
    %200 = vector.broadcast %47 : vector<1x32xf32> to vector<16x32xf32>
    %201 = arith.addf %199, %200 : vector<16x32xf32>
    %202 = arith.addf %201, %161 : vector<16x32xf32>
    %cst_134 = arith.constant dense<0.000000e+00> : vector<16xf32>
    %203 = vector.multi_reduction <add>, %202, %cst_134 [1] : vector<16x32xf32> to vector<16xf32>
    %204 = vector.shape_cast %203 : vector<16xf32> to vector<16x1xf32>
    %cst_135 = arith.constant 3.200000e+01 : f32
    %205 = vector.broadcast %cst_135 : f32 to vector<16x1xf32>
    %206 = arith.divf %204, %205 : vector<16x1xf32>
    %207 = vector.broadcast %206 : vector<16x1xf32> to vector<16x32xf32>
    %208 = arith.subf %202, %207 : vector<16x32xf32>
    %209 = arith.mulf %208, %208 : vector<16x32xf32>
    %cst_136 = arith.constant dense<0.000000e+00> : vector<16xf32>
    %210 = vector.multi_reduction <add>, %209, %cst_136 [1] : vector<16x32xf32> to vector<16xf32>
    %211 = vector.shape_cast %210 : vector<16xf32> to vector<16x1xf32>
    %cst_137 = arith.constant 3.200000e+01 : f32
    %212 = vector.broadcast %cst_137 : f32 to vector<16x1xf32>
    %213 = arith.divf %211, %212 : vector<16x1xf32>
    %cst_138 = arith.constant 9.99999974E-6 : f32
    %214 = vector.broadcast %cst_138 : f32 to vector<16x1xf32>
    %215 = arith.addf %213, %214 : vector<16x1xf32>
    %216 = math.rsqrt %215 : vector<16x1xf32>
    %217 = vector.broadcast %216 : vector<16x1xf32> to vector<16x32xf32>
    %218 = arith.mulf %208, %217 : vector<16x32xf32>
    %219 = vector.broadcast %61 : vector<1x32xf32> to vector<16x32xf32>
    %220 = arith.mulf %218, %219 : vector<16x32xf32>
    %221 = vector.broadcast %63 : vector<1x32xf32> to vector<16x32xf32>
    %222 = arith.addf %220, %221 : vector<16x32xf32>
    %cst_139 = arith.constant dense<0.000000e+00> : vector<80x32xf32>
    %223 = tpu.matmul %18, %222, %cst_139 {dimension_numbers = #tpu.dot_dimension_numbers<[1], [0], [0], [1], [0, 0, 1, 1], [], []>} : vector<80x16xf32>, vector<16x32xf32>, vector<80x32xf32> -> vector<80x32xf32>
    %cst_140 = arith.constant dense<0.000000e+00> : vector<80x32xf32>
    %224 = tpu.matmul %19, %222, %cst_140 {dimension_numbers = #tpu.dot_dimension_numbers<[1], [0], [0], [1], [0, 0, 1, 1], [], []>} : vector<80x16xf32>, vector<16x32xf32>, vector<80x32xf32> -> vector<80x32xf32>
    %225 = vector.extract_strided_slice %49 {offsets = [0, 0], sizes = [32, 32], strides = [1, 1]} : vector<96x32xf32> to vector<32x32xf32>
    %cst_141 = arith.constant dense<0.000000e+00> : vector<80x32xf32>
    %226 = tpu.matmul %223, %225, %cst_141 {dimension_numbers = #tpu.dot_dimension_numbers<[1], [0], [0], [1], [0, 0, 1, 1], [], []>} : vector<80x32xf32>, vector<32x32xf32>, vector<80x32xf32> -> vector<80x32xf32>
    %227 = vector.broadcast %51 : vector<1x32xf32> to vector<80x32xf32>
    %228 = arith.addf %227, %226 : vector<80x32xf32>
    %229 = vector.extract_strided_slice %49 {offsets = [32, 0], sizes = [32, 32], strides = [1, 1]} : vector<96x32xf32> to vector<32x32xf32>
    %cst_142 = arith.constant dense<0.000000e+00> : vector<80x32xf32>
    %230 = tpu.matmul %224, %229, %cst_142 {dimension_numbers = #tpu.dot_dimension_numbers<[1], [0], [0], [1], [0, 0, 1, 1], [], []>} : vector<80x32xf32>, vector<32x32xf32>, vector<80x32xf32> -> vector<80x32xf32>
    %231 = arith.addf %228, %230 : vector<80x32xf32>
    %232 = vector.extract_strided_slice %49 {offsets = [64, 0], sizes = [32, 32], strides = [1, 1]} : vector<96x32xf32> to vector<32x32xf32>
    %cst_143 = arith.constant dense<0.000000e+00> : vector<80x32xf32>
    %233 = tpu.matmul %16, %232, %cst_143 {dimension_numbers = #tpu.dot_dimension_numbers<[1], [0], [0], [1], [0, 0, 1, 1], [], []>} : vector<80x32xf32>, vector<32x32xf32>, vector<80x32xf32> -> vector<80x32xf32>
    %234 = arith.addf %231, %233 : vector<80x32xf32>
    %cst_144 = arith.constant 5.000000e-01 : f32
    %235 = vector.broadcast %cst_144 : f32 to vector<80x32xf32>
    %236 = arith.mulf %235, %234 : vector<80x32xf32>
    %cst_145 = arith.constant 4.471500e-02 : f32
    %237 = vector.broadcast %cst_145 : f32 to vector<80x32xf32>
    %238 = arith.mulf %237, %234 : vector<80x32xf32>
    %239 = arith.mulf %238, %234 : vector<80x32xf32>
    %240 = arith.mulf %239, %234 : vector<80x32xf32>
    %241 = arith.addf %234, %240 : vector<80x32xf32>
    %cst_146 = arith.constant 0.797884583 : f32
    %242 = vector.broadcast %cst_146 : f32 to vector<80x32xf32>
    %243 = arith.mulf %242, %241 : vector<80x32xf32>
    %244 = math.tanh %243 : vector<80x32xf32>
    %cst_147 = arith.constant 1.000000e+00 : f32
    %245 = vector.broadcast %cst_147 : f32 to vector<80x32xf32>
    %246 = arith.addf %245, %244 : vector<80x32xf32>
    %247 = arith.mulf %236, %246 : vector<80x32xf32>
    %cst_148 = arith.constant dense<0.000000e+00> : vector<80x32xf32>
    %248 = tpu.matmul %247, %53, %cst_148 {dimension_numbers = #tpu.dot_dimension_numbers<[1], [0], [0], [1], [0, 0, 1, 1], [], []>} : vector<80x32xf32>, vector<32x32xf32>, vector<80x32xf32> -> vector<80x32xf32>
    %249 = vector.broadcast %55 : vector<1x32xf32> to vector<80x32xf32>
    %250 = arith.addf %248, %249 : vector<80x32xf32>
    %cst_149 = arith.constant 5.000000e-01 : f32
    %251 = vector.broadcast %cst_149 : f32 to vector<80x32xf32>
    %252 = arith.mulf %251, %250 : vector<80x32xf32>
    %cst_150 = arith.constant 4.471500e-02 : f32
    %253 = vector.broadcast %cst_150 : f32 to vector<80x32xf32>
    %254 = arith.mulf %253, %250 : vector<80x32xf32>
    %255 = arith.mulf %254, %250 : vector<80x32xf32>
    %256 = arith.mulf %255, %250 : vector<80x32xf32>
    %257 = arith.addf %250, %256 : vector<80x32xf32>
    %cst_151 = arith.constant 0.797884583 : f32
    %258 = vector.broadcast %cst_151 : f32 to vector<80x32xf32>
    %259 = arith.mulf %258, %257 : vector<80x32xf32>
    %260 = math.tanh %259 : vector<80x32xf32>
    %cst_152 = arith.constant 1.000000e+00 : f32
    %261 = vector.broadcast %cst_152 : f32 to vector<80x32xf32>
    %262 = arith.addf %261, %260 : vector<80x32xf32>
    %263 = arith.mulf %252, %262 : vector<80x32xf32>
    %cst_153 = arith.constant dense<0.000000e+00> : vector<80x32xf32>
    %264 = tpu.matmul %263, %57, %cst_153 {dimension_numbers = #tpu.dot_dimension_numbers<[1], [0], [0], [1], [0, 0, 1, 1], [], []>} : vector<80x32xf32>, vector<32x32xf32>, vector<80x32xf32> -> vector<80x32xf32>
    %265 = vector.broadcast %59 : vector<1x32xf32> to vector<80x32xf32>
    %266 = arith.addf %264, %265 : vector<80x32xf32>
    %267 = arith.addf %16, %266 : vector<80x32xf32>
    %cst_154 = arith.constant dense<0.000000e+00> : vector<80xf32>
    %268 = vector.multi_reduction <add>, %267, %cst_154 [1] : vector<80x32xf32> to vector<80xf32>
    %269 = vector.shape_cast %268 : vector<80xf32> to vector<80x1xf32>
    %cst_155 = arith.constant 3.200000e+01 : f32
    %270 = vector.broadcast %cst_155 : f32 to vector<80x1xf32>
    %271 = arith.divf %269, %270 : vector<80x1xf32>
    %272 = vector.broadcast %271 : vector<80x1xf32> to vector<80x32xf32>
    %273 = arith.subf %267, %272 : vector<80x32xf32>
    %274 = arith.mulf %273, %273 : vector<80x32xf32>
    %cst_156 = arith.constant dense<0.000000e+00> : vector<80xf32>
    %275 = vector.multi_reduction <add>, %274, %cst_156 [1] : vector<80x32xf32> to vector<80xf32>
    %276 = vector.shape_cast %275 : vector<80xf32> to vector<80x1xf32>
    %cst_157 = arith.constant 3.200000e+01 : f32
    %277 = vector.broadcast %cst_157 : f32 to vector<80x1xf32>
    %278 = arith.divf %276, %277 : vector<80x1xf32>
    %cst_158 = arith.constant 9.99999974E-6 : f32
    %279 = vector.broadcast %cst_158 : f32 to vector<80x1xf32>
    %280 = arith.addf %278, %279 : vector<80x1xf32>
    %281 = math.rsqrt %280 : vector<80x1xf32>
    %282 = vector.broadcast %281 : vector<80x1xf32> to vector<80x32xf32>
    %283 = arith.mulf %273, %282 : vector<80x32xf32>
    %284 = vector.broadcast %65 : vector<1x32xf32> to vector<80x32xf32>
    %285 = arith.mulf %283, %284 : vector<80x32xf32>
    %286 = vector.broadcast %67 : vector<1x32xf32> to vector<80x32xf32>
    %287 = arith.addf %285, %286 : vector<80x32xf32>
    %c1 = arith.constant 1 : index
    %c0_159 = arith.constant 0 : index
    %c0_160 = arith.constant 0 : index
    %288 = vector.load %arg9[%c1, %c0_159, %c0_160] : memref<2x96x64xf32, #tpu.memory_space<vmem>>, vector<1x96x64xf32>
    %289 = vector.shape_cast %288 : vector<1x96x64xf32> to vector<96x64xf32>
    %c1_161 = arith.constant 1 : index
    %c0_162 = arith.constant 0 : index
    %c0_163 = arith.constant 0 : index
    %290 = vector.load %arg10[%c1_161, %c0_162, %c0_163] : memref<2x1x64xf32, #tpu.memory_space<vmem>>, vector<1x1x64xf32>
    %291 = vector.shape_cast %290 : vector<1x1x64xf32> to vector<1x64xf32>
    %c1_164 = arith.constant 1 : index
    %c0_165 = arith.constant 0 : index
    %c0_166 = arith.constant 0 : index
    %292 = vector.load %arg11[%c1_164, %c0_165, %c0_166] : memref<2x64x2xf32, #tpu.memory_space<vmem>>, vector<1x64x2xf32>
    %293 = vector.shape_cast %292 : vector<1x64x2xf32> to vector<64x2xf32>
    %c1_167 = arith.constant 1 : index
    %c0_168 = arith.constant 0 : index
    %c0_169 = arith.constant 0 : index
    %294 = vector.load %arg12[%c1_167, %c0_168, %c0_169] : memref<2x1x2xf32, #tpu.memory_space<vmem>>, vector<1x1x2xf32>
    %295 = vector.shape_cast %294 : vector<1x1x2xf32> to vector<1x2xf32>
    %c1_170 = arith.constant 1 : index
    %c0_171 = arith.constant 0 : index
    %c0_172 = arith.constant 0 : index
    %296 = vector.load %arg13[%c1_170, %c0_171, %c0_172] : memref<2x96x32xf32, #tpu.memory_space<vmem>>, vector<1x96x32xf32>
    %297 = vector.shape_cast %296 : vector<1x96x32xf32> to vector<96x32xf32>
    %c1_173 = arith.constant 1 : index
    %c0_174 = arith.constant 0 : index
    %c0_175 = arith.constant 0 : index
    %298 = vector.load %arg14[%c1_173, %c0_174, %c0_175] : memref<2x1x32xf32, #tpu.memory_space<vmem>>, vector<1x1x32xf32>
    %299 = vector.shape_cast %298 : vector<1x1x32xf32> to vector<1x32xf32>
    %c1_176 = arith.constant 1 : index
    %c0_177 = arith.constant 0 : index
    %c0_178 = arith.constant 0 : index
    %300 = vector.load %arg15[%c1_176, %c0_177, %c0_178] : memref<2x32x32xf32, #tpu.memory_space<vmem>>, vector<1x32x32xf32>
    %301 = vector.shape_cast %300 : vector<1x32x32xf32> to vector<32x32xf32>
    %c1_179 = arith.constant 1 : index
    %c0_180 = arith.constant 0 : index
    %c0_181 = arith.constant 0 : index
    %302 = vector.load %arg16[%c1_179, %c0_180, %c0_181] : memref<2x1x32xf32, #tpu.memory_space<vmem>>, vector<1x1x32xf32>
    %303 = vector.shape_cast %302 : vector<1x1x32xf32> to vector<1x32xf32>
    %c1_182 = arith.constant 1 : index
    %c0_183 = arith.constant 0 : index
    %c0_184 = arith.constant 0 : index
    %304 = vector.load %arg17[%c1_182, %c0_183, %c0_184] : memref<2x32x32xf32, #tpu.memory_space<vmem>>, vector<1x32x32xf32>
    %305 = vector.shape_cast %304 : vector<1x32x32xf32> to vector<32x32xf32>
    %c1_185 = arith.constant 1 : index
    %c0_186 = arith.constant 0 : index
    %c0_187 = arith.constant 0 : index
    %306 = vector.load %arg18[%c1_185, %c0_186, %c0_187] : memref<2x1x32xf32, #tpu.memory_space<vmem>>, vector<1x1x32xf32>
    %307 = vector.shape_cast %306 : vector<1x1x32xf32> to vector<1x32xf32>
    %c1_188 = arith.constant 1 : index
    %c0_189 = arith.constant 0 : index
    %c0_190 = arith.constant 0 : index
    %308 = vector.load %arg19[%c1_188, %c0_189, %c0_190] : memref<2x32x128xf32, #tpu.memory_space<vmem>>, vector<1x32x128xf32>
    %309 = vector.shape_cast %308 : vector<1x32x128xf32> to vector<32x128xf32>
    %c1_191 = arith.constant 1 : index
    %c0_192 = arith.constant 0 : index
    %c0_193 = arith.constant 0 : index
    %310 = vector.load %arg20[%c1_191, %c0_192, %c0_193] : memref<2x1x128xf32, #tpu.memory_space<vmem>>, vector<1x1x128xf32>
    %311 = vector.shape_cast %310 : vector<1x1x128xf32> to vector<1x128xf32>
    %c1_194 = arith.constant 1 : index
    %c0_195 = arith.constant 0 : index
    %c0_196 = arith.constant 0 : index
    %312 = vector.load %arg21[%c1_194, %c0_195, %c0_196] : memref<2x128x32xf32, #tpu.memory_space<vmem>>, vector<1x128x32xf32>
    %313 = vector.shape_cast %312 : vector<1x128x32xf32> to vector<128x32xf32>
    %c1_197 = arith.constant 1 : index
    %c0_198 = arith.constant 0 : index
    %c0_199 = arith.constant 0 : index
    %314 = vector.load %arg22[%c1_197, %c0_198, %c0_199] : memref<2x1x32xf32, #tpu.memory_space<vmem>>, vector<1x1x32xf32>
    %315 = vector.shape_cast %314 : vector<1x1x32xf32> to vector<1x32xf32>
    %c1_200 = arith.constant 1 : index
    %c0_201 = arith.constant 0 : index
    %c0_202 = arith.constant 0 : index
    %316 = vector.load %arg23[%c1_200, %c0_201, %c0_202] : memref<2x96x32xf32, #tpu.memory_space<vmem>>, vector<1x96x32xf32>
    %317 = vector.shape_cast %316 : vector<1x96x32xf32> to vector<96x32xf32>
    %c1_203 = arith.constant 1 : index
    %c0_204 = arith.constant 0 : index
    %c0_205 = arith.constant 0 : index
    %318 = vector.load %arg24[%c1_203, %c0_204, %c0_205] : memref<2x1x32xf32, #tpu.memory_space<vmem>>, vector<1x1x32xf32>
    %319 = vector.shape_cast %318 : vector<1x1x32xf32> to vector<1x32xf32>
    %c1_206 = arith.constant 1 : index
    %c0_207 = arith.constant 0 : index
    %c0_208 = arith.constant 0 : index
    %320 = vector.load %arg25[%c1_206, %c0_207, %c0_208] : memref<2x32x32xf32, #tpu.memory_space<vmem>>, vector<1x32x32xf32>
    %321 = vector.shape_cast %320 : vector<1x32x32xf32> to vector<32x32xf32>
    %c1_209 = arith.constant 1 : index
    %c0_210 = arith.constant 0 : index
    %c0_211 = arith.constant 0 : index
    %322 = vector.load %arg26[%c1_209, %c0_210, %c0_211] : memref<2x1x32xf32, #tpu.memory_space<vmem>>, vector<1x1x32xf32>
    %323 = vector.shape_cast %322 : vector<1x1x32xf32> to vector<1x32xf32>
    %c1_212 = arith.constant 1 : index
    %c0_213 = arith.constant 0 : index
    %c0_214 = arith.constant 0 : index
    %324 = vector.load %arg27[%c1_212, %c0_213, %c0_214] : memref<2x32x32xf32, #tpu.memory_space<vmem>>, vector<1x32x32xf32>
    %325 = vector.shape_cast %324 : vector<1x32x32xf32> to vector<32x32xf32>
    %c1_215 = arith.constant 1 : index
    %c0_216 = arith.constant 0 : index
    %c0_217 = arith.constant 0 : index
    %326 = vector.load %arg28[%c1_215, %c0_216, %c0_217] : memref<2x1x32xf32, #tpu.memory_space<vmem>>, vector<1x1x32xf32>
    %327 = vector.shape_cast %326 : vector<1x1x32xf32> to vector<1x32xf32>
    %c1_218 = arith.constant 1 : index
    %c0_219 = arith.constant 0 : index
    %c0_220 = arith.constant 0 : index
    %328 = vector.load %arg29[%c1_218, %c0_219, %c0_220] : memref<2x1x32xf32, #tpu.memory_space<vmem>>, vector<1x1x32xf32>
    %329 = vector.shape_cast %328 : vector<1x1x32xf32> to vector<1x32xf32>
    %c1_221 = arith.constant 1 : index
    %c0_222 = arith.constant 0 : index
    %c0_223 = arith.constant 0 : index
    %330 = vector.load %arg30[%c1_221, %c0_222, %c0_223] : memref<2x1x32xf32, #tpu.memory_space<vmem>>, vector<1x1x32xf32>
    %331 = vector.shape_cast %330 : vector<1x1x32xf32> to vector<1x32xf32>
    %c1_224 = arith.constant 1 : index
    %c0_225 = arith.constant 0 : index
    %c0_226 = arith.constant 0 : index
    %332 = vector.load %arg31[%c1_224, %c0_225, %c0_226] : memref<2x1x32xf32, #tpu.memory_space<vmem>>, vector<1x1x32xf32>
    %333 = vector.shape_cast %332 : vector<1x1x32xf32> to vector<1x32xf32>
    %c1_227 = arith.constant 1 : index
    %c0_228 = arith.constant 0 : index
    %c0_229 = arith.constant 0 : index
    %334 = vector.load %arg32[%c1_227, %c0_228, %c0_229] : memref<2x1x32xf32, #tpu.memory_space<vmem>>, vector<1x1x32xf32>
    %335 = vector.shape_cast %334 : vector<1x1x32xf32> to vector<1x32xf32>
    %cst_230 = arith.constant dense<0.000000e+00> : vector<80x32xf32>
    %336 = tpu.matmul %18, %222, %cst_230 {dimension_numbers = #tpu.dot_dimension_numbers<[1], [0], [0], [1], [0, 0, 1, 1], [], []>} : vector<80x16xf32>, vector<16x32xf32>, vector<80x32xf32> -> vector<80x32xf32>
    %cst_231 = arith.constant dense<0.000000e+00> : vector<80x32xf32>
    %337 = tpu.matmul %19, %222, %cst_231 {dimension_numbers = #tpu.dot_dimension_numbers<[1], [0], [0], [1], [0, 0, 1, 1], [], []>} : vector<80x16xf32>, vector<16x32xf32>, vector<80x32xf32> -> vector<80x32xf32>
    %338 = vector.extract_strided_slice %289 {offsets = [0, 0], sizes = [32, 64], strides = [1, 1]} : vector<96x64xf32> to vector<32x64xf32>
    %cst_232 = arith.constant dense<0.000000e+00> : vector<80x64xf32>
    %339 = tpu.matmul %336, %338, %cst_232 {dimension_numbers = #tpu.dot_dimension_numbers<[1], [0], [0], [1], [0, 0, 1, 1], [], []>} : vector<80x32xf32>, vector<32x64xf32>, vector<80x64xf32> -> vector<80x64xf32>
    %340 = vector.broadcast %291 : vector<1x64xf32> to vector<80x64xf32>
    %341 = arith.addf %340, %339 : vector<80x64xf32>
    %342 = vector.extract_strided_slice %289 {offsets = [32, 0], sizes = [32, 64], strides = [1, 1]} : vector<96x64xf32> to vector<32x64xf32>
    %cst_233 = arith.constant dense<0.000000e+00> : vector<80x64xf32>
    %343 = tpu.matmul %337, %342, %cst_233 {dimension_numbers = #tpu.dot_dimension_numbers<[1], [0], [0], [1], [0, 0, 1, 1], [], []>} : vector<80x32xf32>, vector<32x64xf32>, vector<80x64xf32> -> vector<80x64xf32>
    %344 = arith.addf %341, %343 : vector<80x64xf32>
    %345 = vector.extract_strided_slice %289 {offsets = [64, 0], sizes = [32, 64], strides = [1, 1]} : vector<96x64xf32> to vector<32x64xf32>
    %cst_234 = arith.constant dense<0.000000e+00> : vector<80x64xf32>
    %346 = tpu.matmul %287, %345, %cst_234 {dimension_numbers = #tpu.dot_dimension_numbers<[1], [0], [0], [1], [0, 0, 1, 1], [], []>} : vector<80x32xf32>, vector<32x64xf32>, vector<80x64xf32> -> vector<80x64xf32>
    %347 = arith.addf %344, %346 : vector<80x64xf32>
    %cst_235 = arith.constant 0.000000e+00 : f32
    %348 = vector.broadcast %cst_235 : f32 to vector<80x64xf32>
    %349 = arith.cmpf ogt, %347, %348 : vector<80x64xf32>
    %cst_236 = arith.constant 2.000000e-01 : f32
    %350 = vector.broadcast %cst_236 : f32 to vector<80x64xf32>
    %351 = arith.mulf %350, %347 : vector<80x64xf32>
    %352 = arith.select %349, %347, %351 : vector<80x64xi1>, vector<80x64xf32>
    %cst_237 = arith.constant dense<0.000000e+00> : vector<80x2xf32>
    %353 = tpu.matmul %352, %293, %cst_237 {dimension_numbers = #tpu.dot_dimension_numbers<[1], [0], [0], [1], [0, 0, 1, 1], [], []>} : vector<80x64xf32>, vector<64x2xf32>, vector<80x2xf32> -> vector<80x2xf32>
    %354 = vector.broadcast %295 : vector<1x2xf32> to vector<80x2xf32>
    %355 = arith.addf %353, %354 : vector<80x2xf32>
    %356 = vector.extract_strided_slice %297 {offsets = [0, 0], sizes = [32, 32], strides = [1, 1]} : vector<96x32xf32> to vector<32x32xf32>
    %cst_238 = arith.constant dense<0.000000e+00> : vector<80x32xf32>
    %357 = tpu.matmul %336, %356, %cst_238 {dimension_numbers = #tpu.dot_dimension_numbers<[1], [0], [0], [1], [0, 0, 1, 1], [], []>} : vector<80x32xf32>, vector<32x32xf32>, vector<80x32xf32> -> vector<80x32xf32>
    %358 = vector.broadcast %299 : vector<1x32xf32> to vector<80x32xf32>
    %359 = arith.addf %358, %357 : vector<80x32xf32>
    %360 = vector.extract_strided_slice %297 {offsets = [32, 0], sizes = [32, 32], strides = [1, 1]} : vector<96x32xf32> to vector<32x32xf32>
    %cst_239 = arith.constant dense<0.000000e+00> : vector<80x32xf32>
    %361 = tpu.matmul %337, %360, %cst_239 {dimension_numbers = #tpu.dot_dimension_numbers<[1], [0], [0], [1], [0, 0, 1, 1], [], []>} : vector<80x32xf32>, vector<32x32xf32>, vector<80x32xf32> -> vector<80x32xf32>
    %362 = arith.addf %359, %361 : vector<80x32xf32>
    %363 = vector.extract_strided_slice %297 {offsets = [64, 0], sizes = [32, 32], strides = [1, 1]} : vector<96x32xf32> to vector<32x32xf32>
    %cst_240 = arith.constant dense<0.000000e+00> : vector<80x32xf32>
    %364 = tpu.matmul %287, %363, %cst_240 {dimension_numbers = #tpu.dot_dimension_numbers<[1], [0], [0], [1], [0, 0, 1, 1], [], []>} : vector<80x32xf32>, vector<32x32xf32>, vector<80x32xf32> -> vector<80x32xf32>
    %365 = arith.addf %362, %364 : vector<80x32xf32>
    %cst_241 = arith.constant 5.000000e-01 : f32
    %366 = vector.broadcast %cst_241 : f32 to vector<80x32xf32>
    %367 = arith.mulf %366, %365 : vector<80x32xf32>
    %cst_242 = arith.constant 4.471500e-02 : f32
    %368 = vector.broadcast %cst_242 : f32 to vector<80x32xf32>
    %369 = arith.mulf %368, %365 : vector<80x32xf32>
    %370 = arith.mulf %369, %365 : vector<80x32xf32>
    %371 = arith.mulf %370, %365 : vector<80x32xf32>
    %372 = arith.addf %365, %371 : vector<80x32xf32>
    %cst_243 = arith.constant 0.797884583 : f32
    %373 = vector.broadcast %cst_243 : f32 to vector<80x32xf32>
    %374 = arith.mulf %373, %372 : vector<80x32xf32>
    %375 = math.tanh %374 : vector<80x32xf32>
    %cst_244 = arith.constant 1.000000e+00 : f32
    %376 = vector.broadcast %cst_244 : f32 to vector<80x32xf32>
    %377 = arith.addf %376, %375 : vector<80x32xf32>
    %378 = arith.mulf %367, %377 : vector<80x32xf32>
    %cst_245 = arith.constant dense<0.000000e+00> : vector<80x32xf32>
    %379 = tpu.matmul %378, %301, %cst_245 {dimension_numbers = #tpu.dot_dimension_numbers<[1], [0], [0], [1], [0, 0, 1, 1], [], []>} : vector<80x32xf32>, vector<32x32xf32>, vector<80x32xf32> -> vector<80x32xf32>
    %380 = vector.broadcast %303 : vector<1x32xf32> to vector<80x32xf32>
    %381 = arith.addf %379, %380 : vector<80x32xf32>
    %cst_246 = arith.constant 5.000000e-01 : f32
    %382 = vector.broadcast %cst_246 : f32 to vector<80x32xf32>
    %383 = arith.mulf %382, %381 : vector<80x32xf32>
    %cst_247 = arith.constant 4.471500e-02 : f32
    %384 = vector.broadcast %cst_247 : f32 to vector<80x32xf32>
    %385 = arith.mulf %384, %381 : vector<80x32xf32>
    %386 = arith.mulf %385, %381 : vector<80x32xf32>
    %387 = arith.mulf %386, %381 : vector<80x32xf32>
    %388 = arith.addf %381, %387 : vector<80x32xf32>
    %cst_248 = arith.constant 0.797884583 : f32
    %389 = vector.broadcast %cst_248 : f32 to vector<80x32xf32>
    %390 = arith.mulf %389, %388 : vector<80x32xf32>
    %391 = math.tanh %390 : vector<80x32xf32>
    %cst_249 = arith.constant 1.000000e+00 : f32
    %392 = vector.broadcast %cst_249 : f32 to vector<80x32xf32>
    %393 = arith.addf %392, %391 : vector<80x32xf32>
    %394 = arith.mulf %383, %393 : vector<80x32xf32>
    %cst_250 = arith.constant dense<0.000000e+00> : vector<80x32xf32>
    %395 = tpu.matmul %394, %305, %cst_250 {dimension_numbers = #tpu.dot_dimension_numbers<[1], [0], [0], [1], [0, 0, 1, 1], [], []>} : vector<80x32xf32>, vector<32x32xf32>, vector<80x32xf32> -> vector<80x32xf32>
    %396 = vector.broadcast %307 : vector<1x32xf32> to vector<80x32xf32>
    %397 = arith.addf %395, %396 : vector<80x32xf32>
    %cst_251 = arith.constant 5.000000e-01 : f32
    %398 = vector.broadcast %cst_251 : f32 to vector<80x16xf32>
    %399 = arith.cmpf ogt, %19, %398 : vector<80x16xf32>
    %400 = vector.extract_strided_slice %355 {offsets = [0, 0], sizes = [80, 1], strides = [1, 1]} : vector<80x2xf32> to vector<80x1xf32>
    %cst_252 = arith.constant -1.000000e+30 : f32
    %401 = vector.shape_cast %400 : vector<80x1xf32> to vector<80x1xf32>
    %402 = vector.broadcast %401 : vector<80x1xf32> to vector<80x16xf32>
    %403 = vector.broadcast %cst_252 : f32 to vector<80x16xf32>
    %404 = arith.select %399, %402, %403 : vector<80x16xi1>, vector<80x16xf32>
    %cst_253 = arith.constant dense<0xFF800000> : vector<16xf32>
    %405 = vector.multi_reduction <maximumf>, %404, %cst_253 [0] : vector<80x16xf32> to vector<16xf32>
    %406 = vector.shape_cast %405 : vector<16xf32> to vector<1x16xf32>
    %407 = vector.extract_strided_slice %355 {offsets = [0, 1], sizes = [80, 1], strides = [1, 1]} : vector<80x2xf32> to vector<80x1xf32>
    %cst_254 = arith.constant -1.000000e+30 : f32
    %408 = vector.shape_cast %407 : vector<80x1xf32> to vector<80x1xf32>
    %409 = vector.broadcast %408 : vector<80x1xf32> to vector<80x16xf32>
    %410 = vector.broadcast %cst_254 : f32 to vector<80x16xf32>
    %411 = arith.select %399, %409, %410 : vector<80x16xi1>, vector<80x16xf32>
    %cst_255 = arith.constant dense<0xFF800000> : vector<16xf32>
    %412 = vector.multi_reduction <maximumf>, %411, %cst_255 [0] : vector<80x16xf32> to vector<16xf32>
    %413 = vector.shape_cast %412 : vector<16xf32> to vector<1x16xf32>
    %414 = tpu.concatenate %406, %413 in 0 : vector<1x16xf32>, vector<1x16xf32> -> vector<2x16xf32>
    %cst_256 = arith.constant dense<0.000000e+00> : vector<80x2xf32>
    %415 = tpu.matmul %19, %414, %cst_256 {dimension_numbers = #tpu.dot_dimension_numbers<[1], [1], [0], [0], [0, 0, 1, 0], [], []>} : vector<80x16xf32>, vector<2x16xf32>, vector<80x2xf32> -> vector<80x2xf32>
    %416 = arith.subf %355, %415 : vector<80x2xf32>
    %417 = math.exp %416 : vector<80x2xf32>
    %cst_257 = arith.constant 9.99999996E-13 : f32
    %418 = vector.broadcast %cst_257 : f32 to vector<80x2xf32>
    %419 = arith.addf %417, %418 : vector<80x2xf32>
    %cst_258 = arith.constant dense<0.000000e+00> : vector<16x2xf32>
    %420 = tpu.matmul %19, %419, %cst_258 {dimension_numbers = #tpu.dot_dimension_numbers<[0], [0], [1], [1], [0, 1, 1, 1], [], []>} : vector<80x16xf32>, vector<80x2xf32>, vector<16x2xf32> -> vector<16x2xf32>
    %cst_259 = arith.constant dense<0.000000e+00> : vector<80x2xf32>
    %421 = tpu.matmul %19, %420, %cst_259 {dimension_numbers = #tpu.dot_dimension_numbers<[1], [0], [0], [1], [0, 0, 1, 1], [], []>} : vector<80x16xf32>, vector<16x2xf32>, vector<80x2xf32> -> vector<80x2xf32>
    %422 = arith.divf %417, %421 : vector<80x2xf32>
    %cst_260 = arith.constant dense<0.000000e+00> : vector<80xf32>
    %423 = vector.multi_reduction <add>, %422, %cst_260 [1] : vector<80x2xf32> to vector<80xf32>
    %424 = vector.shape_cast %423 : vector<80xf32> to vector<80x1xf32>
    %cst_261 = arith.constant 2.000000e+00 : f32
    %425 = vector.broadcast %cst_261 : f32 to vector<80x1xf32>
    %426 = arith.divf %424, %425 : vector<80x1xf32>
    %427 = vector.broadcast %426 : vector<80x1xf32> to vector<80x32xf32>
    %428 = arith.mulf %427, %397 : vector<80x32xf32>
    %cst_262 = arith.constant dense<0.000000e+00> : vector<16x32xf32>
    %429 = tpu.matmul %19, %428, %cst_262 {dimension_numbers = #tpu.dot_dimension_numbers<[0], [0], [1], [1], [0, 1, 1, 1], [], []>} : vector<80x16xf32>, vector<80x32xf32>, vector<16x32xf32> -> vector<16x32xf32>
    %430 = arith.addf %222, %429 : vector<16x32xf32>
    %cst_263 = arith.constant dense<0.000000e+00> : vector<16xf32>
    %431 = vector.multi_reduction <add>, %430, %cst_263 [1] : vector<16x32xf32> to vector<16xf32>
    %432 = vector.shape_cast %431 : vector<16xf32> to vector<16x1xf32>
    %cst_264 = arith.constant 3.200000e+01 : f32
    %433 = vector.broadcast %cst_264 : f32 to vector<16x1xf32>
    %434 = arith.divf %432, %433 : vector<16x1xf32>
    %435 = vector.broadcast %434 : vector<16x1xf32> to vector<16x32xf32>
    %436 = arith.subf %430, %435 : vector<16x32xf32>
    %437 = arith.mulf %436, %436 : vector<16x32xf32>
    %cst_265 = arith.constant dense<0.000000e+00> : vector<16xf32>
    %438 = vector.multi_reduction <add>, %437, %cst_265 [1] : vector<16x32xf32> to vector<16xf32>
    %439 = vector.shape_cast %438 : vector<16xf32> to vector<16x1xf32>
    %cst_266 = arith.constant 3.200000e+01 : f32
    %440 = vector.broadcast %cst_266 : f32 to vector<16x1xf32>
    %441 = arith.divf %439, %440 : vector<16x1xf32>
    %cst_267 = arith.constant 9.99999974E-6 : f32
    %442 = vector.broadcast %cst_267 : f32 to vector<16x1xf32>
    %443 = arith.addf %441, %442 : vector<16x1xf32>
    %444 = math.rsqrt %443 : vector<16x1xf32>
    %445 = vector.broadcast %444 : vector<16x1xf32> to vector<16x32xf32>
    %446 = arith.mulf %436, %445 : vector<16x32xf32>
    %447 = vector.broadcast %329 : vector<1x32xf32> to vector<16x32xf32>
    %448 = arith.mulf %446, %447 : vector<16x32xf32>
    %449 = vector.broadcast %331 : vector<1x32xf32> to vector<16x32xf32>
    %450 = arith.addf %448, %449 : vector<16x32xf32>
    %cst_268 = arith.constant dense<0.000000e+00> : vector<16x128xf32>
    %451 = tpu.matmul %450, %309, %cst_268 {dimension_numbers = #tpu.dot_dimension_numbers<[1], [0], [0], [1], [0, 0, 1, 1], [], []>} : vector<16x32xf32>, vector<32x128xf32>, vector<16x128xf32> -> vector<16x128xf32>
    %452 = vector.broadcast %311 : vector<1x128xf32> to vector<16x128xf32>
    %453 = arith.addf %451, %452 : vector<16x128xf32>
    %cst_269 = arith.constant 5.000000e-01 : f32
    %454 = vector.broadcast %cst_269 : f32 to vector<16x128xf32>
    %455 = arith.mulf %454, %453 : vector<16x128xf32>
    %cst_270 = arith.constant 4.471500e-02 : f32
    %456 = vector.broadcast %cst_270 : f32 to vector<16x128xf32>
    %457 = arith.mulf %456, %453 : vector<16x128xf32>
    %458 = arith.mulf %457, %453 : vector<16x128xf32>
    %459 = arith.mulf %458, %453 : vector<16x128xf32>
    %460 = arith.addf %453, %459 : vector<16x128xf32>
    %cst_271 = arith.constant 0.797884583 : f32
    %461 = vector.broadcast %cst_271 : f32 to vector<16x128xf32>
    %462 = arith.mulf %461, %460 : vector<16x128xf32>
    %463 = math.tanh %462 : vector<16x128xf32>
    %cst_272 = arith.constant 1.000000e+00 : f32
    %464 = vector.broadcast %cst_272 : f32 to vector<16x128xf32>
    %465 = arith.addf %464, %463 : vector<16x128xf32>
    %466 = arith.mulf %455, %465 : vector<16x128xf32>
    %cst_273 = arith.constant dense<0.000000e+00> : vector<16x32xf32>
    %467 = tpu.matmul %466, %313, %cst_273 {dimension_numbers = #tpu.dot_dimension_numbers<[1], [0], [0], [1], [0, 0, 1, 1], [], []>} : vector<16x128xf32>, vector<128x32xf32>, vector<16x32xf32> -> vector<16x32xf32>
    %468 = vector.broadcast %315 : vector<1x32xf32> to vector<16x32xf32>
    %469 = arith.addf %467, %468 : vector<16x32xf32>
    %470 = arith.addf %469, %429 : vector<16x32xf32>
    %cst_274 = arith.constant dense<0.000000e+00> : vector<16xf32>
    %471 = vector.multi_reduction <add>, %470, %cst_274 [1] : vector<16x32xf32> to vector<16xf32>
    %472 = vector.shape_cast %471 : vector<16xf32> to vector<16x1xf32>
    %cst_275 = arith.constant 3.200000e+01 : f32
    %473 = vector.broadcast %cst_275 : f32 to vector<16x1xf32>
    %474 = arith.divf %472, %473 : vector<16x1xf32>
    %475 = vector.broadcast %474 : vector<16x1xf32> to vector<16x32xf32>
    %476 = arith.subf %470, %475 : vector<16x32xf32>
    %477 = arith.mulf %476, %476 : vector<16x32xf32>
    %cst_276 = arith.constant dense<0.000000e+00> : vector<16xf32>
    %478 = vector.multi_reduction <add>, %477, %cst_276 [1] : vector<16x32xf32> to vector<16xf32>
    %479 = vector.shape_cast %478 : vector<16xf32> to vector<16x1xf32>
    %cst_277 = arith.constant 3.200000e+01 : f32
    %480 = vector.broadcast %cst_277 : f32 to vector<16x1xf32>
    %481 = arith.divf %479, %480 : vector<16x1xf32>
    %cst_278 = arith.constant 9.99999974E-6 : f32
    %482 = vector.broadcast %cst_278 : f32 to vector<16x1xf32>
    %483 = arith.addf %481, %482 : vector<16x1xf32>
    %484 = math.rsqrt %483 : vector<16x1xf32>
    %485 = vector.broadcast %484 : vector<16x1xf32> to vector<16x32xf32>
    %486 = arith.mulf %476, %485 : vector<16x32xf32>
    %487 = vector.broadcast %329 : vector<1x32xf32> to vector<16x32xf32>
    %488 = arith.mulf %486, %487 : vector<16x32xf32>
    %489 = vector.broadcast %331 : vector<1x32xf32> to vector<16x32xf32>
    %490 = arith.addf %488, %489 : vector<16x32xf32>
    %cst_279 = arith.constant dense<0.000000e+00> : vector<80x32xf32>
    %491 = tpu.matmul %18, %490, %cst_279 {dimension_numbers = #tpu.dot_dimension_numbers<[1], [0], [0], [1], [0, 0, 1, 1], [], []>} : vector<80x16xf32>, vector<16x32xf32>, vector<80x32xf32> -> vector<80x32xf32>
    %cst_280 = arith.constant dense<0.000000e+00> : vector<80x32xf32>
    %492 = tpu.matmul %19, %490, %cst_280 {dimension_numbers = #tpu.dot_dimension_numbers<[1], [0], [0], [1], [0, 0, 1, 1], [], []>} : vector<80x16xf32>, vector<16x32xf32>, vector<80x32xf32> -> vector<80x32xf32>
    %493 = vector.extract_strided_slice %317 {offsets = [0, 0], sizes = [32, 32], strides = [1, 1]} : vector<96x32xf32> to vector<32x32xf32>
    %cst_281 = arith.constant dense<0.000000e+00> : vector<80x32xf32>
    %494 = tpu.matmul %491, %493, %cst_281 {dimension_numbers = #tpu.dot_dimension_numbers<[1], [0], [0], [1], [0, 0, 1, 1], [], []>} : vector<80x32xf32>, vector<32x32xf32>, vector<80x32xf32> -> vector<80x32xf32>
    %495 = vector.broadcast %319 : vector<1x32xf32> to vector<80x32xf32>
    %496 = arith.addf %495, %494 : vector<80x32xf32>
    %497 = vector.extract_strided_slice %317 {offsets = [32, 0], sizes = [32, 32], strides = [1, 1]} : vector<96x32xf32> to vector<32x32xf32>
    %cst_282 = arith.constant dense<0.000000e+00> : vector<80x32xf32>
    %498 = tpu.matmul %492, %497, %cst_282 {dimension_numbers = #tpu.dot_dimension_numbers<[1], [0], [0], [1], [0, 0, 1, 1], [], []>} : vector<80x32xf32>, vector<32x32xf32>, vector<80x32xf32> -> vector<80x32xf32>
    %499 = arith.addf %496, %498 : vector<80x32xf32>
    %500 = vector.extract_strided_slice %317 {offsets = [64, 0], sizes = [32, 32], strides = [1, 1]} : vector<96x32xf32> to vector<32x32xf32>
    %cst_283 = arith.constant dense<0.000000e+00> : vector<80x32xf32>
    %501 = tpu.matmul %287, %500, %cst_283 {dimension_numbers = #tpu.dot_dimension_numbers<[1], [0], [0], [1], [0, 0, 1, 1], [], []>} : vector<80x32xf32>, vector<32x32xf32>, vector<80x32xf32> -> vector<80x32xf32>
    %502 = arith.addf %499, %501 : vector<80x32xf32>
    %cst_284 = arith.constant 5.000000e-01 : f32
    %503 = vector.broadcast %cst_284 : f32 to vector<80x32xf32>
    %504 = arith.mulf %503, %502 : vector<80x32xf32>
    %cst_285 = arith.constant 4.471500e-02 : f32
    %505 = vector.broadcast %cst_285 : f32 to vector<80x32xf32>
    %506 = arith.mulf %505, %502 : vector<80x32xf32>
    %507 = arith.mulf %506, %502 : vector<80x32xf32>
    %508 = arith.mulf %507, %502 : vector<80x32xf32>
    %509 = arith.addf %502, %508 : vector<80x32xf32>
    %cst_286 = arith.constant 0.797884583 : f32
    %510 = vector.broadcast %cst_286 : f32 to vector<80x32xf32>
    %511 = arith.mulf %510, %509 : vector<80x32xf32>
    %512 = math.tanh %511 : vector<80x32xf32>
    %cst_287 = arith.constant 1.000000e+00 : f32
    %513 = vector.broadcast %cst_287 : f32 to vector<80x32xf32>
    %514 = arith.addf %513, %512 : vector<80x32xf32>
    %515 = arith.mulf %504, %514 : vector<80x32xf32>
    %cst_288 = arith.constant dense<0.000000e+00> : vector<80x32xf32>
    %516 = tpu.matmul %515, %321, %cst_288 {dimension_numbers = #tpu.dot_dimension_numbers<[1], [0], [0], [1], [0, 0, 1, 1], [], []>} : vector<80x32xf32>, vector<32x32xf32>, vector<80x32xf32> -> vector<80x32xf32>
    %517 = vector.broadcast %323 : vector<1x32xf32> to vector<80x32xf32>
    %518 = arith.addf %516, %517 : vector<80x32xf32>
    %cst_289 = arith.constant 5.000000e-01 : f32
    %519 = vector.broadcast %cst_289 : f32 to vector<80x32xf32>
    %520 = arith.mulf %519, %518 : vector<80x32xf32>
    %cst_290 = arith.constant 4.471500e-02 : f32
    %521 = vector.broadcast %cst_290 : f32 to vector<80x32xf32>
    %522 = arith.mulf %521, %518 : vector<80x32xf32>
    %523 = arith.mulf %522, %518 : vector<80x32xf32>
    %524 = arith.mulf %523, %518 : vector<80x32xf32>
    %525 = arith.addf %518, %524 : vector<80x32xf32>
    %cst_291 = arith.constant 0.797884583 : f32
    %526 = vector.broadcast %cst_291 : f32 to vector<80x32xf32>
    %527 = arith.mulf %526, %525 : vector<80x32xf32>
    %528 = math.tanh %527 : vector<80x32xf32>
    %cst_292 = arith.constant 1.000000e+00 : f32
    %529 = vector.broadcast %cst_292 : f32 to vector<80x32xf32>
    %530 = arith.addf %529, %528 : vector<80x32xf32>
    %531 = arith.mulf %520, %530 : vector<80x32xf32>
    %cst_293 = arith.constant dense<0.000000e+00> : vector<80x32xf32>
    %532 = tpu.matmul %531, %325, %cst_293 {dimension_numbers = #tpu.dot_dimension_numbers<[1], [0], [0], [1], [0, 0, 1, 1], [], []>} : vector<80x32xf32>, vector<32x32xf32>, vector<80x32xf32> -> vector<80x32xf32>
    %533 = vector.broadcast %327 : vector<1x32xf32> to vector<80x32xf32>
    %534 = arith.addf %532, %533 : vector<80x32xf32>
    %535 = arith.addf %287, %534 : vector<80x32xf32>
    %cst_294 = arith.constant dense<0.000000e+00> : vector<80xf32>
    %536 = vector.multi_reduction <add>, %535, %cst_294 [1] : vector<80x32xf32> to vector<80xf32>
    %537 = vector.shape_cast %536 : vector<80xf32> to vector<80x1xf32>
    %cst_295 = arith.constant 3.200000e+01 : f32
    %538 = vector.broadcast %cst_295 : f32 to vector<80x1xf32>
    %539 = arith.divf %537, %538 : vector<80x1xf32>
    %540 = vector.broadcast %539 : vector<80x1xf32> to vector<80x32xf32>
    %541 = arith.subf %535, %540 : vector<80x32xf32>
    %542 = arith.mulf %541, %541 : vector<80x32xf32>
    %cst_296 = arith.constant dense<0.000000e+00> : vector<80xf32>
    %543 = vector.multi_reduction <add>, %542, %cst_296 [1] : vector<80x32xf32> to vector<80xf32>
    %544 = vector.shape_cast %543 : vector<80xf32> to vector<80x1xf32>
    %cst_297 = arith.constant 3.200000e+01 : f32
    %545 = vector.broadcast %cst_297 : f32 to vector<80x1xf32>
    %546 = arith.divf %544, %545 : vector<80x1xf32>
    %cst_298 = arith.constant 9.99999974E-6 : f32
    %547 = vector.broadcast %cst_298 : f32 to vector<80x1xf32>
    %548 = arith.addf %546, %547 : vector<80x1xf32>
    %549 = math.rsqrt %548 : vector<80x1xf32>
    %550 = vector.broadcast %549 : vector<80x1xf32> to vector<80x32xf32>
    %551 = arith.mulf %541, %550 : vector<80x32xf32>
    %552 = vector.broadcast %333 : vector<1x32xf32> to vector<80x32xf32>
    %553 = arith.mulf %551, %552 : vector<80x32xf32>
    %554 = vector.broadcast %335 : vector<1x32xf32> to vector<80x32xf32>
    %555 = arith.addf %553, %554 : vector<80x32xf32>
    %c0_299 = arith.constant 0 : index
    %c0_300 = arith.constant 0 : index
    %556 = vector.load %arg33[%c0_299, %c0_300] : memref<16x32xf32, #tpu.memory_space<vmem>>, vector<16x32xf32>
    tpu.vector_store %arg33[%c0_299, %c0_300], %490 {strides = array<i32>} : memref<16x32xf32, #tpu.memory_space<vmem>>, vector<16x32xf32>,
    %c0_301 = arith.constant 0 : index
    %c0_302 = arith.constant 0 : index
    %557 = vector.load %arg8[%c0_301, %c0_302] : memref<64x80xf32, #tpu.memory_space<vmem>>, vector<64x80xf32>
    %cst_303 = arith.constant dense<0.000000e+00> : vector<64x32xf32>
    %558 = tpu.matmul %557, %555, %cst_303 {dimension_numbers = #tpu.dot_dimension_numbers<[1], [0], [0], [1], [0, 0, 1, 1], [], []>} : vector<64x80xf32>, vector<80x32xf32>, vector<64x32xf32> -> vector<64x32xf32>
    %c0_304 = arith.constant 0 : index
    %c0_305 = arith.constant 0 : index
    %559 = vector.load %arg34[%c0_304, %c0_305] : memref<64x32xf32, #tpu.memory_space<vmem>>, vector<64x32xf32>
    tpu.vector_store %arg34[%c0_304, %c0_305], %558 {strides = array<i32>} : memref<64x32xf32, #tpu.memory_space<vmem>>, vector<64x32xf32>,
    return
  }
}

module attributes {stable_mosaic.version = 11 : i64} {
  func.func @_chi_chain_kernel(%arg0: memref<16x32xf32, #tpu.memory_space<vmem>>, %arg1: memref<64x32xf32, #tpu.memory_space<vmem>>, %arg2: memref<16x32xf32, #tpu.memory_space<vmem>>, %arg3: memref<64x16xf32, #tpu.memory_space<vmem>>, %arg4: memref<64x16xf32, #tpu.memory_space<vmem>>, %arg5: memref<8x8xf32, #tpu.memory_space<vmem>>, %arg6: memref<128x64xf32, #tpu.memory_space<vmem>>, %arg7: memref<1x64xf32, #tpu.memory_space<vmem>>, %arg8: memref<64x2xf32, #tpu.memory_space<vmem>>, %arg9: memref<1x2xf32, #tpu.memory_space<vmem>>, %arg10: memref<128x32xf32, #tpu.memory_space<vmem>>, %arg11: memref<1x32xf32, #tpu.memory_space<vmem>>, %arg12: memref<32x32xf32, #tpu.memory_space<vmem>>, %arg13: memref<1x32xf32, #tpu.memory_space<vmem>>, %arg14: memref<32x32xf32, #tpu.memory_space<vmem>>, %arg15: memref<1x32xf32, #tpu.memory_space<vmem>>, %arg16: memref<32x128xf32, #tpu.memory_space<vmem>>, %arg17: memref<1x128xf32, #tpu.memory_space<vmem>>, %arg18: memref<128x32xf32, #tpu.memory_space<vmem>>, %arg19: memref<1x32xf32, #tpu.memory_space<vmem>>, %arg20: memref<1x32xf32, #tpu.memory_space<vmem>>, %arg21: memref<1x32xf32, #tpu.memory_space<vmem>>, %arg22: memref<32x8xf32, #tpu.memory_space<vmem>>, %arg23: memref<1x8xf32, #tpu.memory_space<vmem>>, %arg24: memref<3x56x32xf32, #tpu.memory_space<vmem>>, %arg25: memref<3x1x32xf32, #tpu.memory_space<vmem>>, %arg26: memref<3x32x32xf32, #tpu.memory_space<vmem>>, %arg27: memref<3x1x32xf32, #tpu.memory_space<vmem>>, %arg28: memref<3x32x32xf32, #tpu.memory_space<vmem>>, %arg29: memref<3x1x32xf32, #tpu.memory_space<vmem>>, %arg30: memref<3x32x8xf32, #tpu.memory_space<vmem>>, %arg31: memref<3x1x8xf32, #tpu.memory_space<vmem>>, %arg32: memref<16x32xf32, #tpu.memory_space<vmem>>) attributes {dimension_semantics = [], scalar_prefetch = 0 : i64, scratch_operands = 0 : i64, tpu.core_type = #tpu.core_type<tc>} {
    %c0 = arith.constant 0 : index
    %c0_0 = arith.constant 0 : index
    %0 = vector.load %arg6[%c0, %c0_0] : memref<128x64xf32, #tpu.memory_space<vmem>>, vector<128x64xf32>
    %c0_1 = arith.constant 0 : index
    %c0_2 = arith.constant 0 : index
    %1 = vector.load %arg7[%c0_1, %c0_2] : memref<1x64xf32, #tpu.memory_space<vmem>>, vector<1x64xf32>
    %c0_3 = arith.constant 0 : index
    %c0_4 = arith.constant 0 : index
    %2 = vector.load %arg8[%c0_3, %c0_4] : memref<64x2xf32, #tpu.memory_space<vmem>>, vector<64x2xf32>
    %c0_5 = arith.constant 0 : index
    %c0_6 = arith.constant 0 : index
    %3 = vector.load %arg9[%c0_5, %c0_6] : memref<1x2xf32, #tpu.memory_space<vmem>>, vector<1x2xf32>
    %c0_7 = arith.constant 0 : index
    %c0_8 = arith.constant 0 : index
    %4 = vector.load %arg10[%c0_7, %c0_8] : memref<128x32xf32, #tpu.memory_space<vmem>>, vector<128x32xf32>
    %c0_9 = arith.constant 0 : index
    %c0_10 = arith.constant 0 : index
    %5 = vector.load %arg11[%c0_9, %c0_10] : memref<1x32xf32, #tpu.memory_space<vmem>>, vector<1x32xf32>
    %c0_11 = arith.constant 0 : index
    %c0_12 = arith.constant 0 : index
    %6 = vector.load %arg12[%c0_11, %c0_12] : memref<32x32xf32, #tpu.memory_space<vmem>>, vector<32x32xf32>
    %c0_13 = arith.constant 0 : index
    %c0_14 = arith.constant 0 : index
    %7 = vector.load %arg13[%c0_13, %c0_14] : memref<1x32xf32, #tpu.memory_space<vmem>>, vector<1x32xf32>
    %c0_15 = arith.constant 0 : index
    %c0_16 = arith.constant 0 : index
    %8 = vector.load %arg14[%c0_15, %c0_16] : memref<32x32xf32, #tpu.memory_space<vmem>>, vector<32x32xf32>
    %c0_17 = arith.constant 0 : index
    %c0_18 = arith.constant 0 : index
    %9 = vector.load %arg15[%c0_17, %c0_18] : memref<1x32xf32, #tpu.memory_space<vmem>>, vector<1x32xf32>
    %c0_19 = arith.constant 0 : index
    %c0_20 = arith.constant 0 : index
    %10 = vector.load %arg16[%c0_19, %c0_20] : memref<32x128xf32, #tpu.memory_space<vmem>>, vector<32x128xf32>
    %c0_21 = arith.constant 0 : index
    %c0_22 = arith.constant 0 : index
    %11 = vector.load %arg17[%c0_21, %c0_22] : memref<1x128xf32, #tpu.memory_space<vmem>>, vector<1x128xf32>
    %c0_23 = arith.constant 0 : index
    %c0_24 = arith.constant 0 : index
    %12 = vector.load %arg18[%c0_23, %c0_24] : memref<128x32xf32, #tpu.memory_space<vmem>>, vector<128x32xf32>
    %c0_25 = arith.constant 0 : index
    %c0_26 = arith.constant 0 : index
    %13 = vector.load %arg19[%c0_25, %c0_26] : memref<1x32xf32, #tpu.memory_space<vmem>>, vector<1x32xf32>
    %c0_27 = arith.constant 0 : index
    %c0_28 = arith.constant 0 : index
    %14 = vector.load %arg20[%c0_27, %c0_28] : memref<1x32xf32, #tpu.memory_space<vmem>>, vector<1x32xf32>
    %c0_29 = arith.constant 0 : index
    %c0_30 = arith.constant 0 : index
    %15 = vector.load %arg21[%c0_29, %c0_30] : memref<1x32xf32, #tpu.memory_space<vmem>>, vector<1x32xf32>
    %c0_31 = arith.constant 0 : index
    %c0_32 = arith.constant 0 : index
    %16 = vector.load %arg22[%c0_31, %c0_32] : memref<32x8xf32, #tpu.memory_space<vmem>>, vector<32x8xf32>
    %c0_33 = arith.constant 0 : index
    %c0_34 = arith.constant 0 : index
    %17 = vector.load %arg23[%c0_33, %c0_34] : memref<1x8xf32, #tpu.memory_space<vmem>>, vector<1x8xf32>
    %c0_35 = arith.constant 0 : index
    %c0_36 = arith.constant 0 : index
    %18 = vector.load %arg0[%c0_35, %c0_36] : memref<16x32xf32, #tpu.memory_space<vmem>>, vector<16x32xf32>
    %c0_37 = arith.constant 0 : index
    %c0_38 = arith.constant 0 : index
    %19 = vector.load %arg1[%c0_37, %c0_38] : memref<64x32xf32, #tpu.memory_space<vmem>>, vector<64x32xf32>
    %c0_39 = arith.constant 0 : index
    %c0_40 = arith.constant 0 : index
    %20 = vector.load %arg2[%c0_39, %c0_40] : memref<16x32xf32, #tpu.memory_space<vmem>>, vector<16x32xf32>
    %c0_41 = arith.constant 0 : index
    %c0_42 = arith.constant 0 : index
    %21 = vector.load %arg3[%c0_41, %c0_42] : memref<64x16xf32, #tpu.memory_space<vmem>>, vector<64x16xf32>
    %c0_43 = arith.constant 0 : index
    %c0_44 = arith.constant 0 : index
    %22 = vector.load %arg4[%c0_43, %c0_44] : memref<64x16xf32, #tpu.memory_space<vmem>>, vector<64x16xf32>
    %c0_45 = arith.constant 0 : index
    %c0_46 = arith.constant 0 : index
    %23 = vector.load %arg5[%c0_45, %c0_46] : memref<8x8xf32, #tpu.memory_space<vmem>>, vector<8x8xf32>
    %cst = arith.constant dense<0.000000e+00> : vector<64x32xf32>
    %24 = tpu.matmul %21, %18, %cst {dimension_numbers = #tpu.dot_dimension_numbers<[1], [0], [0], [1], [0, 0, 1, 1], [], []>} : vector<64x16xf32>, vector<16x32xf32>, vector<64x32xf32> -> vector<64x32xf32>
    %cst_47 = arith.constant dense<0.000000e+00> : vector<64x32xf32>
    %25 = tpu.matmul %22, %18, %cst_47 {dimension_numbers = #tpu.dot_dimension_numbers<[1], [0], [0], [1], [0, 0, 1, 1], [], []>} : vector<64x16xf32>, vector<16x32xf32>, vector<64x32xf32> -> vector<64x32xf32>
    %cst_48 = arith.constant dense<0.000000e+00> : vector<64x32xf32>
    %26 = tpu.matmul %21, %20, %cst_48 {dimension_numbers = #tpu.dot_dimension_numbers<[1], [0], [0], [1], [0, 0, 1, 1], [], []>} : vector<64x16xf32>, vector<16x32xf32>, vector<64x32xf32> -> vector<64x32xf32>
    %27 = vector.extract_strided_slice %0 {offsets = [0, 0], sizes = [32, 64], strides = [1, 1]} : vector<128x64xf32> to vector<32x64xf32>
    %cst_49 = arith.constant dense<0.000000e+00> : vector<64x64xf32>
    %28 = tpu.matmul %24, %27, %cst_49 {dimension_numbers = #tpu.dot_dimension_numbers<[1], [0], [0], [1], [0, 0, 1, 1], [], []>} : vector<64x32xf32>, vector<32x64xf32>, vector<64x64xf32> -> vector<64x64xf32>
    %29 = vector.broadcast %1 : vector<1x64xf32> to vector<64x64xf32>
    %30 = arith.addf %29, %28 : vector<64x64xf32>
    %31 = vector.extract_strided_slice %0 {offsets = [32, 0], sizes = [32, 64], strides = [1, 1]} : vector<128x64xf32> to vector<32x64xf32>
    %cst_50 = arith.constant dense<0.000000e+00> : vector<64x64xf32>
    %32 = tpu.matmul %25, %31, %cst_50 {dimension_numbers = #tpu.dot_dimension_numbers<[1], [0], [0], [1], [0, 0, 1, 1], [], []>} : vector<64x32xf32>, vector<32x64xf32>, vector<64x64xf32> -> vector<64x64xf32>
    %33 = arith.addf %30, %32 : vector<64x64xf32>
    %34 = vector.extract_strided_slice %0 {offsets = [64, 0], sizes = [32, 64], strides = [1, 1]} : vector<128x64xf32> to vector<32x64xf32>
    %cst_51 = arith.constant dense<0.000000e+00> : vector<64x64xf32>
    %35 = tpu.matmul %26, %34, %cst_51 {dimension_numbers = #tpu.dot_dimension_numbers<[1], [0], [0], [1], [0, 0, 1, 1], [], []>} : vector<64x32xf32>, vector<32x64xf32>, vector<64x64xf32> -> vector<64x64xf32>
    %36 = arith.addf %33, %35 : vector<64x64xf32>
    %37 = vector.extract_strided_slice %0 {offsets = [96, 0], sizes = [32, 64], strides = [1, 1]} : vector<128x64xf32> to vector<32x64xf32>
    %cst_52 = arith.constant dense<0.000000e+00> : vector<64x64xf32>
    %38 = tpu.matmul %19, %37, %cst_52 {dimension_numbers = #tpu.dot_dimension_numbers<[1], [0], [0], [1], [0, 0, 1, 1], [], []>} : vector<64x32xf32>, vector<32x64xf32>, vector<64x64xf32> -> vector<64x64xf32>
    %39 = arith.addf %36, %38 : vector<64x64xf32>
    %cst_53 = arith.constant 0.000000e+00 : f32
    %40 = vector.broadcast %cst_53 : f32 to vector<64x64xf32>
    %41 = arith.cmpf ogt, %39, %40 : vector<64x64xf32>
    %cst_54 = arith.constant 2.000000e-01 : f32
    %42 = vector.broadcast %cst_54 : f32 to vector<64x64xf32>
    %43 = arith.mulf %42, %39 : vector<64x64xf32>
    %44 = arith.select %41, %39, %43 : vector<64x64xi1>, vector<64x64xf32>
    %cst_55 = arith.constant dense<0.000000e+00> : vector<64x2xf32>
    %45 = tpu.matmul %44, %2, %cst_55 {dimension_numbers = #tpu.dot_dimension_numbers<[1], [0], [0], [1], [0, 0, 1, 1], [], []>} : vector<64x64xf32>, vector<64x2xf32>, vector<64x2xf32> -> vector<64x2xf32>
    %46 = vector.broadcast %3 : vector<1x2xf32> to vector<64x2xf32>
    %47 = arith.addf %45, %46 : vector<64x2xf32>
    %48 = vector.extract_strided_slice %4 {offsets = [0, 0], sizes = [32, 32], strides = [1, 1]} : vector<128x32xf32> to vector<32x32xf32>
    %cst_56 = arith.constant dense<0.000000e+00> : vector<64x32xf32>
    %49 = tpu.matmul %24, %48, %cst_56 {dimension_numbers = #tpu.dot_dimension_numbers<[1], [0], [0], [1], [0, 0, 1, 1], [], []>} : vector<64x32xf32>, vector<32x32xf32>, vector<64x32xf32> -> vector<64x32xf32>
    %50 = vector.broadcast %5 : vector<1x32xf32> to vector<64x32xf32>
    %51 = arith.addf %50, %49 : vector<64x32xf32>
    %52 = vector.extract_strided_slice %4 {offsets = [32, 0], sizes = [32, 32], strides = [1, 1]} : vector<128x32xf32> to vector<32x32xf32>
    %cst_57 = arith.constant dense<0.000000e+00> : vector<64x32xf32>
    %53 = tpu.matmul %25, %52, %cst_57 {dimension_numbers = #tpu.dot_dimension_numbers<[1], [0], [0], [1], [0, 0, 1, 1], [], []>} : vector<64x32xf32>, vector<32x32xf32>, vector<64x32xf32> -> vector<64x32xf32>
    %54 = arith.addf %51, %53 : vector<64x32xf32>
    %55 = vector.extract_strided_slice %4 {offsets = [64, 0], sizes = [32, 32], strides = [1, 1]} : vector<128x32xf32> to vector<32x32xf32>
    %cst_58 = arith.constant dense<0.000000e+00> : vector<64x32xf32>
    %56 = tpu.matmul %26, %55, %cst_58 {dimension_numbers = #tpu.dot_dimension_numbers<[1], [0], [0], [1], [0, 0, 1, 1], [], []>} : vector<64x32xf32>, vector<32x32xf32>, vector<64x32xf32> -> vector<64x32xf32>
    %57 = arith.addf %54, %56 : vector<64x32xf32>
    %58 = vector.extract_strided_slice %4 {offsets = [96, 0], sizes = [32, 32], strides = [1, 1]} : vector<128x32xf32> to vector<32x32xf32>
    %cst_59 = arith.constant dense<0.000000e+00> : vector<64x32xf32>
    %59 = tpu.matmul %19, %58, %cst_59 {dimension_numbers = #tpu.dot_dimension_numbers<[1], [0], [0], [1], [0, 0, 1, 1], [], []>} : vector<64x32xf32>, vector<32x32xf32>, vector<64x32xf32> -> vector<64x32xf32>
    %60 = arith.addf %57, %59 : vector<64x32xf32>
    %cst_60 = arith.constant 5.000000e-01 : f32
    %61 = vector.broadcast %cst_60 : f32 to vector<64x32xf32>
    %62 = arith.mulf %61, %60 : vector<64x32xf32>
    %cst_61 = arith.constant 4.471500e-02 : f32
    %63 = vector.broadcast %cst_61 : f32 to vector<64x32xf32>
    %64 = arith.mulf %63, %60 : vector<64x32xf32>
    %65 = arith.mulf %64, %60 : vector<64x32xf32>
    %66 = arith.mulf %65, %60 : vector<64x32xf32>
    %67 = arith.addf %60, %66 : vector<64x32xf32>
    %cst_62 = arith.constant 0.797884583 : f32
    %68 = vector.broadcast %cst_62 : f32 to vector<64x32xf32>
    %69 = arith.mulf %68, %67 : vector<64x32xf32>
    %70 = math.tanh %69 : vector<64x32xf32>
    %cst_63 = arith.constant 1.000000e+00 : f32
    %71 = vector.broadcast %cst_63 : f32 to vector<64x32xf32>
    %72 = arith.addf %71, %70 : vector<64x32xf32>
    %73 = arith.mulf %62, %72 : vector<64x32xf32>
    %cst_64 = arith.constant dense<0.000000e+00> : vector<64x32xf32>
    %74 = tpu.matmul %73, %6, %cst_64 {dimension_numbers = #tpu.dot_dimension_numbers<[1], [0], [0], [1], [0, 0, 1, 1], [], []>} : vector<64x32xf32>, vector<32x32xf32>, vector<64x32xf32> -> vector<64x32xf32>
    %75 = vector.broadcast %7 : vector<1x32xf32> to vector<64x32xf32>
    %76 = arith.addf %74, %75 : vector<64x32xf32>
    %cst_65 = arith.constant 5.000000e-01 : f32
    %77 = vector.broadcast %cst_65 : f32 to vector<64x32xf32>
    %78 = arith.mulf %77, %76 : vector<64x32xf32>
    %cst_66 = arith.constant 4.471500e-02 : f32
    %79 = vector.broadcast %cst_66 : f32 to vector<64x32xf32>
    %80 = arith.mulf %79, %76 : vector<64x32xf32>
    %81 = arith.mulf %80, %76 : vector<64x32xf32>
    %82 = arith.mulf %81, %76 : vector<64x32xf32>
    %83 = arith.addf %76, %82 : vector<64x32xf32>
    %cst_67 = arith.constant 0.797884583 : f32
    %84 = vector.broadcast %cst_67 : f32 to vector<64x32xf32>
    %85 = arith.mulf %84, %83 : vector<64x32xf32>
    %86 = math.tanh %85 : vector<64x32xf32>
    %cst_68 = arith.constant 1.000000e+00 : f32
    %87 = vector.broadcast %cst_68 : f32 to vector<64x32xf32>
    %88 = arith.addf %87, %86 : vector<64x32xf32>
    %89 = arith.mulf %78, %88 : vector<64x32xf32>
    %cst_69 = arith.constant dense<0.000000e+00> : vector<64x32xf32>
    %90 = tpu.matmul %89, %8, %cst_69 {dimension_numbers = #tpu.dot_dimension_numbers<[1], [0], [0], [1], [0, 0, 1, 1], [], []>} : vector<64x32xf32>, vector<32x32xf32>, vector<64x32xf32> -> vector<64x32xf32>
    %91 = vector.broadcast %9 : vector<1x32xf32> to vector<64x32xf32>
    %92 = arith.addf %90, %91 : vector<64x32xf32>
    %cst_70 = arith.constant 5.000000e-01 : f32
    %93 = vector.broadcast %cst_70 : f32 to vector<64x16xf32>
    %94 = arith.cmpf ogt, %22, %93 : vector<64x16xf32>
    %95 = vector.extract_strided_slice %47 {offsets = [0, 0], sizes = [64, 1], strides = [1, 1]} : vector<64x2xf32> to vector<64x1xf32>
    %cst_71 = arith.constant -1.000000e+30 : f32
    %96 = vector.shape_cast %95 : vector<64x1xf32> to vector<64x1xf32>
    %97 = vector.broadcast %96 : vector<64x1xf32> to vector<64x16xf32>
    %98 = vector.broadcast %cst_71 : f32 to vector<64x16xf32>
    %99 = arith.select %94, %97, %98 : vector<64x16xi1>, vector<64x16xf32>
    %cst_72 = arith.constant dense<0xFF800000> : vector<16xf32>
    %100 = vector.multi_reduction <maximumf>, %99, %cst_72 [0] : vector<64x16xf32> to vector<16xf32>
    %101 = vector.shape_cast %100 : vector<16xf32> to vector<1x16xf32>
    %102 = vector.extract_strided_slice %47 {offsets = [0, 1], sizes = [64, 1], strides = [1, 1]} : vector<64x2xf32> to vector<64x1xf32>
    %cst_73 = arith.constant -1.000000e+30 : f32
    %103 = vector.shape_cast %102 : vector<64x1xf32> to vector<64x1xf32>
    %104 = vector.broadcast %103 : vector<64x1xf32> to vector<64x16xf32>
    %105 = vector.broadcast %cst_73 : f32 to vector<64x16xf32>
    %106 = arith.select %94, %104, %105 : vector<64x16xi1>, vector<64x16xf32>
    %cst_74 = arith.constant dense<0xFF800000> : vector<16xf32>
    %107 = vector.multi_reduction <maximumf>, %106, %cst_74 [0] : vector<64x16xf32> to vector<16xf32>
    %108 = vector.shape_cast %107 : vector<16xf32> to vector<1x16xf32>
    %109 = tpu.concatenate %101, %108 in 0 : vector<1x16xf32>, vector<1x16xf32> -> vector<2x16xf32>
    %cst_75 = arith.constant dense<0.000000e+00> : vector<64x2xf32>
    %110 = tpu.matmul %22, %109, %cst_75 {dimension_numbers = #tpu.dot_dimension_numbers<[1], [1], [0], [0], [0, 0, 1, 0], [], []>} : vector<64x16xf32>, vector<2x16xf32>, vector<64x2xf32> -> vector<64x2xf32>
    %111 = arith.subf %47, %110 : vector<64x2xf32>
    %112 = math.exp %111 : vector<64x2xf32>
    %cst_76 = arith.constant 9.99999996E-13 : f32
    %113 = vector.broadcast %cst_76 : f32 to vector<64x2xf32>
    %114 = arith.addf %112, %113 : vector<64x2xf32>
    %cst_77 = arith.constant dense<0.000000e+00> : vector<16x2xf32>
    %115 = tpu.matmul %22, %114, %cst_77 {dimension_numbers = #tpu.dot_dimension_numbers<[0], [0], [1], [1], [0, 1, 1, 1], [], []>} : vector<64x16xf32>, vector<64x2xf32>, vector<16x2xf32> -> vector<16x2xf32>
    %cst_78 = arith.constant dense<0.000000e+00> : vector<64x2xf32>
    %116 = tpu.matmul %22, %115, %cst_78 {dimension_numbers = #tpu.dot_dimension_numbers<[1], [0], [0], [1], [0, 0, 1, 1], [], []>} : vector<64x16xf32>, vector<16x2xf32>, vector<64x2xf32> -> vector<64x2xf32>
    %117 = arith.divf %112, %116 : vector<64x2xf32>
    %cst_79 = arith.constant dense<0.000000e+00> : vector<64xf32>
    %118 = vector.multi_reduction <add>, %117, %cst_79 [1] : vector<64x2xf32> to vector<64xf32>
    %119 = vector.shape_cast %118 : vector<64xf32> to vector<64x1xf32>
    %cst_80 = arith.constant 2.000000e+00 : f32
    %120 = vector.broadcast %cst_80 : f32 to vector<64x1xf32>
    %121 = arith.divf %119, %120 : vector<64x1xf32>
    %122 = vector.broadcast %121 : vector<64x1xf32> to vector<64x32xf32>
    %123 = arith.mulf %122, %92 : vector<64x32xf32>
    %cst_81 = arith.constant dense<0.000000e+00> : vector<16x32xf32>
    %124 = tpu.matmul %22, %123, %cst_81 {dimension_numbers = #tpu.dot_dimension_numbers<[0], [0], [1], [1], [0, 1, 1, 1], [], []>} : vector<64x16xf32>, vector<64x32xf32>, vector<16x32xf32> -> vector<16x32xf32>
    %125 = arith.addf %18, %124 : vector<16x32xf32>
    %cst_82 = arith.constant dense<0.000000e+00> : vector<16xf32>
    %126 = vector.multi_reduction <add>, %125, %cst_82 [1] : vector<16x32xf32> to vector<16xf32>
    %127 = vector.shape_cast %126 : vector<16xf32> to vector<16x1xf32>
    %cst_83 = arith.constant 3.200000e+01 : f32
    %128 = vector.broadcast %cst_83 : f32 to vector<16x1xf32>
    %129 = arith.divf %127, %128 : vector<16x1xf32>
    %130 = vector.broadcast %129 : vector<16x1xf32> to vector<16x32xf32>
    %131 = arith.subf %125, %130 : vector<16x32xf32>
    %132 = arith.mulf %131, %131 : vector<16x32xf32>
    %cst_84 = arith.constant dense<0.000000e+00> : vector<16xf32>
    %133 = vector.multi_reduction <add>, %132, %cst_84 [1] : vector<16x32xf32> to vector<16xf32>
    %134 = vector.shape_cast %133 : vector<16xf32> to vector<16x1xf32>
    %cst_85 = arith.constant 3.200000e+01 : f32
    %135 = vector.broadcast %cst_85 : f32 to vector<16x1xf32>
    %136 = arith.divf %134, %135 : vector<16x1xf32>
    %cst_86 = arith.constant 9.99999974E-6 : f32
    %137 = vector.broadcast %cst_86 : f32 to vector<16x1xf32>
    %138 = arith.addf %136, %137 : vector<16x1xf32>
    %139 = math.rsqrt %138 : vector<16x1xf32>
    %140 = vector.broadcast %139 : vector<16x1xf32> to vector<16x32xf32>
    %141 = arith.mulf %131, %140 : vector<16x32xf32>
    %142 = vector.broadcast %14 : vector<1x32xf32> to vector<16x32xf32>
    %143 = arith.mulf %141, %142 : vector<16x32xf32>
    %144 = vector.broadcast %15 : vector<1x32xf32> to vector<16x32xf32>
    %145 = arith.addf %143, %144 : vector<16x32xf32>
    %cst_87 = arith.constant dense<0.000000e+00> : vector<16x128xf32>
    %146 = tpu.matmul %145, %10, %cst_87 {dimension_numbers = #tpu.dot_dimension_numbers<[1], [0], [0], [1], [0, 0, 1, 1], [], []>} : vector<16x32xf32>, vector<32x128xf32>, vector<16x128xf32> -> vector<16x128xf32>
    %147 = vector.broadcast %11 : vector<1x128xf32> to vector<16x128xf32>
    %148 = arith.addf %146, %147 : vector<16x128xf32>
    %cst_88 = arith.constant 5.000000e-01 : f32
    %149 = vector.broadcast %cst_88 : f32 to vector<16x128xf32>
    %150 = arith.mulf %149, %148 : vector<16x128xf32>
    %cst_89 = arith.constant 4.471500e-02 : f32
    %151 = vector.broadcast %cst_89 : f32 to vector<16x128xf32>
    %152 = arith.mulf %151, %148 : vector<16x128xf32>
    %153 = arith.mulf %152, %148 : vector<16x128xf32>
    %154 = arith.mulf %153, %148 : vector<16x128xf32>
    %155 = arith.addf %148, %154 : vector<16x128xf32>
    %cst_90 = arith.constant 0.797884583 : f32
    %156 = vector.broadcast %cst_90 : f32 to vector<16x128xf32>
    %157 = arith.mulf %156, %155 : vector<16x128xf32>
    %158 = math.tanh %157 : vector<16x128xf32>
    %cst_91 = arith.constant 1.000000e+00 : f32
    %159 = vector.broadcast %cst_91 : f32 to vector<16x128xf32>
    %160 = arith.addf %159, %158 : vector<16x128xf32>
    %161 = arith.mulf %150, %160 : vector<16x128xf32>
    %cst_92 = arith.constant dense<0.000000e+00> : vector<16x32xf32>
    %162 = tpu.matmul %161, %12, %cst_92 {dimension_numbers = #tpu.dot_dimension_numbers<[1], [0], [0], [1], [0, 0, 1, 1], [], []>} : vector<16x128xf32>, vector<128x32xf32>, vector<16x32xf32> -> vector<16x32xf32>
    %163 = vector.broadcast %13 : vector<1x32xf32> to vector<16x32xf32>
    %164 = arith.addf %162, %163 : vector<16x32xf32>
    %165 = arith.addf %164, %124 : vector<16x32xf32>
    %cst_93 = arith.constant dense<0.000000e+00> : vector<16xf32>
    %166 = vector.multi_reduction <add>, %165, %cst_93 [1] : vector<16x32xf32> to vector<16xf32>
    %167 = vector.shape_cast %166 : vector<16xf32> to vector<16x1xf32>
    %cst_94 = arith.constant 3.200000e+01 : f32
    %168 = vector.broadcast %cst_94 : f32 to vector<16x1xf32>
    %169 = arith.divf %167, %168 : vector<16x1xf32>
    %170 = vector.broadcast %169 : vector<16x1xf32> to vector<16x32xf32>
    %171 = arith.subf %165, %170 : vector<16x32xf32>
    %172 = arith.mulf %171, %171 : vector<16x32xf32>
    %cst_95 = arith.constant dense<0.000000e+00> : vector<16xf32>
    %173 = vector.multi_reduction <add>, %172, %cst_95 [1] : vector<16x32xf32> to vector<16xf32>
    %174 = vector.shape_cast %173 : vector<16xf32> to vector<16x1xf32>
    %cst_96 = arith.constant 3.200000e+01 : f32
    %175 = vector.broadcast %cst_96 : f32 to vector<16x1xf32>
    %176 = arith.divf %174, %175 : vector<16x1xf32>
    %cst_97 = arith.constant 9.99999974E-6 : f32
    %177 = vector.broadcast %cst_97 : f32 to vector<16x1xf32>
    %178 = arith.addf %176, %177 : vector<16x1xf32>
    %179 = math.rsqrt %178 : vector<16x1xf32>
    %180 = vector.broadcast %179 : vector<16x1xf32> to vector<16x32xf32>
    %181 = arith.mulf %171, %180 : vector<16x32xf32>
    %182 = vector.broadcast %14 : vector<1x32xf32> to vector<16x32xf32>
    %183 = arith.mulf %181, %182 : vector<16x32xf32>
    %184 = vector.broadcast %15 : vector<1x32xf32> to vector<16x32xf32>
    %185 = arith.addf %183, %184 : vector<16x32xf32>
    %cst_98 = arith.constant dense<0.000000e+00> : vector<16x8xf32>
    %186 = tpu.matmul %185, %16, %cst_98 {dimension_numbers = #tpu.dot_dimension_numbers<[1], [0], [0], [1], [0, 0, 1, 1], [], []>} : vector<16x32xf32>, vector<32x8xf32>, vector<16x8xf32> -> vector<16x8xf32>
    %187 = vector.broadcast %17 : vector<1x8xf32> to vector<16x8xf32>
    %188 = arith.addf %186, %187 : vector<16x8xf32>
    %cst_99 = arith.constant dense<0xFF800000> : vector<16xf32>
    %189 = vector.multi_reduction <maximumf>, %188, %cst_99 [1] : vector<16x8xf32> to vector<16xf32>
    %190 = vector.shape_cast %189 : vector<16xf32> to vector<16x1xf32>
    %191 = tpu.iota {dimensions = array<i32: 1>} : vector<16x8xi32>
    %192 = arith.sitofp %191 : vector<16x8xi32> to vector<16x8xf32>
    %193 = vector.broadcast %190 : vector<16x1xf32> to vector<16x8xf32>
    %194 = arith.cmpf oge, %188, %193 : vector<16x8xf32>
    %cst_100 = arith.constant 8.000000e+00 : f32
    %195 = vector.broadcast %cst_100 : f32 to vector<16x8xf32>
    %196 = arith.select %194, %192, %195 : vector<16x8xi1>, vector<16x8xf32>
    %cst_101 = arith.constant dense<0x7F800000> : vector<16xf32>
    %197 = vector.multi_reduction <minimumf>, %196, %cst_101 [1] : vector<16x8xf32> to vector<16xf32>
    %198 = vector.shape_cast %197 : vector<16xf32> to vector<16x1xf32>
    %199 = vector.broadcast %198 : vector<16x1xf32> to vector<16x8xf32>
    %200 = arith.cmpf oeq, %192, %199 : vector<16x8xf32>
    %201 = arith.extui %200 : vector<16x8xi1> to vector<16x8xi32>
    %202 = arith.sitofp %201 : vector<16x8xi32> to vector<16x8xf32>
    %cst_102 = arith.constant dense<0.000000e+00> : vector<16x8xf32>
    %203 = tpu.matmul %202, %23, %cst_102 {dimension_numbers = #tpu.dot_dimension_numbers<[1], [0], [0], [1], [0, 0, 1, 1], [], []>} : vector<16x8xf32>, vector<8x8xf32>, vector<16x8xf32> -> vector<16x8xf32>
    %c0_103 = arith.constant 0 : index
    %c0_104 = arith.constant 0 : index
    %c0_105 = arith.constant 0 : index
    %204 = vector.load %arg24[%c0_103, %c0_104, %c0_105] : memref<3x56x32xf32, #tpu.memory_space<vmem>>, vector<1x56x32xf32>
    %205 = vector.shape_cast %204 : vector<1x56x32xf32> to vector<56x32xf32>
    %c0_106 = arith.constant 0 : index
    %c0_107 = arith.constant 0 : index
    %c0_108 = arith.constant 0 : index
    %206 = vector.load %arg25[%c0_106, %c0_107, %c0_108] : memref<3x1x32xf32, #tpu.memory_space<vmem>>, vector<1x1x32xf32>
    %207 = vector.shape_cast %206 : vector<1x1x32xf32> to vector<1x32xf32>
    %c0_109 = arith.constant 0 : index
    %c0_110 = arith.constant 0 : index
    %c0_111 = arith.constant 0 : index
    %208 = vector.load %arg26[%c0_109, %c0_110, %c0_111] : memref<3x32x32xf32, #tpu.memory_space<vmem>>, vector<1x32x32xf32>
    %209 = vector.shape_cast %208 : vector<1x32x32xf32> to vector<32x32xf32>
    %c0_112 = arith.constant 0 : index
    %c0_113 = arith.constant 0 : index
    %c0_114 = arith.constant 0 : index
    %210 = vector.load %arg27[%c0_112, %c0_113, %c0_114] : memref<3x1x32xf32, #tpu.memory_space<vmem>>, vector<1x1x32xf32>
    %211 = vector.shape_cast %210 : vector<1x1x32xf32> to vector<1x32xf32>
    %c0_115 = arith.constant 0 : index
    %c0_116 = arith.constant 0 : index
    %c0_117 = arith.constant 0 : index
    %212 = vector.load %arg28[%c0_115, %c0_116, %c0_117] : memref<3x32x32xf32, #tpu.memory_space<vmem>>, vector<1x32x32xf32>
    %213 = vector.shape_cast %212 : vector<1x32x32xf32> to vector<32x32xf32>
    %c0_118 = arith.constant 0 : index
    %c0_119 = arith.constant 0 : index
    %c0_120 = arith.constant 0 : index
    %214 = vector.load %arg29[%c0_118, %c0_119, %c0_120] : memref<3x1x32xf32, #tpu.memory_space<vmem>>, vector<1x1x32xf32>
    %215 = vector.shape_cast %214 : vector<1x1x32xf32> to vector<1x32xf32>
    %c0_121 = arith.constant 0 : index
    %c0_122 = arith.constant 0 : index
    %c0_123 = arith.constant 0 : index
    %216 = vector.load %arg30[%c0_121, %c0_122, %c0_123] : memref<3x32x8xf32, #tpu.memory_space<vmem>>, vector<1x32x8xf32>
    %217 = vector.shape_cast %216 : vector<1x32x8xf32> to vector<32x8xf32>
    %c0_124 = arith.constant 0 : index
    %c0_125 = arith.constant 0 : index
    %c0_126 = arith.constant 0 : index
    %218 = vector.load %arg31[%c0_124, %c0_125, %c0_126] : memref<3x1x8xf32, #tpu.memory_space<vmem>>, vector<1x1x8xf32>
    %219 = vector.shape_cast %218 : vector<1x1x8xf32> to vector<1x8xf32>
    %220 = vector.extract_strided_slice %205 {offsets = [0, 0], sizes = [32, 32], strides = [1, 1]} : vector<56x32xf32> to vector<32x32xf32>
    %cst_127 = arith.constant dense<0.000000e+00> : vector<16x32xf32>
    %221 = tpu.matmul %185, %220, %cst_127 {dimension_numbers = #tpu.dot_dimension_numbers<[1], [0], [0], [1], [0, 0, 1, 1], [], []>} : vector<16x32xf32>, vector<32x32xf32>, vector<16x32xf32> -> vector<16x32xf32>
    %222 = vector.broadcast %207 : vector<1x32xf32> to vector<16x32xf32>
    %223 = arith.addf %222, %221 : vector<16x32xf32>
    %224 = vector.extract_strided_slice %205 {offsets = [32, 0], sizes = [8, 32], strides = [1, 1]} : vector<56x32xf32> to vector<8x32xf32>
    %cst_128 = arith.constant dense<0.000000e+00> : vector<16x32xf32>
    %225 = tpu.matmul %203, %224, %cst_128 {dimension_numbers = #tpu.dot_dimension_numbers<[1], [0], [0], [1], [0, 0, 1, 1], [], []>} : vector<16x8xf32>, vector<8x32xf32>, vector<16x32xf32> -> vector<16x32xf32>
    %226 = arith.addf %223, %225 : vector<16x32xf32>
    %cst_129 = arith.constant 5.000000e-01 : f32
    %227 = vector.broadcast %cst_129 : f32 to vector<16x32xf32>
    %228 = arith.mulf %227, %226 : vector<16x32xf32>
    %cst_130 = arith.constant 4.471500e-02 : f32
    %229 = vector.broadcast %cst_130 : f32 to vector<16x32xf32>
    %230 = arith.mulf %229, %226 : vector<16x32xf32>
    %231 = arith.mulf %230, %226 : vector<16x32xf32>
    %232 = arith.mulf %231, %226 : vector<16x32xf32>
    %233 = arith.addf %226, %232 : vector<16x32xf32>
    %cst_131 = arith.constant 0.797884583 : f32
    %234 = vector.broadcast %cst_131 : f32 to vector<16x32xf32>
    %235 = arith.mulf %234, %233 : vector<16x32xf32>
    %236 = math.tanh %235 : vector<16x32xf32>
    %cst_132 = arith.constant 1.000000e+00 : f32
    %237 = vector.broadcast %cst_132 : f32 to vector<16x32xf32>
    %238 = arith.addf %237, %236 : vector<16x32xf32>
    %239 = arith.mulf %228, %238 : vector<16x32xf32>
    %cst_133 = arith.constant dense<0.000000e+00> : vector<16x32xf32>
    %240 = tpu.matmul %239, %209, %cst_133 {dimension_numbers = #tpu.dot_dimension_numbers<[1], [0], [0], [1], [0, 0, 1, 1], [], []>} : vector<16x32xf32>, vector<32x32xf32>, vector<16x32xf32> -> vector<16x32xf32>
    %241 = vector.broadcast %211 : vector<1x32xf32> to vector<16x32xf32>
    %242 = arith.addf %240, %241 : vector<16x32xf32>
    %cst_134 = arith.constant 5.000000e-01 : f32
    %243 = vector.broadcast %cst_134 : f32 to vector<16x32xf32>
    %244 = arith.mulf %243, %242 : vector<16x32xf32>
    %cst_135 = arith.constant 4.471500e-02 : f32
    %245 = vector.broadcast %cst_135 : f32 to vector<16x32xf32>
    %246 = arith.mulf %245, %242 : vector<16x32xf32>
    %247 = arith.mulf %246, %242 : vector<16x32xf32>
    %248 = arith.mulf %247, %242 : vector<16x32xf32>
    %249 = arith.addf %242, %248 : vector<16x32xf32>
    %cst_136 = arith.constant 0.797884583 : f32
    %250 = vector.broadcast %cst_136 : f32 to vector<16x32xf32>
    %251 = arith.mulf %250, %249 : vector<16x32xf32>
    %252 = math.tanh %251 : vector<16x32xf32>
    %cst_137 = arith.constant 1.000000e+00 : f32
    %253 = vector.broadcast %cst_137 : f32 to vector<16x32xf32>
    %254 = arith.addf %253, %252 : vector<16x32xf32>
    %255 = arith.mulf %244, %254 : vector<16x32xf32>
    %cst_138 = arith.constant dense<0.000000e+00> : vector<16x32xf32>
    %256 = tpu.matmul %255, %213, %cst_138 {dimension_numbers = #tpu.dot_dimension_numbers<[1], [0], [0], [1], [0, 0, 1, 1], [], []>} : vector<16x32xf32>, vector<32x32xf32>, vector<16x32xf32> -> vector<16x32xf32>
    %257 = vector.broadcast %215 : vector<1x32xf32> to vector<16x32xf32>
    %258 = arith.addf %256, %257 : vector<16x32xf32>
    %cst_139 = arith.constant 5.000000e-01 : f32
    %259 = vector.broadcast %cst_139 : f32 to vector<16x32xf32>
    %260 = arith.mulf %259, %258 : vector<16x32xf32>
    %cst_140 = arith.constant 4.471500e-02 : f32
    %261 = vector.broadcast %cst_140 : f32 to vector<16x32xf32>
    %262 = arith.mulf %261, %258 : vector<16x32xf32>
    %263 = arith.mulf %262, %258 : vector<16x32xf32>
    %264 = arith.mulf %263, %258 : vector<16x32xf32>
    %265 = arith.addf %258, %264 : vector<16x32xf32>
    %cst_141 = arith.constant 0.797884583 : f32
    %266 = vector.broadcast %cst_141 : f32 to vector<16x32xf32>
    %267 = arith.mulf %266, %265 : vector<16x32xf32>
    %268 = math.tanh %267 : vector<16x32xf32>
    %cst_142 = arith.constant 1.000000e+00 : f32
    %269 = vector.broadcast %cst_142 : f32 to vector<16x32xf32>
    %270 = arith.addf %269, %268 : vector<16x32xf32>
    %271 = arith.mulf %260, %270 : vector<16x32xf32>
    %cst_143 = arith.constant dense<0.000000e+00> : vector<16x8xf32>
    %272 = tpu.matmul %271, %217, %cst_143 {dimension_numbers = #tpu.dot_dimension_numbers<[1], [0], [0], [1], [0, 0, 1, 1], [], []>} : vector<16x32xf32>, vector<32x8xf32>, vector<16x8xf32> -> vector<16x8xf32>
    %273 = vector.broadcast %219 : vector<1x8xf32> to vector<16x8xf32>
    %274 = arith.addf %272, %273 : vector<16x8xf32>
    %cst_144 = arith.constant dense<0xFF800000> : vector<16xf32>
    %275 = vector.multi_reduction <maximumf>, %274, %cst_144 [1] : vector<16x8xf32> to vector<16xf32>
    %276 = vector.shape_cast %275 : vector<16xf32> to vector<16x1xf32>
    %277 = tpu.iota {dimensions = array<i32: 1>} : vector<16x8xi32>
    %278 = arith.sitofp %277 : vector<16x8xi32> to vector<16x8xf32>
    %279 = vector.broadcast %276 : vector<16x1xf32> to vector<16x8xf32>
    %280 = arith.cmpf oge, %274, %279 : vector<16x8xf32>
    %cst_145 = arith.constant 8.000000e+00 : f32
    %281 = vector.broadcast %cst_145 : f32 to vector<16x8xf32>
    %282 = arith.select %280, %278, %281 : vector<16x8xi1>, vector<16x8xf32>
    %cst_146 = arith.constant dense<0x7F800000> : vector<16xf32>
    %283 = vector.multi_reduction <minimumf>, %282, %cst_146 [1] : vector<16x8xf32> to vector<16xf32>
    %284 = vector.shape_cast %283 : vector<16xf32> to vector<16x1xf32>
    %285 = vector.broadcast %284 : vector<16x1xf32> to vector<16x8xf32>
    %286 = arith.cmpf oeq, %278, %285 : vector<16x8xf32>
    %287 = arith.extui %286 : vector<16x8xi1> to vector<16x8xi32>
    %288 = arith.sitofp %287 : vector<16x8xi32> to vector<16x8xf32>
    %cst_147 = arith.constant dense<0.000000e+00> : vector<16x8xf32>
    %289 = tpu.matmul %288, %23, %cst_147 {dimension_numbers = #tpu.dot_dimension_numbers<[1], [0], [0], [1], [0, 0, 1, 1], [], []>} : vector<16x8xf32>, vector<8x8xf32>, vector<16x8xf32> -> vector<16x8xf32>
    %c1 = arith.constant 1 : index
    %c0_148 = arith.constant 0 : index
    %c0_149 = arith.constant 0 : index
    %290 = vector.load %arg24[%c1, %c0_148, %c0_149] : memref<3x56x32xf32, #tpu.memory_space<vmem>>, vector<1x56x32xf32>
    %291 = vector.shape_cast %290 : vector<1x56x32xf32> to vector<56x32xf32>
    %c1_150 = arith.constant 1 : index
    %c0_151 = arith.constant 0 : index
    %c0_152 = arith.constant 0 : index
    %292 = vector.load %arg25[%c1_150, %c0_151, %c0_152] : memref<3x1x32xf32, #tpu.memory_space<vmem>>, vector<1x1x32xf32>
    %293 = vector.shape_cast %292 : vector<1x1x32xf32> to vector<1x32xf32>
    %c1_153 = arith.constant 1 : index
    %c0_154 = arith.constant 0 : index
    %c0_155 = arith.constant 0 : index
    %294 = vector.load %arg26[%c1_153, %c0_154, %c0_155] : memref<3x32x32xf32, #tpu.memory_space<vmem>>, vector<1x32x32xf32>
    %295 = vector.shape_cast %294 : vector<1x32x32xf32> to vector<32x32xf32>
    %c1_156 = arith.constant 1 : index
    %c0_157 = arith.constant 0 : index
    %c0_158 = arith.constant 0 : index
    %296 = vector.load %arg27[%c1_156, %c0_157, %c0_158] : memref<3x1x32xf32, #tpu.memory_space<vmem>>, vector<1x1x32xf32>
    %297 = vector.shape_cast %296 : vector<1x1x32xf32> to vector<1x32xf32>
    %c1_159 = arith.constant 1 : index
    %c0_160 = arith.constant 0 : index
    %c0_161 = arith.constant 0 : index
    %298 = vector.load %arg28[%c1_159, %c0_160, %c0_161] : memref<3x32x32xf32, #tpu.memory_space<vmem>>, vector<1x32x32xf32>
    %299 = vector.shape_cast %298 : vector<1x32x32xf32> to vector<32x32xf32>
    %c1_162 = arith.constant 1 : index
    %c0_163 = arith.constant 0 : index
    %c0_164 = arith.constant 0 : index
    %300 = vector.load %arg29[%c1_162, %c0_163, %c0_164] : memref<3x1x32xf32, #tpu.memory_space<vmem>>, vector<1x1x32xf32>
    %301 = vector.shape_cast %300 : vector<1x1x32xf32> to vector<1x32xf32>
    %c1_165 = arith.constant 1 : index
    %c0_166 = arith.constant 0 : index
    %c0_167 = arith.constant 0 : index
    %302 = vector.load %arg30[%c1_165, %c0_166, %c0_167] : memref<3x32x8xf32, #tpu.memory_space<vmem>>, vector<1x32x8xf32>
    %303 = vector.shape_cast %302 : vector<1x32x8xf32> to vector<32x8xf32>
    %c1_168 = arith.constant 1 : index
    %c0_169 = arith.constant 0 : index
    %c0_170 = arith.constant 0 : index
    %304 = vector.load %arg31[%c1_168, %c0_169, %c0_170] : memref<3x1x8xf32, #tpu.memory_space<vmem>>, vector<1x1x8xf32>
    %305 = vector.shape_cast %304 : vector<1x1x8xf32> to vector<1x8xf32>
    %306 = vector.extract_strided_slice %291 {offsets = [0, 0], sizes = [32, 32], strides = [1, 1]} : vector<56x32xf32> to vector<32x32xf32>
    %cst_171 = arith.constant dense<0.000000e+00> : vector<16x32xf32>
    %307 = tpu.matmul %258, %306, %cst_171 {dimension_numbers = #tpu.dot_dimension_numbers<[1], [0], [0], [1], [0, 0, 1, 1], [], []>} : vector<16x32xf32>, vector<32x32xf32>, vector<16x32xf32> -> vector<16x32xf32>
    %308 = vector.broadcast %293 : vector<1x32xf32> to vector<16x32xf32>
    %309 = arith.addf %308, %307 : vector<16x32xf32>
    %310 = vector.extract_strided_slice %291 {offsets = [32, 0], sizes = [8, 32], strides = [1, 1]} : vector<56x32xf32> to vector<8x32xf32>
    %cst_172 = arith.constant dense<0.000000e+00> : vector<16x32xf32>
    %311 = tpu.matmul %203, %310, %cst_172 {dimension_numbers = #tpu.dot_dimension_numbers<[1], [0], [0], [1], [0, 0, 1, 1], [], []>} : vector<16x8xf32>, vector<8x32xf32>, vector<16x32xf32> -> vector<16x32xf32>
    %312 = arith.addf %309, %311 : vector<16x32xf32>
    %313 = vector.extract_strided_slice %291 {offsets = [40, 0], sizes = [8, 32], strides = [1, 1]} : vector<56x32xf32> to vector<8x32xf32>
    %cst_173 = arith.constant dense<0.000000e+00> : vector<16x32xf32>
    %314 = tpu.matmul %289, %313, %cst_173 {dimension_numbers = #tpu.dot_dimension_numbers<[1], [0], [0], [1], [0, 0, 1, 1], [], []>} : vector<16x8xf32>, vector<8x32xf32>, vector<16x32xf32> -> vector<16x32xf32>
    %315 = arith.addf %312, %314 : vector<16x32xf32>
    %cst_174 = arith.constant 5.000000e-01 : f32
    %316 = vector.broadcast %cst_174 : f32 to vector<16x32xf32>
    %317 = arith.mulf %316, %315 : vector<16x32xf32>
    %cst_175 = arith.constant 4.471500e-02 : f32
    %318 = vector.broadcast %cst_175 : f32 to vector<16x32xf32>
    %319 = arith.mulf %318, %315 : vector<16x32xf32>
    %320 = arith.mulf %319, %315 : vector<16x32xf32>
    %321 = arith.mulf %320, %315 : vector<16x32xf32>
    %322 = arith.addf %315, %321 : vector<16x32xf32>
    %cst_176 = arith.constant 0.797884583 : f32
    %323 = vector.broadcast %cst_176 : f32 to vector<16x32xf32>
    %324 = arith.mulf %323, %322 : vector<16x32xf32>
    %325 = math.tanh %324 : vector<16x32xf32>
    %cst_177 = arith.constant 1.000000e+00 : f32
    %326 = vector.broadcast %cst_177 : f32 to vector<16x32xf32>
    %327 = arith.addf %326, %325 : vector<16x32xf32>
    %328 = arith.mulf %317, %327 : vector<16x32xf32>
    %cst_178 = arith.constant dense<0.000000e+00> : vector<16x32xf32>
    %329 = tpu.matmul %328, %295, %cst_178 {dimension_numbers = #tpu.dot_dimension_numbers<[1], [0], [0], [1], [0, 0, 1, 1], [], []>} : vector<16x32xf32>, vector<32x32xf32>, vector<16x32xf32> -> vector<16x32xf32>
    %330 = vector.broadcast %297 : vector<1x32xf32> to vector<16x32xf32>
    %331 = arith.addf %329, %330 : vector<16x32xf32>
    %cst_179 = arith.constant 5.000000e-01 : f32
    %332 = vector.broadcast %cst_179 : f32 to vector<16x32xf32>
    %333 = arith.mulf %332, %331 : vector<16x32xf32>
    %cst_180 = arith.constant 4.471500e-02 : f32
    %334 = vector.broadcast %cst_180 : f32 to vector<16x32xf32>
    %335 = arith.mulf %334, %331 : vector<16x32xf32>
    %336 = arith.mulf %335, %331 : vector<16x32xf32>
    %337 = arith.mulf %336, %331 : vector<16x32xf32>
    %338 = arith.addf %331, %337 : vector<16x32xf32>
    %cst_181 = arith.constant 0.797884583 : f32
    %339 = vector.broadcast %cst_181 : f32 to vector<16x32xf32>
    %340 = arith.mulf %339, %338 : vector<16x32xf32>
    %341 = math.tanh %340 : vector<16x32xf32>
    %cst_182 = arith.constant 1.000000e+00 : f32
    %342 = vector.broadcast %cst_182 : f32 to vector<16x32xf32>
    %343 = arith.addf %342, %341 : vector<16x32xf32>
    %344 = arith.mulf %333, %343 : vector<16x32xf32>
    %cst_183 = arith.constant dense<0.000000e+00> : vector<16x32xf32>
    %345 = tpu.matmul %344, %299, %cst_183 {dimension_numbers = #tpu.dot_dimension_numbers<[1], [0], [0], [1], [0, 0, 1, 1], [], []>} : vector<16x32xf32>, vector<32x32xf32>, vector<16x32xf32> -> vector<16x32xf32>
    %346 = vector.broadcast %301 : vector<1x32xf32> to vector<16x32xf32>
    %347 = arith.addf %345, %346 : vector<16x32xf32>
    %cst_184 = arith.constant 5.000000e-01 : f32
    %348 = vector.broadcast %cst_184 : f32 to vector<16x32xf32>
    %349 = arith.mulf %348, %347 : vector<16x32xf32>
    %cst_185 = arith.constant 4.471500e-02 : f32
    %350 = vector.broadcast %cst_185 : f32 to vector<16x32xf32>
    %351 = arith.mulf %350, %347 : vector<16x32xf32>
    %352 = arith.mulf %351, %347 : vector<16x32xf32>
    %353 = arith.mulf %352, %347 : vector<16x32xf32>
    %354 = arith.addf %347, %353 : vector<16x32xf32>
    %cst_186 = arith.constant 0.797884583 : f32
    %355 = vector.broadcast %cst_186 : f32 to vector<16x32xf32>
    %356 = arith.mulf %355, %354 : vector<16x32xf32>
    %357 = math.tanh %356 : vector<16x32xf32>
    %cst_187 = arith.constant 1.000000e+00 : f32
    %358 = vector.broadcast %cst_187 : f32 to vector<16x32xf32>
    %359 = arith.addf %358, %357 : vector<16x32xf32>
    %360 = arith.mulf %349, %359 : vector<16x32xf32>
    %cst_188 = arith.constant dense<0.000000e+00> : vector<16x8xf32>
    %361 = tpu.matmul %360, %303, %cst_188 {dimension_numbers = #tpu.dot_dimension_numbers<[1], [0], [0], [1], [0, 0, 1, 1], [], []>} : vector<16x32xf32>, vector<32x8xf32>, vector<16x8xf32> -> vector<16x8xf32>
    %362 = vector.broadcast %305 : vector<1x8xf32> to vector<16x8xf32>
    %363 = arith.addf %361, %362 : vector<16x8xf32>
    %cst_189 = arith.constant dense<0xFF800000> : vector<16xf32>
    %364 = vector.multi_reduction <maximumf>, %363, %cst_189 [1] : vector<16x8xf32> to vector<16xf32>
    %365 = vector.shape_cast %364 : vector<16xf32> to vector<16x1xf32>
    %366 = tpu.iota {dimensions = array<i32: 1>} : vector<16x8xi32>
    %367 = arith.sitofp %366 : vector<16x8xi32> to vector<16x8xf32>
    %368 = vector.broadcast %365 : vector<16x1xf32> to vector<16x8xf32>
    %369 = arith.cmpf oge, %363, %368 : vector<16x8xf32>
    %cst_190 = arith.constant 8.000000e+00 : f32
    %370 = vector.broadcast %cst_190 : f32 to vector<16x8xf32>
    %371 = arith.select %369, %367, %370 : vector<16x8xi1>, vector<16x8xf32>
    %cst_191 = arith.constant dense<0x7F800000> : vector<16xf32>
    %372 = vector.multi_reduction <minimumf>, %371, %cst_191 [1] : vector<16x8xf32> to vector<16xf32>
    %373 = vector.shape_cast %372 : vector<16xf32> to vector<16x1xf32>
    %374 = vector.broadcast %373 : vector<16x1xf32> to vector<16x8xf32>
    %375 = arith.cmpf oeq, %367, %374 : vector<16x8xf32>
    %376 = arith.extui %375 : vector<16x8xi1> to vector<16x8xi32>
    %377 = arith.sitofp %376 : vector<16x8xi32> to vector<16x8xf32>
    %cst_192 = arith.constant dense<0.000000e+00> : vector<16x8xf32>
    %378 = tpu.matmul %377, %23, %cst_192 {dimension_numbers = #tpu.dot_dimension_numbers<[1], [0], [0], [1], [0, 0, 1, 1], [], []>} : vector<16x8xf32>, vector<8x8xf32>, vector<16x8xf32> -> vector<16x8xf32>
    %c2 = arith.constant 2 : index
    %c0_193 = arith.constant 0 : index
    %c0_194 = arith.constant 0 : index
    %379 = vector.load %arg24[%c2, %c0_193, %c0_194] : memref<3x56x32xf32, #tpu.memory_space<vmem>>, vector<1x56x32xf32>
    %380 = vector.shape_cast %379 : vector<1x56x32xf32> to vector<56x32xf32>
    %c2_195 = arith.constant 2 : index
    %c0_196 = arith.constant 0 : index
    %c0_197 = arith.constant 0 : index
    %381 = vector.load %arg25[%c2_195, %c0_196, %c0_197] : memref<3x1x32xf32, #tpu.memory_space<vmem>>, vector<1x1x32xf32>
    %382 = vector.shape_cast %381 : vector<1x1x32xf32> to vector<1x32xf32>
    %c2_198 = arith.constant 2 : index
    %c0_199 = arith.constant 0 : index
    %c0_200 = arith.constant 0 : index
    %383 = vector.load %arg26[%c2_198, %c0_199, %c0_200] : memref<3x32x32xf32, #tpu.memory_space<vmem>>, vector<1x32x32xf32>
    %384 = vector.shape_cast %383 : vector<1x32x32xf32> to vector<32x32xf32>
    %c2_201 = arith.constant 2 : index
    %c0_202 = arith.constant 0 : index
    %c0_203 = arith.constant 0 : index
    %385 = vector.load %arg27[%c2_201, %c0_202, %c0_203] : memref<3x1x32xf32, #tpu.memory_space<vmem>>, vector<1x1x32xf32>
    %386 = vector.shape_cast %385 : vector<1x1x32xf32> to vector<1x32xf32>
    %c2_204 = arith.constant 2 : index
    %c0_205 = arith.constant 0 : index
    %c0_206 = arith.constant 0 : index
    %387 = vector.load %arg28[%c2_204, %c0_205, %c0_206] : memref<3x32x32xf32, #tpu.memory_space<vmem>>, vector<1x32x32xf32>
    %388 = vector.shape_cast %387 : vector<1x32x32xf32> to vector<32x32xf32>
    %c2_207 = arith.constant 2 : index
    %c0_208 = arith.constant 0 : index
    %c0_209 = arith.constant 0 : index
    %389 = vector.load %arg29[%c2_207, %c0_208, %c0_209] : memref<3x1x32xf32, #tpu.memory_space<vmem>>, vector<1x1x32xf32>
    %390 = vector.shape_cast %389 : vector<1x1x32xf32> to vector<1x32xf32>
    %c2_210 = arith.constant 2 : index
    %c0_211 = arith.constant 0 : index
    %c0_212 = arith.constant 0 : index
    %391 = vector.load %arg30[%c2_210, %c0_211, %c0_212] : memref<3x32x8xf32, #tpu.memory_space<vmem>>, vector<1x32x8xf32>
    %392 = vector.shape_cast %391 : vector<1x32x8xf32> to vector<32x8xf32>
    %c2_213 = arith.constant 2 : index
    %c0_214 = arith.constant 0 : index
    %c0_215 = arith.constant 0 : index
    %393 = vector.load %arg31[%c2_213, %c0_214, %c0_215] : memref<3x1x8xf32, #tpu.memory_space<vmem>>, vector<1x1x8xf32>
    %394 = vector.shape_cast %393 : vector<1x1x8xf32> to vector<1x8xf32>
    %395 = vector.extract_strided_slice %380 {offsets = [0, 0], sizes = [32, 32], strides = [1, 1]} : vector<56x32xf32> to vector<32x32xf32>
    %cst_216 = arith.constant dense<0.000000e+00> : vector<16x32xf32>
    %396 = tpu.matmul %347, %395, %cst_216 {dimension_numbers = #tpu.dot_dimension_numbers<[1], [0], [0], [1], [0, 0, 1, 1], [], []>} : vector<16x32xf32>, vector<32x32xf32>, vector<16x32xf32> -> vector<16x32xf32>
    %397 = vector.broadcast %382 : vector<1x32xf32> to vector<16x32xf32>
    %398 = arith.addf %397, %396 : vector<16x32xf32>
    %399 = vector.extract_strided_slice %380 {offsets = [32, 0], sizes = [8, 32], strides = [1, 1]} : vector<56x32xf32> to vector<8x32xf32>
    %cst_217 = arith.constant dense<0.000000e+00> : vector<16x32xf32>
    %400 = tpu.matmul %203, %399, %cst_217 {dimension_numbers = #tpu.dot_dimension_numbers<[1], [0], [0], [1], [0, 0, 1, 1], [], []>} : vector<16x8xf32>, vector<8x32xf32>, vector<16x32xf32> -> vector<16x32xf32>
    %401 = arith.addf %398, %400 : vector<16x32xf32>
    %402 = vector.extract_strided_slice %380 {offsets = [40, 0], sizes = [8, 32], strides = [1, 1]} : vector<56x32xf32> to vector<8x32xf32>
    %cst_218 = arith.constant dense<0.000000e+00> : vector<16x32xf32>
    %403 = tpu.matmul %289, %402, %cst_218 {dimension_numbers = #tpu.dot_dimension_numbers<[1], [0], [0], [1], [0, 0, 1, 1], [], []>} : vector<16x8xf32>, vector<8x32xf32>, vector<16x32xf32> -> vector<16x32xf32>
    %404 = arith.addf %401, %403 : vector<16x32xf32>
    %405 = vector.extract_strided_slice %380 {offsets = [48, 0], sizes = [8, 32], strides = [1, 1]} : vector<56x32xf32> to vector<8x32xf32>
    %cst_219 = arith.constant dense<0.000000e+00> : vector<16x32xf32>
    %406 = tpu.matmul %378, %405, %cst_219 {dimension_numbers = #tpu.dot_dimension_numbers<[1], [0], [0], [1], [0, 0, 1, 1], [], []>} : vector<16x8xf32>, vector<8x32xf32>, vector<16x32xf32> -> vector<16x32xf32>
    %407 = arith.addf %404, %406 : vector<16x32xf32>
    %cst_220 = arith.constant 5.000000e-01 : f32
    %408 = vector.broadcast %cst_220 : f32 to vector<16x32xf32>
    %409 = arith.mulf %408, %407 : vector<16x32xf32>
    %cst_221 = arith.constant 4.471500e-02 : f32
    %410 = vector.broadcast %cst_221 : f32 to vector<16x32xf32>
    %411 = arith.mulf %410, %407 : vector<16x32xf32>
    %412 = arith.mulf %411, %407 : vector<16x32xf32>
    %413 = arith.mulf %412, %407 : vector<16x32xf32>
    %414 = arith.addf %407, %413 : vector<16x32xf32>
    %cst_222 = arith.constant 0.797884583 : f32
    %415 = vector.broadcast %cst_222 : f32 to vector<16x32xf32>
    %416 = arith.mulf %415, %414 : vector<16x32xf32>
    %417 = math.tanh %416 : vector<16x32xf32>
    %cst_223 = arith.constant 1.000000e+00 : f32
    %418 = vector.broadcast %cst_223 : f32 to vector<16x32xf32>
    %419 = arith.addf %418, %417 : vector<16x32xf32>
    %420 = arith.mulf %409, %419 : vector<16x32xf32>
    %cst_224 = arith.constant dense<0.000000e+00> : vector<16x32xf32>
    %421 = tpu.matmul %420, %384, %cst_224 {dimension_numbers = #tpu.dot_dimension_numbers<[1], [0], [0], [1], [0, 0, 1, 1], [], []>} : vector<16x32xf32>, vector<32x32xf32>, vector<16x32xf32> -> vector<16x32xf32>
    %422 = vector.broadcast %386 : vector<1x32xf32> to vector<16x32xf32>
    %423 = arith.addf %421, %422 : vector<16x32xf32>
    %cst_225 = arith.constant 5.000000e-01 : f32
    %424 = vector.broadcast %cst_225 : f32 to vector<16x32xf32>
    %425 = arith.mulf %424, %423 : vector<16x32xf32>
    %cst_226 = arith.constant 4.471500e-02 : f32
    %426 = vector.broadcast %cst_226 : f32 to vector<16x32xf32>
    %427 = arith.mulf %426, %423 : vector<16x32xf32>
    %428 = arith.mulf %427, %423 : vector<16x32xf32>
    %429 = arith.mulf %428, %423 : vector<16x32xf32>
    %430 = arith.addf %423, %429 : vector<16x32xf32>
    %cst_227 = arith.constant 0.797884583 : f32
    %431 = vector.broadcast %cst_227 : f32 to vector<16x32xf32>
    %432 = arith.mulf %431, %430 : vector<16x32xf32>
    %433 = math.tanh %432 : vector<16x32xf32>
    %cst_228 = arith.constant 1.000000e+00 : f32
    %434 = vector.broadcast %cst_228 : f32 to vector<16x32xf32>
    %435 = arith.addf %434, %433 : vector<16x32xf32>
    %436 = arith.mulf %425, %435 : vector<16x32xf32>
    %cst_229 = arith.constant dense<0.000000e+00> : vector<16x32xf32>
    %437 = tpu.matmul %436, %388, %cst_229 {dimension_numbers = #tpu.dot_dimension_numbers<[1], [0], [0], [1], [0, 0, 1, 1], [], []>} : vector<16x32xf32>, vector<32x32xf32>, vector<16x32xf32> -> vector<16x32xf32>
    %438 = vector.broadcast %390 : vector<1x32xf32> to vector<16x32xf32>
    %439 = arith.addf %437, %438 : vector<16x32xf32>
    %cst_230 = arith.constant 5.000000e-01 : f32
    %440 = vector.broadcast %cst_230 : f32 to vector<16x32xf32>
    %441 = arith.mulf %440, %439 : vector<16x32xf32>
    %cst_231 = arith.constant 4.471500e-02 : f32
    %442 = vector.broadcast %cst_231 : f32 to vector<16x32xf32>
    %443 = arith.mulf %442, %439 : vector<16x32xf32>
    %444 = arith.mulf %443, %439 : vector<16x32xf32>
    %445 = arith.mulf %444, %439 : vector<16x32xf32>
    %446 = arith.addf %439, %445 : vector<16x32xf32>
    %cst_232 = arith.constant 0.797884583 : f32
    %447 = vector.broadcast %cst_232 : f32 to vector<16x32xf32>
    %448 = arith.mulf %447, %446 : vector<16x32xf32>
    %449 = math.tanh %448 : vector<16x32xf32>
    %cst_233 = arith.constant 1.000000e+00 : f32
    %450 = vector.broadcast %cst_233 : f32 to vector<16x32xf32>
    %451 = arith.addf %450, %449 : vector<16x32xf32>
    %452 = arith.mulf %441, %451 : vector<16x32xf32>
    %cst_234 = arith.constant dense<0.000000e+00> : vector<16x8xf32>
    %453 = tpu.matmul %452, %392, %cst_234 {dimension_numbers = #tpu.dot_dimension_numbers<[1], [0], [0], [1], [0, 0, 1, 1], [], []>} : vector<16x32xf32>, vector<32x8xf32>, vector<16x8xf32> -> vector<16x8xf32>
    %454 = vector.broadcast %394 : vector<1x8xf32> to vector<16x8xf32>
    %455 = arith.addf %453, %454 : vector<16x8xf32>
    %456 = tpu.concatenate %188, %274, %363, %455 in 1 : vector<16x8xf32>, vector<16x8xf32>, vector<16x8xf32>, vector<16x8xf32> -> vector<16x32xf32>
    %c0_235 = arith.constant 0 : index
    %c0_236 = arith.constant 0 : index
    %457 = vector.load %arg32[%c0_235, %c0_236] : memref<16x32xf32, #tpu.memory_space<vmem>>, vector<16x32xf32>
    tpu.vector_store %arg32[%c0_235, %c0_236], %456 {strides = array<i32>} : memref<16x32xf32, #tpu.memory_space<vmem>>, vector<16x32xf32>,
    return
  }
}

</mosaic_0001>

<bundles_post_ra>
// kernel: _forward_impl.3
= control target key start
LH: loop header
LB: loop body
LE: loop exit
PB: predicated region body
PF: predicated region fallthrough
CT: control target
= control target key end

     0   :  { %s7031_s6 = smov 3   ;;  %s7032_s10 = smov 4   ;;  %vm245_vm0 = vcmask 130048   ;;  %vm609_vm1 = vcmask 261120   ;;  %vm1194_vm4 = vcmask 523264   ;;  %s8122_s0 = inlined_call_operand.smem [shape: u32[33], index: -1, kind: input, shape index: {}] }
   0x1   :  { %s7074_s5 = sld [smem:[%s8122_s0]]   ;;  %s7033_s14 = smov 2  }
   0x2   :  { %s7079_s9 = sld [smem:[%s8122_s0 + %s7031_s6]]   ;;  %s7034_s18 = smov 6  }
   0x3   :  { %s7084_s13 = sld [smem:[%s8122_s0 + %s7032_s10]]   ;;  %s7035_s22 = smov 8  }
   0x4   :  { %s5296_s17 = sld [smem:[%s8122_s0 + %s7033_s14]]   ;;  %s7036_s26 = smov 1  }
   0x5   :  { %s7092_s21 = sld [smem:[%s8122_s0 + %s7034_s18]]   ;;  %s7037_s30 = smov 10  }
   0x6   :  { %s7170_s25 = sld [smem:[%s8122_s0 + %s7035_s22]]   ;;  %s7038_s4 = smov 7  }
   0x7   :  { %v216_v0 = vld [vmem:[%s7074_s5] sm:$0xff]  ;;  %v217_v1 = vld [vmem:[%s7074_s5 + $0x8] sm:$0xff]  ;;  %s5295_s29 = sld [smem:[%s8122_s0 + %s7036_s26]]   ;;  %s7042_s14 = smov 9  }
   0x8   :  { %v228_v2 = vld [vmem:[%s7079_s9] sm:$0xff]  ;;  %v6491_v3 = vpack.c.bf16 %v217_v1, %v216_v0  ;;  %v234_v4 = vld [vmem:[%s7079_s9 + $0x30] sm:$0xff]  ;;  %v229_v5 = vld [vmem:[%s7079_s9 + $0x8] sm:$0xff]  ;;  %s7324_s3 = sld [smem:[%s8122_s0 + %s7037_s30]]   ;;  %s7043_s18 = smov 11  }
   0x9   :  { %5917 = vmatprep.mubr.msk.f32.mxu0 %vm245_vm0, %v228_v2  ;;  %v235_v6 = vld [vmem:[%s7079_s9 + $0x38] sm:$0xff]  ;;  %v230_v7 = vld [vmem:[%s7079_s9 + $0x10] sm:$0xff]  ;;  %5926 = vmatprep.mubr.msk.f32.mxu1 %vm245_vm0, %v234_v4  ;;  %v7104_v8 = vld [vmem:[%s7084_s13] sm:$0xff]  ;;  %s5301_s8 = sld [smem:[%s8122_s0 + %s7038_s4]]   ;;  %s7044_s23 = smov 14  }
   0xa   :  { %6492 = vmatprep.subr.bf16.mxu0 %v6491_v3  ;;  %6779 = vmatprep.subr.bf16.mxu1 %v6491_v3  ;;  %v226_v9 = vld [vmem:[%s5296_s17] sm:$0xff]  ;;  %v227_v10 = vld [vmem:[%s5296_s17 + $0x8] sm:$0xff]  ;;  %v231_v16 = vld [vmem:[%s7079_s9 + $0x18] sm:$0xff]  ;;  %s5303_s17 = sld [smem:[%s8122_s0 + %s7042_s14]]   ;;  %vm2196_vm13 = vcmp.gt.f32.partialorder %v7104_v8, 0.5  ;;  %s7045_s27 = smov 13  }
   0xb   :  { %6494 = vmatpush3.bf16.msra.mxu0 %v6491_v3  ;;  %6780 = vmatpush3.bf16.msra.mxu1 %v6491_v3  ;;  %v134_v11 = vld [vmem:[%s7092_s21] sm:$0xff]  ;;  %v6499_v12 = vpack.c.bf16 %v227_v10, %v226_v9  ;;  %v135_v13 = vld [vmem:[%s7092_s21 + $0x8] sm:$0xff]  ;;  %v136_v14 = vld [vmem:[%s7092_s21 + $0x10] sm:$0xff]  ;;  %s5308_s26 = sld [smem:[%s8122_s0 + %s7044_s23]]   ;;  %s7064_s14 = smov 31  }
   0xc   :  { %6496 = vmatprep.subr.bf16.mxu1 %v6491_v3  ;;  %v137_v15 = vld [vmem:[%s7092_s21 + $0x18] sm:$0xff]  ;;  %v7115_v17 = vld [vmem:[%s7084_s13 + $0x8] sm:$0xff]  ;;  %v6503_v18 = vpack.c.bf16 %v135_v13, %v134_v11  ;;  %v232_v19 = vld [vmem:[%s7079_s9 + $0x20] sm:$0xff]  ;;  %s5307_s30 = sld [smem:[%s8122_s0 + %s7045_s27]]  }
   0xd   :  { %v7121_v20 = vld [vmem:[%s7084_s13 + $0x10] sm:$0xff]  ;;  %6500 = vmatprep.subr.bf16.mxu0 %v6499_v12  ;;  %v6507_v21 = vpack.c.bf16 %v137_v15, %v136_v14  ;;  %v233_v22 = vld [vmem:[%s7079_s9 + $0x28] sm:$0xff]  ;;  %v7131_v23 = vld [vmem:[%s7084_s13 + $0x18] sm:$0xff]  ;;  %s7041_s9 = smov 12   ;;  %vm2197_vm12 = vcmp.gt.f32.partialorder %v7115_v17, 0.5 }
   0xe   :  { %5918 = vmatmul.mubr.msk.f32.vlgmr.msra.gmra.mrb[0].mxu0 %vm245_vm0, %v229_v5  ;;  %5927 = vmatmul.mubr.msk.f32.vlgmr.msra.gmra.mrb[0].mxu1 %vm245_vm0, %v235_v6  ;;  %v7134_v24 = vld [vmem:[%s7084_s13 + $0x20] sm:$0xff]  ;;  %v7142_v25 = vld [vmem:[%s7084_s13 + $0x28] sm:$0xff]  ;;  %v7146_v26 = vld [vmem:[%s7084_s13 + $0x30] sm:$0xff]  ;;  %s5306_s12 = sld [smem:[%s8122_s0 + %s7041_s9]]   ;;  %vm2199_vm14 = vcmp.gt.f32.partialorder %v7131_v23, 0.5 }
   0xf   :  { %5920 = vmatprep.mubr.msk.f32.mxu0 %vm245_vm0, %v230_v7  ;;  %6498 = vmatpush3.bf16.msra.mxu1 %v6491_v3  ;;  %v7154_v27 = vld [vmem:[%s7084_s13 + $0x38] sm:$0xff]  ;;  %v138_v28 = vld [vmem:[%s7092_s21 + $0x20] sm:$0xff]  ;;  %v139_v29 = vld [vmem:[%s7092_s21 + $0x28] sm:$0xff]  ;;  %vm2200_vm11 = vcmp.gt.f32.partialorder %v7134_v24, 0.5  ;;  %vm2201_vm15 = vcmp.gt.f32.partialorder %v7142_v25, 0.5 }
  0x10   :  { %5933 = vmatprep.mubr.msk.f32.mxu1 %vm245_vm0, %v7104_v8  ;;  %6502 = vmatpush3.bf16.msra.mxu0 %v6499_v12  ;;  %v6511_v30 = vpack.c.bf16 %v139_v29, %v138_v28  ;;  %v151_v31 = vld [vmem:[%s7170_s25] sm:$0xff]  ;;  %v152_v32 = vld [vmem:[%s7170_s25 + $0x8] sm:$0xff]  ;;  %v153_v33 = vld [vmem:[%s7170_s25 + $0x10] sm:$0xff] }
  0x11   :  { %6504 = vmatprep.subr.bf16.mxu1 %v6503_v18  ;;  %v6535_v34 = vpack.c.bf16 %v152_v32, %v151_v31  ;;  %v154_v35 = vld [vmem:[%s7170_s25 + $0x18] sm:$0xff]  ;;  %v140_v37 = vld [vmem:[%s7092_s21 + $0x30] sm:$0xff]  ;;  %v142_v44 = vld [vmem:[%s7092_s21 + $0x40] sm:$0xff] }
  0x12   :  { %5921 = vmatmul.mubr.msk.f32.gmra.mrb[2].mxu0 %vm245_vm0, %v231_v16  ;;  %5934 = vmatmul.mubr.msk.f32.vlgmr.msra.gmra.mrb[2].mxu1 %vm245_vm0, %v7115_v17  ;;  %v6539_v36 = vpack.c.bf16 %v154_v35, %v153_v33  ;;  %v141_v38 = vld [vmem:[%s7092_s21 + $0x38] sm:$0xff]  ;;  %v143_v45 = vld [vmem:[%s7092_s21 + $0x48] sm:$0xff]  ;;  %v144_v59 = vld [vmem:[%s7092_s21 + $0x50] sm:$0xff] }
  0x13   :  { %5923 = vmatprep.mubr.msk.f32.mxu0 %vm245_vm0, %v232_v19  ;;  %5936 = vmatprep.mubr.msk.f32.mxu1 %vm245_vm0, %v7121_v20  ;;  %v6515_v43 = vpack.c.bf16 %v141_v38, %v140_v37  ;;  %v6519_v50 = vpack.c.bf16 %v143_v45, %v142_v44  ;;  %v145_v60 = vld [vmem:[%s7092_s21 + $0x58] sm:$0xff]  ;;  %v147_v3 = vld [vmem:[%s7092_s21 + $0x68] sm:$0xff]  ;;  %v148_v10 = vld [vmem:[%s7092_s21 + $0x70] sm:$0xff] }
  0x14   :  { %6506 = vmatpush3.bf16.msra.mxu1 %v6503_v18  ;;  %6536 = vmatprep.subr.bf16.mxu0 %v6535_v34  ;;  %v6523_v0 = vpack.c.bf16 %v145_v60, %v144_v59  ;;  %v149_v11 = vld [vmem:[%s7092_s21 + $0x78] sm:$0xff]  ;;  %v7283_v13 = vld [vmem:[%s5295_s29] sm:$0xff]  ;;  %v7289_v14 = vld [vmem:[%s5295_s29 + $0x8] sm:$0xff] }
  0x15   :  { %6508 = vmatprep.subr.bf16.mxu1 %v6507_v21  ;;  %v6531_v12 = vpack.c.bf16 %v149_v11, %v148_v10  ;;  %v7291_v15 = vld [vmem:[%s5295_s29 + $0x10] sm:$0xff]  ;;  %v7299_v18 = vld [vmem:[%s5295_s29 + $0x20] sm:$0xff]  ;;  %v156_v29 = vld [vmem:[%s7170_s25 + $0x28] sm:$0xff] }
  0x16   :  { %5924 = vmatmul.mubr.msk.f32.gmra.mrb[4].mxu0 %vm245_vm0, %v233_v22  ;;  %5937 = vmatmul.mubr.msk.f32.gmra.mrb[4].mxu1 %vm245_vm0, %v7131_v23  ;;  %v155_v28 = vld [vmem:[%s7170_s25 + $0x20] sm:$0xff]  ;;  %v157_v31 = vld [vmem:[%s7170_s25 + $0x30] sm:$0xff]  ;;  %v158_v32 = vld [vmem:[%s7170_s25 + $0x38] sm:$0xff] }
  0x17   :  { %5939 = vmatprep.mubr.msk.f32.mxu1 %vm245_vm0, %v7134_v24  ;;  %5949 = vmatprep.mubr.msk.f32.mxu0 %vm245_vm0, %v228_v2  ;;  %v146_v2 = vld [vmem:[%s7092_s21 + $0x60] sm:$0xff]  ;;  %v6547_v33 = vpack.c.bf16 %v158_v32, %v157_v31  ;;  %v161_v35 = vld [vmem:[%s7324_s3 + $0x8] sm:$0xff]  ;;  %v162_v59 = vld [vmem:[%s7324_s3 + $0x10] sm:$0xff]  ;;  %s5305_s21 = sld [smem:[%s8122_s0 + %s7043_s18]]  }
  0x18   :  { %6510 = vmatpush3.bf16.msra.mxu1 %v6507_v21  ;;  %v7307_v21 = vld [vmem:[%s5295_s29 + $0x30] sm:$0xff]  ;;  %v5359_v37 = vld [vmem:[%s5301_s8] ss:$0 sm:$0xff]  ;;  %v163_v60 = vld [vmem:[%s7324_s3 + $0x18] sm:$0xff]  ;;  %s7048_s8 = smov 18   ;;  %s7974_s18 = sld [smem:[%s8122_s0 + %s7064_s14]]  }
  0x19   :  { %6512 = vmatprep.subr.bf16.mxu1 %v6511_v30  ;;  %v165_v31 = vld [vmem:[%s7324_s3 + $0x28] sm:$0xff]  ;;  %s7803_s11 = sld [smem:[%s8122_s0 + %s7048_s8]]   ;;  %s7055_s8 = smov 5  }
  0x1a   :  { %5940 = vmatmul.mubr.msk.f32.gmra.mrb[6].mxu1 %vm245_vm0, %v7142_v25  ;;  %5950 = vmatmul.mubr.msk.f32.vlgmr.msra.gmra.mrb[6].mxu0 %vm245_vm0, %v229_v5 }
  0x1b   :  { %5942 = vmatprep.mubr.msk.f32.mxu1 %vm245_vm0, %v7146_v26  ;;  %5952 = vmatprep.mubr.msk.f32.mxu0 %vm245_vm0, %v230_v7 }
  0x1c   :  { %6538 = vmatpush3.bf16.msra.mxu0 %v6535_v34  ;;  %v160_v34 = vld [vmem:[%s7324_s3] sm:$0xff] }
  0x1d   :  { %6540 = vmatprep.subr.bf16.mxu0 %v6539_v36 }
  0x1e   :  { %5943 = vmatmul.mubr.msk.f32.gmra.mrb[8].mxu1 %vm245_vm0, %v7154_v27  ;;  %5953 = vmatmul.mubr.msk.f32.gmra.mrb[8].mxu0 %vm245_vm0, %v231_v16  ;;  %v7297_v16 = vld [vmem:[%s5295_s29 + $0x18] sm:$0xff] }
  0x1f   :  { %5955 = vmatprep.mubr.msk.f32.mxu0 %vm245_vm0, %v232_v19  ;;  %v7305_v19 = vld [vmem:[%s5295_s29 + $0x28] sm:$0xff] }
  0x20   :  { %6542 = vmatpush3.bf16.msra.mxu0 %v6539_v36  ;;  %v6551_v36 = vpack.c.bf16 %v161_v35, %v160_v34 }
  0x22   :  { %5956 = vmatmul.mubr.msk.f32.gmra.mrb[10].mxu0 %vm245_vm0, %v233_v22  ;;  %v7313_v22 = vld [vmem:[%s5295_s29 + $0x38] sm:$0xff] }
  0x23   :  { %5958 = vmatprep.mubr.msk.f32.mxu0 %vm245_vm0, %v234_v4 }
  0x26   :  { %5959 = vmatmul.mubr.msk.f32.gmra.mrb[12].mxu0 %vm245_vm0, %v235_v6  ;;  %v6527_v6 = vpack.c.bf16 %v147_v3, %v146_v2 }
  0xe1   :  { %v7178_v39 = vpop.f32.mrb[0].mxu0  ;;  %v7180_v40 = vpop.f32.mrb[0].mxu1 }
  0xe2   :  { %v7182_v41 = vpop.f32.mrb[1].mxu0  ;;  %v7184_v42 = vpop.f32.mrb[1].mxu1 }
  0xe3   :  { %5969 = vmatprep.mubr.msk.f32.mxu1 %vm609_vm1, %v7182_v41 }
  0xe4   :  { %5970 = vmatmul.mubr.msk.f32.vlgmr.msra.gmra.mrb[10].mxu1 %vm609_vm1, %v7178_v39 }
  0xe5   :  { %v7192_v46 = vpop.f32.mrb[2].mxu0  ;;  %6514 = vmatpush3.bf16.msra.mxu1 %v6511_v30  ;;  %v7194_v47 = vpop.f32.mrb[2].mxu1  ;;  %v6543_v30 = vpack.c.bf16 %v156_v29, %v155_v28 }
  0xe6   :  { %v7196_v48 = vpop.f32.mrb[3].mxu0  ;;  %6516 = vmatprep.subr.bf16.mxu1 %v6515_v43  ;;  %v7198_v49 = vpop.f32.mrb[3].mxu1 }
  0xe7   :  { %5972 = vmatprep.mubr.msk.f32.mxu1 %vm609_vm1, %v7196_v48  ;;  %6544 = vmatprep.subr.bf16.mxu0 %v6543_v30 }
  0xe8   :  { %5973 = vmatmul.mubr.msk.f32.gmra.mrb[12].mxu1 %vm609_vm1, %v7192_v46  ;;  %6546 = vmatpush3.bf16.msra.mxu0 %v6543_v30  ;;  %v164_v30 = vld [vmem:[%s7324_s3 + $0x20] sm:$0xff] }
  0xe9   :  { %v7204_v51 = vpop.f32.mrb[4].mxu0  ;;  %6518 = vmatpush3.bf16.msra.mxu1 %v6515_v43  ;;  %v7206_v52 = vpop.f32.mrb[4].mxu1  ;;  %6548 = vmatprep.subr.bf16.mxu0 %v6547_v33 }
  0xea   :  { %v7208_v53 = vpop.f32.mrb[5].mxu0  ;;  %v7210_v54 = vpop.f32.mrb[5].mxu1  ;;  %6520 = vmatprep.subr.bf16.mxu1 %v6519_v50 }
  0xeb   :  { %5975 = vmatprep.mubr.msk.f32.mxu1 %vm609_vm1, %v7208_v53 }
  0xec   :  { %5976 = vmatmul.mubr.msk.f32.gmra.mrb[14].mxu1 %vm609_vm1, %v7204_v51  ;;  %6550 = vmatpush3.bf16.msra.mxu0 %v6547_v33 }
  0xed   :  { %5978 = vmatprep.mubr.msk.f32.mxu1 %vm609_vm1, %v7184_v42  ;;  %v7218_v55 = vpop.f32.mrb[6].mxu1  ;;  %v7220_v56 = vpop.f32.mrb[6].mxu0  ;;  %6552 = vmatprep.subr.bf16.mxu0 %v6551_v36 }
  0xee   :  { %v7222_v57 = vpop.f32.mrb[7].mxu1  ;;  %v7224_v58 = vpop.f32.mrb[7].mxu0 }
  0xf0   :  { %5979 = vmatmul.mubr.msk.f32.gmra.mrb[16].mxu1 %vm609_vm1, %v7180_v40 }
  0xf1   :  { %5989 = vmatprep.mubr.msk.f32.mxu1 %vm609_vm1, %v7198_v49  ;;  %v7232_v61 = vpop.f32.mrb[8].mxu1  ;;  %v7234_v62 = vpop.f32.mrb[8].mxu0 }
  0xf2   :  { %v7236_v63 = vpop.f32.mrb[9].mxu1  ;;  %v7238_v1 = vpop.f32.mrb[9].mxu0 }
  0xf4   :  { %5990 = vmatmul.mubr.msk.f32.vlgmr.msra.gmra.mrb[10].mxu1 %vm609_vm1, %v7194_v47 }
  0xf5   :  { %5992 = vmatprep.mubr.msk.f32.mxu1 %vm609_vm1, %v7210_v54  ;;  %6522 = vmatpush3.bf16.msra.mxu1 %v6519_v50  ;;  %v7246_v4 = vpop.f32.mrb[10].mxu0 }
  0xf6   :  { %6524 = vmatprep.subr.bf16.mxu1 %v6523_v0  ;;  %v7248_v5 = vpop.f32.mrb[11].mxu0 }
  0xf8   :  { %5993 = vmatmul.mubr.msk.f32.gmra.mrb[12].mxu1 %vm609_vm1, %v7206_v52 }
  0xf9   :  { %5995 = vmatprep.mubr.msk.f32.mxu1 %vm609_vm1, %v7222_v57  ;;  %6526 = vmatpush3.bf16.msra.mxu1 %v6523_v0  ;;  %v7254_v7 = vpop.f32.mrb[12].mxu0 }
  0xfa   :  { %6528 = vmatprep.subr.bf16.mxu1 %v6527_v6  ;;  %v7256_v9 = vpop.f32.mrb[13].mxu0 }
  0xfc   :  { %5996 = vmatmul.mubr.msk.f32.gmra.mrb[14].mxu1 %vm609_vm1, %v7218_v55 }
  0xfd   :  { %5998 = vmatprep.mubr.msk.f32.mxu1 %vm609_vm1, %v7236_v63 }
 0x100   :  { %5999 = vmatmul.mubr.msk.f32.gmra.mrb[16].mxu1 %vm609_vm1, %v7232_v61 }
 0x101   :  { %6009 = vmatprep.mubr.msk.f32.mxu1 %vm609_vm1, %v7224_v58 }
 0x104   :  { %6010 = vmatmul.mubr.msk.f32.vlgmr.msra.gmra.mrb[10].mxu1 %vm609_vm1, %v7220_v56 }
 0x105   :  { %6012 = vmatprep.mubr.msk.f32.mxu1 %vm609_vm1, %v7238_v1  ;;  %6530 = vmatpush3.bf16.msra.mxu1 %v6527_v6 }
 0x106   :  { %6532 = vmatprep.subr.bf16.mxu1 %v6531_v12 }
 0x108   :  { %6013 = vmatmul.mubr.msk.f32.gmra.mrb[12].mxu1 %vm609_vm1, %v7234_v62 }
 0x109   :  { %6015 = vmatprep.mubr.msk.f32.mxu1 %vm609_vm1, %v7248_v5  ;;  %6534 = vmatpush3.bf16.msra.mxu1 %v6531_v12  ;;  %v6555_v12 = vpack.c.bf16 %v163_v60, %v162_v59 }
 0x10c   :  { %6016 = vmatmul.mubr.msk.f32.gmra.mrb[14].mxu1 %vm609_vm1, %v7246_v4 }
 0x10d   :  { %6018 = vmatprep.mubr.msk.f32.mxu1 %vm609_vm1, %v7256_v9 }
 0x110   :  { %6019 = vmatmul.mubr.msk.f32.gmra.mrb[16].mxu1 %vm609_vm1, %v7254_v7 }
 0x111   :  { %6029 = vmatprep.mubr.msk.f32.mxu1 %vm609_vm1, %v7283_v13 }
 0x114   :  { %6030 = vmatmul.mubr.msk.f32.vlgmr.msra.gmra.mrb[10].mxu1 %vm609_vm1, %v7289_v14 }
 0x115   :  { %6032 = vmatprep.mubr.msk.f32.mxu1 %vm609_vm1, %v7291_v15 }
 0x118   :  { %6033 = vmatmul.mubr.msk.f32.gmra.mrb[12].mxu1 %vm609_vm1, %v7297_v16 }
 0x119   :  { %6035 = vmatprep.mubr.msk.f32.mxu1 %vm609_vm1, %v7299_v18 }
 0x11c   :  { %6036 = vmatmul.mubr.msk.f32.gmra.mrb[14].mxu1 %vm609_vm1, %v7305_v19 }
 0x11d   :  { %6038 = vmatprep.mubr.msk.f32.mxu1 %vm609_vm1, %v7307_v21 }
 0x120   :  { %6039 = vmatmul.mubr.msk.f32.gmra.mrb[16].mxu1 %vm609_vm1, %v7313_v22 }
 0x1e7   :  { %v6031_v38 = vpop.f32.mrb[10].mxu1 }
 0x1e8   :  { %v6781_v43 = vadd.f32 %v6031_v38, %v5359_v37  ;;  %v1117_v44 = vpop.f32.mrb[11].mxu1 }
 0x1e9   :  { %v6782_v45 = vadd.f32 %v5359_v37, %v1117_v44 }
 0x1ea   :  { %v1173_v50 = vmul.f32 0.2, %v6781_v43  ;;  %vm1165_vm2 = vcmp.gt.f32.partialorder %v6781_v43, 0.0 }
 0x1eb   :  { %vm1164_vm3 = vcmp.gt.f32.partialorder %v6782_v45, 0.0  ;;  %v1172_v0 = vmul.f32 0.2, %v6782_v45  ;;  %v6034_v2 = vpop.f32.mrb[12].mxu1 }
 0x1ec   :  { %v6783_v3 = vadd.f32 %v6034_v2, %v5359_v37  ;;  %v1127_v6 = vpop.f32.mrb[13].mxu1  ;;  %v1181_v28 = vsel %vm1165_vm2, %v6781_v43, %v1173_v50  ;;  %vm2202_vm2 = vcmp.gt.f32.partialorder %v7146_v26, 0.5 }
 0x1ed   :  { %v6784_v10 = vadd.f32 %v5359_v37, %v1127_v6  ;;  %v1180_v11 = vsel %vm1164_vm3, %v6782_v45, %v1172_v0  ;;  %v6559_v45 = vpack.c.bf16 %v165_v31, %v164_v30  ;;  %v166_v30 = vld [vmem:[%s7324_s3 + $0x30] sm:$0xff]  ;;  %v168_v31 = vld [vmem:[%s7324_s3 + $0x40] sm:$0xff]  ;;  %vm2198_vm3 = vcmp.gt.f32.partialorder %v7121_v20, 0.5 }
 0x1ee   :  { %v1175_v29 = vmul.f32 0.2, %v6783_v3  ;;  %6057 = vmatprep.mubr.msk.f32.mxu0 %vm1194_vm4, %v1180_v11  ;;  %vm1167_vm5 = vcmp.gt.f32.partialorder %v6783_v3, 0.0 }
 0x1ef   :  { %vm1166_vm6 = vcmp.gt.f32.partialorder %v6784_v10, 0.0  ;;  %v1174_v32 = vmul.f32 0.2, %v6784_v10  ;;  %v6037_v33 = vpop.f32.mrb[14].mxu1  ;;  %6058 = vmatmul.mubr.msk.f32.vlgmr.msra.gmra.mrb[14].mxu0 %vm1194_vm4, %v1181_v28 }
 0x1f0   :  { %v6785_v34 = vadd.f32 %v6037_v33, %v5359_v37  ;;  %v1137_v35 = vpop.f32.mrb[15].mxu1  ;;  %6554 = vmatpush3.bf16.msra.mxu0 %v6551_v36  ;;  %v1183_v43 = vsel %vm1167_vm5, %v6783_v3, %v1175_v29  ;;  %vm2203_vm5 = vcmp.gt.f32.partialorder %v7154_v27, 0.5 }
 0x1f1   :  { %v6786_v38 = vadd.f32 %v5359_v37, %v1137_v35  ;;  %v1182_v44 = vsel %vm1166_vm6, %v6784_v10, %v1174_v32  ;;  %6556 = vmatprep.subr.bf16.mxu0 %v6555_v12  ;;  %v169_v32 = vld [vmem:[%s7324_s3 + $0x48] sm:$0xff]  ;;  %vm2334_vm6 = vcmask 1040384  }
 0x1f2   :  { %v1177_v59 = vmul.f32 0.2, %v6785_v34  ;;  %6060 = vmatprep.mubr.msk.f32.mxu0 %vm1194_vm4, %v1182_v44  ;;  %vm1169_vm7 = vcmp.gt.f32.partialorder %v6785_v34, 0.0  ;;  %v6567_v33 = vpack.c.bf16 %v169_v32, %v168_v31 }
 0x1f3   :  { %vm1168_vm8 = vcmp.gt.f32.partialorder %v6786_v38, 0.0  ;;  %v1176_v50 = vmul.f32 0.2, %v6786_v38  ;;  %v6040_v60 = vpop.f32.mrb[16].mxu1  ;;  %6061 = vmatmul.mubr.msk.f32.gmra.mrb[16].mxu0 %vm1194_vm4, %v1183_v43 }
 0x1f4   :  { %v6787_v0 = vadd.f32 %v6040_v60, %v5359_v37  ;;  %v1147_v2 = vpop.f32.mrb[17].mxu1  ;;  %6558 = vmatpush3.bf16.msra.mxu0 %v6555_v12  ;;  %v1185_v3 = vsel %vm1169_vm7, %v6785_v34, %v1177_v59  ;;  %v167_v12 = vld [vmem:[%s7324_s3 + $0x38] sm:$0xff]  ;;  %vm2710_vm7 = vcmask 15360  }
 0x1f5   :  { %v6788_v36 = vadd.f32 %v5359_v37, %v1147_v2  ;;  %v1184_v6 = vsel %vm1168_vm8, %v6786_v38, %v1176_v50  ;;  %6560 = vmatprep.subr.bf16.mxu0 %v6559_v45  ;;  %v6563_v37 = vpack.c.bf16 %v167_v12, %v166_v30  ;;  %v5401_v38 = vld [vmem:[%s5305_s21] ss:$0 sm:$0xff]  ;;  %s7051_s21 = smov 17  }
 0x1f6   :  { %v1179_v10 = vmul.f32 0.2, %v6787_v0  ;;  %6063 = vmatprep.mubr.msk.f32.mxu0 %vm1194_vm4, %v1184_v6  ;;  %vm1171_vm9 = vcmp.gt.f32.partialorder %v6787_v0, 0.0  ;;  %s5311_s25 = sld [smem:[%s8122_s0 + %s7051_s21]]   ;;  %s7059_s21 = smov 25  }
 0x1f7   :  { %vm1170_vm10 = vcmp.gt.f32.partialorder %v6788_v36, 0.0  ;;  %v1178_v11 = vmul.f32 0.2, %v6788_v36  ;;  %6064 = vmatmul.mubr.msk.f32.gmra.mrb[18].mxu0 %vm1194_vm4, %v1185_v3 }
 0x1f8   :  { %v1187_v29 = vsel %vm1171_vm9, %v6787_v0, %v1179_v10 }
 0x1f9   :  { %v1186_v28 = vsel %vm1170_vm10, %v6788_v36, %v1178_v11 }
 0x1fa   :  { %6066 = vmatprep.mubr.msk.f32.mxu0 %vm1194_vm4, %v1186_v28 }
 0x1fb   :  { %6067 = vmatmul.mubr.msk.f32.gmra.mrb[20].mxu0 %vm1194_vm4, %v1187_v29 }
 0x1fc   :  { %6077 = vmatprep.mubr.msk.f32.mxu0 %vm609_vm1, %v7182_v41  ;;  %v171_v41 = vld [vmem:[%s7324_s3 + $0x58] sm:$0xff] }
 0x1ff   :  { %6078 = vmatmul.mubr.msk.f32.vlgmr.msra.gmra.mrb[22].mxu0 %vm609_vm1, %v7178_v39  ;;  %v170_v39 = vld [vmem:[%s7324_s3 + $0x50] sm:$0xff] }
 0x200   :  { %6080 = vmatprep.mubr.msk.f32.mxu0 %vm609_vm1, %v7196_v48  ;;  %6562 = vmatpush3.bf16.msra.mxu0 %v6559_v45  ;;  %v172_v48 = vld [vmem:[%s7324_s3 + $0x60] sm:$0xff] }
 0x201   :  { %6564 = vmatprep.subr.bf16.mxu0 %v6563_v37 }
 0x203   :  { %6081 = vmatmul.mubr.msk.f32.gmra.mrb[24].mxu0 %vm609_vm1, %v7192_v46  ;;  %v6571_v46 = vpack.c.bf16 %v171_v41, %v170_v39 }
 0x204   :  { %6083 = vmatprep.mubr.msk.f32.mxu0 %vm609_vm1, %v7208_v53  ;;  %6566 = vmatpush3.bf16.msra.mxu0 %v6563_v37  ;;  %v173_v53 = vld [vmem:[%s7324_s3 + $0x68] sm:$0xff] }
 0x205   :  { %6568 = vmatprep.subr.bf16.mxu0 %v6567_v33 }
 0x207   :  { %6084 = vmatmul.mubr.msk.f32.gmra.mrb[26].mxu0 %vm609_vm1, %v7204_v51  ;;  %v7039_v51 = vmov 1  }
 0x208   :  { %6086 = vmatprep.mubr.msk.f32.mxu0 %vm609_vm1, %v7184_v42  ;;  %v6575_v42 = vpack.c.bf16 %v173_v53, %v172_v48  ;;  %6899 = vset.pattern.permute.xlu1 %v7039_v51 }
 0x20b   :  { %6087 = vmatmul.mubr.msk.f32.gmra.mrb[28].mxu0 %vm609_vm1, %v7180_v40  ;;  %v174_v40 = vld [vmem:[%s7324_s3 + $0x70] sm:$0xff] }
 0x20c   :  { %6097 = vmatprep.mubr.msk.f32.mxu0 %vm609_vm1, %v7198_v49 }
 0x20f   :  { %6098 = vmatmul.mubr.msk.f32.vlgmr.msra.gmra.mrb[22].mxu0 %vm609_vm1, %v7194_v47  ;;  %v175_v47 = vld [vmem:[%s7324_s3 + $0x78] sm:$0xff] }
 0x210   :  { %6100 = vmatprep.mubr.msk.f32.mxu0 %vm609_vm1, %v7210_v54  ;;  %6570 = vmatpush3.bf16.msra.mxu0 %v6567_v33  ;;  %v6579_v49 = vpack.c.bf16 %v175_v47, %v174_v40  ;;  %v177_v54 = vld [vmem:[%s5306_s12] sm:$0xff] }
 0x211   :  { %6572 = vmatprep.subr.bf16.mxu0 %v6571_v46 }
 0x213   :  { %6101 = vmatmul.mubr.msk.f32.gmra.mrb[24].mxu0 %vm609_vm1, %v7206_v52  ;;  %v7040_v52 = vmov 0  }
 0x214   :  { %6103 = vmatprep.mubr.msk.f32.mxu0 %vm609_vm1, %v7222_v57  ;;  %6574 = vmatpush3.bf16.msra.mxu0 %v6571_v46  ;;  %v179_v57 = vld [vmem:[%s5306_s12 + $0x10] sm:$0xff] }
 0x215   :  { %6576 = vmatprep.subr.bf16.mxu0 %v6575_v42  ;;  %6898 = vset.pattern.permute.xlu0 %v7040_v52 }
 0x217   :  { %6104 = vmatmul.mubr.msk.f32.gmra.mrb[26].mxu0 %vm609_vm1, %v7218_v55  ;;  %v178_v55 = vld [vmem:[%s5306_s12 + $0x8] sm:$0xff] }
 0x218   :  { %6106 = vmatprep.mubr.msk.f32.mxu0 %vm609_vm1, %v7236_v63 }
 0x21b   :  { %6107 = vmatmul.mubr.msk.f32.gmra.mrb[28].mxu0 %vm609_vm1, %v7232_v61 }
 0x21c   :  { %6117 = vmatprep.mubr.msk.f32.mxu0 %vm609_vm1, %v7224_v58  ;;  %v180_v58 = vld [vmem:[%s5306_s12 + $0x18] sm:$0xff]  ;;  %s7049_s12 = smov 20  }
 0x21d   :  { %v6587_v61 = vpack.c.bf16 %v180_v58, %v179_v57  ;;  %s5314_s16 = sld [smem:[%s8122_s0 + %s7049_s12]]   ;;  %s7056_s12 = smov 24  }
 0x21f   :  { %6118 = vmatmul.mubr.msk.f32.vlgmr.msra.gmra.mrb[22].mxu0 %vm609_vm1, %v7220_v56  ;;  %v6583_v56 = vpack.c.bf16 %v178_v55, %v177_v54 }
 0x220   :  { %6120 = vmatprep.mubr.msk.f32.mxu0 %vm609_vm1, %v7238_v1  ;;  %6578 = vmatpush3.bf16.msra.mxu0 %v6575_v42 }
 0x221   :  { %6580 = vmatprep.subr.bf16.mxu0 %v6579_v49  ;;  %6584 = vmatprep.subr.bf16.mxu1 %v6583_v56 }
 0x222   :  { %6586 = vmatpush3.bf16.msra.mxu1 %v6583_v56 }
 0x223   :  { %6121 = vmatmul.mubr.msk.f32.gmra.mrb[24].mxu0 %vm609_vm1, %v7234_v62  ;;  %6588 = vmatprep.subr.bf16.mxu1 %v6587_v61  ;;  %v5384_v62 = vld [vmem:[%s5303_s17] ss:$0 sm:$0xff]  ;;  %s7050_s17 = smov 21  }
 0x224   :  { %6123 = vmatprep.mubr.msk.f32.mxu0 %vm609_vm1, %v7248_v5  ;;  %6582 = vmatpush3.bf16.msra.mxu0 %v6579_v49  ;;  %s5315_s20 = sld [smem:[%s8122_s0 + %s7050_s17]]   ;;  %s7058_s17 = smov 26  }
 0x226   :  { %6590 = vmatpush3.bf16.msra.mxu1 %v6587_v61 }
 0x227   :  { %6124 = vmatmul.mubr.msk.f32.gmra.mrb[26].mxu0 %vm609_vm1, %v7246_v4 }
 0x228   :  { %6126 = vmatprep.mubr.msk.f32.mxu0 %vm609_vm1, %v7256_v9 }
 0x22b   :  { %6127 = vmatmul.mubr.msk.f32.gmra.mrb[28].mxu0 %vm609_vm1, %v7254_v7 }
 0x22c   :  { %6137 = vmatprep.mubr.msk.f32.mxu0 %vm609_vm1, %v7283_v13 }
 0x22f   :  { %6138 = vmatmul.mubr.msk.f32.vlgmr.msra.gmra.mrb[22].mxu0 %vm609_vm1, %v7289_v14 }
 0x230   :  { %6140 = vmatprep.mubr.msk.f32.mxu0 %vm609_vm1, %v7291_v15 }
 0x233   :  { %6141 = vmatmul.mubr.msk.f32.gmra.mrb[24].mxu0 %vm609_vm1, %v7297_v16 }
 0x234   :  { %6143 = vmatprep.mubr.msk.f32.mxu0 %vm609_vm1, %v7299_v18 }
 0x237   :  { %6144 = vmatmul.mubr.msk.f32.gmra.mrb[26].mxu0 %vm609_vm1, %v7305_v19 }
 0x238   :  { %6146 = vmatprep.mubr.msk.f32.mxu0 %vm609_vm1, %v7307_v21 }
 0x23b   :  { %6147 = vmatmul.mubr.msk.f32.gmra.mrb[28].mxu0 %vm609_vm1, %v7313_v22 }
 0x23c   :  { %6191 = vmatprep.mubr.msk.f32.mxu0 %vm245_vm0, %v7104_v8 }
 0x2c2   :  { %v6059_v63 = vpop.f32.mrb[14].mxu0 }
 0x2c3   :  { %v7425_v1 = vadd.f32 %v6059_v63, %v5384_v62  ;;  %v1285_v4 = vpop.f32.mrb[15].mxu0 }
 0x2c4   :  { %v7429_v7 = vadd.f32 %v5384_v62, %v1285_v4 }
 0x2c5   :  { %2278 = vperm.xlu1 %6899, %v7425_v1   ;;  %2211 = vperm.xlu0 %6898, %v7425_v1  }
 0x2c6   :  { %v6062_v5 = vpop.f32.mrb[16].mxu0 }
 0x2c7   :  { %v7431_v9 = vadd.f32 %v6062_v5, %v5384_v62  ;;  %v1295_v13 = vpop.f32.mrb[17].mxu0 }
 0x2c8   :  { %v7435_v16 = vadd.f32 %v5384_v62, %v1295_v13 }
 0x2c9   :  { %6901 = vset.pattern.permute.xlu1 %v7040_v52  ;;  %2206 = vperm.xlu0 %6898, %v7429_v7  }
 0x2ca   :  { %2221 = vperm.xlu1 %6901, %v7431_v9   ;;  %v6065_v14 = vpop.f32.mrb[18].mxu0 }
 0x2cb   :  { %v1305_v15 = vpop.f32.mrb[19].mxu0  ;;  %v7441_v21 = vadd.f32 %v6065_v14, %v5384_v62 }
 0x2cc   :  { %v7445_v22 = vadd.f32 %v5384_v62, %v1305_v15 }
 0x2cd   :  { %6900 = vset.pattern.permute.xlu0 %v7039_v51 }
 0x2ce   :  { %2274 = vperm.xlu0 %6900, %v7429_v7   ;;  %2216 = vperm.xlu1 %6901, %v7435_v16   ;;  %v6068_v18 = vpop.f32.mrb[20].mxu0 }
 0x2cf   :  { %v1315_v19 = vpop.f32.mrb[21].mxu0  ;;  %v7452_v35 = vadd.f32 %v6068_v18, %v5384_v62 }
 0x2d0   :  { %v7448_v34 = vadd.f32 %v5384_v62, %v1315_v19 }
 0x2d2   :  { %2286 = vperm.xlu0 %6900, %v7431_v9   ;;  %6902 = vset.pattern.permute.xlu1 %v7039_v51 }
 0x2d3   :  { %2282 = vperm.xlu1 %6902, %v7435_v16  }
 0x2d6   :  { %2294 = vperm.xlu0 %6900, %v7441_v21  }
 0x2d7   :  { %6903 = vset.pattern.permute.xlu1 %v7040_v52 }
 0x2d8   :  { %2231 = vperm.xlu1 %6903, %v7441_v21  }
 0x2da   :  { %6904 = vset.pattern.permute.xlu0 %v7040_v52 }
 0x2db   :  { %2226 = vperm.xlu0 %6904, %v7445_v22  }
 0x2dc   :  { %6905 = vset.pattern.permute.xlu1 %v7039_v51 }
 0x2dd   :  { %2290 = vperm.xlu1 %6905, %v7445_v22  }
 0x2df   :  { %2236 = vperm.xlu0 %6904, %v7448_v34  }
 0x2e1   :  { %6906 = vset.pattern.permute.xlu1 %v7040_v52 }
 0x2e2   :  { %2241 = vperm.xlu1 %6906, %v7452_v35  }
 0x2e3   :  { %6908 = vset.pattern.permute.xlu0 %v7039_v51 }
 0x2e4   :  { %2302 = vperm.xlu0 %6908, %v7452_v35  }
 0x2e6   :  { %6907 = vset.pattern.permute.xlu1 %v7039_v51 }
 0x2e7   :  { %2298 = vperm.xlu1 %6907, %v7448_v34  }
 0x302   :  { %v6139_v44 = vpop.f32.mrb[22].mxu0 }
 0x303   :  { %v7460_v45 = vadd.f32 %v6139_v44, %v5401_v38  ;;  %v1735_v59 = vpop.f32.mrb[23].mxu0 }
 0x304   :  { %v7462_v43 = vadd.f32 %v5401_v38, %v1735_v59 }
 0x305   :  { %v1791_v50 = vmul.f32 0.044715, %v7460_v45 }
 0x306   :  { %v1790_v60 = vmul.f32 0.044715, %v7462_v43  ;;  %v6142_v0 = vpop.f32.mrb[24].mxu0 }
 0x307   :  { %v1799_v2 = vmul.f32 %v7460_v45, %v1791_v50  ;;  %v7467_v36 = vadd.f32 %v6142_v0, %v5401_v38  ;;  %v1745_v6 = vpop.f32.mrb[25].mxu0 }
 0x308   :  { %v1798_v10 = vmul.f32 %v7462_v43, %v1790_v60  ;;  %v7470_v3 = vadd.f32 %v5401_v38, %v1745_v6 }
 0x309   :  { %v1807_v11 = vmul.f32 %v7460_v45, %v1799_v2  ;;  %v1793_v28 = vmul.f32 0.044715, %v7467_v36 }
 0x30a   :  { %v1806_v29 = vmul.f32 %v7462_v43, %v1798_v10  ;;  %v1792_v30 = vmul.f32 0.044715, %v7470_v3  ;;  %v6145_v12 = vpop.f32.mrb[26].mxu0 }
 0x30b   :  { %v1815_v37 = vadd.f32 %v7460_v45, %v1807_v11  ;;  %v1801_v31 = vmul.f32 %v7467_v36, %v1793_v28  ;;  %v7478_v32 = vadd.f32 %v6145_v12, %v5401_v38  ;;  %v1755_v33 = vpop.f32.mrb[27].mxu0 }
 0x30c   :  { %v1814_v39 = vadd.f32 %v7462_v43, %v1806_v29  ;;  %v1800_v41 = vmul.f32 %v7470_v3, %v1792_v30  ;;  %v7482_v46 = vadd.f32 %v5401_v38, %v1755_v33  ;;  %v1782_v30 = vmul.f32 0.5, %v7462_v43 }
 0x30d   :  { %v1823_v48 = vmul.f32 0.7978846, %v1815_v37  ;;  %v1809_v53 = vmul.f32 %v7467_v36, %v1801_v31  ;;  %v1795_v42 = vmul.f32 0.044715, %v7478_v32  ;;  %v1783_v37 = vmul.f32 0.5, %v7460_v45 }
 0x30e   :  { %v1808_v40 = vmul.f32 %v7470_v3, %v1800_v41  ;;  %v1794_v47 = vmul.f32 0.044715, %v7482_v46  ;;  %v6148_v49 = vpop.f32.mrb[28].mxu0  ;;  %v1822_v51 = vmul.f32 0.7978846, %v1814_v39  ;;  %v1785_v43 = vmul.f32 0.5, %v7467_v36 }
 0x30f   :  { %6909 = vtanh.f32 %v1823_v48  ;;  %v1817_v52 = vadd.f32 %v7467_v36, %v1809_v53  ;;  %v1803_v54 = vmul.f32 %v7478_v32, %v1795_v42  ;;  %v7490_v55 = vadd.f32 %v6148_v49, %v5401_v38  ;;  %v1765_v56 = vpop.f32.mrb[29].mxu0 }
 0x310   :  { %v1816_v57 = vadd.f32 %v7470_v3, %v1808_v40  ;;  %v1802_v58 = vmul.f32 %v7482_v46, %v1794_v47  ;;  %v7494_v61 = vadd.f32 %v5401_v38, %v1765_v56  ;;  %6911 = vtanh.f32 %v1822_v51  ;;  %2476 = vxpose.xlu1.b32.start [1/8] (short) (narrow) %v7104_v8, 16 }
 0x311   :  { %v1811_v62 = vmul.f32 %v7478_v32, %v1803_v54  ;;  %v1797_v63 = vmul.f32 0.044715, %v7490_v55  ;;  %v1825_v4 = vmul.f32 0.7978846, %v1817_v52  ;;  %v1784_v53 = vmul.f32 0.5, %v7470_v3 }
 0x312   :  { %v1810_v5 = vmul.f32 %v7482_v46, %v1802_v58  ;;  %v1796_v13 = vmul.f32 0.044715, %v7494_v61  ;;  %v1824_v14 = vmul.f32 0.7978846, %v1816_v57  ;;  %v1786_v52 = vmul.f32 0.5, %v7482_v46 }
 0x313   :  { %v1819_v15 = vadd.f32 %v7478_v32, %v1811_v62  ;;  %v1805_v18 = vmul.f32 %v7490_v55, %v1797_v63  ;;  %6913 = vtanh.f32 %v1825_v4  ;;  %v1787_v3 = vmul.f32 0.5, %v7478_v32 }
 0x314   :  { %v1818_v19 = vadd.f32 %v7482_v46, %v1810_v5  ;;  %v1804_v38 = vmul.f32 %v7494_v61, %v1796_v13  ;;  %6915 = vtanh.f32 %v1824_v14  ;;  %2477 = vxpose.xlu1.b32.cont [2/8] (short) (narrow) %v7115_v17, 16  ;;  %v1788_v63 = vmul.f32 0.5, %v7494_v61 }
 0x315   :  { %v1813_v44 = vmul.f32 %v7490_v55, %v1805_v18  ;;  %v1827_v59 = vmul.f32 0.7978846, %v1819_v15  ;;  %v1789_v46 = vmul.f32 0.5, %v7490_v55 }
 0x316   :  { %v1812_v50 = vmul.f32 %v7494_v61, %v1804_v38  ;;  %v1826_v60 = vmul.f32 0.7978846, %v1818_v19 }
 0x317   :  { %v1821_v0 = vadd.f32 %v7490_v55, %v1813_v44  ;;  %6917 = vtanh.f32 %v1827_v59 }
 0x318   :  { %v1820_v2 = vadd.f32 %v7494_v61, %v1812_v50  ;;  %6919 = vtanh.f32 %v1826_v60  ;;  %2478 = vxpose.xlu1.b32.cont [3/8] (short) (narrow) %v7121_v20, 16 }
 0x319   :  { %v6910_v6 = vpop.eup %6909  ;;  %v1829_v10 = vmul.f32 0.7978846, %v1821_v0 }
 0x31a   :  { %v6912_v11 = vpop.eup %6911  ;;  %v1839_v28 = vadd.f32 1.0, %v6910_v6  ;;  %v1828_v29 = vmul.f32 0.7978846, %v1820_v2 }
 0x31b   :  { %v1838_v12 = vadd.f32 1.0, %v6912_v11  ;;  %6921 = vtanh.f32 %v1829_v10 }
 0x31c   :  { %6923 = vtanh.f32 %v1828_v29  ;;  %2479 = vxpose.xlu1.b32.cont [4/8] (short) (narrow) %v7131_v23, 16  ;;  %v1847_v41 = vmul.f32 %v1839_v28, %v1783_v37 }
 0x31d   :  { %v6914_v31 = vpop.eup %6913  ;;  %v1846_v33 = vmul.f32 %v1838_v12, %v1782_v30 }
 0x31e   :  { %v6916_v39 = vpop.eup %6915  ;;  %v1841_v48 = vadd.f32 1.0, %v6914_v31 }
 0x31f   :  { %6157 = vmatprep.mubr.msk.f32.mxu1 %vm609_vm1, %v1846_v33  ;;  %v1840_v42 = vadd.f32 1.0, %v6916_v39 }
 0x320   :  { %6158 = vmatmul.mubr.msk.f32.vlgmr.msra.gmra.mrb[18].mxu1 %vm609_vm1, %v1847_v41  ;;  %2480 = vxpose.xlu1.b32.cont [5/8] (short) (narrow) %v7134_v24, 16  ;;  %v1849_v49 = vmul.f32 %v1841_v48, %v1785_v43 }
 0x321   :  { %v6918_v45 = vpop.eup %6917  ;;  %v1848_v40 = vmul.f32 %v1840_v42, %v1784_v53 }
 0x322   :  { %v6920_v47 = vpop.eup %6919  ;;  %v1843_v51 = vadd.f32 1.0, %v6918_v45 }
 0x323   :  { %6160 = vmatprep.mubr.msk.f32.mxu1 %vm609_vm1, %v1848_v40  ;;  %v1842_v54 = vadd.f32 1.0, %v6920_v47 }
 0x324   :  { %6161 = vmatmul.mubr.msk.f32.gmra.mrb[20].mxu1 %vm609_vm1, %v1849_v49  ;;  %2481 = vxpose.xlu1.b32.cont [6/8] (short) (narrow) %v7142_v25, 16  ;;  %v1851_v58 = vmul.f32 %v1843_v51, %v1787_v3 }
 0x325   :  { %v6922_v56 = vpop.eup %6921  ;;  %v1850_v36 = vmul.f32 %v1842_v54, %v1786_v52 }
 0x326   :  { %v6924_v57 = vpop.eup %6923  ;;  %v1845_v62 = vadd.f32 1.0, %v6922_v56 }
 0x327   :  { %6163 = vmatprep.mubr.msk.f32.mxu1 %vm609_vm1, %v1850_v36  ;;  %v1844_v4 = vadd.f32 1.0, %v6924_v57 }
 0x328   :  { %6164 = vmatmul.mubr.msk.f32.gmra.mrb[22].mxu1 %vm609_vm1, %v1851_v58  ;;  %2482 = vxpose.xlu1.b32.cont [7/8] (short) (narrow) %v7146_v26, 16  ;;  %v1853_v32 = vmul.f32 %v1845_v62, %v1789_v46 }
 0x329   :  { %v1852_v5 = vmul.f32 %v1844_v4, %v1788_v63 }
 0x32b   :  { %6166 = vmatprep.mubr.msk.f32.mxu1 %vm609_vm1, %v1852_v5 }
 0x32c   :  { %6167 = vmatmul.mubr.msk.f32.gmra.mrb[24].mxu1 %vm609_vm1, %v1853_v32  ;;  %2483 = vxpose.xlu1.b32.end [8/8] (short) (narrow) %v7154_v27, 16 }
 0x344   :  { %v2279_v13 = vpop.permute.xlu1 %2278  ;;  %v2212_v14 = vpop.permute.xlu0 %2211 }
 0x345   :  { %v2245_v6 = vsel %vm2197_vm12, %v2212_v14, -1e+30  ;;  %v2306_v12 = vsel %vm2197_vm12, %v2279_v13, -1e+30 }
 0x346   :  { %v2253_v33 = vsel %vm245_vm0, %v2245_v6, -inf  ;;  %v2314_v46 = vsel %vm245_vm0, %v2306_v12, -inf  ;;  %v7599_v12 = vld [vmem:[%s7084_s13 + $0x10] sm:$0xff] }
 0x348   :  { %v2207_v15 = vpop.permute.xlu0 %2206 }
 0x349   :  { %v2222_v18 = vpop.permute.xlu1 %2221  ;;  %v2244_v10 = vsel %vm2196_vm13, %v2207_v15, -1e+30 }
 0x34a   :  { %v2247_v28 = vsel %vm2199_vm14, %v2222_v18, -1e+30  ;;  %v2252_v39 = vsel %vm245_vm0, %v2244_v10, -inf }
 0x34b   :  { %v2255_v42 = vsel %vm245_vm0, %v2247_v28, -inf }
 0x34d   :  { %v2275_v61 = vpop.permute.xlu0 %2274  ;;  %v2217_v19 = vpop.permute.xlu1 %2216 }
 0x34e   :  { %v2246_v37 = vsel %vm2198_vm3, %v2217_v19, -1e+30  ;;  %v2305_v17 = vsel %vm2196_vm13, %v2275_v61, -1e+30 }
 0x34f   :  { %v2254_v40 = vsel %vm245_vm0, %v2246_v37, -inf  ;;  %v2313_v56 = vsel %vm245_vm0, %v2305_v17, -inf  ;;  %v7604_v37 = vld [vmem:[%s7084_s13 + $0x18] sm:$0xff] }
 0x350   :  { %v185_v17 = vld [vmem:[%s5308_s26 + $0x18] sm:$0xff] }
 0x351   :  { %v2287_v38 = vpop.permute.xlu0 %2286 }
 0x352   :  { %v2283_v44 = vpop.permute.xlu1 %2282  ;;  %v2308_v36 = vsel %vm2199_vm14, %v2287_v38, -1e+30 }
 0x353   :  { %v2307_v25 = vsel %vm2198_vm3, %v2283_v44, -1e+30  ;;  %v2316_v32 = vsel %vm245_vm0, %v2308_v36, -inf }
 0x354   :  { %v2315_v23 = vsel %vm245_vm0, %v2307_v25, -inf }
 0x355   :  { %v2295_v59 = vpop.permute.xlu0 %2294 }
 0x356   :  { %v2310_v47 = vsel %vm2201_vm15, %v2295_v59, -1e+30 }
 0x357   :  { %v2232_v55 = vpop.permute.xlu1 %2231  ;;  %v2319_v57 = vsel %vm245_vm0, %v2310_v47, -inf }
 0x358   :  { %v2249_v2 = vsel %vm2201_vm15, %v2232_v55, -1e+30  ;;  %v2320_v14 = vmax.f32 %v2314_v46, %v2319_v57 }
 0x359   :  { %v2258_v31 = vsel %vm245_vm0, %v2249_v2, -inf }
 0x35a   :  { %v2227_v50 = vpop.permute.xlu0 %2226  ;;  %v2259_v49 = vmax.f32 %v2253_v33, %v2258_v31  ;;  %v7609_v31 = vld [vmem:[%s7084_s13 + $0x20] sm:$0xff] }
 0x35b   :  { %v2248_v60 = vsel %vm2200_vm11, %v2227_v50, -1e+30  ;;  %v182_v33 = vld [vmem:[%s5308_s26] sm:$0xff] }
 0x35c   :  { %v2291_v0 = vpop.permute.xlu1 %2290  ;;  %v2256_v29 = vsel %vm245_vm0, %v2248_v60, -inf }
 0x35d   :  { %v2309_v41 = vsel %vm2200_vm11, %v2291_v0, -1e+30  ;;  %v2257_v43 = vmax.f32 %v2252_v39, %v2256_v29  ;;  %v183_v39 = vld [vmem:[%s5308_s26 + $0x8] sm:$0xff] }
 0x35e   :  { %v2237_v11 = vpop.permute.xlu0 %2236  ;;  %v2317_v52 = vsel %vm245_vm0, %v2309_v41, -inf  ;;  %v6591_v41 = vpack.c.bf16 %v183_v39, %v182_v33 }
 0x35f   :  { %v2250_v30 = vsel %vm2202_vm2, %v2237_v11, -1e+30  ;;  %v2264_v58 = vmax.f32 %v2257_v43, %v2259_v49  ;;  %v2318_v5 = vmax.f32 %v2313_v56, %v2317_v52 }
 0x360   :  { %v2260_v48 = vsel %vm245_vm0, %v2250_v30, -inf  ;;  %v7591_v30 = vld [vmem:[%s7084_s13 + $0x8] sm:$0xff]  ;;  %6592 = vmatprep.subr.bf16.mxu1 %v6591_v41 }
 0x361   :  { %v2242_v53 = vpop.permute.xlu1 %2241  ;;  %v2261_v54 = vmax.f32 %v2254_v40, %v2260_v48  ;;  %v2325_v19 = vmax.f32 %v2318_v5, %v2320_v14  ;;  %v7614_v48 = vld [vmem:[%s7084_s13 + $0x28] sm:$0xff]  ;;  %6594 = vmatpush3.bf16.msra.mxu1 %v6591_v41  ;;  %v5426_v40 = vld [vmem:[%s5307_s30] ss:$0 sm:$0xff]  ;;  %s7053_s30 = smov 22  }
 0x362   :  { %v2251_v45 = vsel %vm2203_vm5, %v2242_v53, -1e+30  ;;  %v7619_v53 = vld [vmem:[%s7084_s13 + $0x30] sm:$0xff]  ;;  %s5316_s2 = sld [smem:[%s8122_s0 + %s7053_s30]]   ;;  %s7061_s30 = smov 27  }
 0x363   :  { %v2262_v24 = vsel %vm245_vm0, %v2251_v45, -inf  ;;  %v2303_v51 = vpop.permute.xlu0 %2302  ;;  %v7624_v45 = vld [vmem:[%s7084_s13 + $0x38] sm:$0xff] }
 0x364   :  { %v2263_v3 = vmax.f32 %v2255_v42, %v2262_v24  ;;  %v2312_v8 = vsel %vm2203_vm5, %v2303_v51, -1e+30  ;;  %v184_v42 = vld [vmem:[%s5308_s26 + $0x10] sm:$0xff]  ;;  %s7052_s26 = smov 19  }
 0x365   :  { %v2323_v63 = vsel %vm245_vm0, %v2312_v8, -inf  ;;  %v6595_v43 = vpack.c.bf16 %v185_v17, %v184_v42  ;;  %s5313_s29 = sld [smem:[%s8122_s0 + %s7052_s26]]   ;;  %s7060_s26 = smov 28  }
 0x366   :  { %v2265_v62 = vmax.f32 %v2261_v54, %v2263_v3  ;;  %v2299_v4 = vpop.permute.xlu1 %2298  ;;  %v2324_v15 = vmax.f32 %v2316_v32, %v2323_v63 }
 0x367   :  { %v2311_v27 = vsel %vm2202_vm2, %v2299_v4, -1e+30  ;;  %6596 = vmatprep.subr.bf16.mxu1 %v6595_v43 }
 0x368   :  { %v2266_v13 = vmax.f32 %v2264_v58, %v2265_v62  ;;  %v2321_v20 = vsel %vm245_vm0, %v2311_v27, -inf  ;;  %6598 = vmatpush3.bf16.msra.mxu1 %v6595_v43 }
 0x369   :  { %v2322_v18 = vmax.f32 %v2315_v23, %v2321_v20 }
 0x36a   :  { %v2267_v61 = vrot.slane %v2266_v13, 4 }
 0x36b   :  { %v2326_v38 = vmax.f32 %v2322_v18, %v2324_v15 }
 0x36c   :  { %v2268_v44 = vmax.f32 %v2266_v13, %v2267_v61 }
 0x36d   :  { %v2327_v59 = vmax.f32 %v2325_v19, %v2326_v38 }
 0x36e   :  { %v2269_v55 = vrot.slane %v2268_v44, 2 }
 0x36f   :  { %v2328_v50 = vrot.slane %v2327_v59, 4 }
 0x370   :  { %v2270_v60 = vmax.f32 %v2268_v44, %v2269_v55 }
 0x371   :  { %v2329_v26 = vmax.f32 %v2327_v59, %v2328_v50 }
 0x372   :  { %v2271_v2 = vrot.slane %v2270_v60, 1 }
 0x373   :  { %v2330_v0 = vrot.slane %v2329_v26, 2 }
 0x374   :  { %v2272_v11 = vmax.f32 %v2270_v60, %v2271_v2 }
 0x375   :  { %v2331_v6 = vmax.f32 %v2329_v26, %v2330_v0 }
 0x377   :  { %v2332_v10 = vrot.slane %v2331_v6, 1 }
 0x379   :  { %v2333_v28 = vmax.f32 %v2331_v6, %v2332_v10 }
 0x37b   :  { %v2335_v29 = vsel %vm2334_vm6, %v2272_v11, %v2333_v28 }
 0x37c   :  { %6189 = vmatprep.subr.msk.mxu0 %vm245_vm0, %v2335_v29 }
 0x37d   :  { %6190 = vmatpush3.xpose.msk.msra.mxu0 %vm245_vm0, %v2335_v29 }
 0x380   :  { %6192 = vmatmul.mubr.msk.f32.vlgmr.msra.gmra.mrb[30].mxu0 %vm245_vm0, %v7591_v30 }
 0x381   :  { %6194 = vmatprep.mubr.msk.f32.mxu0 %vm245_vm0, %v7599_v12 }
 0x384   :  { %6195 = vmatmul.mubr.msk.f32.gmra.mrb[32].mxu0 %vm245_vm0, %v7604_v37 }
 0x385   :  { %6197 = vmatprep.mubr.msk.f32.mxu0 %vm245_vm0, %v7609_v31 }
 0x388   :  { %6198 = vmatmul.mubr.msk.f32.gmra.mrb[34].mxu0 %vm245_vm0, %v7614_v48 }
 0x389   :  { %6200 = vmatprep.mubr.msk.f32.mxu0 %vm245_vm0, %v7619_v53 }
 0x38c   :  { %6201 = vmatmul.mubr.msk.f32.gmra.mrb[36].mxu0 %vm245_vm0, %v7624_v45 }
 0x390   :  { %v7631_v47 = vpop.trf.xlu1 }
 0x391   :  { %6254 = vmatprep.mubr.msk.f32.mxu0 %vm1194_vm4, %v7631_v47 }
 0x3f3   :  { %v6159_v49 = vpop.f32.mrb[18].mxu1 }
 0x3f4   :  { %v7635_v24 = vadd.f32 %v6159_v49, %v5426_v40  ;;  %v1950_v51 = vpop.f32.mrb[19].mxu1 }
 0x3f5   :  { %v1951_v52 = vadd.f32 %v5426_v40, %v1950_v51 }
 0x3f6   :  { %v1998_v54 = vmul.f32 0.044715, %v7635_v24 }
 0x3f7   :  { %v1997_v3 = vmul.f32 0.044715, %v1951_v52  ;;  %v6162_v8 = vpop.f32.mrb[20].mxu1 }
 0x3f8   :  { %v2006_v56 = vmul.f32 %v1998_v54, %v7635_v24  ;;  %v7639_v36 = vadd.f32 %v6162_v8, %v5426_v40  ;;  %v1960_v25 = vpop.f32.mrb[21].mxu1 }
 0x3f9   :  { %v2005_v57 = vmul.f32 %v1997_v3, %v1951_v52  ;;  %v7641_v58 = vadd.f32 %v5426_v40, %v1960_v25 }
 0x3fa   :  { %v2014_v62 = vmul.f32 %v2006_v56, %v7635_v24  ;;  %v2000_v63 = vmul.f32 0.044715, %v7639_v36 }
 0x3fb   :  { %v2013_v4 = vmul.f32 %v2005_v57, %v1951_v52  ;;  %v1999_v46 = vmul.f32 0.044715, %v7641_v58  ;;  %v6165_v5 = vpop.f32.mrb[22].mxu1 }
 0x3fc   :  { %v2022_v27 = vadd.f32 %v2014_v62, %v7635_v24  ;;  %v2008_v32 = vmul.f32 %v2000_v63, %v7639_v36  ;;  %v7648_v23 = vadd.f32 %v6165_v5, %v5426_v40  ;;  %v1970_v13 = vpop.f32.mrb[23].mxu1 }
 0x3fd   :  { %v2021_v20 = vadd.f32 %v2013_v4, %v1951_v52  ;;  %v2007_v14 = vmul.f32 %v1999_v46, %v7641_v58  ;;  %v7651_v15 = vadd.f32 %v5426_v40, %v1970_v13  ;;  %v1989_v46 = vmul.f32 0.5, %v1951_v52 }
 0x3fe   :  { %v2030_v18 = vmul.f32 0.7978846, %v2022_v27  ;;  %v2016_v61 = vmul.f32 %v2008_v32, %v7639_v36  ;;  %v2002_v19 = vmul.f32 0.044715, %v7648_v23  ;;  %v1990_v27 = vmul.f32 0.5, %v7635_v24 }
 0x3ff   :  { %v2015_v38 = vmul.f32 %v2007_v14, %v7641_v58  ;;  %v2001_v44 = vmul.f32 0.044715, %v7651_v15  ;;  %v6168_v59 = vpop.f32.mrb[24].mxu1  ;;  %v2029_v55 = vmul.f32 0.7978846, %v2021_v20 }
 0x400   :  { %6925 = vtanh.f32 %v2030_v18  ;;  %v2024_v50 = vadd.f32 %v2016_v61, %v7639_v36  ;;  %v2010_v26 = vmul.f32 %v2002_v19, %v7648_v23  ;;  %v7659_v60 = vadd.f32 %v6168_v59, %v5426_v40  ;;  %v1980_v0 = vpop.f32.mrb[25].mxu1 }
 0x401   :  { %v2023_v2 = vadd.f32 %v2015_v38, %v7641_v58  ;;  %v2009_v6 = vmul.f32 %v2001_v44, %v7651_v15  ;;  %v1981_v10 = vadd.f32 %v5426_v40, %v1980_v0  ;;  %6927 = vtanh.f32 %v2029_v55 }
 0x402   :  { %v2018_v11 = vmul.f32 %v2010_v26, %v7648_v23  ;;  %v2004_v28 = vmul.f32 0.044715, %v7659_v60  ;;  %v2032_v29 = vmul.f32 0.7978846, %v2024_v50  ;;  %v1991_v61 = vmul.f32 0.5, %v7641_v58 }
 0x403   :  { %v2017_v33 = vmul.f32 %v2009_v6, %v7651_v15  ;;  %v2003_v39 = vmul.f32 0.044715, %v1981_v10  ;;  %v2031_v41 = vmul.f32 0.7978846, %v2023_v2  ;;  %v1992_v38 = vmul.f32 0.5, %v7639_v36 }
 0x404   :  { %v2026_v42 = vadd.f32 %v2018_v11, %v7648_v23  ;;  %v2012_v17 = vmul.f32 %v2004_v28, %v7659_v60  ;;  %6929 = vtanh.f32 %v2032_v29  ;;  %v1993_v50 = vmul.f32 0.5, %v7651_v15 }
 0x405   :  { %v2025_v43 = vadd.f32 %v2017_v33, %v7651_v15  ;;  %v2011_v49 = vmul.f32 %v2003_v39, %v1981_v10  ;;  %6931 = vtanh.f32 %v2031_v41  ;;  %v1994_v0 = vmul.f32 0.5, %v7648_v23 }
 0x406   :  { %v2020_v40 = vmul.f32 %v2012_v17, %v7659_v60  ;;  %v2034_v51 = vmul.f32 0.7978846, %v2026_v42  ;;  %v1995_v36 = vmul.f32 0.5, %v1981_v10  ;;  %v1996_v33 = vmul.f32 0.5, %v7659_v60 }
 0x407   :  { %v2019_v54 = vmul.f32 %v2011_v49, %v1981_v10  ;;  %v2033_v3 = vmul.f32 0.7978846, %v2025_v43 }
 0x408   :  { %v2028_v8 = vadd.f32 %v2020_v40, %v7659_v60  ;;  %6933 = vtanh.f32 %v2034_v51 }
 0x409   :  { %v2027_v56 = vadd.f32 %v2019_v54, %v1981_v10  ;;  %6935 = vtanh.f32 %v2033_v3 }
 0x40a   :  { %v6926_v25 = vpop.eup %6925  ;;  %v2036_v57 = vmul.f32 0.7978846, %v2028_v8 }
 0x40b   :  { %v6928_v62 = vpop.eup %6927  ;;  %v2046_v63 = vadd.f32 1.0, %v6926_v25  ;;  %v2035_v4 = vmul.f32 0.7978846, %v2027_v56 }
 0x40c   :  { %v2045_v5 = vadd.f32 1.0, %v6928_v62  ;;  %6937 = vtanh.f32 %v2036_v57 }
 0x40d   :  { %6939 = vtanh.f32 %v2035_v4  ;;  %v2054_v14 = vmul.f32 %v2046_v63, %v1990_v27 }
 0x40e   :  { %v6930_v32 = vpop.eup %6929  ;;  %v2053_v13 = vmul.f32 %v2045_v5, %v1989_v46 }
 0x40f   :  { %v6932_v20 = vpop.eup %6931  ;;  %v2048_v18 = vadd.f32 1.0, %v6930_v32 }
 0x410   :  { %6177 = vmatprep.mubr.msk.f32.mxu1 %vm609_vm1, %v2053_v13  ;;  %v2047_v19 = vadd.f32 1.0, %v6932_v20 }
 0x411   :  { %6178 = vmatmul.mubr.msk.f32.vlgmr.msra.gmra.mrb[26].mxu1 %vm609_vm1, %v2054_v14  ;;  %v2056_v55 = vmul.f32 %v2048_v18, %v1992_v38 }
 0x412   :  { %v6934_v52 = vpop.eup %6933  ;;  %v2055_v44 = vmul.f32 %v2047_v19, %v1991_v61 }
 0x413   :  { %v6936_v59 = vpop.eup %6935  ;;  %v2050_v24 = vadd.f32 1.0, %v6934_v52 }
 0x414   :  { %6180 = vmatprep.mubr.msk.f32.mxu1 %vm609_vm1, %v2055_v44  ;;  %v2049_v26 = vadd.f32 1.0, %v6936_v59 }
 0x415   :  { %6181 = vmatmul.mubr.msk.f32.gmra.mrb[28].mxu1 %vm609_vm1, %v2056_v55  ;;  %v2058_v11 = vmul.f32 %v2050_v24, %v1994_v0 }
 0x416   :  { %v6938_v58 = vpop.eup %6937  ;;  %v2057_v2 = vmul.f32 %v2049_v26, %v1993_v50  ;;  %v7719_v50 = vpop.trf.xlu1  ;;  %v7028_v26 = vld [vmem:[%s7084_s13] sm:$0xff]  ;;  %s7046_s13 = smov 15  }
 0x417   :  { %v6940_v6 = vpop.eup %6939  ;;  %v2052_v28 = vadd.f32 1.0, %v6938_v58  ;;  %s5309_s3 = sld [smem:[%s8122_s0 + %s7046_s13]]  }
 0x418   :  { %6183 = vmatprep.mubr.msk.f32.mxu1 %vm609_vm1, %v2057_v2  ;;  %v2051_v29 = vadd.f32 1.0, %v6940_v6 }
 0x419   :  { %6184 = vmatmul.mubr.msk.f32.gmra.mrb[30].mxu1 %vm609_vm1, %v2058_v11  ;;  %v2060_v15 = vmul.f32 %v2052_v28, %v1996_v33 }
 0x41a   :  { %v2059_v39 = vmul.f32 %v2051_v29, %v1995_v36 }
 0x41c   :  { %6186 = vmatprep.mubr.msk.f32.mxu1 %vm609_vm1, %v2059_v39 }
 0x41d   :  { %6187 = vmatmul.mubr.msk.f32.gmra.mrb[32].mxu1 %vm609_vm1, %v2060_v15 }
 0x41e   :  { %6219 = vmatprep.mubr.msk.f32.mxu1 %vm1194_vm4, %v7631_v47 }
 0x453   :  { %v6193_v23 = vpop.f32.mrb[30].mxu0 }
 0x454   :  { %v2445_v41 = vsub.f32 %v7425_v1, %v6193_v23  ;;  %v2405_v42 = vpop.f32.mrb[31].mxu0 }
 0x455   :  { %v2444_v10 = vsub.f32 %v7429_v7, %v2405_v42 }
 0x456   :  { %v2454_v17 = vmul.f32 1.442695, %v2445_v41 }
 0x457   :  { %v2452_v43 = vmul.f32 1.442695, %v2444_v10  ;;  %v6196_v49 = vpop.f32.mrb[32].mxu0 }
 0x458   :  { %6941 = vpow2.f32 %v2454_v17  ;;  %v2447_v60 = vsub.f32 %v7431_v9, %v6196_v49  ;;  %v2415_v40 = vpop.f32.mrb[33].mxu0 }
 0x459   :  { %6943 = vpow2.f32 %v2452_v43  ;;  %v2446_v51 = vsub.f32 %v7435_v16, %v2415_v40 }
 0x45a   :  { %v2458_v54 = vmul.f32 1.442695, %v2447_v60 }
 0x45b   :  { %v2456_v3 = vmul.f32 1.442695, %v2446_v51  ;;  %v6199_v8 = vpop.f32.mrb[34].mxu0 }
 0x45c   :  { %6945 = vpow2.f32 %v2458_v54  ;;  %v2449_v47 = vsub.f32 %v7441_v21, %v6199_v8  ;;  %v2425_v1 = vpop.f32.mrb[35].mxu0 }
 0x45d   :  { %6947 = vpow2.f32 %v2456_v3  ;;  %v2448_v7 = vsub.f32 %v7445_v22, %v2425_v1 }
 0x45e   :  { %v2462_v56 = vmul.f32 1.442695, %v2449_v47 }
 0x45f   :  { %v2460_v25 = vmul.f32 1.442695, %v2448_v7  ;;  %v6202_v57 = vpop.f32.mrb[36].mxu0 }
 0x460   :  { %6949 = vpow2.f32 %v2462_v56  ;;  %v2451_v9 = vsub.f32 %v7452_v35, %v6202_v57  ;;  %v2435_v62 = vpop.f32.mrb[37].mxu0 }
 0x461   :  { %6951 = vpow2.f32 %v2460_v25  ;;  %v2450_v16 = vsub.f32 %v7448_v34, %v2435_v62 }
 0x462   :  { %v7695_v63 = vpop.eup %6941  ;;  %v2466_v4 = vmul.f32 1.442695, %v2451_v9 }
 0x463   :  { %v7697_v46 = vpop.eup %6943  ;;  %v2464_v21 = vmul.f32 1.442695, %v2450_v16  ;;  %v2469_v5 = vadd.f32 1e-12, %v7695_v63 }
 0x464   :  { %6953 = vpow2.f32 %v2466_v4  ;;  %v2468_v22 = vadd.f32 1e-12, %v7697_v46 }
 0x465   :  { %6955 = vpow2.f32 %v2464_v21 }
 0x466   :  { %v7701_v27 = vpop.eup %6945  ;;  %v6599_v32 = vpack.c.bf16 %v2469_v5, %v2468_v22  ;;  %v5435_v5 = vld [vmem:[%s5309_s3] ss:$0 sm:$0xff]  ;;  %s7054_s3 = smov 23  }
 0x467   :  { %v7703_v35 = vpop.eup %6947  ;;  %v2471_v13 = vadd.f32 1e-12, %v7701_v27 }
 0x468   :  { %6600 = vmatprep.subr.bf16.mxu1 %v6599_v32  ;;  %v2470_v34 = vadd.f32 1e-12, %v7703_v35 }
 0x469   :  { %6602 = vmatpush3.bf16.msra.mxu1 %v6599_v32 }
 0x46a   :  { %v7707_v20 = vpop.eup %6949  ;;  %v6603_v14 = vpack.c.bf16 %v2471_v13, %v2470_v34 }
 0x46b   :  { %v7709_v18 = vpop.eup %6951  ;;  %v2473_v61 = vadd.f32 1e-12, %v7707_v20 }
 0x46c   :  { %6604 = vmatprep.subr.bf16.mxu1 %v6603_v14  ;;  %v2472_v19 = vadd.f32 1e-12, %v7709_v18 }
 0x46d   :  { %6606 = vmatpush3.bf16.msra.mxu1 %v6603_v14 }
 0x46e   :  { %v7713_v38 = vpop.eup %6953  ;;  %v6607_v52 = vpack.c.bf16 %v2473_v61, %v2472_v19 }
 0x46f   :  { %v7715_v44 = vpop.eup %6955  ;;  %v2475_v59 = vadd.f32 1e-12, %v7713_v38 }
 0x470   :  { %6608 = vmatprep.subr.bf16.mxu1 %v6607_v52  ;;  %v2474_v55 = vadd.f32 1e-12, %v7715_v44 }
 0x471   :  { %6610 = vmatpush3.bf16.msra.mxu1 %v6607_v52 }
 0x472   :  { %v6611_v24 = vpack.c.bf16 %v2475_v59, %v2474_v55 }
 0x474   :  { %6612 = vmatprep.subr.bf16.mxu1 %v6611_v24 }
 0x475   :  { %6614 = vmatpush3.bf16.msra.mxu1 %v6611_v24 }
 0x478   :  { %6220 = vmatmul.mubr.msk.f32.vlgmr.msra.gmra.mrb[34].mxu1 %vm1194_vm4, %v7719_v50 }
 0x479   :  { %6226 = vmatprep.mubr.msk.f32.mxu1 %vm245_vm0, %v7028_v26 }
 0x4e4   :  { %v7725_v0 = vpop.f32.mrb[26].mxu1 }
 0x4e5   :  { %v7727_v58 = vpop.f32.mrb[27].mxu1  ;;  %v2163_v32 = vadd.f32 %v7725_v0, %v5435_v5 }
 0x4e8   :  { %v7729_v2 = vpop.f32.mrb[28].mxu1 }
 0x4e9   :  { %v7731_v6 = vpop.f32.mrb[29].mxu1 }
 0x4ea   :  { %v2168_v52 = vadd.f32 %v5435_v5, %v7731_v6 }
 0x4ec   :  { %v7733_v11 = vpop.f32.mrb[30].mxu1 }
 0x4ed   :  { %v7735_v28 = vpop.f32.mrb[31].mxu1 }
 0x4f0   :  { %v7737_v36 = vpop.f32.mrb[32].mxu1 }
 0x4f1   :  { %v7739_v29 = vpop.f32.mrb[33].mxu1 }
 0x54b   :  { %v6221_v33 = vpop.f32.mrb[34].mxu1 }
 0x54c   :  { %v2580_v39 = vpop.f32.mrb[35].mxu1 }
 0x54d   :  { %v6615_v15 = vpack.c.bf16 %v6221_v33, %v2580_v39  ;;  %v2183_v33 = vadd.f32 %v7733_v11, %v5435_v5  ;;  %v2178_v39 = vadd.f32 %v5435_v5, %v7735_v28 }
 0x54f   :  { %6616 = vmatprep.subr.bf16.mxu1 %v6615_v15 }
 0x550   :  { %6618 = vmatpush3.bf16.msra.mxu1 %v6615_v15 }
 0x553   :  { %6227 = vmatmul.mubr.msk.f32.vlgmr.msra.gmra.mrb[36].mxu1 %vm245_vm0, %v7591_v30 }
 0x554   :  { %6229 = vmatprep.mubr.msk.f32.mxu1 %vm245_vm0, %v7599_v12 }
 0x557   :  { %6230 = vmatmul.mubr.msk.f32.gmra.mrb[38].mxu1 %vm245_vm0, %v7604_v37 }
 0x558   :  { %6232 = vmatprep.mubr.msk.f32.mxu1 %vm245_vm0, %v7609_v31 }
 0x55b   :  { %6233 = vmatmul.mubr.msk.f32.gmra.mrb[40].mxu1 %vm245_vm0, %v7614_v48 }
 0x55c   :  { %6235 = vmatprep.mubr.msk.f32.mxu1 %vm245_vm0, %v7619_v53 }
 0x55f   :  { %6236 = vmatmul.mubr.msk.f32.gmra.mrb[42].mxu1 %vm245_vm0, %v7624_v45 }
 0x626   :  { %v6228_v23 = vpop.f32.mrb[36].mxu1 }
 0x627   :  { %6957 = vrcp.f32 %v6228_v23  ;;  %v2655_v30 = vpop.f32.mrb[37].mxu1 }
 0x628   :  { %6959 = vrcp.f32 %v2655_v30 }
 0x62a   :  { %v6231_v12 = vpop.f32.mrb[38].mxu1 }
 0x62b   :  { %6961 = vrcp.f32 %v6231_v12  ;;  %v2665_v41 = vpop.f32.mrb[39].mxu1 }
 0x62c   :  { %6963 = vrcp.f32 %v2665_v41 }
 0x62e   :  { %v6234_v37 = vpop.f32.mrb[40].mxu1 }
 0x62f   :  { %v2675_v42 = vpop.f32.mrb[41].mxu1  ;;  %6965 = vrcp.f32 %v6234_v37  ;;  %v2193_v37 = vadd.f32 %v7737_v36, %v5435_v5 }
 0x630   :  { %6967 = vrcp.f32 %v2675_v42  ;;  %v2188_v42 = vadd.f32 %v5435_v5, %v7739_v29 }
 0x631   :  { %v6958_v31 = vpop.eup %6957 }
 0x632   :  { %v6960_v10 = vpop.eup %6959  ;;  %v6237_v48 = vpop.f32.mrb[42].mxu1  ;;  %v2697_v17 = vmul.f32 %v6958_v31, %v7695_v63 }
 0x633   :  { %v2685_v53 = vpop.f32.mrb[43].mxu1  ;;  %v2695_v43 = vmul.f32 %v6960_v10, %v7697_v46 }
 0x634   :  { %v2714_v45 = vsel %vm2710_vm7, %v2697_v17, 0.0  ;;  %6969 = vrcp.f32 %v2685_v53  ;;  %v7029_v53 = vld [vmem:[%s7074_s5] sm:$0xff] }
 0x635   :  { %v6962_v49 = vpop.eup %6961  ;;  %2715 = vadd.xlane.f32.xlu0 %v2714_v45  ;;  %v2711_v60 = vsel %vm2710_vm7, %v2695_v43, 0.0  ;;  %6971 = vrcp.f32 %v6237_v48  ;;  %v7030_v43 = vld [vmem:[%s7074_s5 + $0x8] sm:$0xff]  ;;  %s7047_s5 = smov 16  }
 0x636   :  { %v2701_v40 = vmul.f32 %v6962_v49, %v7701_v27  ;;  %v6964_v51 = vpop.eup %6963  ;;  %s5310_s7 = sld [smem:[%s8122_s0 + %s7047_s5]]  }
 0x637   :  { %v2699_v3 = vmul.f32 %v6964_v51, %v7703_v35  ;;  %v2158_v35 = vadd.f32 %v5435_v5, %v7727_v58 }
 0x638   :  { %v2720_v54 = vsel %vm2710_vm7, %v2701_v40, 0.0 }
 0x639   :  { %2712 = vadd.xlane.f32.xlu0 %v2711_v60  ;;  %v6966_v8 = vpop.eup %6965  ;;  %v2717_v47 = vsel %vm2710_vm7, %v2699_v3, 0.0 }
 0x63a   :  { %v2705_v1 = vmul.f32 %v6966_v8, %v7707_v20  ;;  %v6968_v7 = vpop.eup %6967 }
 0x63b   :  { %v2703_v25 = vmul.f32 %v6968_v7, %v7709_v18 }
 0x63c   :  { %v2726_v56 = vsel %vm2710_vm7, %v2705_v1, 0.0 }
 0x63d   :  { %2721 = vadd.xlane.f32.xlu0 %v2720_v54  ;;  %v2723_v9 = vsel %vm2710_vm7, %v2703_v25, 0.0  ;;  %v188_v25 = vld [vmem:[%s5310_s7 + $0x8] sm:$0xff] }
 0x63e   :  { %v6970_v57 = vpop.eup %6969 }
 0x63f   :  { %v2707_v62 = vmul.f32 %v6970_v57, %v7715_v44  ;;  %v6972_v16 = vpop.eup %6971 }
 0x640   :  { %v2709_v4 = vmul.f32 %v6972_v16, %v7713_v38  ;;  %v2173_v38 = vadd.f32 %v7729_v2, %v5435_v5 }
 0x641   :  { %2718 = vadd.xlane.f32.xlu0 %v2717_v47  ;;  %v2729_v63 = vsel %vm2710_vm7, %v2707_v62, 0.0  ;;  %v190_v62 = vld [vmem:[%s5310_s7 + $0x18] sm:$0xff] }
 0x642   :  { %v2732_v46 = vsel %vm2710_vm7, %v2709_v4, 0.0  ;;  %v193_v4 = vld [vmem:[%s7803_s11 + $0x8] sm:$0xff]  ;;  %vm5286_vm7 = vcmask 195584  }
 0x645   :  { %2727 = vadd.xlane.f32.xlu0 %v2726_v56  ;;  %v187_v56 = vld [vmem:[%s5310_s7] sm:$0xff] }
 0x646   :  { %v6635_v57 = vpack.c.bf16 %v188_v25, %v187_v56 }
 0x648   :  { %6636 = vmatprep.subr.bf16.mxu1 %v6635_v57 }
 0x649   :  { %2724 = vadd.xlane.f32.xlu0 %v2723_v9  ;;  %6638 = vmatpush3.bf16.msra.mxu1 %v6635_v57  ;;  %v189_v9 = vld [vmem:[%s5310_s7 + $0x10] sm:$0xff]  ;;  %s5317_s7 = sld [smem:[%s8122_s0 + %s7054_s3]]   ;;  %s7062_s3 = smov 30  }
 0x64a   :  { %v6639_v16 = vpack.c.bf16 %v190_v62, %v189_v9 }
 0x64c   :  { %6640 = vmatprep.subr.bf16.mxu1 %v6639_v16 }
 0x64d   :  { %2730 = vadd.xlane.f32.xlu0 %v2729_v63  ;;  %6642 = vmatpush3.bf16.msra.mxu1 %v6639_v16  ;;  %v192_v63 = vld [vmem:[%s7803_s11] sm:$0xff] }
 0x651   :  { %2733 = vadd.xlane.f32.xlu0 %v2732_v46  ;;  %v6643_v46 = vpack.c.bf16 %v193_v4, %v192_v63  ;;  %v5470_v4 = vld [vmem:[%s5313_s29] ss:$0 sm:$0xff]  ;;  %s7931_s29 = sld [smem:[%s8122_s0 + %s7060_s26]]  }
 0x6c2   :  { %v2716_v21 = vpop.xlane.xlu0 %2715 }
 0x6c3   :  { %v2737_v22 = vmul.f32 0.5, %v2716_v21 }
 0x6c5   :  { %v2745_v34 = vmul.f32 %v2737_v22, %v2163_v32 }
 0x6c6   :  { %v2713_v27 = vpop.xlane.xlu0 %2712 }
 0x6c7   :  { %v2736_v13 = vmul.f32 0.5, %v2713_v27 }
 0x6c9   :  { %v2744_v20 = vmul.f32 %v2736_v13, %v2158_v35 }
 0x6ca   :  { %v2722_v14 = vpop.xlane.xlu0 %2721 }
 0x6cb   :  { %v6619_v18 = vpack.c.bf16 %v2745_v34, %v2744_v20  ;;  %v2739_v61 = vmul.f32 0.5, %v2722_v14  ;;  %v7813_v34 = vld [vmem:[%s5314_s16] ss:$0 sm:$0xff]  ;;  %s7884_s16 = sld [smem:[%s8122_s0 + %s7056_s12]]  }
 0x6cc   :  { %v7815_v14 = vld [vmem:[%s5315_s20] ss:$0 sm:$0xff]  ;;  %s7914_s20 = sld [smem:[%s8122_s0 + %s7058_s17]]  }
 0x6cd   :  { %6620 = vmatprep.subr.bf16.mxu0 %v6619_v18  ;;  %v2747_v59 = vmul.f32 %v2739_v61, %v2173_v38 }
 0x6ce   :  { %6622 = vmatpush3.bf16.msra.mxu0 %v6619_v18  ;;  %v2719_v19 = vpop.xlane.xlu0 %2718 }
 0x6cf   :  { %v2738_v44 = vmul.f32 0.5, %v2719_v19 }
 0x6d1   :  { %v2746_v55 = vmul.f32 %v2738_v44, %v2168_v52 }
 0x6d2   :  { %v2728_v24 = vpop.xlane.xlu0 %2727 }
 0x6d3   :  { %v6623_v26 = vpack.c.bf16 %v2747_v59, %v2746_v55  ;;  %v2741_v0 = vmul.f32 0.5, %v2728_v24  ;;  %v194_v59 = vld [vmem:[%s7803_s11 + $0x10] sm:$0xff]  ;;  %v195_v55 = vld [vmem:[%s7803_s11 + $0x18] sm:$0xff] }
 0x6d4   :  { %v6647_v24 = vpack.c.bf16 %v195_v55, %v194_v59 }
 0x6d5   :  { %6624 = vmatprep.subr.bf16.mxu0 %v6623_v26  ;;  %v2749_v23 = vmul.f32 %v2741_v0, %v2183_v33  ;;  %v197_v0 = vld [vmem:[%s7803_s11 + $0x28] sm:$0xff]  ;;  %v198_v33 = vld [vmem:[%s7803_s11 + $0x30] sm:$0xff] }
 0x6d6   :  { %6626 = vmatpush3.bf16.msra.mxu0 %v6623_v26  ;;  %v2725_v58 = vpop.xlane.xlu0 %2724  ;;  %v196_v26 = vld [vmem:[%s7803_s11 + $0x20] sm:$0xff] }
 0x6d7   :  { %v2740_v15 = vmul.f32 0.5, %v2725_v58  ;;  %v6651_v58 = vpack.c.bf16 %v197_v0, %v196_v26  ;;  %v213_v0 = vld [vmem:[%s5316_s2 + $0x10] sm:$0xff] }
 0x6d9   :  { %v2748_v30 = vmul.f32 %v2740_v15, %v2178_v39  ;;  %v199_v39 = vld [vmem:[%s7803_s11 + $0x38] sm:$0xff] }
 0x6da   :  { %v2731_v12 = vpop.xlane.xlu0 %2730  ;;  %v6655_v15 = vpack.c.bf16 %v199_v39, %v198_v33 }
 0x6db   :  { %v6627_v2 = vpack.c.bf16 %v2749_v23, %v2748_v30  ;;  %v2742_v6 = vmul.f32 0.5, %v2731_v12  ;;  %v200_v23 = vld [vmem:[%s7803_s11 + $0x40] sm:$0xff]  ;;  %v201_v30 = vld [vmem:[%s7803_s11 + $0x48] sm:$0xff]  ;;  %v202_v12 = vld [vmem:[%s7803_s11 + $0x50] sm:$0xff] }
 0x6dd   :  { %6628 = vmatprep.subr.bf16.mxu0 %v6627_v2  ;;  %v2750_v10 = vmul.f32 %v2742_v6, %v2188_v42  ;;  %v203_v6 = vld [vmem:[%s7803_s11 + $0x58] sm:$0xff]  ;;  %v205_v42 = vld [vmem:[%s7803_s11 + $0x68] sm:$0xff] }
 0x6de   :  { %6630 = vmatpush3.bf16.msra.mxu0 %v6627_v2  ;;  %v2734_v41 = vpop.xlane.xlu0 %2733  ;;  %v6659_v2 = vpack.c.bf16 %v201_v30, %v200_v23 }
 0x6df   :  { %v2743_v31 = vmul.f32 0.5, %v2734_v41  ;;  %v6663_v41 = vpack.c.bf16 %v203_v6, %v202_v12 }
 0x6e1   :  { %v2751_v11 = vmul.f32 %v2743_v31, %v2193_v37  ;;  %v204_v37 = vld [vmem:[%s7803_s11 + $0x60] sm:$0xff] }
 0x6e2   :  { %v6667_v31 = vpack.c.bf16 %v205_v42, %v204_v37 }
 0x6e3   :  { %v6631_v48 = vpack.c.bf16 %v2751_v11, %v2750_v10  ;;  %v206_v10 = vld [vmem:[%s7803_s11 + $0x70] sm:$0xff]  ;;  %v207_v11 = vld [vmem:[%s7803_s11 + $0x78] sm:$0xff]  ;;  %s5299_s11 = sld [smem:[%s8122_s0 + %s7055_s8]]   ;;  %s7063_s8 = smov 29  }
 0x6e5   :  { %6632 = vmatprep.subr.bf16.mxu0 %v6631_v48 }
 0x6e6   :  { %6634 = vmatpush3.bf16.msra.mxu0 %v6631_v48  ;;  %v6671_v48 = vpack.c.bf16 %v207_v11, %v206_v10 }
 0x6e7   :  { %6644 = vmatprep.subr.bf16.mxu0 %v6643_v46 }
 0x6e9   :  { %6255 = vmatmul.mubr.msk.f32.vlgmr.msra.gmra.mrb[38].mxu0 %vm1194_vm4, %v7719_v50  ;;  %vm3177_vm4 = vcmask 64512  }
 0x6ea   :  { %6646 = vmatpush3.bf16.msra.mxu0 %v6643_v46 }
 0x6eb   :  { %6648 = vmatprep.subr.bf16.mxu0 %v6647_v24 }
 0x6ee   :  { %6650 = vmatpush3.bf16.msra.mxu0 %v6647_v24  ;;  %v212_v24 = vld [vmem:[%s5316_s2 + $0x8] sm:$0xff] }
 0x6ef   :  { %6652 = vmatprep.subr.bf16.mxu0 %v6651_v58 }
 0x6f2   :  { %6654 = vmatpush3.bf16.msra.mxu0 %v6651_v58  ;;  %v214_v58 = vld [vmem:[%s5316_s2 + $0x18] sm:$0xff] }
 0x6f3   :  { %6656 = vmatprep.subr.bf16.mxu0 %v6655_v15  ;;  %v6679_v33 = vpack.c.bf16 %v214_v58, %v213_v0 }
 0x6f6   :  { %6658 = vmatpush3.bf16.msra.mxu0 %v6655_v15 }
 0x6f7   :  { %6660 = vmatprep.subr.bf16.mxu0 %v6659_v2 }
 0x6fa   :  { %6662 = vmatpush3.bf16.msra.mxu0 %v6659_v2 }
 0x6fb   :  { %6664 = vmatprep.subr.bf16.mxu0 %v6663_v41 }
 0x6fe   :  { %6666 = vmatpush3.bf16.msra.mxu0 %v6663_v41 }
 0x6ff   :  { %6668 = vmatprep.subr.bf16.mxu0 %v6667_v31 }
 0x702   :  { %6670 = vmatpush3.bf16.msra.mxu0 %v6667_v31 }
 0x703   :  { %6672 = vmatprep.subr.bf16.mxu0 %v6671_v48 }
 0x706   :  { %6674 = vmatpush3.bf16.msra.mxu0 %v6671_v48 }
 0x7bc   :  { %v7784_v28 = vpop.f32.mrb[38].mxu0 }
 0x7bd   :  { %v7786_v17 = vpop.f32.mrb[39].mxu0  ;;  %v2828_v36 = vadd.f32 %v7030_v43, %v7784_v28 }
 0x7be   :  { %v2827_v45 = vadd.f32 %v7029_v53, %v7786_v17  ;;  %v5467_v53 = vld [vmem:[%s5311_s25] ss:$0 sm:$0xff]  ;;  %s7923_s25 = sld [smem:[%s8122_s0 + %s7059_s21]]  }
 0x7bf   :  { %v2832_v49 = vsel %vm609_vm1, %v2828_v36, 0.0 }
 0x7c0   :  { %v2829_v29 = vsel %vm609_vm1, %v2827_v45, 0.0 }
 0x7c1   :  { %2830 = vadd.xlane.f32.xlu0 %v2829_v29 }
 0x7c5   :  { %2833 = vadd.xlane.f32.xlu0 %v2832_v49 }
 0x84e   :  { %v2831_v60 = vpop.xlane.xlu0 %2830 }
 0x84f   :  { %v2836_v40 = vmul.f32 0.03125, %v2831_v60 }
 0x851   :  { %v2838_v51 = vsub.f32 %v2827_v45, %v2836_v40 }
 0x852   :  { %v2834_v50 = vpop.xlane.xlu0 %2833 }
 0x853   :  { %v2837_v54 = vmul.f32 0.03125, %v2834_v50  ;;  %v2840_v3 = vmul.f32 %v2838_v51, %v2838_v51 }
 0x855   :  { %v2839_v8 = vsub.f32 %v2828_v36, %v2837_v54  ;;  %v2842_v47 = vsel %vm609_vm1, %v2840_v3, 0.0 }
 0x856   :  { %2843 = vadd.xlane.f32.xlu1 %v2842_v47 }
 0x857   :  { %v2841_v1 = vmul.f32 %v2839_v8, %v2839_v8 }
 0x859   :  { %v2845_v7 = vsel %vm609_vm1, %v2841_v1, 0.0 }
 0x85a   :  { %2846 = vadd.xlane.f32.xlu0 %v2845_v7 }
 0x8e3   :  { %v2844_v21 = vpop.xlane.xlu1 %2843 }
 0x8e4   :  { %v2848_v5 = vmul.f32 0.03125, %v2844_v21 }
 0x8e6   :  { %v2850_v22 = vadd.f32 1e-05, %v2848_v5 }
 0x8e7   :  { %v2847_v27 = vpop.xlane.xlu0 %2846 }
 0x8e8   :  { %6973 = vrsqrt.f32 %v2850_v22  ;;  %v2849_v32 = vmul.f32 0.03125, %v2847_v27 }
 0x8ea   :  { %v2851_v35 = vadd.f32 1e-05, %v2849_v32 }
 0x8ec   :  { %6975 = vrsqrt.f32 %v2851_v35 }
 0x8f2   :  { %v6974_v13 = vpop.eup %6973 }
 0x8f3   :  { %v2854_v20 = vmul.f32 %v6974_v13, %v2838_v51 }
 0x8f5   :  { %v2862_v18 = vmul.f32 %v7813_v34, %v2854_v20 }
 0x8f6   :  { %v6976_v61 = vpop.eup %6975 }
 0x8f7   :  { %v2855_v19 = vmul.f32 %v6976_v61, %v2839_v8  ;;  %v2870_v38 = vadd.f32 %v7815_v14, %v2862_v18 }
 0x8f9   :  { %v2863_v52 = vmul.f32 %v7813_v34, %v2855_v19  ;;  %6265 = vmatprep.mubr.msk.f32.mxu1 %vm609_vm1, %v2870_v38 }
 0x8fb   :  { %v2871_v44 = vadd.f32 %v7815_v14, %v2863_v52 }
 0x8fd   :  { %6266 = vmatmul.mubr.msk.f32.vlgmr.msra.gmra.mrb[44].mxu1 %vm609_vm1, %v2871_v44 }
 0x9d0   :  { %v6267_v45 = vpop.f32.mrb[44].mxu1 }
 0x9d1   :  { %v2956_v43 = vadd.f32 %v6267_v45, %v5467_v53  ;;  %v2950_v36 = vpop.f32.mrb[45].mxu1 }
 0x9d2   :  { %v2951_v29 = vadd.f32 %v5467_v53, %v2950_v36  ;;  %v5471_v53 = vld [vmem:[%s5317_s7] ss:$0 sm:$0xff]  ;;  %s7950_s7 = sld [smem:[%s8122_s0 + %s7062_s3]]  }
 0x9d3   :  { %v2962_v49 = vmul.f32 0.044715, %v2956_v43  ;;  %v2960_v62 = vmul.f32 0.5, %v2956_v43 }
 0x9d4   :  { %v2961_v60 = vmul.f32 0.044715, %v2951_v29  ;;  %v2959_v57 = vmul.f32 0.5, %v2951_v29 }
 0x9d5   :  { %v2964_v40 = vmul.f32 %v2962_v49, %v2956_v43  ;;  %v3184_v49 = vlaneseq }
 0x9d6   :  { %v2963_v51 = vmul.f32 %v2961_v60, %v2951_v29 }
 0x9d7   :  { %v2966_v50 = vmul.f32 %v2964_v40, %v2956_v43  ;;  %v3185_v60 = vand.u32 127, %v3184_v49 }
 0x9d8   :  { %v2965_v54 = vmul.f32 %v2963_v51, %v2951_v29 }
 0x9d9   :  { %v2968_v3 = vadd.f32 %v2966_v50, %v2956_v43  ;;  %v7869_v40 = vcvt.s32.f32 %v3185_v60 }
 0x9da   :  { %v2967_v8 = vadd.f32 %v2965_v54, %v2951_v29 }
 0x9db   :  { %v2970_v47 = vmul.f32 0.7978846, %v2968_v3 }
 0x9dc   :  { %v2969_v1 = vmul.f32 0.7978846, %v2967_v8 }
 0x9dd   :  { %6977 = vtanh.f32 %v2970_v47 }
 0x9de   :  { %6979 = vtanh.f32 %v2969_v1  ;;  %v7886_v1 = vld [vmem:[%s5299_s11] sm:$0xff]  ;;  %s7959_s11 = sld [smem:[%s8122_s0 + %s7063_s8]]  }
 0x9e7   :  { %v6978_v7 = vpop.eup %6977 }
 0x9e8   :  { %v6980_v56 = vpop.eup %6979  ;;  %v2974_v25 = vadd.f32 1.0, %v6978_v7  ;;  %v3284_v7 = vld [vmem:[%s7884_s16] sm:$0xff] }
 0x9e9   :  { %v2973_v9 = vadd.f32 1.0, %v6980_v56  ;;  %v3285_v56 = vld [vmem:[%s7884_s16 + $0x8] sm:$0xff] }
 0x9ea   :  { %v2976_v63 = vmul.f32 %v2974_v25, %v2960_v62  ;;  %v6683_v25 = vpack.c.bf16 %v3285_v56, %v3284_v7 }
 0x9eb   :  { %v2975_v16 = vmul.f32 %v2973_v9, %v2959_v57  ;;  %v7057_v9 = vmov 0.0  }
 0x9ed   :  { %6300 = vmatprep.mubr.f32.mxu0 %v2975_v16  ;;  %v3286_v16 = vld [vmem:[%s7884_s16 + $0x10] sm:$0xff] }
 0x9ee   :  { %6301 = vmatmul.mubr.f32.vlgmr.msra.gmra.mrb[40].mxu0 %v2976_v63  ;;  %v3287_v63 = vld [vmem:[%s7884_s16 + $0x18] sm:$0xff] }
 0xac1   :  { %v6302_v46 = vpop.f32.mrb[40].mxu0 }
 0xac2   :  { %v3055_v21 = vadd.f32 %v6302_v46, %v5470_v4  ;;  %v3049_v5 = vpop.f32.mrb[41].mxu0  ;;  %v6687_v46 = vpack.c.bf16 %v3287_v63, %v3286_v16 }
 0xac3   :  { %v3050_v22 = vadd.f32 %v5470_v4, %v3049_v5  ;;  %v3288_v5 = vld [vmem:[%s7884_s16 + $0x20] sm:$0xff] }
 0xac4   :  { %v3059_v27 = vadd.f32 %v7784_v28, %v3055_v21 }
 0xac5   :  { %v3058_v32 = vadd.f32 %v3050_v22, %v7786_v17  ;;  %v211_v17 = vld [vmem:[%s5316_s2] sm:$0xff]  ;;  %s7941_s2 = sld [smem:[%s8122_s0 + %s7061_s30]]  }
 0xac6   :  { %v3063_v13 = vsel %vm609_vm1, %v3059_v27, 0.0  ;;  %v6675_v26 = vpack.c.bf16 %v212_v24, %v211_v17 }
 0xac7   :  { %v3060_v35 = vsel %vm609_vm1, %v3058_v32, 0.0 }
 0xac8   :  { %3061 = vadd.xlane.f32.xlu0 %v3060_v35  ;;  %6676 = vmatprep.subr.bf16.mxu1 %v6675_v26  ;;  %v3291_v35 = vld [vmem:[%s7914_s20 + $0x8] sm:$0xff] }
 0xac9   :  { %6678 = vmatpush3.bf16.msra.mxu1 %v6675_v26 }
 0xaca   :  { %6680 = vmatprep.subr.bf16.mxu1 %v6679_v33 }
 0xacc   :  { %3064 = vadd.xlane.f32.xlu0 %v3063_v13  ;;  %v3292_v13 = vld [vmem:[%s7914_s20 + $0x10] sm:$0xff] }
 0xacd   :  { %6682 = vmatpush3.bf16.msra.mxu1 %v6679_v33 }
 0xace   :  { %6314 = vmatprep.subr.mxu1 %v7886_v1 }
 0xb55   :  { %v3062_v20 = vpop.xlane.xlu0 %3061 }
 0xb56   :  { %v3066_v18 = vmul.f32 0.03125, %v3062_v20 }
 0xb58   :  { %v3068_v61 = vsub.f32 %v3058_v32, %v3066_v18  ;;  %v3290_v32 = vld [vmem:[%s7914_s20] sm:$0xff]  ;;  %v3293_v18 = vld [vmem:[%s7914_s20 + $0x18] sm:$0xff] }
 0xb59   :  { %v3065_v19 = vpop.xlane.xlu0 %3064  ;;  %v6691_v20 = vpack.c.bf16 %v3291_v35, %v3290_v32  ;;  %v3300_v35 = vld [vmem:[%s7950_s7] sm:$0xff] }
 0xb5a   :  { %v3067_v38 = vmul.f32 0.03125, %v3065_v19  ;;  %v3070_v52 = vmul.f32 %v3068_v61, %v3068_v61  ;;  %v5480_v19 = vld [vmem:[%s7923_s25] ss:$0 sm:$0xff] }
 0xb5c   :  { %v3069_v44 = vsub.f32 %v3059_v27, %v3067_v38  ;;  %v3072_v59 = vsel %vm609_vm1, %v3070_v52, 0.0 }
 0xb5d   :  { %3073 = vadd.xlane.f32.xlu0 %v3072_v59 }
 0xb5e   :  { %v3071_v55 = vmul.f32 %v3069_v44, %v3069_v44 }
 0xb60   :  { %v3075_v28 = vsel %vm609_vm1, %v3071_v55, 0.0 }
 0xb61   :  { %3076 = vadd.xlane.f32.xlu0 %v3075_v28 }
 0xbea   :  { %v3074_v39 = vpop.xlane.xlu0 %3073 }
 0xbeb   :  { %v3078_v15 = vmul.f32 0.03125, %v3074_v39 }
 0xbed   :  { %v3080_v23 = vadd.f32 1e-05, %v3078_v15 }
 0xbee   :  { %v3077_v30 = vpop.xlane.xlu0 %3076 }
 0xbef   :  { %6981 = vrsqrt.f32 %v3080_v23  ;;  %v3079_v12 = vmul.f32 0.03125, %v3077_v30 }
 0xbf1   :  { %v3081_v2 = vadd.f32 1e-05, %v3079_v12 }
 0xbf3   :  { %6983 = vrsqrt.f32 %v3081_v2 }
 0xbf9   :  { %v6982_v6 = vpop.eup %6981 }
 0xbfa   :  { %v3084_v41 = vmul.f32 %v6982_v6, %v3068_v61  ;;  %v6695_v61 = vpack.c.bf16 %v3293_v18, %v3292_v13  ;;  %v3301_v13 = vld [vmem:[%s7950_s7 + $0x8] sm:$0xff] }
 0xbfb   :  { %v6707_v18 = vpack.c.bf16 %v3301_v13, %v3300_v35  ;;  %v5504_v35 = vld [vmem:[%s7914_s20 + $0x28] sm:$0xff]  ;;  %v5505_v13 = vld [vmem:[%s7914_s20 + $0x30] sm:$0xff] }
 0xbfc   :  { %v3086_v37 = vmul.f32 %v7813_v34, %v3084_v41 }
 0xbfd   :  { %v6984_v42 = vpop.eup %6983 }
 0xbfe   :  { %v3085_v31 = vmul.f32 %v6984_v42, %v3069_v44  ;;  %v3088_v10 = vadd.f32 %v7815_v14, %v3086_v37 }
 0xc00   :  { %6311 = vmatprep.mubr.msk.f32.mxu1 %vm609_vm1, %v3088_v10  ;;  %v3087_v11 = vmul.f32 %v7813_v34, %v3085_v31  ;;  %v3295_v31 = vld [vmem:[%s7931_s29] sm:$0xff] }
 0xc02   :  { %v3089_v48 = vadd.f32 %v7815_v14, %v3087_v11  ;;  %v3297_v11 = vld [vmem:[%s7931_s29 + $0x10] sm:$0xff] }
 0xc04   :  { %6312 = vmatmul.mubr.msk.f32.vlgmr.msra.gmra.mrb[46].mxu1 %vm609_vm1, %v3089_v48 }
 0xc05   :  { %6315 = vmatpush3.msra.mxu1 %v7886_v1 }
 0xc06   :  { %6684 = vmatprep.subr.bf16.mxu1 %v6683_v25 }
 0xcd7   :  { %v6313_v45 = vpop.f32.mrb[46].mxu1 }
 0xcd8   :  { %v3168_v43 = vpop.f32.mrb[47].mxu1  ;;  %v7863_v29 = vadd.f32 %v6313_v45, %v5471_v53 }
 0xcd9   :  { %v7861_v36 = vadd.f32 %v5471_v53, %v3168_v43  ;;  %v3298_v53 = vld [vmem:[%s7931_s29 + $0x18] sm:$0xff]  ;;  %v5483_v43 = vld [vmem:[%s7941_s2] ss:$0 sm:$0xff] }
 0xcda   :  { %v3181_v14 = vsel %vm3177_vm4, %v7863_v29, -inf  ;;  %v6703_v45 = vpack.c.bf16 %v3298_v53, %v3297_v11 }
 0xcdb   :  { %v3178_v34 = vsel %vm3177_vm4, %v7861_v36, -inf }
 0xcdc   :  { %3179 = vmax.xlane.f32.xlu0 %v3178_v34 }
 0xce0   :  { %3182 = vmax.xlane.f32.xlu0 %v3181_v14 }
 0xd69   :  { %v3180_v51 = vpop.xlane.xlu0 %3179 }
 0xd6a   :  { %vm3187_vm8 = vcmp.ge.f32.partialorder %v7861_v36, %v3180_v51 }
 0xd6b   :  { %v3189_v50 = vsel %vm3187_vm8, %v7869_v40, 8.0 }
 0xd6c   :  { %v3191_v54 = vsel %vm3177_vm4, %v3189_v50, inf }
 0xd6d   :  { %3192 = vmin.xlane.f32.xlu0 %v3191_v54  ;;  %v3183_v3 = vpop.xlane.xlu0 %3182 }
 0xd6e   :  { %vm3188_vm9 = vcmp.ge.f32.partialorder %v7863_v29, %v3183_v3 }
 0xd6f   :  { %v3190_v8 = vsel %vm3188_vm9, %v7869_v40, 8.0 }
 0xd70   :  { %v3194_v47 = vsel %vm3177_vm4, %v3190_v8, inf }
 0xd71   :  { %3195 = vmin.xlane.f32.xlu0 %v3194_v47 }
 0xdfa   :  { %v3193_v57 = vpop.xlane.xlu0 %3192 }
 0xdfb   :  { %vm3197_vm10 = vcmp.eq.f32.partialorder %v7869_v40, %v3193_v57 }
 0xdfc   :  { %v5474_v62 = vsel %vm3197_vm10, 1.0, %v7057_v9 }
 0xdfd   :  { %6316 = vmatprep.mubr.msk.f32.mxu1 %vm3177_vm4, %v5474_v62 }
 0xdfe   :  { %v3196_v4 = vpop.xlane.xlu0 %3195 }
 0xdff   :  { %vm3198_vm11 = vcmp.eq.f32.partialorder %v7869_v40, %v3196_v4 }
 0xe00   :  { %v5475_v21 = vsel %vm3198_vm11, 1.0, %v7057_v9 }
 0xe01   :  { %6317 = vmatmul.mubr.msk.f32.vlgmr.msra.gmra.mrb[48].mxu1 %vm3177_vm4, %v5475_v21 }
 0xe02   :  { %6686 = vmatpush3.bf16.msra.mxu1 %v6683_v25  ;;  %6327 = vmatprep.mubr.msk.f32.mxu1 %vm609_vm1, %v3088_v10  ;;  %v3296_v10 = vld [vmem:[%s7931_s29 + $0x8] sm:$0xff] }
 0xe03   :  { %6688 = vmatprep.subr.bf16.mxu1 %v6687_v46 }
 0xe06   :  { %6690 = vmatpush3.bf16.msra.mxu1 %v6687_v46 }
 0xe07   :  { %6330 = vmatprep.subr.mxu1 %v3288_v5 }
 0xe09   :  { %6328 = vmatmul.mubr.msk.f32.vlgmr.msra.gmra.mrb[50].mxu1 %vm609_vm1, %v3089_v48  ;;  %v6699_v48 = vpack.c.bf16 %v3296_v10, %v3295_v31  ;;  %v5489_v10 = vld [vmem:[%s7974_s18] ss:$0 sm:$0xff] }
 0xe0a   :  { %6331 = vmatpush3.msra.mxu1 %v3288_v5 }
 0xe0b   :  { %6692 = vmatprep.subr.bf16.mxu1 %v6691_v20  ;;  %6700 = vmatprep.subr.bf16.mxu0 %v6699_v48 }
 0xe0c   :  { %6702 = vmatpush3.bf16.msra.mxu0 %v6699_v48 }
 0xe0d   :  { %6704 = vmatprep.subr.bf16.mxu0 %v6703_v45 }
 0xe10   :  { %6706 = vmatpush3.bf16.msra.mxu0 %v6703_v45 }
 0xe11   :  { %6368 = vmatprep.subr.mxu0 %v7886_v1 }
 0xed4   :  { %v7903_v22 = vpop.f32.mrb[48].mxu1 }
 0xed5   :  { %v7905_v27 = vpop.f32.mrb[49].mxu1 }
 0xed6   :  { %6332 = vmatprep.mubr.msk.f32.mxu1 %vm3177_vm4, %v7905_v27 }
 0xed7   :  { %6333 = vmatmul.mubr.msk.f32.vlgmr.msra.gmra.mrb[50].mxu1 %vm3177_vm4, %v7903_v22 }
 0xed8   :  { %6694 = vmatpush3.bf16.msra.mxu1 %v6691_v20  ;;  %v3302_v20 = vld [vmem:[%s7950_s7 + $0x10] sm:$0xff] }
 0xed9   :  { %6696 = vmatprep.subr.bf16.mxu1 %v6695_v61 }
 0xedc   :  { %6698 = vmatpush3.bf16.msra.mxu1 %v6695_v61  ;;  %v3303_v61 = vld [vmem:[%s7950_s7 + $0x18] sm:$0xff] }
 0xedd   :  { %6708 = vmatprep.subr.bf16.mxu1 %v6707_v18 }
 0xfaa   :  { %v6334_v38 = vpop.f32.mrb[50].mxu1 }
 0xfab   :  { %v6797_v52 = vadd.f32 %v6334_v38, %v5480_v19  ;;  %v3460_v44 = vpop.f32.mrb[51].mxu1  ;;  %v5486_v38 = vld [vmem:[%s7959_s11] ss:$0 sm:$0xff] }
 0xfac   :  { %v6798_v59 = vadd.f32 %v5480_v19, %v3460_v44  ;;  %v6711_v19 = vpack.c.bf16 %v3303_v61, %v3302_v20 }
 0xfad   :  { %v3474_v55 = vmul.f32 0.044715, %v6797_v52  ;;  %v3472_v41 = vmul.f32 0.5, %v6797_v52 }
 0xfae   :  { %v3473_v28 = vmul.f32 0.044715, %v6798_v59  ;;  %v3471_v2 = vmul.f32 0.5, %v6798_v59 }
 0xfaf   :  { %v3476_v17 = vmul.f32 %v6797_v52, %v3474_v55 }
 0xfb0   :  { %v3475_v24 = vmul.f32 %v6798_v59, %v3473_v28 }
 0xfb1   :  { %v3478_v26 = vmul.f32 %v6797_v52, %v3476_v17 }
 0xfb2   :  { %v3477_v0 = vmul.f32 %v6798_v59, %v3475_v24 }
 0xfb3   :  { %v3480_v58 = vadd.f32 %v6797_v52, %v3478_v26 }
 0xfb4   :  { %v3479_v33 = vadd.f32 %v6798_v59, %v3477_v0 }
 0xfb5   :  { %v3482_v39 = vmul.f32 0.7978846, %v3480_v58 }
 0xfb6   :  { %v3481_v15 = vmul.f32 0.7978846, %v3479_v33 }
 0xfb7   :  { %6985 = vtanh.f32 %v3482_v39 }
 0xfb8   :  { %6987 = vtanh.f32 %v3481_v15 }
 0xfc1   :  { %v6986_v23 = vpop.eup %6985 }
 0xfc2   :  { %v6988_v30 = vpop.eup %6987  ;;  %v3486_v12 = vadd.f32 1.0, %v6986_v23 }
 0xfc3   :  { %v3485_v6 = vadd.f32 1.0, %v6988_v30 }
 0xfc4   :  { %v3488_v42 = vmul.f32 %v3486_v12, %v3472_v41 }
 0xfc5   :  { %v3487_v37 = vmul.f32 %v3485_v6, %v3471_v2 }
 0xfc7   :  { %6343 = vmatprep.mubr.msk.f32.mxu1 %vm609_vm1, %v3487_v37 }
 0xfc8   :  { %6344 = vmatmul.mubr.msk.f32.vlgmr.msra.gmra.mrb[52].mxu1 %vm609_vm1, %v3488_v42 }
 0xfc9   :  { %6710 = vmatpush3.bf16.msra.mxu1 %v6707_v18  ;;  %v5506_v18 = vld [vmem:[%s7914_s20 + $0x38] sm:$0xff] }
 0xfca   :  { %6712 = vmatprep.subr.bf16.mxu1 %v6711_v19  ;;  %v6727_v61 = vpack.c.bf16 %v5506_v18, %v5505_v13 }
 0xfcd   :  { %6714 = vmatpush3.bf16.msra.mxu1 %v6711_v19  ;;  %v5520_v19 = vld [vmem:[%s7923_s25 + $0x1] ss:$0 sm:$0xff] }
0x109b   :  { %v6345_v34 = vpop.f32.mrb[52].mxu1 }
0x109c   :  { %v3573_v14 = vadd.f32 %v6345_v34, %v5483_v43  ;;  %v3567_v49 = vpop.f32.mrb[53].mxu1 }
0x109d   :  { %v3568_v60 = vadd.f32 %v5483_v43, %v3567_v49 }
0x109e   :  { %v3579_v51 = vmul.f32 0.044715, %v3573_v14  ;;  %v3577_v21 = vmul.f32 0.5, %v3573_v14 }
0x109f   :  { %v3578_v50 = vmul.f32 0.044715, %v3568_v60  ;;  %v3576_v4 = vmul.f32 0.5, %v3568_v60 }
0x10a0   :  { %v3581_v54 = vmul.f32 %v3579_v51, %v3573_v14 }
0x10a1   :  { %v3580_v3 = vmul.f32 %v3578_v50, %v3568_v60 }
0x10a2   :  { %v3583_v8 = vmul.f32 %v3581_v54, %v3573_v14 }
0x10a3   :  { %v3582_v47 = vmul.f32 %v3580_v3, %v3568_v60  ;;  %v5496_v3 = vld [vmem:[%s7884_s16 + $0x38] sm:$0xff] }
0x10a4   :  { %v3585_v7 = vadd.f32 %v3583_v8, %v3573_v14  ;;  %v5497_v8 = vld [vmem:[%s7884_s16 + $0x40] sm:$0xff] }
0x10a5   :  { %v3584_v56 = vadd.f32 %v3582_v47, %v3568_v60  ;;  %v6715_v47 = vpack.c.bf16 %v5497_v8, %v5496_v3 }
0x10a6   :  { %v3587_v25 = vmul.f32 0.7978846, %v3585_v7 }
0x10a7   :  { %v3586_v57 = vmul.f32 0.7978846, %v3584_v56  ;;  %v5498_v56 = vld [vmem:[%s7884_s16 + $0x48] sm:$0xff] }
0x10a8   :  { %6989 = vtanh.f32 %v3587_v25  ;;  %v5499_v25 = vld [vmem:[%s7884_s16 + $0x50] sm:$0xff] }
0x10a9   :  { %6991 = vtanh.f32 %v3586_v57 }
0x10b2   :  { %v6990_v62 = vpop.eup %6989 }
0x10b3   :  { %v6992_v16 = vpop.eup %6991  ;;  %v3591_v63 = vadd.f32 1.0, %v6990_v62 }
0x10b4   :  { %v3590_v46 = vadd.f32 1.0, %v6992_v16  ;;  %v6719_v16 = vpack.c.bf16 %v5499_v25, %v5498_v56 }
0x10b5   :  { %v3593_v32 = vmul.f32 %v3591_v63, %v3577_v21 }
0x10b6   :  { %v3592_v5 = vmul.f32 %v3590_v46, %v3576_v4  ;;  %v5500_v4 = vld [vmem:[%s7884_s16 + $0x58] sm:$0xff]  ;;  %v5501_v46 = vld [vmem:[%s7884_s16 + $0x60] sm:$0xff] }
0x10b8   :  { %6354 = vmatprep.mubr.msk.f32.mxu0 %vm609_vm1, %v3592_v5 }
0x10b9   :  { %6355 = vmatmul.mubr.msk.f32.vlgmr.msra.gmra.mrb[42].mxu0 %vm609_vm1, %v3593_v32  ;;  %v5503_v32 = vld [vmem:[%s7914_s20 + $0x20] sm:$0xff] }
0x10ba   :  { %6369 = vmatpush3.msra.mxu0 %v7886_v1  ;;  %v6723_v20 = vpack.c.bf16 %v5504_v35, %v5503_v32 }
0x10bb   :  { %6716 = vmatprep.subr.bf16.mxu0 %v6715_v47 }
0x10bc   :  { %6724 = vmatprep.subr.bf16.mxu1 %v6723_v20 }
0x118c   :  { %v6356_v52 = vpop.f32.mrb[42].mxu0 }
0x118d   :  { %v7962_v44 = vadd.f32 %v6356_v52, %v5486_v38  ;;  %v3672_v59 = vpop.f32.mrb[43].mxu0 }
0x118e   :  { %v3673_v55 = vadd.f32 %v5486_v38, %v3672_v59 }
0x118f   :  { %v3684_v28 = vmul.f32 0.044715, %v7962_v44  ;;  %v3682_v37 = vmul.f32 0.5, %v7962_v44 }
0x1190   :  { %v3683_v17 = vmul.f32 0.044715, %v3673_v55  ;;  %v3681_v6 = vmul.f32 0.5, %v3673_v55 }
0x1191   :  { %v3686_v24 = vmul.f32 %v3684_v28, %v7962_v44 }
0x1192   :  { %v3685_v26 = vmul.f32 %v3683_v17, %v3673_v55 }
0x1193   :  { %v3688_v0 = vmul.f32 %v3686_v24, %v7962_v44 }
0x1194   :  { %v3687_v58 = vmul.f32 %v3685_v26, %v3673_v55 }
0x1195   :  { %v3690_v33 = vadd.f32 %v3688_v0, %v7962_v44 }
0x1196   :  { %v3689_v39 = vadd.f32 %v3687_v58, %v3673_v55 }
0x1197   :  { %v3692_v15 = vmul.f32 0.7978846, %v3690_v33 }
0x1198   :  { %v3691_v23 = vmul.f32 0.7978846, %v3689_v39 }
0x1199   :  { %6993 = vtanh.f32 %v3692_v15 }
0x119a   :  { %6995 = vtanh.f32 %v3691_v23 }
0x11a3   :  { %v6994_v30 = vpop.eup %6993 }
0x11a4   :  { %v6996_v12 = vpop.eup %6995  ;;  %v3696_v2 = vadd.f32 1.0, %v6994_v30 }
0x11a5   :  { %v3695_v41 = vadd.f32 1.0, %v6996_v12 }
0x11a6   :  { %v3698_v31 = vmul.f32 %v3696_v2, %v3682_v37 }
0x11a7   :  { %v3697_v42 = vmul.f32 %v3695_v41, %v3681_v6 }
0x11a9   :  { %6365 = vmatprep.mubr.msk.f32.mxu1 %vm609_vm1, %v3697_v42 }
0x11aa   :  { %6366 = vmatmul.mubr.msk.f32.vlgmr.msra.gmra.mrb[54].mxu1 %vm609_vm1, %v3698_v31  ;;  %v5508_v31 = vld [vmem:[%s7931_s29 + $0x20] sm:$0xff] }
0x11ab   :  { %6726 = vmatpush3.bf16.msra.mxu1 %v6723_v20 }
0x11ac   :  { %6728 = vmatprep.subr.bf16.mxu1 %v6727_v61 }
0x11af   :  { %6730 = vmatpush3.bf16.msra.mxu1 %v6727_v61  ;;  %v5513_v61 = vld [vmem:[%s7950_s7 + $0x20] sm:$0xff] }
0x127d   :  { %v6367_v11 = vpop.f32.mrb[54].mxu1 }
0x127e   :  { %v7977_v48 = vadd.f32 %v6367_v11, %v5489_v10  ;;  %v3777_v53 = vpop.f32.mrb[55].mxu1  ;;  %v5510_v11 = vld [vmem:[%s7931_s29 + $0x30] sm:$0xff] }
0x127f   :  { %v7979_v45 = vadd.f32 %v5489_v10, %v3777_v53  ;;  %v5509_v10 = vld [vmem:[%s7931_s29 + $0x28] sm:$0xff] }
0x1280   :  { %v3789_v43 = vsel %vm3177_vm4, %v7977_v48, -inf  ;;  %v6731_v53 = vpack.c.bf16 %v5509_v10, %v5508_v31 }
0x1281   :  { %3790 = vmax.xlane.f32.xlu1 %v3789_v43  ;;  %v3786_v34 = vsel %vm3177_vm4, %v7979_v45, -inf  ;;  %v5511_v43 = vld [vmem:[%s7931_s29 + $0x38] sm:$0xff] }
0x1282   :  { %3787 = vmax.xlane.f32.xlu0 %v3786_v34  ;;  %v6735_v34 = vpack.c.bf16 %v5511_v43, %v5510_v11  ;;  %6732 = vmatprep.subr.bf16.mxu1 %v6731_v53  ;;  %v5531_v43 = vld [vmem:[%s7974_s18 + $0x1] ss:$0 sm:$0xff] }
0x130e   :  { %v3791_v14 = vpop.xlane.xlu1 %3790 }
0x130f   :  { %vm3793_vm12 = vcmp.ge.f32.partialorder %v7977_v48, %v3791_v14  ;;  %v3788_v49 = vpop.xlane.xlu0 %3787  ;;  %v5525_v14 = vld [vmem:[%s7941_s2 + $0x1] ss:$0 sm:$0xff] }
0x1310   :  { %vm3792_vm13 = vcmp.ge.f32.partialorder %v7979_v45, %v3788_v49  ;;  %v3795_v60 = vsel %vm3793_vm12, %v7869_v40, 8.0 }
0x1311   :  { %v3799_v51 = vsel %vm3177_vm4, %v3795_v60, inf  ;;  %v3794_v50 = vsel %vm3792_vm13, %v7869_v40, 8.0 }
0x1312   :  { %3800 = vmin.xlane.f32.xlu1 %v3799_v51  ;;  %v3796_v54 = vsel %vm3177_vm4, %v3794_v50, inf }
0x1313   :  { %3797 = vmin.xlane.f32.xlu0 %v3796_v54 }
0x139f   :  { %v3801_v7 = vpop.xlane.xlu1 %3800 }
0x13a0   :  { %vm3803_vm14 = vcmp.eq.f32.partialorder %v7869_v40, %v3801_v7  ;;  %v3798_v57 = vpop.xlane.xlu0 %3797 }
0x13a1   :  { %vm3802_vm15 = vcmp.eq.f32.partialorder %v7869_v40, %v3798_v57  ;;  %v5493_v63 = vsel %vm3803_vm14, 1.0, %v7057_v9 }
0x13a2   :  { %v5492_v62 = vsel %vm3802_vm15, 1.0, %v7057_v9 }
0x13a3   :  { %6370 = vmatprep.mubr.msk.f32.mxu0 %vm3177_vm4, %v5492_v62 }
0x13a4   :  { %6371 = vmatmul.mubr.msk.f32.vlgmr.msra.gmra.mrb[44].mxu0 %vm3177_vm4, %v5493_v63 }
0x13a5   :  { %6718 = vmatpush3.bf16.msra.mxu0 %v6715_v47  ;;  %6381 = vmatprep.mubr.msk.f32.mxu0 %vm609_vm1, %v3673_v55 }
0x13a6   :  { %6720 = vmatprep.subr.bf16.mxu0 %v6719_v16 }
0x13a9   :  { %6722 = vmatpush3.bf16.msra.mxu0 %v6719_v16 }
0x13aa   :  { %6384 = vmatprep.subr.mxu0 %v5500_v4 }
0x13ac   :  { %6382 = vmatmul.mubr.msk.f32.vlgmr.msra.gmra.mrb[46].mxu0 %vm609_vm1, %v7962_v44 }
0x13ad   :  { %6386 = vmatprep.mubr.msk.f32.mxu0 %vm3177_vm4, %v7905_v27  ;;  %6385 = vmatpush3.msra.mxu0 %v5500_v4 }
0x13ae   :  { %6389 = vmatprep.subr.mxu0 %v5501_v46 }
0x13b4   :  { %6387 = vmatmul.mubr.msk.f32.vlgmr.msra.gmra.mrb[46].mxu0 %vm3177_vm4, %v7903_v22 }
0x13b5   :  { %6390 = vmatpush3.msra.mxu0 %v5501_v46 }
0x1477   :  { %v8010_v21 = vpop.f32.mrb[44].mxu0 }
0x1478   :  { %v8012_v5 = vpop.f32.mrb[45].mxu0 }
0x1479   :  { %6391 = vmatprep.mubr.msk.f32.mxu0 %vm3177_vm4, %v8012_v5 }
0x147a   :  { %6392 = vmatmul.mubr.msk.f32.vlgmr.msra.gmra.mrb[46].mxu0 %vm3177_vm4, %v8010_v21 }
0x154d   :  { %v6393_v38 = vpop.f32.mrb[46].mxu0 }
0x154e   :  { %v6799_v52 = vadd.f32 %v6393_v38, %v5520_v19  ;;  %v4157_v44 = vpop.f32.mrb[47].mxu0  ;;  %v5515_v38 = vld [vmem:[%s7950_s7 + $0x30] sm:$0xff] }
0x154f   :  { %v6800_v59 = vadd.f32 %v5520_v19, %v4157_v44  ;;  %v5514_v19 = vld [vmem:[%s7950_s7 + $0x28] sm:$0xff]  ;;  %v5516_v44 = vld [vmem:[%s7950_s7 + $0x38] sm:$0xff] }
0x1550   :  { %v4171_v55 = vmul.f32 0.044715, %v6799_v52  ;;  %v4169_v41 = vmul.f32 0.5, %v6799_v52 }
0x1551   :  { %v4170_v28 = vmul.f32 0.044715, %v6800_v59  ;;  %v4168_v2 = vmul.f32 0.5, %v6800_v59 }
0x1552   :  { %v4173_v17 = vmul.f32 %v6799_v52, %v4171_v55  ;;  %v5528_v55 = vld [vmem:[%s7959_s11 + $0x1] ss:$0 sm:$0xff] }
0x1553   :  { %v4172_v24 = vmul.f32 %v6800_v59, %v4170_v28 }
0x1554   :  { %v4175_v26 = vmul.f32 %v6799_v52, %v4173_v17 }
0x1555   :  { %v4174_v0 = vmul.f32 %v6800_v59, %v4172_v24 }
0x1556   :  { %v4177_v58 = vadd.f32 %v6799_v52, %v4175_v26  ;;  %v6739_v52 = vpack.c.bf16 %v5514_v19, %v5513_v61  ;;  %v5549_v19 = vld [vmem:[%s7914_s20 + $0x58] sm:$0xff] }
0x1557   :  { %v4176_v33 = vadd.f32 %v6800_v59, %v4174_v0  ;;  %v6743_v59 = vpack.c.bf16 %v5516_v44, %v5515_v38 }
0x1558   :  { %v4179_v39 = vmul.f32 0.7978846, %v4177_v58  ;;  %6740 = vmatprep.subr.bf16.mxu0 %v6739_v52 }
0x1559   :  { %v4178_v15 = vmul.f32 0.7978846, %v4176_v33  ;;  %6742 = vmatpush3.bf16.msra.mxu0 %v6739_v52 }
0x155a   :  { %6997 = vtanh.f32 %v4179_v39  ;;  %6744 = vmatprep.subr.bf16.mxu0 %v6743_v59 }
0x155b   :  { %6999 = vtanh.f32 %v4178_v15 }
0x155d   :  { %6746 = vmatpush3.bf16.msra.mxu0 %v6743_v59 }
0x1564   :  { %v6998_v23 = vpop.eup %6997 }
0x1565   :  { %v7000_v30 = vpop.eup %6999  ;;  %v4183_v12 = vadd.f32 1.0, %v6998_v23 }
0x1566   :  { %v4182_v6 = vadd.f32 1.0, %v7000_v30 }
0x1567   :  { %v4185_v42 = vmul.f32 %v4183_v12, %v4169_v41 }
0x1568   :  { %v4184_v37 = vmul.f32 %v4182_v6, %v4168_v2 }
0x156a   :  { %6402 = vmatprep.mubr.msk.f32.mxu1 %vm609_vm1, %v4184_v37 }
0x156b   :  { %6403 = vmatmul.mubr.msk.f32.vlgmr.msra.gmra.mrb[56].mxu1 %vm609_vm1, %v4185_v42 }
0x156c   :  { %6734 = vmatpush3.bf16.msra.mxu1 %v6731_v53 }
0x156d   :  { %6736 = vmatprep.subr.bf16.mxu1 %v6735_v34 }
0x1570   :  { %6738 = vmatpush3.bf16.msra.mxu1 %v6735_v34 }
0x1571   :  { %6427 = vmatprep.subr.mxu1 %v7886_v1 }
0x163e   :  { %v6404_v49 = vpop.f32.mrb[56].mxu1 }
0x163f   :  { %v4270_v60 = vadd.f32 %v6404_v49, %v5525_v14  ;;  %v4264_v51 = vpop.f32.mrb[57].mxu1 }
0x1640   :  { %v4265_v50 = vadd.f32 %v5525_v14, %v4264_v51 }
0x1641   :  { %v4276_v54 = vmul.f32 0.044715, %v4270_v60  ;;  %v4274_v13 = vmul.f32 0.5, %v4270_v60 }
0x1642   :  { %v4275_v3 = vmul.f32 0.044715, %v4265_v50  ;;  %v4273_v32 = vmul.f32 0.5, %v4265_v50 }
0x1643   :  { %v4278_v8 = vmul.f32 %v4276_v54, %v4270_v60 }
0x1644   :  { %v4277_v47 = vmul.f32 %v4275_v3, %v4265_v50 }
0x1645   :  { %v4280_v7 = vmul.f32 %v4278_v8, %v4270_v60 }
0x1646   :  { %v4279_v56 = vmul.f32 %v4277_v47, %v4265_v50 }
0x1647   :  { %v4282_v25 = vadd.f32 %v4280_v7, %v4270_v60 }
0x1648   :  { %v4281_v57 = vadd.f32 %v4279_v56, %v4265_v50 }
0x1649   :  { %v4284_v62 = vmul.f32 0.7978846, %v4282_v25  ;;  %v5538_v25 = vld [vmem:[%s7884_s16 + $0x70] sm:$0xff] }
0x164a   :  { %v4283_v16 = vmul.f32 0.7978846, %v4281_v57  ;;  %v5539_v57 = vld [vmem:[%s7884_s16 + $0x78] sm:$0xff] }
0x164b   :  { %7001 = vtanh.f32 %v4284_v62  ;;  %v6747_v62 = vpack.c.bf16 %v5539_v57, %v5538_v25 }
0x164c   :  { %7003 = vtanh.f32 %v4283_v16 }
0x1655   :  { %v7002_v63 = vpop.eup %7001 }
0x1656   :  { %v7004_v4 = vpop.eup %7003  ;;  %v4288_v46 = vadd.f32 1.0, %v7002_v63  ;;  %v5540_v63 = vld [vmem:[%s7884_s16 + $0x80] sm:$0xff] }
0x1657   :  { %v4287_v35 = vadd.f32 1.0, %v7004_v4  ;;  %v5541_v4 = vld [vmem:[%s7884_s16 + $0x88] sm:$0xff] }
0x1658   :  { %v4290_v18 = vmul.f32 %v4288_v46, %v4274_v13  ;;  %v5543_v13 = vld [vmem:[%s7884_s16 + $0x98] sm:$0xff] }
0x1659   :  { %v4289_v20 = vmul.f32 %v4287_v35, %v4273_v32  ;;  %v6751_v32 = vpack.c.bf16 %v5541_v4, %v5540_v63 }
0x165b   :  { %6413 = vmatprep.mubr.msk.f32.mxu1 %vm609_vm1, %v4289_v20  ;;  %v5546_v20 = vld [vmem:[%s7914_s20 + $0x40] sm:$0xff] }
0x165c   :  { %6414 = vmatmul.mubr.msk.f32.vlgmr.msra.gmra.mrb[58].mxu1 %vm609_vm1, %v4290_v18  ;;  %v5547_v18 = vld [vmem:[%s7914_s20 + $0x48] sm:$0xff] }
0x165d   :  { %6428 = vmatpush3.msra.mxu1 %v7886_v1  ;;  %v6755_v61 = vpack.c.bf16 %v5547_v18, %v5546_v20  ;;  %v5559_v20 = vld [vmem:[%s7950_s7 + $0x58] sm:$0xff] }
0x165e   :  { %6748 = vmatprep.subr.bf16.mxu1 %v6747_v62 }
0x165f   :  { %6756 = vmatprep.subr.bf16.mxu0 %v6755_v61 }
0x172f   :  { %v6415_v28 = vpop.f32.mrb[58].mxu1 }
0x1730   :  { %v8039_v17 = vadd.f32 %v6415_v28, %v5528_v55  ;;  %v4369_v24 = vpop.f32.mrb[59].mxu1 }
0x1731   :  { %v4370_v26 = vadd.f32 %v5528_v55, %v4369_v24 }
0x1732   :  { %v4381_v0 = vmul.f32 0.044715, %v8039_v17  ;;  %v4379_v10 = vmul.f32 0.5, %v8039_v17 }
0x1733   :  { %v4380_v58 = vmul.f32 0.044715, %v4370_v26  ;;  %v4378_v42 = vmul.f32 0.5, %v4370_v26 }
0x1734   :  { %v4383_v1 = vmul.f32 %v4381_v0, %v8039_v17 }
0x1735   :  { %v4382_v33 = vmul.f32 %v4380_v58, %v4370_v26 }
0x1736   :  { %v4385_v39 = vmul.f32 %v4383_v1, %v8039_v17 }
0x1737   :  { %v4384_v15 = vmul.f32 %v4382_v33, %v4370_v26 }
0x1738   :  { %v4387_v23 = vadd.f32 %v4385_v39, %v8039_v17 }
0x1739   :  { %v4386_v30 = vadd.f32 %v4384_v15, %v4370_v26 }
0x173a   :  { %v4389_v12 = vmul.f32 0.7978846, %v4387_v23 }
0x173b   :  { %v4388_v2 = vmul.f32 0.7978846, %v4386_v30 }
0x173c   :  { %7005 = vtanh.f32 %v4389_v12 }
0x173d   :  { %7007 = vtanh.f32 %v4388_v2 }
0x1746   :  { %v7006_v6 = vpop.eup %7005 }
0x1747   :  { %v7008_v41 = vpop.eup %7007  ;;  %v4393_v37 = vadd.f32 1.0, %v7006_v6 }
0x1748   :  { %v4392_v31 = vadd.f32 1.0, %v7008_v41 }
0x1749   :  { %v4395_v53 = vmul.f32 %v4393_v37, %v4379_v10  ;;  %v5553_v10 = vld [vmem:[%s7931_s29 + $0x50] sm:$0xff] }
0x174a   :  { %v4394_v11 = vmul.f32 %v4392_v31, %v4378_v42  ;;  %v5551_v42 = vld [vmem:[%s7931_s29 + $0x40] sm:$0xff]  ;;  %v5552_v31 = vld [vmem:[%s7931_s29 + $0x48] sm:$0xff] }
0x174c   :  { %6424 = vmatprep.mubr.msk.f32.mxu0 %vm609_vm1, %v4394_v11  ;;  %v6763_v11 = vpack.c.bf16 %v5552_v31, %v5551_v42 }
0x174d   :  { %6425 = vmatmul.mubr.msk.f32.vlgmr.msra.gmra.mrb[48].mxu0 %vm609_vm1, %v4395_v53  ;;  %v5554_v53 = vld [vmem:[%s7931_s29 + $0x58] sm:$0xff] }
0x174e   :  { %6758 = vmatpush3.bf16.msra.mxu0 %v6755_v61 }
0x1820   :  { %v6426_v34 = vpop.f32.mrb[48].mxu0 }
0x1821   :  { %v4480_v14 = vadd.f32 %v6426_v34, %v5531_v43  ;;  %v4474_v49 = vpop.f32.mrb[49].mxu0  ;;  %v5570_v34 = vld [vmem:[%s7941_s2 + $0x2] ss:$0 sm:$0xff] }
0x1822   :  { %v4475_v60 = vadd.f32 %v5531_v43, %v4474_v49  ;;  %v6767_v43 = vpack.c.bf16 %v5554_v53, %v5553_v10 }
0x1823   :  { %v4486_v51 = vsel %vm3177_vm4, %v4480_v14, -inf }
0x1824   :  { %4487 = vmax.xlane.f32.xlu1 %v4486_v51  ;;  %v4483_v50 = vsel %vm3177_vm4, %v4475_v60, -inf }
0x1825   :  { %4484 = vmax.xlane.f32.xlu0 %v4483_v50 }
0x18b1   :  { %v4488_v54 = vpop.xlane.xlu1 %4487 }
0x18b2   :  { %vm4490_vm2 = vcmp.ge.f32.partialorder %v4480_v14, %v4488_v54  ;;  %v4485_v3 = vpop.xlane.xlu0 %4484 }
0x18b3   :  { %vm4489_vm3 = vcmp.ge.f32.partialorder %v4475_v60, %v4485_v3  ;;  %v4492_v8 = vsel %vm4490_vm2, %v7869_v40, 8.0 }
0x18b4   :  { %v4496_v47 = vsel %vm3177_vm4, %v4492_v8, inf  ;;  %v4491_v7 = vsel %vm4489_vm3, %v7869_v40, 8.0 }
0x18b5   :  { %4497 = vmin.xlane.f32.xlu1 %v4496_v47  ;;  %v4493_v56 = vsel %vm3177_vm4, %v4491_v7, inf }
0x18b6   :  { %4494 = vmin.xlane.f32.xlu0 %v4493_v56 }
0x18c6   :  { %5262 = vrot.lane.b32.xlu1 %v7977_v48, %s7035_s22 }
0x18ca   :  { %5268 = vrot.lane.b32.xlu1 %v4475_v60, %s7047_s5 }
0x18cc   :  { %5260 = vrot.lane.b32.xlu0 %v7979_v45, %s7035_s22  ;;  %v5542_v45 = vld [vmem:[%s7884_s16 + $0x90] sm:$0xff]  ;;  %s7065_s22 = smov 32  }
0x18cd   :  { %s5326_s19 = sld [smem:[%s8122_s0 + %s7065_s22]]  }
0x18d0   :  { %5270 = vrot.lane.b32.xlu0 %v4480_v14, %s7047_s5 }
0x1942   :  { %v4498_v16 = vpop.xlane.xlu1 %4497 }
0x1943   :  { %vm4500_vm5 = vcmp.eq.f32.partialorder %v7869_v40, %v4498_v16  ;;  %v4495_v46 = vpop.xlane.xlu0 %4494 }
0x1944   :  { %vm4499_vm6 = vcmp.eq.f32.partialorder %v7869_v40, %v4495_v46  ;;  %v5535_v35 = vsel %vm4500_vm5, 1.0, %v7057_v9  ;;  %v5544_v40 = vld [vmem:[%s7884_s16 + $0xa0] sm:$0xff] }
0x1945   :  { %v5534_v48 = vsel %vm4499_vm6, 1.0, %v7057_v9 }
0x1946   :  { %6429 = vmatprep.mubr.msk.f32.mxu1 %vm3177_vm4, %v5534_v48  ;;  %v5263_v10 = vpop.permute.xlu1 %5262 }
0x1947   :  { %6430 = vmatmul.mubr.msk.f32.vlgmr.msra.gmra.mrb[60].mxu1 %vm3177_vm4, %v5535_v35  ;;  %v5261_v31 = vpop.permute.xlu0 %5260 }
0x1948   :  { %6750 = vmatpush3.bf16.msra.mxu1 %v6747_v62  ;;  %6440 = vmatprep.mubr.msk.f32.mxu1 %vm609_vm1, %v4370_v26 }
0x1949   :  { %6752 = vmatprep.subr.bf16.mxu1 %v6751_v32 }
0x194a   :  { %v5269_v53 = vpop.permute.xlu1 %5268 }
0x194c   :  { %6754 = vmatpush3.bf16.msra.mxu1 %v6751_v32 }
0x194d   :  { %6443 = vmatprep.subr.mxu1 %v5542_v45 }
0x194f   :  { %6441 = vmatmul.mubr.msk.f32.vlgmr.msra.gmra.mrb[62].mxu1 %vm609_vm1, %v8039_v17 }
0x1950   :  { %6445 = vmatprep.mubr.msk.f32.mxu1 %vm3177_vm4, %v7905_v27  ;;  %6444 = vmatpush3.msra.mxu1 %v5542_v45 }
0x1951   :  { %6448 = vmatprep.subr.mxu1 %v5543_v13 }
0x1957   :  { %6446 = vmatmul.mubr.msk.f32.vlgmr.msra.gmra.mrb[62].mxu1 %vm3177_vm4, %v7903_v22  ;;  %v5548_v22 = vld [vmem:[%s7914_s20 + $0x50] sm:$0xff] }
0x1958   :  { %6450 = vmatprep.mubr.msk.f32.mxu1 %vm3177_vm4, %v8012_v5  ;;  %6449 = vmatpush3.msra.mxu1 %v5543_v13  ;;  %v6759_v5 = vpack.c.bf16 %v5549_v19, %v5548_v22  ;;  %v5556_v13 = vld [vmem:[%s7950_s7 + $0x40] sm:$0xff] }
0x1959   :  { %6453 = vmatprep.subr.mxu1 %v5544_v40  ;;  %v5573_v22 = vld [vmem:[%s7959_s11 + $0x2] ss:$0 sm:$0xff] }
0x195a   :  { %6760 = vmatprep.subr.bf16.mxu0 %v6759_v5 }
0x195b   :  { %6762 = vmatpush3.bf16.msra.mxu0 %v6759_v5 }
0x195c   :  { %6764 = vmatprep.subr.bf16.mxu0 %v6763_v11 }
0x195f   :  { %6451 = vmatmul.mubr.msk.f32.vlgmr.msra.gmra.mrb[62].mxu1 %vm3177_vm4, %v8010_v21  ;;  %v5563_v21 = vld [vmem:[%s7923_s25 + $0x2] ss:$0 sm:$0xff] }
0x1960   :  { %6454 = vmatpush3.msra.mxu1 %v5544_v40  ;;  %v5557_v40 = vld [vmem:[%s7950_s7 + $0x48] sm:$0xff] }
0x1a1a   :  { %v6431_v9 = vpop.f32.mrb[60].mxu1 }
0x1a1b   :  { %v4577_v27 = vpop.f32.mrb[61].mxu1 }
0x1a1c   :  { %6455 = vmatprep.mubr.msk.f32.mxu1 %vm3177_vm4, %v4577_v27  ;;  %v6771_v27 = vpack.c.bf16 %v5557_v40, %v5556_v13 }
0x1a1d   :  { %6456 = vmatmul.mubr.msk.f32.vlgmr.msra.gmra.mrb[62].mxu1 %vm3177_vm4, %v6431_v9  ;;  %v5558_v9 = vld [vmem:[%s7950_s7 + $0x50] sm:$0xff] }
0x1a1e   :  { %v6775_v18 = vpack.c.bf16 %v5559_v20, %v5558_v9 }
0x1af0   :  { %v6457_v38 = vpop.f32.mrb[62].mxu1 }
0x1af1   :  { %v6801_v52 = vadd.f32 %v6457_v38, %v5563_v21  ;;  %v4932_v44 = vpop.f32.mrb[63].mxu1 }
0x1af2   :  { %v6802_v59 = vadd.f32 %v5563_v21, %v4932_v44 }
0x1af3   :  { %v4946_v55 = vmul.f32 0.044715, %v6801_v52  ;;  %v4944_v6 = vmul.f32 0.5, %v6801_v52 }
0x1af4   :  { %v4945_v28 = vmul.f32 0.044715, %v6802_v59  ;;  %v4943_v12 = vmul.f32 0.5, %v6802_v59 }
0x1af5   :  { %v4948_v17 = vmul.f32 %v6801_v52, %v4946_v55 }
0x1af6   :  { %v4947_v24 = vmul.f32 %v6802_v59, %v4945_v28 }
0x1af7   :  { %v4950_v26 = vmul.f32 %v6801_v52, %v4948_v17 }
0x1af8   :  { %v4949_v0 = vmul.f32 %v6802_v59, %v4947_v24 }
0x1af9   :  { %v4952_v58 = vadd.f32 %v6801_v52, %v4950_v26 }
0x1afa   :  { %v4951_v1 = vadd.f32 %v6802_v59, %v4949_v0 }
0x1afb   :  { %v4954_v33 = vmul.f32 0.7978846, %v4952_v58 }
0x1afc   :  { %v4953_v39 = vmul.f32 0.7978846, %v4951_v1 }
0x1afd   :  { %7009 = vtanh.f32 %v4954_v33 }
0x1afe   :  { %7011 = vtanh.f32 %v4953_v39 }
0x1b07   :  { %v7010_v15 = vpop.eup %7009 }
0x1b08   :  { %v7012_v23 = vpop.eup %7011  ;;  %v4958_v30 = vadd.f32 1.0, %v7010_v15 }
0x1b09   :  { %v4957_v2 = vadd.f32 1.0, %v7012_v23 }
0x1b0a   :  { %v4960_v37 = vmul.f32 %v4958_v30, %v4944_v6 }
0x1b0b   :  { %v4959_v41 = vmul.f32 %v4957_v2, %v4943_v12  ;;  %v5576_v2 = vld [vmem:[%s7974_s18 + $0x2] ss:$0 sm:$0xff] }
0x1b0d   :  { %6466 = vmatprep.mubr.msk.f32.mxu0 %vm609_vm1, %v4959_v41 }
0x1b0e   :  { %6467 = vmatmul.mubr.msk.f32.vlgmr.msra.gmra.mrb[50].mxu0 %vm609_vm1, %v4960_v37 }
0x1b0f   :  { %6766 = vmatpush3.bf16.msra.mxu0 %v6763_v11  ;;  %v5271_v11 = vpop.permute.xlu0 %5270 }
0x1b10   :  { %6768 = vmatprep.subr.bf16.mxu0 %v6767_v43 }
0x1b13   :  { %6770 = vmatpush3.bf16.msra.mxu0 %v6767_v43  ;;  %v5283_v43 = vsel %vm3177_vm4, %v7863_v29, %v5263_v10 }
0x1b14   :  { %6772 = vmatprep.subr.bf16.mxu0 %v6771_v27 }
0x1be1   :  { %v6468_v14 = vpop.f32.mrb[50].mxu0 }
0x1be2   :  { %v5045_v49 = vadd.f32 %v6468_v14, %v5570_v34  ;;  %v5039_v60 = vpop.f32.mrb[51].mxu0  ;;  %v5285_v14 = vsel %vm245_vm0, %v5283_v43, %v5271_v11 }
0x1be3   :  { %v5040_v51 = vadd.f32 %v5570_v34, %v5039_v60  ;;  %v5282_v34 = vsel %vm3177_vm4, %v7861_v36, %v5261_v31 }
0x1be4   :  { %v5051_v50 = vmul.f32 0.044715, %v5045_v49  ;;  %v5049_v32 = vmul.f32 0.5, %v5045_v49  ;;  %v5284_v60 = vsel %vm245_vm0, %v5282_v34, %v5269_v53 }
0x1be5   :  { %v5050_v54 = vmul.f32 0.044715, %v5040_v51  ;;  %v5048_v46 = vmul.f32 0.5, %v5040_v51 }
0x1be6   :  { %v5053_v3 = vmul.f32 %v5051_v50, %v5045_v49 }
0x1be7   :  { %v5052_v8 = vmul.f32 %v5050_v54, %v5040_v51 }
0x1be8   :  { %v5055_v47 = vmul.f32 %v5053_v3, %v5045_v49 }
0x1be9   :  { %v5054_v7 = vmul.f32 %v5052_v8, %v5040_v51 }
0x1bea   :  { %v5057_v56 = vadd.f32 %v5055_v47, %v5045_v49 }
0x1beb   :  { %v5056_v25 = vadd.f32 %v5054_v7, %v5040_v51 }
0x1bec   :  { %v5059_v57 = vmul.f32 0.7978846, %v5057_v56 }
0x1bed   :  { %v5058_v62 = vmul.f32 0.7978846, %v5056_v25 }
0x1bee   :  { %7013 = vtanh.f32 %v5059_v57 }
0x1bef   :  { %7015 = vtanh.f32 %v5058_v62 }
0x1bf8   :  { %v7014_v16 = vpop.eup %7013 }
0x1bf9   :  { %v7016_v63 = vpop.eup %7015  ;;  %v5063_v4 = vadd.f32 1.0, %v7014_v16 }
0x1bfa   :  { %v5062_v48 = vadd.f32 1.0, %v7016_v63 }
0x1bfb   :  { %v5065_v45 = vmul.f32 %v5063_v4, %v5049_v32 }
0x1bfc   :  { %v5064_v35 = vmul.f32 %v5062_v48, %v5048_v46 }
0x1bfe   :  { %6477 = vmatprep.mubr.msk.f32.mxu0 %vm609_vm1, %v5064_v35 }
0x1bff   :  { %6478 = vmatmul.mubr.msk.f32.vlgmr.msra.gmra.mrb[52].mxu0 %vm609_vm1, %v5065_v45 }
0x1c00   :  { %6774 = vmatpush3.bf16.msra.mxu0 %v6771_v27 }
0x1c01   :  { %6776 = vmatprep.subr.bf16.mxu0 %v6775_v18 }
0x1c04   :  { %6778 = vmatpush3.bf16.msra.mxu0 %v6775_v18 }
0x1cd2   :  { %v6479_v61 = vpop.f32.mrb[52].mxu0 }
0x1cd3   :  { %v5150_v19 = vadd.f32 %v6479_v61, %v5573_v22  ;;  %v5144_v5 = vpop.f32.mrb[53].mxu0 }
0x1cd4   :  { %v5145_v21 = vadd.f32 %v5573_v22, %v5144_v5 }
0x1cd5   :  { %v5156_v38 = vmul.f32 0.044715, %v5150_v19  ;;  %v5154_v23 = vmul.f32 0.5, %v5150_v19 }
0x1cd6   :  { %v5155_v52 = vmul.f32 0.044715, %v5145_v21  ;;  %v5153_v39 = vmul.f32 0.5, %v5145_v21 }
0x1cd7   :  { %v5158_v44 = vmul.f32 %v5156_v38, %v5150_v19 }
0x1cd8   :  { %v5157_v59 = vmul.f32 %v5155_v52, %v5145_v21 }
0x1cd9   :  { %v5160_v55 = vmul.f32 %v5158_v44, %v5150_v19 }
0x1cda   :  { %v5159_v28 = vmul.f32 %v5157_v59, %v5145_v21 }
0x1cdb   :  { %v5162_v17 = vadd.f32 %v5160_v55, %v5150_v19 }
0x1cdc   :  { %v5161_v24 = vadd.f32 %v5159_v28, %v5145_v21 }
0x1cdd   :  { %v5164_v26 = vmul.f32 0.7978846, %v5162_v17 }
0x1cde   :  { %v5163_v0 = vmul.f32 0.7978846, %v5161_v24 }
0x1cdf   :  { %7017 = vtanh.f32 %v5164_v26 }
0x1ce0   :  { %7019 = vtanh.f32 %v5163_v0 }
0x1ce9   :  { %v7018_v58 = vpop.eup %7017 }
0x1cea   :  { %v7020_v1 = vpop.eup %7019  ;;  %v5168_v33 = vadd.f32 1.0, %v7018_v58 }
0x1ceb   :  { %v5167_v15 = vadd.f32 1.0, %v7020_v1 }
0x1cec   :  { %v5170_v12 = vmul.f32 %v5168_v33, %v5154_v23 }
0x1ced   :  { %v5169_v30 = vmul.f32 %v5167_v15, %v5153_v39 }
0x1cef   :  { %6488 = vmatprep.mubr.msk.f32.mxu0 %vm609_vm1, %v5169_v30 }
0x1cf0   :  { %6489 = vmatmul.mubr.msk.f32.vlgmr.msra.gmra.mrb[54].mxu0 %vm609_vm1, %v5170_v12 }
0x1dc3   :  { %v6490_v6 = vpop.f32.mrb[54].mxu0 }
0x1dc4   :  { %v5255_v41 = vadd.f32 %v6490_v6, %v5576_v2  ;;  %v5249_v37 = vpop.f32.mrb[55].mxu0 }
0x1dc5   :  { %v5250_v42 = vadd.f32 %v5576_v2, %v5249_v37 }
0x1dc6   :  { %5278 = vrot.lane.b32.xlu0 %v5255_v41, %s7056_s12 }
0x1dc7   :  { %5276 = vrot.lane.b32.xlu1 %v5250_v42, %s7056_s12 }
0x1e38   :  { %v5279_v49 = vpop.permute.xlu0 %5278 }
0x1e39   :  { %v5288_v51 = vsel %vm5286_vm7, %v5285_v14, %v5279_v49  ;;  %v5277_v50 = vpop.permute.xlu1 %5276 }
0x1e3a   :  { %5290 = vst.msk [vmem:[%s5326_s19 + $0x8] sm:$0xff] %vm609_vm1, %v5288_v51  ;;  %v5287_v54 = vsel %vm5286_vm7, %v5284_v60, %v5277_v50 }
0x1e3b   :  { %5289 = vst.msk [vmem:[%s5326_s19] sm:$0xff] %vm609_vm1, %v5287_v54 }

// kernel: _forward_impl.2
= control target key start
LH: loop header
LB: loop body
LE: loop exit
PB: predicated region body
PF: predicated region fallthrough
CT: control target
= control target key end

     0   :  { %s12143_s3 = smov 2   ;;  %s12144_s7 = smov 1   ;;  %vm152_vm0 = vcmask 64512   ;;  %vm639_vm1 = vcmask 130048   ;;  %vm377_vm2 = vcmask 326656   ;;  %vm930_vm3 = vcmask 261120   ;;  %s14689_s0 = inlined_call_operand.smem [shape: u32[35], index: -1, kind: input, shape index: {}] }
   0x1   :  { %s8711_s6 = sld [smem:[%s14689_s0 + %s12143_s3]]   ;;  %s12145_s11 = smov 4   ;;  %vm1438_vm6 = vcmask 523264  }
   0x2   :  { %s8710_s10 = sld [smem:[%s14689_s0 + %s12144_s7]]   ;;  %s12146_s18 = smov 6  }
   0x3   :  { %s8713_s14 = sld [smem:[%s14689_s0 + %s12145_s11]]   ;;  %s12147_s22 = smov 9  }
   0x4   :  { %s12206_s17 = sld [smem:[%s14689_s0]]   ;;  %s12148_s26 = smov 3  }
   0x5   :  { %s12211_s21 = sld [smem:[%s14689_s0 + %s12146_s18]]   ;;  %s12149_s30 = smov 7  }
   0x6   :  { %s12243_s25 = sld [smem:[%s14689_s0 + %s12147_s22]]   ;;  %s12150_s4 = smov 11  }
   0x7   :  { %v151_v0 = vld [vmem:[%s8711_s6] sm:$0xff]  ;;  %s8712_s29 = sld [smem:[%s14689_s0 + %s12148_s26]]   ;;  %s12151_s8 = smov 5  }
   0x8   :  { %v141_v1 = vld [vmem:[%s8710_s10] sm:$0xff]  ;;  %v142_v2 = vld [vmem:[%s8710_s10 + $0x8] sm:$0xff]  ;;  %9948 = vmatprep.subr.mxu0 %v151_v0  ;;  %v143_v3 = vld [vmem:[%s8710_s10 + $0x10] sm:$0xff]  ;;  %s12260_s3 = sld [smem:[%s14689_s0 + %s12149_s30]]   ;;  %s12152_s12 = smov 13  }
   0x9   :  { %9950 = vmatprep.mubr.msk.f32.mxu0 %vm152_vm0, %v141_v1  ;;  %9949 = vmatpush3.msra.mxu0 %v151_v0  ;;  %v144_v4 = vld [vmem:[%s8710_s10 + $0x18] sm:$0xff]  ;;  %v145_v5 = vld [vmem:[%s8710_s10 + $0x20] sm:$0xff]  ;;  %v146_v6 = vld [vmem:[%s8710_s10 + $0x28] sm:$0xff]  ;;  %s12367_s7 = sld [smem:[%s14689_s0 + %s12150_s4]]   ;;  %s12153_s16 = smov 10  }
   0xa   :  { %9951 = vmatmul.mubr.msk.f32.vlgmr.msra.gmra.mrb[0].mxu0 %vm152_vm0, %v142_v2  ;;  %v147_v7 = vld [vmem:[%s8710_s10 + $0x30] sm:$0xff]  ;;  %v148_v8 = vld [vmem:[%s8710_s10 + $0x38] sm:$0xff]  ;;  %v149_v9 = vld [vmem:[%s8710_s10 + $0x40] sm:$0xff]  ;;  %s8714_s11 = sld [smem:[%s14689_s0 + %s12151_s8]]   ;;  %s12156_s22 = smov 15  }
   0xb   :  { %9953 = vmatprep.mubr.msk.f32.mxu0 %vm152_vm0, %v143_v3  ;;  %v150_v10 = vld [vmem:[%s8710_s10 + $0x48] sm:$0xff]  ;;  %v365_v11 = vld [vmem:[%s8713_s14] sm:$0xff]  ;;  %v367_v14 = vld [vmem:[%s8713_s14 + $0x10] sm:$0xff]  ;;  %s12465_s15 = sld [smem:[%s14689_s0 + %s12152_s12]]   ;;  %s12157_s27 = smov 12  }
   0xc   :  { %v366_v12 = vld [vmem:[%s8713_s14 + $0x8] sm:$0xff]  ;;  %v368_v15 = vld [vmem:[%s8713_s14 + $0x18] sm:$0xff]  ;;  %v523_v16 = vld [vmem:[%s12206_s17] sm:$0xff]  ;;  %s12472_s20 = sld [smem:[%s14689_s0 + %s12153_s16]]   ;;  %s12158_s1 = smov 14  }
   0xd   :  { %v11052_v13 = vpack.c.bf16 %v366_v12, %v365_v11  ;;  %v11056_v17 = vpack.c.bf16 %v368_v15, %v367_v14  ;;  %v524_v18 = vld [vmem:[%s12206_s17 + $0x8] sm:$0xff]  ;;  %v525_v20 = vld [vmem:[%s12211_s21] sm:$0xff]  ;;  %v527_v23 = vld [vmem:[%s12211_s21 + $0x10] sm:$0xff]  ;;  %s12562_s26 = sld [smem:[%s14689_s0 + %s12156_s22]]   ;;  %s12159_s6 = smov 17  }
   0xe   :  { %9954 = vmatmul.mubr.msk.f32.gmra.mrb[2].mxu0 %vm152_vm0, %v144_v4  ;;  %v12215_v19 = vpack.c.bf16 %v524_v18, %v523_v16  ;;  %v369_v21 = vld [vmem:[%s8713_s14 + $0x20] sm:$0xff]  ;;  %v526_v22 = vld [vmem:[%s12211_s21 + $0x8] sm:$0xff]  ;;  %v528_v24 = vld [vmem:[%s12211_s21 + $0x18] sm:$0xff]  ;;  %s12571_s30 = sld [smem:[%s14689_s0 + %s12157_s27]]   ;;  %s12161_s16 = smov 18  }
   0xf   :  { %9956 = vmatprep.mubr.msk.f32.mxu0 %vm152_vm0, %v145_v5  ;;  %11053 = vmatprep.subr.bf16.mxu1 %v11052_v13  ;;  %v529_v25 = vld [vmem:[%s12211_s21 + $0x20] sm:$0xff]  ;;  %v530_v26 = vld [vmem:[%s12211_s21 + $0x28] sm:$0xff]  ;;  %v531_v27 = vld [vmem:[%s12211_s21 + $0x30] sm:$0xff]  ;;  %s12629_s5 = sld [smem:[%s14689_s0 + %s12158_s1]]   ;;  %s12163_s28 = smov 21  }
  0x10   :  { %11055 = vmatpush3.bf16.msra.mxu1 %v11052_v13  ;;  %11061 = vmatprep.subr.bf16.mxu0 %v12215_v19  ;;  %v532_v28 = vld [vmem:[%s12211_s21 + $0x38] sm:$0xff]  ;;  %v533_v29 = vld [vmem:[%s12211_s21 + $0x40] sm:$0xff]  ;;  %v534_v30 = vld [vmem:[%s12211_s21 + $0x48] sm:$0xff]  ;;  %s12799_s10 = sld [smem:[%s14689_s0 + %s12159_s6]]   ;;  %s12164_s4 = smov 29  }
  0x11   :  { %11057 = vmatprep.subr.bf16.mxu1 %v11056_v17  ;;  %11063 = vmatpush3.bf16.msra.mxu0 %v12215_v19  ;;  %v545_v31 = vld [vmem:[%s12243_s25] sm:$0xff]  ;;  %v546_v32 = vld [vmem:[%s12243_s25 + $0x8] sm:$0xff]  ;;  %v547_v33 = vld [vmem:[%s12243_s25 + $0x10] sm:$0xff]  ;;  %s13055_s22 = sld [smem:[%s14689_s0 + %s12161_s16]]   ;;  %s12166_s18 = smov 20  }
  0x12   :  { %9957 = vmatmul.mubr.msk.f32.gmra.mrb[4].mxu0 %vm152_vm0, %v146_v6  ;;  %v11068_v34 = vpack.c.bf16 %v546_v32, %v545_v31  ;;  %v548_v35 = vld [vmem:[%s12243_s25 + $0x18] sm:$0xff]  ;;  %v8754_v37 = vld [vmem:[%s8712_s29] ss:$0 sm:$0xff]  ;;  %s13094_s2 = sld [smem:[%s14689_s0 + %s12163_s28]]   ;;  %s12167_s24 = smov 22  }
  0x13   :  { %9959 = vmatprep.mubr.msk.f32.mxu0 %vm152_vm0, %v147_v7  ;;  %v11072_v36 = vpack.c.bf16 %v548_v35, %v547_v33  ;;  %s13101_s9 = sld [smem:[%s14689_s0 + %s12164_s4]]   ;;  %s12168_s4 = smov 23  }
  0x14   :  { %11059 = vmatpush3.bf16.msra.mxu1 %v11056_v17  ;;  %11069 = vmatprep.subr.bf16.mxu0 %v11068_v34  ;;  %s13139_s23 = sld [smem:[%s14689_s0 + %s12166_s18]]   ;;  %s12169_s12 = smov 25  }
  0x15   :  { %9973 = vmatprep.subr.mxu1 %v369_v21  ;;  %s13147_s1 = sld [smem:[%s14689_s0 + %s12167_s24]]   ;;  %s12172_s13 = smov 26  }
  0x16   :  { %9960 = vmatmul.mubr.msk.f32.gmra.mrb[6].mxu0 %vm152_vm0, %v148_v8  ;;  %s13322_s19 = sld [smem:[%s14689_s0 + %s12169_s12]]   ;;  %s12173_s28 = smov 28  }
  0x17   :  { %9962 = vmatprep.mubr.msk.f32.mxu0 %vm152_vm0, %v149_v9  ;;  %s13431_s24 = sld [smem:[%s14689_s0 + %s12172_s13]]  }
  0x18   :  { %9974 = vmatpush3.msra.mxu1 %v369_v21  ;;  %s13564_s8 = sld [smem:[%s14689_s0 + %s12173_s28]]   ;;  %s12175_s28 = smov 32  }
  0x19   :  { %11065 = vmatprep.subr.bf16.mxu1 %v12215_v19 }
  0x1a   :  { %9963 = vmatmul.mubr.msk.f32.gmra.mrb[8].mxu0 %vm152_vm0, %v150_v10 }
  0x1b   :  { %9994 = vmatprep.mubr.msk.f32.mxu0 %vm639_vm1, %v525_v20 }
  0x1e   :  { %9995 = vmatmul.mubr.msk.f32.vlgmr.msra.gmra.mrb[10].mxu0 %vm639_vm1, %v526_v22  ;;  %14731 = sst [smem:[#allocation13_spill]] %s13564_s8 }
  0x1f   :  { %9997 = vmatprep.mubr.msk.f32.mxu0 %vm639_vm1, %v527_v23  ;;  %11071 = vmatpush3.bf16.msra.mxu0 %v11068_v34 }
  0x20   :  { %11073 = vmatprep.subr.bf16.mxu0 %v11072_v36 }
  0x22   :  { %9998 = vmatmul.mubr.msk.f32.gmra.mrb[12].mxu0 %vm639_vm1, %v528_v24 }
  0x23   :  { %10000 = vmatprep.mubr.msk.f32.mxu0 %vm639_vm1, %v529_v25  ;;  %11075 = vmatpush3.bf16.msra.mxu0 %v11072_v36 }
  0x26   :  { %10001 = vmatmul.mubr.msk.f32.gmra.mrb[14].mxu0 %vm639_vm1, %v530_v26 }
  0x27   :  { %10003 = vmatprep.mubr.msk.f32.mxu0 %vm639_vm1, %v531_v27 }
  0x2a   :  { %10004 = vmatmul.mubr.msk.f32.gmra.mrb[16].mxu0 %vm639_vm1, %v532_v28 }
  0x2b   :  { %10006 = vmatprep.mubr.msk.f32.mxu0 %vm639_vm1, %v533_v29 }
  0x2e   :  { %10007 = vmatmul.mubr.msk.f32.gmra.mrb[18].mxu0 %vm639_vm1, %v534_v30 }
  0xdd   :  { %v9952_v38 = vpop.f32.mrb[0].mxu0 }
  0xde   :  { %v306_v39 = vsub.f32 %v9952_v38, %v8754_v37  ;;  %v249_v40 = vpop.f32.mrb[1].mxu0 }
  0xdf   :  { %v305_v41 = vsub.f32 %v249_v40, %v8754_v37 }
  0xe0   :  { %v316_v42 = vmul.f32 %v306_v39, %v306_v39 }
  0xe1   :  { %v315_v43 = vmul.f32 %v305_v41, %v305_v41  ;;  %v9955_v44 = vpop.f32.mrb[2].mxu0 }
  0xe2   :  { %v326_v45 = vsub.f32 0.0, %v316_v42  ;;  %v308_v46 = vsub.f32 %v9955_v44, %v8754_v37  ;;  %v259_v47 = vpop.f32.mrb[3].mxu0  ;;  %v12267_v44 = vld [vmem:[%s12260_s3] sm:$0xff] }
  0xe3   :  { %v325_v48 = vsub.f32 0.0, %v315_v43  ;;  %v307_v49 = vsub.f32 %v259_v47, %v8754_v37  ;;  %v12284_v47 = vld [vmem:[%s12260_s3 + $0x18] sm:$0xff] }
  0xe4   :  { %v337_v50 = vmul.f32 1.442695, %v326_v45  ;;  %v318_v51 = vmul.f32 %v308_v46, %v308_v46  ;;  %v12274_v45 = vld [vmem:[%s12260_s3 + $0x8] sm:$0xff]  ;;  %v12277_v46 = vld [vmem:[%s12260_s3 + $0x10] sm:$0xff]  ;;  %14721 = vst [vmem:[#allocation3_spill] sm:$0xff] %v12284_v47 }
  0xe5   :  { %v335_v52 = vmul.f32 1.442695, %v325_v48  ;;  %v317_v53 = vmul.f32 %v307_v49, %v307_v49  ;;  %v9958_v54 = vpop.f32.mrb[4].mxu0  ;;  %14720 = vst [vmem:[#allocation2_spill] sm:$0xff] %v12277_v46  ;;  %v12287_v48 = vld [vmem:[%s12260_s3 + $0x20] sm:$0xff]  ;;  %v12294_v49 = vld [vmem:[%s12260_s3 + $0x28] sm:$0xff] }
  0xe6   :  { %11758 = vpow2.f32 %v337_v50  ;;  %v328_v55 = vsub.f32 0.0, %v318_v51  ;;  %v310_v56 = vsub.f32 %v9958_v54, %v8754_v37  ;;  %v269_v57 = vpop.f32.mrb[5].mxu0  ;;  %14722 = vst [vmem:[#allocation4_spill] sm:$0xff] %v12287_v48  ;;  %v12297_v50 = vld [vmem:[%s12260_s3 + $0x30] sm:$0xff]  ;;  %v12304_v51 = vld [vmem:[%s12260_s3 + $0x38] sm:$0xff]  ;;  %vm2452_vm15 = vcmp.gt.f32.partialorder %v12294_v49, 0.5 }
  0xe7   :  { %11760 = vpow2.f32 %v335_v52  ;;  %v327_v58 = vsub.f32 0.0, %v317_v53  ;;  %v309_v59 = vsub.f32 %v269_v57, %v8754_v37  ;;  %14723 = vst [vmem:[#allocation5_spill] sm:$0xff] %v12297_v50  ;;  %14724 = vst [vmem:[#allocation6_spill] sm:$0xff] %v12304_v51  ;;  %v12307_v52 = vld [vmem:[%s12260_s3 + $0x40] sm:$0xff]  ;;  %v12314_v53 = vld [vmem:[%s12260_s3 + $0x48] sm:$0xff]  ;;  %vm2448_vm0 = vcmp.gt.f32.partialorder %v12274_v45, 0.5 }
  0xe8   :  { %v341_v60 = vmul.f32 1.442695, %v328_v55  ;;  %v320_v61 = vmul.f32 %v310_v56, %v310_v56  ;;  %14725 = vst [vmem:[#allocation7_spill] sm:$0xff] %v12307_v52  ;;  %14726 = vst [vmem:[#allocation8_spill] sm:$0xff] %v12314_v53 }
  0xe9   :  { %v339_v62 = vmul.f32 1.442695, %v327_v58  ;;  %v319_v63 = vmul.f32 %v309_v59, %v309_v59  ;;  %v9961_v0 = vpop.f32.mrb[6].mxu0 }
  0xea   :  { %11762 = vpow2.f32 %v341_v60  ;;  %v330_v1 = vsub.f32 0.0, %v320_v61  ;;  %v312_v2 = vsub.f32 %v9961_v0, %v8754_v37  ;;  %v279_v3 = vpop.f32.mrb[7].mxu0 }
  0xeb   :  { %11764 = vpow2.f32 %v339_v62  ;;  %v329_v4 = vsub.f32 0.0, %v319_v63  ;;  %v311_v5 = vsub.f32 %v279_v3, %v8754_v37  ;;  %v549_v62 = vld [vmem:[%s12243_s25 + $0x20] sm:$0xff]  ;;  %v550_v63 = vld [vmem:[%s12243_s25 + $0x28] sm:$0xff]  ;;  %v551_v3 = vld [vmem:[%s12243_s25 + $0x30] sm:$0xff] }
  0xec   :  { %v345_v6 = vmul.f32 1.442695, %v330_v1  ;;  %v322_v7 = vmul.f32 %v312_v2, %v312_v2  ;;  %v11076_v0 = vpack.c.bf16 %v550_v63, %v549_v62 }
  0xed   :  { %v343_v8 = vmul.f32 1.442695, %v329_v4  ;;  %v321_v9 = vmul.f32 %v311_v5, %v311_v5  ;;  %v9964_v10 = vpop.f32.mrb[8].mxu0  ;;  %v552_v4 = vld [vmem:[%s12243_s25 + $0x38] sm:$0xff] }
  0xee   :  { %11766 = vpow2.f32 %v345_v6  ;;  %v332_v11 = vsub.f32 0.0, %v322_v7  ;;  %v314_v12 = vsub.f32 %v9964_v10, %v8754_v37  ;;  %v289_v13 = vpop.f32.mrb[9].mxu0  ;;  %11077 = vmatprep.subr.bf16.mxu0 %v11076_v0  ;;  %v11080_v5 = vpack.c.bf16 %v552_v4, %v551_v3  ;;  %v553_v6 = vld [vmem:[%s12243_s25 + $0x40] sm:$0xff]  ;;  %v554_v7 = vld [vmem:[%s12243_s25 + $0x48] sm:$0xff] }
  0xef   :  { %11768 = vpow2.f32 %v343_v8  ;;  %v331_v14 = vsub.f32 0.0, %v321_v9  ;;  %v313_v15 = vsub.f32 %v289_v13, %v8754_v37  ;;  %v11084_v8 = vpack.c.bf16 %v554_v7, %v553_v6  ;;  %v558_v9 = vld [vmem:[%s12367_s7] sm:$0xff]  ;;  %v559_v10 = vld [vmem:[%s12367_s7 + $0x8] sm:$0xff]  ;;  %v561_v13 = vld [vmem:[%s12367_s7 + $0x18] sm:$0xff] }
  0xf0   :  { %v11759_v16 = vpop.eup %11758  ;;  %v349_v17 = vmul.f32 1.442695, %v332_v11  ;;  %v324_v18 = vmul.f32 %v314_v12, %v314_v12  ;;  %v560_v11 = vld [vmem:[%s12367_s7 + $0x10] sm:$0xff]  ;;  %v11092_v12 = vpack.c.bf16 %v559_v10, %v558_v9  ;;  %v563_v6 = vld [vmem:[%s12367_s7 + $0x28] sm:$0xff]  ;;  %v565_v9 = vld [vmem:[%s12367_s7 + $0x38] sm:$0xff] }
  0xf1   :  { %v11761_v20 = vpop.eup %11760  ;;  %v347_v21 = vmul.f32 1.442695, %v331_v14  ;;  %v323_v22 = vmul.f32 %v313_v15, %v313_v15  ;;  %v356_v25 = vadd.f32 1e-08, %v11759_v16  ;;  %v12318_v54 = vpop.f32.mrb[10].mxu0  ;;  %v11096_v14 = vpack.c.bf16 %v561_v13, %v560_v11  ;;  %v567_v11 = vld [vmem:[%s12465_s15] sm:$0xff] }
  0xf2   :  { %11770 = vpow2.f32 %v349_v17  ;;  %v334_v23 = vsub.f32 0.0, %v324_v18  ;;  %v355_v24 = vadd.f32 1e-08, %v11761_v20  ;;  %v12320_v55 = vpop.f32.mrb[11].mxu0 }
  0xf3   :  { %11772 = vpow2.f32 %v347_v21  ;;  %v333_v26 = vsub.f32 0.0, %v323_v22  ;;  %10036 = vmatprep.mubr.msk.f32.mxu0 %vm930_vm3, %v12320_v55 }
  0xf4   :  { %v11763_v27 = vpop.eup %11762  ;;  %v353_v28 = vmul.f32 1.442695, %v334_v23  ;;  %9975 = vmatprep.mubr.msk.f32.mxu1 %vm377_vm2, %v355_v24  ;;  %10037 = vmatmul.mubr.msk.f32.vlgmr.msra.gmra.mrb[20].mxu0 %vm930_vm3, %v12318_v54 }
  0xf5   :  { %v11765_v29 = vpop.eup %11764  ;;  %v351_v30 = vmul.f32 1.442695, %v333_v26  ;;  %9976 = vmatmul.mubr.msk.f32.vlgmr.msra.gmra.mrb[0].mxu1 %vm377_vm2, %v356_v25  ;;  %v358_v32 = vadd.f32 1e-08, %v11763_v27  ;;  %v12326_v56 = vpop.f32.mrb[12].mxu0  ;;  %11079 = vmatpush3.bf16.msra.mxu0 %v11076_v0  ;;  %v555_v26 = vld [vmem:[%s12243_s25 + $0x50] sm:$0xff] }
  0xf6   :  { %v357_v31 = vadd.f32 1e-08, %v11765_v29  ;;  %11774 = vpow2.f32 %v353_v28  ;;  %11067 = vmatpush3.bf16.msra.mxu1 %v12215_v19  ;;  %v12328_v57 = vpop.f32.mrb[13].mxu0  ;;  %11081 = vmatprep.subr.bf16.mxu0 %v11080_v5  ;;  %v556_v27 = vld [vmem:[%s12243_s25 + $0x58] sm:$0xff] }
  0xf7   :  { %11776 = vpow2.f32 %v351_v30  ;;  %10039 = vmatprep.mubr.msk.f32.mxu0 %vm930_vm3, %v12328_v57  ;;  %11093 = vmatprep.subr.bf16.mxu1 %v11092_v12  ;;  %v11088_v30 = vpack.c.bf16 %v556_v27, %v555_v26 }
  0xf8   :  { %v11767_v33 = vpop.eup %11766  ;;  %9978 = vmatprep.mubr.msk.f32.mxu1 %vm377_vm2, %v357_v31  ;;  %10040 = vmatmul.mubr.msk.f32.gmra.mrb[22].mxu0 %vm930_vm3, %v12326_v56 }
  0xf9   :  { %v11769_v34 = vpop.eup %11768  ;;  %9979 = vmatmul.mubr.msk.f32.gmra.mrb[2].mxu1 %vm377_vm2, %v358_v32  ;;  %v360_v36 = vadd.f32 1e-08, %v11767_v33  ;;  %v12334_v58 = vpop.f32.mrb[14].mxu0  ;;  %11083 = vmatpush3.bf16.msra.mxu0 %v11080_v5  ;;  %v562_v5 = vld [vmem:[%s12367_s7 + $0x20] sm:$0xff] }
  0xfa   :  { %v359_v35 = vadd.f32 1e-08, %v11769_v34  ;;  %v12336_v59 = vpop.f32.mrb[15].mxu0  ;;  %11085 = vmatprep.subr.bf16.mxu0 %v11084_v8  ;;  %v11100_v7 = vpack.c.bf16 %v563_v6, %v562_v5 }
  0xfb   :  { %10042 = vmatprep.mubr.msk.f32.mxu0 %vm930_vm3, %v12336_v59 }
  0xfc   :  { %v11771_v37 = vpop.eup %11770  ;;  %9981 = vmatprep.mubr.msk.f32.mxu1 %vm377_vm2, %v359_v35  ;;  %10043 = vmatmul.mubr.msk.f32.gmra.mrb[24].mxu0 %vm930_vm3, %v12334_v58 }
  0xfd   :  { %v11773_v19 = vpop.eup %11772  ;;  %9982 = vmatmul.mubr.msk.f32.gmra.mrb[4].mxu1 %vm377_vm2, %v360_v36  ;;  %v362_v39 = vadd.f32 1e-08, %v11771_v37  ;;  %v12342_v60 = vpop.f32.mrb[16].mxu0  ;;  %v8755_v37 = vld [vmem:[%s8714_s11] ss:$0 sm:$0xff]  ;;  %s12160_s11 = smov 16  }
  0xfe   :  { %v361_v38 = vadd.f32 1e-08, %v11773_v19  ;;  %v12344_v61 = vpop.f32.mrb[17].mxu0  ;;  %s12856_s14 = sld [smem:[%s14689_s0 + %s12160_s11]]   ;;  %s12165_s11 = smov 30  }
  0xff   :  { %10045 = vmatprep.mubr.msk.f32.mxu0 %vm930_vm3, %v12344_v61  ;;  %s13106_s16 = sld [smem:[%s14689_s0 + %s12165_s11]]  }
 0x100   :  { %v11775_v40 = vpop.eup %11774  ;;  %9984 = vmatprep.mubr.msk.f32.mxu1 %vm377_vm2, %v361_v38  ;;  %10046 = vmatmul.mubr.msk.f32.gmra.mrb[26].mxu0 %vm930_vm3, %v12342_v60  ;;  %s13159_s11 = sld [smem:[%s14689_s0 + %s12168_s4]]   ;;  %s12171_s4 = smov 27  }
 0x101   :  { %v11777_v41 = vpop.eup %11776  ;;  %9985 = vmatmul.mubr.msk.f32.gmra.mrb[6].mxu1 %vm377_vm2, %v362_v39  ;;  %v364_v43 = vadd.f32 1e-08, %v11775_v40  ;;  %v12352_v1 = vpop.f32.mrb[18].mxu0  ;;  %s13417_s12 = sld [smem:[%s14689_s0 + %s12171_s4]]  }
 0x102   :  { %v363_v42 = vadd.f32 1e-08, %v11777_v41  ;;  %v12354_v2 = vpop.f32.mrb[19].mxu0 }
 0x103   :  { %10048 = vmatprep.mubr.msk.f32.mxu0 %vm930_vm3, %v12354_v2 }
 0x104   :  { %9987 = vmatprep.mubr.msk.f32.mxu1 %vm377_vm2, %v363_v42  ;;  %10049 = vmatmul.mubr.msk.f32.gmra.mrb[28].mxu0 %vm930_vm3, %v12352_v1 }
 0x105   :  { %9988 = vmatmul.mubr.msk.f32.gmra.mrb[8].mxu1 %vm377_vm2, %v364_v43  ;;  %vm2451_vm2 = vcmp.gt.f32.partialorder %v12287_v48, 0.5 }
 0x106   :  { %10013 = vmatprep.mubr.msk.f32.mxu1 %vm639_vm1, %v12267_v44 }
 0x109   :  { %10014 = vmatmul.mubr.msk.f32.vlgmr.msra.gmra.mrb[10].mxu1 %vm639_vm1, %v12274_v45 }
 0x10a   :  { %10016 = vmatprep.mubr.msk.f32.mxu1 %vm639_vm1, %v12277_v46  ;;  %11095 = vmatpush3.bf16.msra.mxu1 %v11092_v12  ;;  %v568_v12 = vld [vmem:[%s12465_s15 + $0x8] sm:$0xff] }
 0x10b   :  { %11097 = vmatprep.subr.bf16.mxu1 %v11096_v14  ;;  %v11108_v13 = vpack.c.bf16 %v568_v12, %v567_v11 }
 0x10d   :  { %10017 = vmatmul.mubr.msk.f32.gmra.mrb[12].mxu1 %vm639_vm1, %v12284_v47 }
 0x10e   :  { %10019 = vmatprep.mubr.msk.f32.mxu1 %vm639_vm1, %v12287_v48  ;;  %11099 = vmatpush3.bf16.msra.mxu1 %v11096_v14  ;;  %v8796_v14 = vld [vmem:[%s12472_s20] ss:$0 sm:$0xff] }
 0x10f   :  { %11101 = vmatprep.subr.bf16.mxu1 %v11100_v7 }
 0x111   :  { %10020 = vmatmul.mubr.msk.f32.gmra.mrb[14].mxu1 %vm639_vm1, %v12294_v49 }
 0x112   :  { %10022 = vmatprep.mubr.msk.f32.mxu1 %vm639_vm1, %v12297_v50  ;;  %11103 = vmatpush3.bf16.msra.mxu1 %v11100_v7  ;;  %v571_v7 = vld [vmem:[%s12465_s15 + $0x20] sm:$0xff] }
 0x115   :  { %10023 = vmatmul.mubr.msk.f32.gmra.mrb[16].mxu1 %vm639_vm1, %v12304_v51 }
 0x116   :  { %10025 = vmatprep.mubr.msk.f32.mxu1 %vm639_vm1, %v12307_v52 }
 0x119   :  { %10026 = vmatmul.mubr.msk.f32.gmra.mrb[18].mxu1 %vm639_vm1, %v12314_v53 }
 0x1c8   :  { %v9977_v15 = vpop.f32.mrb[0].mxu1 }
 0x1c9   :  { %v474_v16 = vpop.f32.mrb[1].mxu1  ;;  %v12422_v40 = vadd.f32 %v9977_v15, %v8755_v37 }
 0x1ca   :  { %v12414_v39 = vadd.f32 %v8755_v37, %v474_v16 }
 0x1cc   :  { %v9980_v17 = vpop.f32.mrb[2].mxu1 }
 0x1cd   :  { %v484_v18 = vpop.f32.mrb[3].mxu1  ;;  %v12430_v42 = vadd.f32 %v9980_v17, %v8755_v37 }
 0x1ce   :  { %v12424_v41 = vadd.f32 %v8755_v37, %v484_v18 }
 0x1d0   :  { %v9983_v20 = vpop.f32.mrb[4].mxu1 }
 0x1d1   :  { %v494_v21 = vpop.f32.mrb[5].mxu1  ;;  %v12438_v62 = vadd.f32 %v9983_v20, %v8755_v37 }
 0x1d2   :  { %v12432_v43 = vadd.f32 %v8755_v37, %v494_v21  ;;  %v569_v21 = vld [vmem:[%s12465_s15 + $0x10] sm:$0xff] }
 0x1d4   :  { %v9986_v22 = vpop.f32.mrb[6].mxu1 }
 0x1d5   :  { %v504_v23 = vpop.f32.mrb[7].mxu1  ;;  %v12446_v0 = vadd.f32 %v9986_v22, %v8755_v37  ;;  %v570_v22 = vld [vmem:[%s12465_s15 + $0x18] sm:$0xff] }
 0x1d6   :  { %v12440_v63 = vadd.f32 %v8755_v37, %v504_v23 }
 0x1d8   :  { %v9989_v24 = vpop.f32.mrb[8].mxu1 }
 0x1d9   :  { %v514_v25 = vpop.f32.mrb[9].mxu1  ;;  %v12454_v4 = vadd.f32 %v9989_v24, %v8755_v37 }
 0x1da   :  { %v12448_v3 = vadd.f32 %v8755_v37, %v514_v25  ;;  %v11112_v37 = vpack.c.bf16 %v570_v22, %v569_v21 }
 0x1dc   :  { %v12375_v28 = vpop.f32.mrb[10].mxu1 }
 0x1dd   :  { %v12377_v29 = vpop.f32.mrb[11].mxu1 }
 0x1de   :  { %10059 = vmatprep.mubr.msk.f32.mxu0 %vm930_vm3, %v12377_v29 }
 0x1df   :  { %10060 = vmatmul.mubr.msk.f32.vlgmr.msra.gmra.mrb[20].mxu0 %vm930_vm3, %v12375_v28 }
 0x1e0   :  { %v12383_v31 = vpop.f32.mrb[12].mxu1  ;;  %11087 = vmatpush3.bf16.msra.mxu0 %v11084_v8  ;;  %v564_v8 = vld [vmem:[%s12367_s7 + $0x30] sm:$0xff] }
 0x1e1   :  { %v12385_v32 = vpop.f32.mrb[13].mxu1  ;;  %11089 = vmatprep.subr.bf16.mxu0 %v11088_v30  ;;  %v11104_v10 = vpack.c.bf16 %v565_v9, %v564_v8  ;;  %v572_v8 = vld [vmem:[%s12465_s15 + $0x28] sm:$0xff] }
 0x1e2   :  { %10062 = vmatprep.mubr.msk.f32.mxu0 %vm930_vm3, %v12385_v32 }
 0x1e3   :  { %10063 = vmatmul.mubr.msk.f32.gmra.mrb[22].mxu0 %vm930_vm3, %v12383_v31  ;;  %11105 = vmatprep.subr.bf16.mxu1 %v11104_v10 }
 0x1e4   :  { %v12394_v33 = vpop.f32.mrb[14].mxu1  ;;  %11091 = vmatpush3.bf16.msra.mxu0 %v11088_v30  ;;  %11107 = vmatpush3.bf16.msra.mxu1 %v11104_v10 }
 0x1e5   :  { %v12396_v34 = vpop.f32.mrb[15].mxu1  ;;  %11109 = vmatprep.subr.bf16.mxu1 %v11108_v13 }
 0x1e6   :  { %10065 = vmatprep.mubr.msk.f32.mxu0 %vm930_vm3, %v12396_v34 }
 0x1e7   :  { %10066 = vmatmul.mubr.msk.f32.gmra.mrb[24].mxu0 %vm930_vm3, %v12394_v33 }
 0x1e8   :  { %v12402_v35 = vpop.f32.mrb[16].mxu1 }
 0x1e9   :  { %v12404_v36 = vpop.f32.mrb[17].mxu1 }
 0x1ea   :  { %10068 = vmatprep.mubr.msk.f32.mxu0 %vm930_vm3, %v12404_v36 }
 0x1eb   :  { %10069 = vmatmul.mubr.msk.f32.gmra.mrb[26].mxu0 %vm930_vm3, %v12402_v35 }
 0x1ec   :  { %v12410_v19 = vpop.f32.mrb[18].mxu1 }
 0x1ed   :  { %v12412_v38 = vpop.f32.mrb[19].mxu1 }
 0x1ee   :  { %10071 = vmatprep.mubr.msk.f32.mxu0 %vm930_vm3, %v12412_v38 }
 0x1ef   :  { %10072 = vmatmul.mubr.msk.f32.gmra.mrb[28].mxu0 %vm930_vm3, %v12410_v19 }
 0x1f0   :  { %10082 = vmatprep.mubr.msk.f32.mxu0 %vm930_vm3, %v12414_v39 }
 0x1f3   :  { %10083 = vmatmul.mubr.msk.f32.vlgmr.msra.gmra.mrb[20].mxu0 %vm930_vm3, %v12422_v40 }
 0x1f4   :  { %10085 = vmatprep.mubr.msk.f32.mxu0 %vm930_vm3, %v12424_v41 }
 0x1f7   :  { %10086 = vmatmul.mubr.msk.f32.gmra.mrb[22].mxu0 %vm930_vm3, %v12430_v42 }
 0x1f8   :  { %10088 = vmatprep.mubr.msk.f32.mxu0 %vm930_vm3, %v12432_v43 }
 0x1fb   :  { %10089 = vmatmul.mubr.msk.f32.gmra.mrb[24].mxu0 %vm930_vm3, %v12438_v62 }
 0x1fc   :  { %10091 = vmatprep.mubr.msk.f32.mxu0 %vm930_vm3, %v12440_v63 }
 0x1ff   :  { %10092 = vmatmul.mubr.msk.f32.gmra.mrb[26].mxu0 %vm930_vm3, %v12446_v0 }
 0x200   :  { %10094 = vmatprep.mubr.msk.f32.mxu0 %vm930_vm3, %v12448_v3 }
 0x203   :  { %10095 = vmatmul.mubr.msk.f32.gmra.mrb[28].mxu0 %vm930_vm3, %v12454_v4 }
 0x2c6   :  { %v10084_v15 = vpop.f32.mrb[20].mxu0 }
 0x2c7   :  { %v11512_v16 = vadd.f32 %v10084_v15, %v8796_v14  ;;  %v1343_v17 = vpop.f32.mrb[21].mxu0 }
 0x2c8   :  { %v11513_v18 = vadd.f32 %v8796_v14, %v1343_v17 }
 0x2c9   :  { %v1413_v20 = vmul.f32 0.2, %v11512_v16  ;;  %vm1403_vm4 = vcmp.gt.f32.partialorder %v11512_v16, 0.0 }
 0x2ca   :  { %vm1402_vm5 = vcmp.gt.f32.partialorder %v11513_v18, 0.0  ;;  %v1412_v23 = vmul.f32 0.2, %v11513_v18  ;;  %v10087_v24 = vpop.f32.mrb[22].mxu0 }
 0x2cb   :  { %v11514_v25 = vadd.f32 %v10087_v24, %v8796_v14  ;;  %v1353_v26 = vpop.f32.mrb[23].mxu0  ;;  %v1423_v5 = vsel %vm1403_vm4, %v11512_v16, %v1413_v20  ;;  %vm2447_vm4 = vcmp.gt.f32.partialorder %v12267_v44, 0.5 }
 0x2cc   :  { %v11515_v27 = vadd.f32 %v8796_v14, %v1353_v26  ;;  %v1422_v30 = vsel %vm1402_vm5, %v11513_v18, %v1412_v23  ;;  %v11116_v18 = vpack.c.bf16 %v572_v8, %v571_v7  ;;  %vm2453_vm5 = vcmp.gt.f32.partialorder %v12297_v50, 0.5 }
 0x2cd   :  { %v1415_v6 = vmul.f32 0.2, %v11514_v25  ;;  %10113 = vmatprep.mubr.msk.f32.mxu1 %vm1438_vm6, %v1422_v30  ;;  %vm1405_vm7 = vcmp.gt.f32.partialorder %v11514_v25, 0.0 }
 0x2ce   :  { %vm1404_vm8 = vcmp.gt.f32.partialorder %v11515_v27, 0.0  ;;  %v1414_v9 = vmul.f32 0.2, %v11515_v27  ;;  %v10090_v10 = vpop.f32.mrb[24].mxu0  ;;  %10114 = vmatmul.mubr.msk.f32.vlgmr.msra.gmra.mrb[20].mxu1 %vm1438_vm6, %v1423_v5 }
 0x2cf   :  { %v11516_v11 = vadd.f32 %v10090_v10, %v8796_v14  ;;  %v1363_v12 = vpop.f32.mrb[25].mxu0  ;;  %11111 = vmatpush3.bf16.msra.mxu1 %v11108_v13  ;;  %v1425_v16 = vsel %vm1405_vm7, %v11514_v25, %v1415_v6  ;;  %vm2450_vm7 = vcmp.gt.f32.partialorder %v12284_v47, 0.5 }
 0x2d0   :  { %v11517_v15 = vadd.f32 %v8796_v14, %v1363_v12  ;;  %v1424_v17 = vsel %vm1404_vm8, %v11515_v27, %v1414_v9  ;;  %11113 = vmatprep.subr.bf16.mxu1 %v11112_v37  ;;  %vm2449_vm8 = vcmp.gt.f32.partialorder %v12277_v46, 0.5 }
 0x2d1   :  { %v1417_v21 = vmul.f32 0.2, %v11516_v11  ;;  %10116 = vmatprep.mubr.msk.f32.mxu1 %vm1438_vm6, %v1424_v17  ;;  %vm1407_vm9 = vcmp.gt.f32.partialorder %v11516_v11, 0.0  ;;  %v573_v17 = vld [vmem:[%s12465_s15 + $0x30] sm:$0xff] }
 0x2d2   :  { %vm1406_vm10 = vcmp.gt.f32.partialorder %v11517_v15, 0.0  ;;  %v1416_v20 = vmul.f32 0.2, %v11517_v15  ;;  %v10093_v22 = vpop.f32.mrb[26].mxu0  ;;  %10117 = vmatmul.mubr.msk.f32.gmra.mrb[22].mxu1 %vm1438_vm6, %v1425_v16  ;;  %v575_v16 = vld [vmem:[%s12465_s15 + $0x40] sm:$0xff] }
 0x2d3   :  { %v11518_v23 = vadd.f32 %v10093_v22, %v8796_v14  ;;  %v1373_v24 = vpop.f32.mrb[27].mxu0  ;;  %11115 = vmatpush3.bf16.msra.mxu1 %v11112_v37  ;;  %v1427_v27 = vsel %vm1407_vm9, %v11516_v11, %v1417_v21  ;;  %v574_v21 = vld [vmem:[%s12465_s15 + $0x38] sm:$0xff]  ;;  %vm2454_vm9 = vcmp.gt.f32.partialorder %v12304_v51, 0.5 }
 0x2d4   :  { %v11519_v26 = vadd.f32 %v8796_v14, %v1373_v24  ;;  %v1426_v30 = vsel %vm1406_vm10, %v11517_v15, %v1416_v20  ;;  %11117 = vmatprep.subr.bf16.mxu1 %v11116_v18  ;;  %v576_v20 = vld [vmem:[%s12465_s15 + $0x48] sm:$0xff]  ;;  %vm14718_vm10 = vcmp.gt.f32.partialorder %v12307_v52, 0.5 }
 0x2d5   :  { %v1419_v13 = vmul.f32 0.2, %v11518_v23  ;;  %10119 = vmatprep.mubr.msk.f32.mxu1 %vm1438_vm6, %v1426_v30  ;;  %vm1409_vm11 = vcmp.gt.f32.partialorder %v11518_v23, 0.0  ;;  %v11124_v22 = vpack.c.bf16 %v576_v20, %v575_v16 }
 0x2d6   :  { %vm1408_vm12 = vcmp.gt.f32.partialorder %v11519_v26, 0.0  ;;  %v1418_v5 = vmul.f32 0.2, %v11519_v26  ;;  %v10096_v25 = vpop.f32.mrb[28].mxu0  ;;  %10120 = vmatmul.mubr.msk.f32.gmra.mrb[24].mxu1 %vm1438_vm6, %v1427_v27 }
 0x2d7   :  { %v11520_v6 = vadd.f32 %v10096_v25, %v8796_v14  ;;  %v1383_v7 = vpop.f32.mrb[29].mxu0  ;;  %v1429_v10 = vsel %vm1409_vm11, %v11518_v23, %v1419_v13  ;;  %vm14719_vm11 = vcmp.gt.f32.partialorder %v12314_v53, 0.5 }
 0x2d8   :  { %v11521_v8 = vadd.f32 %v8796_v14, %v1383_v7  ;;  %v1428_v9 = vsel %vm1408_vm12, %v11519_v26, %v1418_v5  ;;  %v11120_v14 = vpack.c.bf16 %v574_v21, %v573_v17  ;;  %vm14717_vm12 = vcmask 1040384  }
 0x2d9   :  { %v1421_v37 = vmul.f32 0.2, %v11520_v6  ;;  %10122 = vmatprep.mubr.msk.f32.mxu1 %vm1438_vm6, %v1428_v9  ;;  %vm1411_vm13 = vcmp.gt.f32.partialorder %v11520_v6, 0.0  ;;  %v8838_v9 = vld [vmem:[%s12629_s5] ss:$0 sm:$0xff] }
 0x2da   :  { %vm1410_vm14 = vcmp.gt.f32.partialorder %v11521_v8, 0.0  ;;  %v1420_v11 = vmul.f32 0.2, %v11521_v8  ;;  %10123 = vmatmul.mubr.msk.f32.gmra.mrb[26].mxu1 %vm1438_vm6, %v1429_v10 }
 0x2db   :  { %v1431_v15 = vsel %vm1411_vm13, %v11520_v6, %v1421_v37  ;;  %vm14716_vm13 = vcmask 654336  }
 0x2dc   :  { %v1430_v12 = vsel %vm1410_vm14, %v11521_v8, %v1420_v11  ;;  %vm14715_vm14 = vcmask 15360  }
 0x2dd   :  { %10125 = vmatprep.mubr.msk.f32.mxu1 %vm1438_vm6, %v1430_v12 }
 0x2de   :  { %10126 = vmatmul.mubr.msk.f32.gmra.mrb[28].mxu1 %vm1438_vm6, %v1431_v15 }
 0x2df   :  { %10136 = vmatprep.mubr.msk.f32.mxu1 %vm930_vm3, %v12320_v55  ;;  %v578_v55 = vld [vmem:[%s12465_s15 + $0x58] sm:$0xff] }
 0x2e2   :  { %10137 = vmatmul.mubr.msk.f32.vlgmr.msra.gmra.mrb[30].mxu1 %vm930_vm3, %v12318_v54  ;;  %v577_v54 = vld [vmem:[%s12465_s15 + $0x50] sm:$0xff] }
 0x2e3   :  { %10139 = vmatprep.mubr.msk.f32.mxu1 %vm930_vm3, %v12328_v57  ;;  %11119 = vmatpush3.bf16.msra.mxu1 %v11116_v18  ;;  %v14692_v57 = vmov 1  }
 0x2e4   :  { %11121 = vmatprep.subr.bf16.mxu1 %v11120_v14  ;;  %11730 = vset.pattern.permute.xlu1 %v14692_v57 }
 0x2e6   :  { %10140 = vmatmul.mubr.msk.f32.gmra.mrb[32].mxu1 %vm930_vm3, %v12326_v56  ;;  %v11128_v56 = vpack.c.bf16 %v578_v55, %v577_v54 }
 0x2e7   :  { %10142 = vmatprep.mubr.msk.f32.mxu1 %vm930_vm3, %v12336_v59  ;;  %11123 = vmatpush3.bf16.msra.mxu1 %v11120_v14  ;;  %v580_v59 = vld [vmem:[%s12562_s26] sm:$0xff] }
 0x2e8   :  { %11125 = vmatprep.subr.bf16.mxu1 %v11124_v22 }
 0x2ea   :  { %10143 = vmatmul.mubr.msk.f32.gmra.mrb[34].mxu1 %vm930_vm3, %v12334_v58  ;;  %v14690_v58 = vmov 0  }
 0x2eb   :  { %10145 = vmatprep.mubr.msk.f32.mxu1 %vm930_vm3, %v12344_v61  ;;  %11729 = vset.pattern.permute.xlu0 %v14690_v58 }
 0x2ee   :  { %10146 = vmatmul.mubr.msk.f32.gmra.mrb[36].mxu1 %vm930_vm3, %v12342_v60  ;;  %v581_v60 = vld [vmem:[%s12562_s26 + $0x8] sm:$0xff] }
 0x2ef   :  { %10148 = vmatprep.mubr.msk.f32.mxu1 %vm930_vm3, %v12354_v2  ;;  %v11132_v61 = vpack.c.bf16 %v581_v60, %v580_v59  ;;  %v583_v2 = vld [vmem:[%s12562_s26 + $0x18] sm:$0xff] }
 0x2f1   :  { %11133 = vmatprep.subr.bf16.mxu0 %v11132_v61 }
 0x2f2   :  { %10149 = vmatmul.mubr.msk.f32.gmra.mrb[38].mxu1 %vm930_vm3, %v12352_v1  ;;  %11135 = vmatpush3.bf16.msra.mxu0 %v11132_v61  ;;  %v582_v1 = vld [vmem:[%s12562_s26 + $0x10] sm:$0xff] }
 0x2f3   :  { %10159 = vmatprep.mubr.msk.f32.mxu1 %vm930_vm3, %v12377_v29  ;;  %v8817_v29 = vld [vmem:[%s12571_s30] ss:$0 sm:$0xff] }
 0x2f6   :  { %10160 = vmatmul.mubr.msk.f32.vlgmr.msra.gmra.mrb[30].mxu1 %vm930_vm3, %v12375_v28  ;;  %v11136_v28 = vpack.c.bf16 %v583_v2, %v582_v1 }
 0x2f7   :  { %10162 = vmatprep.mubr.msk.f32.mxu1 %vm930_vm3, %v12385_v32  ;;  %11127 = vmatpush3.bf16.msra.mxu1 %v11124_v22 }
 0x2f8   :  { %11129 = vmatprep.subr.bf16.mxu1 %v11128_v56  ;;  %11137 = vmatprep.subr.bf16.mxu0 %v11136_v28 }
 0x2f9   :  { %11139 = vmatpush3.bf16.msra.mxu0 %v11136_v28 }
 0x2fa   :  { %10163 = vmatmul.mubr.msk.f32.gmra.mrb[32].mxu1 %vm930_vm3, %v12383_v31 }
 0x2fb   :  { %10165 = vmatprep.mubr.msk.f32.mxu1 %vm930_vm3, %v12396_v34  ;;  %11131 = vmatpush3.bf16.msra.mxu1 %v11128_v56 }
 0x2fe   :  { %10166 = vmatmul.mubr.msk.f32.gmra.mrb[34].mxu1 %vm930_vm3, %v12394_v33 }
 0x2ff   :  { %10168 = vmatprep.mubr.msk.f32.mxu1 %vm930_vm3, %v12404_v36 }
 0x302   :  { %10169 = vmatmul.mubr.msk.f32.gmra.mrb[36].mxu1 %vm930_vm3, %v12402_v35 }
 0x303   :  { %10171 = vmatprep.mubr.msk.f32.mxu1 %vm930_vm3, %v12412_v38 }
 0x306   :  { %10172 = vmatmul.mubr.msk.f32.gmra.mrb[38].mxu1 %vm930_vm3, %v12410_v19 }
 0x307   :  { %10182 = vmatprep.mubr.msk.f32.mxu1 %vm930_vm3, %v12414_v39 }
 0x30a   :  { %10183 = vmatmul.mubr.msk.f32.vlgmr.msra.gmra.mrb[30].mxu1 %vm930_vm3, %v12422_v40 }
 0x30b   :  { %10185 = vmatprep.mubr.msk.f32.mxu1 %vm930_vm3, %v12424_v41 }
 0x30e   :  { %10186 = vmatmul.mubr.msk.f32.gmra.mrb[32].mxu1 %vm930_vm3, %v12430_v42 }
 0x30f   :  { %10188 = vmatprep.mubr.msk.f32.mxu1 %vm930_vm3, %v12432_v43 }
 0x312   :  { %10189 = vmatmul.mubr.msk.f32.gmra.mrb[34].mxu1 %vm930_vm3, %v12438_v62 }
 0x313   :  { %10191 = vmatprep.mubr.msk.f32.mxu1 %vm930_vm3, %v12440_v63 }
 0x316   :  { %10192 = vmatmul.mubr.msk.f32.gmra.mrb[36].mxu1 %vm930_vm3, %v12446_v0 }
 0x317   :  { %10194 = vmatprep.mubr.msk.f32.mxu1 %vm930_vm3, %v12448_v3 }
 0x31a   :  { %10195 = vmatmul.mubr.msk.f32.gmra.mrb[38].mxu1 %vm930_vm3, %v12454_v4 }
 0x31b   :  { %10245 = vmatprep.mubr.msk.f32.mxu1 %vm639_vm1, %v12267_v44 }
 0x3a1   :  { %v10115_v31 = vpop.f32.mrb[20].mxu1 }
 0x3a2   :  { %v12574_v32 = vadd.f32 %v10115_v31, %v8817_v29  ;;  %v1535_v33 = vpop.f32.mrb[21].mxu1 }
 0x3a3   :  { %v12578_v35 = vadd.f32 %v8817_v29, %v1535_v33 }
 0x3a4   :  { %2547 = vperm.xlu1 %11730, %v12574_v32   ;;  %2464 = vperm.xlu0 %11729, %v12574_v32  }
 0x3a5   :  { %v10118_v34 = vpop.f32.mrb[22].mxu1 }
 0x3a6   :  { %v12580_v36 = vadd.f32 %v10118_v34, %v8817_v29  ;;  %v1545_v19 = vpop.f32.mrb[23].mxu1 }
 0x3a7   :  { %v12584_v23 = vadd.f32 %v8817_v29, %v1545_v19 }
 0x3a8   :  { %2459 = vperm.xlu0 %11729, %v12578_v35   ;;  %2555 = vperm.xlu1 %11730, %v12580_v36  }
 0x3a9   :  { %v10121_v38 = vpop.f32.mrb[24].mxu1 }
 0x3aa   :  { %v1555_v18 = vpop.f32.mrb[25].mxu1  ;;  %v12590_v30 = vadd.f32 %v10121_v38, %v8817_v29 }
 0x3ab   :  { %v12595_v5 = vadd.f32 %v8817_v29, %v1555_v18 }
 0x3ac   :  { %11731 = vset.pattern.permute.xlu0 %v14692_v57  ;;  %11733 = vset.pattern.permute.xlu1 %v14690_v58 }
 0x3ad   :  { %2543 = vperm.xlu0 %11731, %v12578_v35   ;;  %2469 = vperm.xlu1 %11733, %v12584_v23   ;;  %v10124_v24 = vpop.f32.mrb[26].mxu1 }
 0x3ae   :  { %v1565_v26 = vpop.f32.mrb[27].mxu1  ;;  %v12603_v25 = vadd.f32 %v10124_v24, %v8817_v29 }
 0x3af   :  { %v12608_v6 = vadd.f32 %v8817_v29, %v1565_v26 }
 0x3b1   :  { %11732 = vset.pattern.permute.xlu0 %v14690_v58  ;;  %2484 = vperm.xlu1 %11733, %v12590_v30   ;;  %v10127_v13 = vpop.f32.mrb[28].mxu1 }
 0x3b2   :  { %2474 = vperm.xlu0 %11732, %v12580_v36   ;;  %v1575_v27 = vpop.f32.mrb[29].mxu1  ;;  %v12615_v8 = vadd.f32 %v10127_v13, %v8817_v29 }
 0x3b3   :  { %v12610_v7 = vadd.f32 %v8817_v29, %v1575_v27 }
 0x3b5   :  { %2479 = vperm.xlu1 %11733, %v12595_v5  }
 0x3b6   :  { %11734 = vset.pattern.permute.xlu0 %v14692_v57 }
 0x3b7   :  { %2551 = vperm.xlu0 %11734, %v12584_v23  }
 0x3b9   :  { %11735 = vset.pattern.permute.xlu1 %v14692_v57 }
 0x3ba   :  { %2559 = vperm.xlu1 %11735, %v12595_v5  }
 0x3bb   :  { %2563 = vperm.xlu0 %11734, %v12590_v30  }
 0x3be   :  { %11736 = vset.pattern.permute.xlu1 %v14690_v58 }
 0x3bf   :  { %2571 = vperm.xlu0 %11734, %v12603_v25   ;;  %2494 = vperm.xlu1 %11736, %v12603_v25  }
 0x3c3   :  { %11739 = vset.pattern.permute.xlu0 %v14690_v58  ;;  %2489 = vperm.xlu1 %11736, %v12608_v6  }
 0x3c4   :  { %2499 = vperm.xlu0 %11739, %v12610_v7  }
 0x3c7   :  { %11737 = vset.pattern.permute.xlu1 %v14692_v57 }
 0x3c8   :  { %2567 = vperm.xlu1 %11737, %v12608_v6   ;;  %11741 = vset.pattern.permute.xlu0 %v14692_v57 }
 0x3c9   :  { %2579 = vperm.xlu0 %11741, %v12615_v8  }
 0x3cc   :  { %11738 = vset.pattern.permute.xlu1 %v14690_v58 }
 0x3cd   :  { %2504 = vperm.xlu1 %11738, %v12615_v8   ;;  %11744 = vset.pattern.permute.xlu0 %v14690_v58 }
 0x3d1   :  { %11740 = vset.pattern.permute.xlu1 %v14692_v57 }
 0x3d2   :  { %2575 = vperm.xlu1 %11740, %v12610_v7  }
 0x3dd   :  { %v10184_v37 = vpop.f32.mrb[30].mxu1 }
 0x3de   :  { %v12632_v10 = vadd.f32 %v10184_v37, %v8838_v9  ;;  %v1906_v11 = vpop.f32.mrb[31].mxu1 }
 0x3df   :  { %v12634_v12 = vadd.f32 %v8838_v9, %v1906_v11 }
 0x3e0   :  { %v1976_v15 = vmul.f32 0.044715, %v12632_v10 }
 0x3e1   :  { %v1975_v17 = vmul.f32 0.044715, %v12634_v12  ;;  %v10187_v21 = vpop.f32.mrb[32].mxu1 }
 0x3e2   :  { %v1986_v14 = vmul.f32 %v12632_v10, %v1976_v15  ;;  %v12639_v16 = vadd.f32 %v10187_v21, %v8838_v9  ;;  %v1916_v20 = vpop.f32.mrb[33].mxu1 }
 0x3e3   :  { %v1985_v22 = vmul.f32 %v12634_v12, %v1975_v17  ;;  %v12642_v54 = vadd.f32 %v8838_v9, %v1916_v20 }
 0x3e4   :  { %v1996_v55 = vmul.f32 %v12632_v10, %v1986_v14  ;;  %v1978_v56 = vmul.f32 0.044715, %v12639_v16 }
 0x3e5   :  { %v1995_v59 = vmul.f32 %v12634_v12, %v1985_v22  ;;  %v1977_v60 = vmul.f32 0.044715, %v12642_v54  ;;  %v10190_v61 = vpop.f32.mrb[34].mxu1 }
 0x3e6   :  { %v2006_v1 = vadd.f32 %v12632_v10, %v1996_v55  ;;  %v1988_v2 = vmul.f32 %v12639_v16, %v1978_v56  ;;  %v12650_v28 = vadd.f32 %v10190_v61, %v8838_v9  ;;  %v1926_v29 = vpop.f32.mrb[35].mxu1 }
 0x3e7   :  { %v2005_v31 = vadd.f32 %v12634_v12, %v1995_v59  ;;  %v1987_v33 = vmul.f32 %v12642_v54, %v1977_v60  ;;  %v12654_v34 = vadd.f32 %v8838_v9, %v1926_v29 }
 0x3e8   :  { %v2016_v19 = vmul.f32 0.7978846, %v2006_v1  ;;  %v1998_v38 = vmul.f32 %v12639_v16, %v1988_v2  ;;  %v1980_v18 = vmul.f32 0.044715, %v12650_v28 }
 0x3e9   :  { %v1997_v24 = vmul.f32 %v12642_v54, %v1987_v33  ;;  %v1979_v26 = vmul.f32 0.044715, %v12654_v34  ;;  %v10193_v13 = vpop.f32.mrb[36].mxu1  ;;  %v2015_v27 = vmul.f32 0.7978846, %v2005_v31 }
 0x3ea   :  { %11778 = vtanh.f32 %v2016_v19  ;;  %v2008_v37 = vadd.f32 %v12639_v16, %v1998_v38  ;;  %v1990_v11 = vmul.f32 %v12650_v28, %v1980_v18  ;;  %v12662_v15 = vadd.f32 %v10193_v13, %v8838_v9  ;;  %v1936_v17 = vpop.f32.mrb[37].mxu1 }
 0x3eb   :  { %v2007_v21 = vadd.f32 %v12642_v54, %v1997_v24  ;;  %v1989_v14 = vmul.f32 %v12654_v34, %v1979_v26  ;;  %v12666_v20 = vadd.f32 %v8838_v9, %v1936_v17  ;;  %11780 = vtanh.f32 %v2015_v27 }
 0x3ec   :  { %v2000_v22 = vmul.f32 %v12650_v28, %v1990_v11  ;;  %v1982_v55 = vmul.f32 0.044715, %v12662_v15  ;;  %v2018_v56 = vmul.f32 0.7978846, %v2008_v37 }
 0x3ed   :  { %v1999_v59 = vmul.f32 %v12654_v34, %v1989_v14  ;;  %v1981_v60 = vmul.f32 0.044715, %v12666_v20  ;;  %v10196_v61 = vpop.f32.mrb[38].mxu1  ;;  %v2017_v1 = vmul.f32 0.7978846, %v2007_v21 }
 0x3ee   :  { %v2010_v2 = vadd.f32 %v12650_v28, %v2000_v22  ;;  %v1992_v29 = vmul.f32 %v12662_v15, %v1982_v55  ;;  %v12674_v31 = vadd.f32 %v10196_v61, %v8838_v9  ;;  %v1946_v33 = vpop.f32.mrb[39].mxu1  ;;  %11782 = vtanh.f32 %v2018_v56 }
 0x3ef   :  { %v2009_v19 = vadd.f32 %v12654_v34, %v1999_v59  ;;  %v1991_v38 = vmul.f32 %v12666_v20, %v1981_v60  ;;  %v12678_v18 = vadd.f32 %v8838_v9, %v1946_v33  ;;  %11784 = vtanh.f32 %v2017_v1 }
 0x3f0   :  { %v2002_v24 = vmul.f32 %v12662_v15, %v1992_v29  ;;  %v1984_v26 = vmul.f32 0.044715, %v12674_v31  ;;  %v2020_v13 = vmul.f32 0.7978846, %v2010_v2  ;;  %v1965_v29 = vmul.f32 0.5, %v12634_v12 }
 0x3f1   :  { %v2001_v27 = vmul.f32 %v12666_v20, %v1991_v38  ;;  %v1983_v37 = vmul.f32 0.044715, %v12678_v18  ;;  %v2019_v11 = vmul.f32 0.7978846, %v2009_v19  ;;  %v1966_v19 = vmul.f32 0.5, %v12632_v10 }
 0x3f2   :  { %v2012_v17 = vadd.f32 %v12662_v15, %v2002_v24  ;;  %v1994_v21 = vmul.f32 %v12674_v31, %v1984_v26  ;;  %11786 = vtanh.f32 %v2020_v13  ;;  %v1968_v10 = vmul.f32 0.5, %v12639_v16 }
 0x3f3   :  { %v2011_v14 = vadd.f32 %v12666_v20, %v2001_v27  ;;  %v1993_v9 = vmul.f32 %v12678_v18, %v1983_v37  ;;  %11788 = vtanh.f32 %v2019_v11 }
 0x3f4   :  { %v11779_v22 = vpop.eup %11778  ;;  %v2004_v55 = vmul.f32 %v12674_v31, %v1994_v21  ;;  %v2022_v56 = vmul.f32 0.7978846, %v2012_v17  ;;  %v1967_v21 = vmul.f32 0.5, %v12642_v54  ;;  %v1970_v54 = vmul.f32 0.5, %v12650_v28 }
 0x3f5   :  { %v11781_v59 = vpop.eup %11780  ;;  %v2036_v60 = vadd.f32 1.0, %v11779_v22  ;;  %v2003_v61 = vmul.f32 %v12678_v18, %v1993_v9  ;;  %v2021_v1 = vmul.f32 0.7978846, %v2011_v14 }
 0x3f6   :  { %v2014_v2 = vadd.f32 %v12674_v31, %v2004_v55  ;;  %v2035_v33 = vadd.f32 1.0, %v11781_v59  ;;  %11790 = vtanh.f32 %v2022_v56  ;;  %v1969_v59 = vmul.f32 0.5, %v12654_v34 }
 0x3f7   :  { %v2013_v38 = vadd.f32 %v12678_v18, %v2003_v61  ;;  %11792 = vtanh.f32 %v2021_v1  ;;  %v2046_v37 = vmul.f32 %v2036_v60, %v1966_v19  ;;  %v1972_v34 = vmul.f32 0.5, %v12662_v15 }
 0x3f8   :  { %v11783_v24 = vpop.eup %11782  ;;  %v2045_v26 = vmul.f32 %v2035_v33, %v1965_v29  ;;  %v2024_v13 = vmul.f32 0.7978846, %v2014_v2  ;;  %v1971_v33 = vmul.f32 0.5, %v12666_v20  ;;  %v1974_v20 = vmul.f32 0.5, %v12674_v31 }
 0x3f9   :  { %v11785_v27 = vpop.eup %11784  ;;  %v2038_v11 = vadd.f32 1.0, %v11783_v24  ;;  %v2023_v17 = vmul.f32 0.7978846, %v2013_v38 }
 0x3fa   :  { %10205 = vmatprep.mubr.msk.f32.mxu0 %vm930_vm3, %v2045_v26  ;;  %v2037_v14 = vadd.f32 1.0, %v11785_v27  ;;  %11794 = vtanh.f32 %v2024_v13  ;;  %v1973_v27 = vmul.f32 0.5, %v12678_v18 }
 0x3fb   :  { %10206 = vmatmul.mubr.msk.f32.vlgmr.msra.gmra.mrb[30].mxu0 %vm930_vm3, %v2046_v37  ;;  %11796 = vtanh.f32 %v2023_v17  ;;  %2777 = vxpose.xlu1.b32.start [1/10] (short) (narrow) %v12267_v44, 16  ;;  %v2048_v55 = vmul.f32 %v2038_v11, %v1968_v10 }
 0x3fc   :  { %v11787_v12 = vpop.eup %11786  ;;  %v2047_v9 = vmul.f32 %v2037_v14, %v1967_v21 }
 0x3fd   :  { %v11789_v22 = vpop.eup %11788  ;;  %v2040_v56 = vadd.f32 1.0, %v11787_v12 }
 0x3fe   :  { %10208 = vmatprep.mubr.msk.f32.mxu0 %vm930_vm3, %v2047_v9  ;;  %v2039_v60 = vadd.f32 1.0, %v11789_v22 }
 0x3ff   :  { %10209 = vmatmul.mubr.msk.f32.gmra.mrb[32].mxu0 %vm930_vm3, %v2048_v55  ;;  %2778 = vxpose.xlu1.b32.cont [2/10] (short) (narrow) %v12274_v45, 16  ;;  %v2050_v2 = vmul.f32 %v2040_v56, %v1970_v54 }
 0x400   :  { %v11791_v16 = vpop.eup %11790  ;;  %v2049_v61 = vmul.f32 %v2039_v60, %v1969_v59 }
 0x401   :  { %v11793_v1 = vpop.eup %11792  ;;  %v2042_v29 = vadd.f32 1.0, %v11791_v16 }
 0x402   :  { %10211 = vmatprep.mubr.msk.f32.mxu0 %vm930_vm3, %v2049_v61  ;;  %v2041_v19 = vadd.f32 1.0, %v11793_v1 }
 0x403   :  { %10212 = vmatmul.mubr.msk.f32.gmra.mrb[34].mxu0 %vm930_vm3, %v2050_v2  ;;  %2779 = vxpose.xlu1.b32.cont [3/10] (short) (narrow) %v12277_v46, 16  ;;  %v2052_v26 = vmul.f32 %v2042_v29, %v1972_v34 }
 0x404   :  { %v11795_v38 = vpop.eup %11794  ;;  %v2051_v28 = vmul.f32 %v2041_v19, %v1971_v33 }
 0x405   :  { %v11797_v24 = vpop.eup %11796  ;;  %v2044_v13 = vadd.f32 1.0, %v11795_v38 }
 0x406   :  { %10214 = vmatprep.mubr.msk.f32.mxu0 %vm930_vm3, %v2051_v28  ;;  %v2043_v37 = vadd.f32 1.0, %v11797_v24 }
 0x407   :  { %10215 = vmatmul.mubr.msk.f32.gmra.mrb[36].mxu0 %vm930_vm3, %v2052_v26  ;;  %2780 = vxpose.xlu1.b32.cont [4/10] (short) (narrow) %v12284_v47, 16  ;;  %v2054_v15 = vmul.f32 %v2044_v13, %v1974_v20 }
 0x408   :  { %v2053_v11 = vmul.f32 %v2043_v37, %v1973_v27 }
 0x40a   :  { %10217 = vmatprep.mubr.msk.f32.mxu0 %vm930_vm3, %v2053_v11 }
 0x40b   :  { %10218 = vmatmul.mubr.msk.f32.gmra.mrb[38].mxu0 %vm930_vm3, %v2054_v15  ;;  %2781 = vxpose.xlu1.b32.cont [5/10] (short) (narrow) %v12287_v48, 16 }
 0x40f   :  { %2782 = vxpose.xlu1.b32.cont [6/10] (short) (narrow) %v12294_v49, 16 }
 0x413   :  { %2783 = vxpose.xlu1.b32.cont [7/10] (short) (narrow) %v12297_v50, 16 }
 0x417   :  { %2784 = vxpose.xlu1.b32.cont [8/10] (short) (narrow) %v12304_v51, 16 }
 0x41b   :  { %2785 = vxpose.xlu1.b32.cont [9/10] (short) (narrow) %v12307_v52, 16 }
 0x41f   :  { %2786 = vxpose.xlu1.b32.end [10/10] (short) (narrow) %v12314_v53, 16 }
 0x423   :  { %v2548_v31 = vpop.permute.xlu1 %2547  ;;  %v2465_v18 = vpop.permute.xlu0 %2464 }
 0x424   :  { %v2508_v2 = vsel %vm2448_vm0, %v2465_v18, -1e+30  ;;  %v2583_v33 = vsel %vm2448_vm0, %v2548_v31, -1e+30 }
 0x425   :  { %v2518_v13 = vsel %vm639_vm1, %v2508_v2, -inf }
 0x427   :  { %v2460_v17 = vpop.permute.xlu0 %2459  ;;  %v12722_v21 = vpop.permute.xlu1 %2555 }
 0x428   :  { %v2507_v19 = vsel %vm2447_vm4, %v2460_v17, -1e+30 }
 0x429   :  { %v2517_v11 = vsel %vm639_vm1, %v2507_v19, -inf }
 0x42c   :  { %v2544_v14 = vpop.permute.xlu0 %2543  ;;  %v2470_v10 = vpop.permute.xlu1 %2469 }
 0x42d   :  { %v2509_v28 = vsel %vm2449_vm8, %v2470_v10, -1e+30  ;;  %v2582_v15 = vsel %vm2447_vm4, %v2544_v14, -1e+30 }
 0x42e   :  { %v2519_v17 = vsel %vm639_vm1, %v2509_v28, -inf }
 0x430   :  { %v2485_v12 = vpop.permute.xlu1 %2484 }
 0x431   :  { %v2475_v9 = vpop.permute.xlu0 %2474  ;;  %v2512_v61 = vsel %vm2452_vm15, %v2485_v12, -1e+30 }
 0x432   :  { %v2523_v24 = vsel %vm639_vm1, %v2512_v61, -inf  ;;  %v2510_v26 = vsel %vm2450_vm7, %v2475_v9, -1e+30 }
 0x433   :  { %v2524_v10 = vmax.f32 %v2518_v13, %v2523_v24  ;;  %v2520_v12 = vsel %vm639_vm1, %v2510_v26, -inf }
 0x434   :  { %v2480_v22 = vpop.permute.xlu1 %2479 }
 0x435   :  { %v2511_v29 = vsel %vm2451_vm2, %v2480_v22, -1e+30 }
 0x436   :  { %v2552_v55 = vpop.permute.xlu0 %2551  ;;  %v2521_v27 = vsel %vm639_vm1, %v2511_v29, -inf }
 0x439   :  { %v2560_v56 = vpop.permute.xlu1 %2559 }
 0x43a   :  { %v2564_v59 = vpop.permute.xlu0 %2563  ;;  %v2586_v31 = vsel %vm2451_vm2, %v2560_v56, -1e+30 }
 0x43b   :  { %v2587_v9 = vsel %vm2452_vm15, %v2564_v59, -1e+30  ;;  %v2596_v2 = vsel %vm639_vm1, %v2586_v31, -inf }
 0x43c   :  { %v2598_v59 = vsel %vm639_vm1, %v2587_v9, -inf }
 0x43d   :  { %11742 = vset.pattern.permute.xlu1 %v14690_v58 }
 0x43e   :  { %v2495_v60 = vpop.permute.xlu1 %2494  ;;  %v2572_v54 = vpop.permute.xlu0 %2571 }
 0x43f   :  { %v2514_v37 = vsel %vm2454_vm9, %v2495_v60, -1e+30  ;;  %v2522_v60 = vmax.f32 %v2517_v11, %v2521_v27  ;;  %v2593_v27 = vsel %vm639_vm1, %v2583_v33, -inf }
 0x442   :  { %v2490_v16 = vpop.permute.xlu1 %2489 }
 0x443   :  { %v2500_v1 = vpop.permute.xlu0 %2499  ;;  %v2513_v34 = vsel %vm2453_vm5, %v2490_v16, -1e+30  ;;  %v2527_v16 = vsel %vm639_vm1, %v2514_v37, -inf  ;;  %v2585_v37 = vsel %vm2450_vm7, %v12722_v21, -1e+30 }
 0x444   :  { %v2515_v20 = vsel %vm14718_vm10, %v2500_v1, -1e+30  ;;  %v2525_v18 = vsel %vm639_vm1, %v2513_v34, -inf  ;;  %v2584_v1 = vsel %vm2449_vm8, %v2552_v55, -1e+30  ;;  %v2528_v24 = vmax.f32 %v2520_v12, %v2527_v16 }
 0x445   :  { %v2529_v61 = vsel %vm639_vm1, %v2515_v20, -inf  ;;  %v2526_v29 = vmax.f32 %v2519_v17, %v2525_v18  ;;  %v2589_v34 = vsel %vm2454_vm9, %v2572_v54, -1e+30  ;;  %v2592_v20 = vsel %vm639_vm1, %v2582_v15, -inf }
 0x446   :  { %v2530_v26 = vmax.f32 %v2522_v60, %v2529_v61  ;;  %v2594_v54 = vsel %vm639_vm1, %v2584_v1, -inf  ;;  %v2602_v11 = vsel %vm639_vm1, %v2589_v34, -inf  ;;  %v2597_v9 = vmax.f32 %v2592_v20, %v2596_v2 }
 0x447   :  { %v2568_v38 = vpop.permute.xlu1 %2567  ;;  %v2534_v31 = vmax.f32 %v2526_v29, %v2528_v24  ;;  %v2595_v60 = vsel %vm639_vm1, %v2585_v37, -inf }
 0x448   :  { %v2580_v22 = vpop.permute.xlu0 %2579  ;;  %v2588_v14 = vsel %vm2453_vm5, %v2568_v38, -1e+30  ;;  %v2603_v16 = vmax.f32 %v2595_v60, %v2602_v11  ;;  %v12829_v60 = vld [vmem:[%s12260_s3 + $0x28] sm:$0xff] }
 0x449   :  { %v2591_v28 = vsel %vm14719_vm11, %v2580_v22, -1e+30  ;;  %v2600_v55 = vsel %vm639_vm1, %v2588_v14, -inf  ;;  %v2599_v22 = vmax.f32 %v2593_v27, %v2598_v59  ;;  %v586_v27 = vld [vmem:[%s12799_s10 + $0x8] sm:$0xff] }
 0x44a   :  { %v2606_v18 = vsel %vm639_vm1, %v2591_v28, -inf }
 0x44b   :  { %v2607_v61 = vmax.f32 %v2599_v22, %v2606_v18  ;;  %v588_v18 = vld [vmem:[%s12799_s10 + $0x18] sm:$0xff]  ;;  %v12814_v22 = vld [vmem:[%s12260_s3 + $0x10] sm:$0xff] }
 0x44c   :  { %v2505_v56 = vpop.permute.xlu1 %2504 }
 0x44d   :  { %v2516_v19 = vsel %vm14719_vm11, %v2505_v56, -1e+30 }
 0x44e   :  { %v2531_v38 = vsel %vm639_vm1, %v2516_v19, -inf }
 0x44f   :  { %v2532_v13 = vmax.f32 %v2524_v10, %v2531_v38  ;;  %v2601_v10 = vmax.f32 %v2594_v54, %v2600_v55 }
 0x451   :  { %v2533_v17 = vmax.f32 %v2530_v26, %v2532_v13  ;;  %v2576_v12 = vpop.permute.xlu1 %2575  ;;  %v2609_v1 = vmax.f32 %v2601_v10, %v2603_v16  ;;  %v585_v13 = vld [vmem:[%s12799_s10] sm:$0xff]  ;;  %v12819_v10 = vld [vmem:[%s12260_s3 + $0x18] sm:$0xff] }
 0x452   :  { %v2590_v33 = vsel %vm14718_vm10, %v2576_v12, -1e+30  ;;  %v11140_v20 = vpack.c.bf16 %v586_v27, %v585_v13  ;;  %v12844_v16 = vld [vmem:[%s12260_s3 + $0x40] sm:$0xff] }
 0x453   :  { %v2535_v21 = vmax.f32 %v2533_v17, %v2534_v31  ;;  %v2604_v15 = vsel %vm639_vm1, %v2590_v33, -inf  ;;  %v587_v31 = vld [vmem:[%s12799_s10 + $0x10] sm:$0xff]  ;;  %v12824_v33 = vld [vmem:[%s12260_s3 + $0x20] sm:$0xff] }
 0x454   :  { %v2605_v14 = vmax.f32 %v2597_v9, %v2604_v15  ;;  %11141 = vmatprep.subr.bf16.mxu0 %v11140_v20  ;;  %v11144_v12 = vpack.c.bf16 %v588_v18, %v587_v31  ;;  %v12809_v9 = vld [vmem:[%s12260_s3 + $0x8] sm:$0xff]  ;;  %v12839_v15 = vld [vmem:[%s12260_s3 + $0x38] sm:$0xff] }
 0x455   :  { %v2536_v56 = vrot.slane %v2535_v21, 4  ;;  %11143 = vmatpush3.bf16.msra.mxu0 %v11140_v20 }
 0x456   :  { %v2608_v29 = vmax.f32 %v2605_v14, %v2607_v61  ;;  %11145 = vmatprep.subr.bf16.mxu0 %v11144_v12  ;;  %v12849_v61 = vld [vmem:[%s12260_s3 + $0x48] sm:$0xff]  ;;  %v8859_v14 = vld [vmem:[%s12856_s14] ss:$0 sm:$0xff] }
 0x457   :  { %v2537_v19 = vmax.f32 %v2535_v21, %v2536_v56  ;;  %v12834_v21 = vld [vmem:[%s12260_s3 + $0x30] sm:$0xff] }
 0x458   :  { %v2610_v34 = vmax.f32 %v2608_v29, %v2609_v1 }
 0x459   :  { %v2538_v28 = vrot.slane %v2537_v19, 2  ;;  %11147 = vmatpush3.bf16.msra.mxu0 %v11144_v12 }
 0x45a   :  { %v2611_v2 = vrot.slane %v2610_v34, 4 }
 0x45b   :  { %v2539_v38 = vmax.f32 %v2537_v19, %v2538_v28 }
 0x45c   :  { %v2612_v59 = vmax.f32 %v2610_v34, %v2611_v2 }
 0x45d   :  { %v2540_v26 = vrot.slane %v2539_v38, 1 }
 0x45e   :  { %v2613_v24 = vrot.slane %v2612_v59, 2 }
 0x45f   :  { %v2541_v54 = vmax.f32 %v2539_v38, %v2540_v26 }
 0x460   :  { %v2614_v55 = vmax.f32 %v2612_v59, %v2613_v24 }
 0x462   :  { %v2615_v37 = vrot.slane %v2614_v55, 1 }
 0x464   :  { %v2616_v11 = vmax.f32 %v2614_v55, %v2615_v37 }
 0x466   :  { %v2618_v17 = vsel %vm14717_vm12, %v2541_v54, %v2616_v11 }
 0x467   :  { %10243 = vmatprep.subr.msk.mxu1 %vm639_vm1, %v2618_v17 }
 0x468   :  { %10244 = vmatpush3.xpose.msk.msra.mxu1 %vm639_vm1, %v2618_v17 }
 0x46b   :  { %10246 = vmatmul.mubr.msk.f32.vlgmr.msra.gmra.mrb[40].mxu1 %vm639_vm1, %v12809_v9 }
 0x46c   :  { %10248 = vmatprep.mubr.msk.f32.mxu1 %vm639_vm1, %v12814_v22 }
 0x46f   :  { %10249 = vmatmul.mubr.msk.f32.gmra.mrb[42].mxu1 %vm639_vm1, %v12819_v10 }
 0x470   :  { %10251 = vmatprep.mubr.msk.f32.mxu1 %vm639_vm1, %v12824_v33 }
 0x473   :  { %10252 = vmatmul.mubr.msk.f32.gmra.mrb[44].mxu1 %vm639_vm1, %v12829_v60 }
 0x474   :  { %10254 = vmatprep.mubr.msk.f32.mxu1 %vm639_vm1, %v12834_v21 }
 0x477   :  { %10255 = vmatmul.mubr.msk.f32.gmra.mrb[46].mxu1 %vm639_vm1, %v12839_v15 }
 0x478   :  { %10257 = vmatprep.mubr.msk.f32.mxu1 %vm639_vm1, %v12844_v16 }
 0x47b   :  { %10258 = vmatmul.mubr.msk.f32.gmra.mrb[48].mxu1 %vm639_vm1, %v12849_v61  ;;  %v12909_v53 = vpop.trf.xlu1 }
 0x47c   :  { %14727 = vst [vmem:[#allocation9_spill] sm:$0xff] %v12909_v53  ;;  %10322 = vmatprep.mubr.msk.f32.mxu1 %vm14716_vm13, %v12909_v53 }
 0x4ce   :  { %v10207_v56 = vpop.f32.mrb[30].mxu0 }
 0x4cf   :  { %v12859_v1 = vadd.f32 %v10207_v56, %v8859_v14  ;;  %v2157_v29 = vpop.f32.mrb[31].mxu0 }
 0x4d0   :  { %v12861_v19 = vadd.f32 %v8859_v14, %v2157_v29 }
 0x4d1   :  { %v2217_v34 = vmul.f32 0.044715, %v12859_v1 }
 0x4d2   :  { %v2216_v28 = vmul.f32 0.044715, %v12861_v19  ;;  %v10210_v2 = vpop.f32.mrb[32].mxu0 }
 0x4d3   :  { %v2227_v59 = vmul.f32 %v2217_v34, %v12859_v1  ;;  %v12866_v38 = vadd.f32 %v10210_v2, %v8859_v14  ;;  %v2167_v24 = vpop.f32.mrb[33].mxu0 }
 0x4d4   :  { %v2226_v26 = vmul.f32 %v2216_v28, %v12861_v19  ;;  %v12869_v55 = vadd.f32 %v8859_v14, %v2167_v24 }
 0x4d5   :  { %v2237_v13 = vmul.f32 %v2227_v59, %v12859_v1  ;;  %v2219_v27 = vmul.f32 0.044715, %v12866_v38 }
 0x4d6   :  { %v2236_v37 = vmul.f32 %v2226_v26, %v12861_v19  ;;  %v2218_v20 = vmul.f32 0.044715, %v12869_v55  ;;  %v10213_v54 = vpop.f32.mrb[34].mxu0 }
 0x4d7   :  { %v2247_v11 = vadd.f32 %v2237_v13, %v12859_v1  ;;  %v2229_v31 = vmul.f32 %v2219_v27, %v12866_v38  ;;  %v12877_v18 = vadd.f32 %v10213_v54, %v8859_v14  ;;  %v2177_v17 = vpop.f32.mrb[35].mxu0 }
 0x4d8   :  { %v2246_v12 = vadd.f32 %v2236_v37, %v12861_v19  ;;  %v2228_v56 = vmul.f32 %v2218_v20, %v12869_v55  ;;  %v12881_v29 = vadd.f32 %v8859_v14, %v2177_v17 }
 0x4d9   :  { %v2257_v34 = vmul.f32 0.7978846, %v2247_v11  ;;  %v2239_v28 = vmul.f32 %v2229_v31, %v12866_v38  ;;  %v2221_v2 = vmul.f32 0.044715, %v12877_v18 }
 0x4da   :  { %v2238_v59 = vmul.f32 %v2228_v56, %v12869_v55  ;;  %v2220_v24 = vmul.f32 0.044715, %v12881_v29  ;;  %v10216_v26 = vpop.f32.mrb[36].mxu0  ;;  %v2256_v13 = vmul.f32 0.7978846, %v2246_v12 }
 0x4db   :  { %11798 = vtanh.f32 %v2257_v34  ;;  %v2249_v27 = vadd.f32 %v2239_v28, %v12866_v38  ;;  %v2231_v37 = vmul.f32 %v2221_v2, %v12877_v18  ;;  %v12889_v54 = vadd.f32 %v10216_v26, %v8859_v14  ;;  %v2187_v20 = vpop.f32.mrb[37].mxu0 }
 0x4dc   :  { %v2248_v11 = vadd.f32 %v2238_v59, %v12869_v55  ;;  %v2230_v31 = vmul.f32 %v2220_v24, %v12881_v29  ;;  %v12893_v17 = vadd.f32 %v8859_v14, %v2187_v20  ;;  %11800 = vtanh.f32 %v2256_v13 }
 0x4dd   :  { %v2241_v56 = vmul.f32 %v2231_v37, %v12877_v18  ;;  %v2223_v58 = vmul.f32 0.044715, %v12889_v54  ;;  %v2259_v12 = vmul.f32 0.7978846, %v2249_v27 }
 0x4de   :  { %v2240_v34 = vmul.f32 %v2230_v31, %v12881_v29  ;;  %v2222_v28 = vmul.f32 0.044715, %v12893_v17  ;;  %v10219_v2 = vpop.f32.mrb[38].mxu0  ;;  %v2258_v26 = vmul.f32 0.7978846, %v2248_v11 }
 0x4df   :  { %v2251_v57 = vadd.f32 %v2241_v56, %v12877_v18  ;;  %v2233_v59 = vmul.f32 %v2223_v58, %v12889_v54  ;;  %v12901_v52 = vadd.f32 %v10219_v2, %v8859_v14  ;;  %v2197_v24 = vpop.f32.mrb[39].mxu0  ;;  %11802 = vtanh.f32 %v2259_v12 }
 0x4e0   :  { %v2250_v13 = vadd.f32 %v2240_v34, %v12881_v29  ;;  %v2232_v37 = vmul.f32 %v2222_v28, %v12893_v17  ;;  %v12905_v20 = vadd.f32 %v8859_v14, %v2197_v24  ;;  %11804 = vtanh.f32 %v2258_v26 }
 0x4e1   :  { %v2243_v27 = vmul.f32 %v2233_v59, %v12889_v54  ;;  %v2225_v31 = vmul.f32 0.044715, %v12901_v52  ;;  %v2261_v11 = vmul.f32 0.7978846, %v2251_v57 }
 0x4e2   :  { %v2242_v58 = vmul.f32 %v2232_v37, %v12893_v17  ;;  %v2224_v56 = vmul.f32 0.044715, %v12905_v20  ;;  %v2260_v2 = vmul.f32 0.7978846, %v2250_v13 }
 0x4e3   :  { %v2253_v12 = vadd.f32 %v2243_v27, %v12889_v54  ;;  %v2235_v34 = vmul.f32 %v2225_v31, %v12901_v52  ;;  %11806 = vtanh.f32 %v2261_v11  ;;  %v2206_v11 = vmul.f32 0.5, %v12861_v19 }
 0x4e4   :  { %v2252_v14 = vadd.f32 %v2242_v58, %v12893_v17  ;;  %v2234_v28 = vmul.f32 %v2224_v56, %v12905_v20  ;;  %11808 = vtanh.f32 %v2260_v2  ;;  %v2207_v56 = vmul.f32 0.5, %v12859_v1 }
 0x4e5   :  { %v11799_v57 = vpop.eup %11798  ;;  %v2245_v26 = vmul.f32 %v2235_v34, %v12901_v52  ;;  %v2263_v59 = vmul.f32 0.7978846, %v2253_v12  ;;  %v2209_v1 = vmul.f32 0.5, %v12866_v38 }
 0x4e6   :  { %v11801_v24 = vpop.eup %11800  ;;  %v2277_v13 = vadd.f32 1.0, %v11799_v57  ;;  %v2244_v37 = vmul.f32 %v2234_v28, %v12905_v20  ;;  %v2262_v27 = vmul.f32 0.7978846, %v2252_v14  ;;  %v2208_v14 = vmul.f32 0.5, %v12869_v55 }
 0x4e7   :  { %v2255_v31 = vadd.f32 %v2245_v26, %v12901_v52  ;;  %v2276_v58 = vadd.f32 1.0, %v11801_v24  ;;  %11810 = vtanh.f32 %v2263_v59 }
 0x4e8   :  { %v2254_v2 = vadd.f32 %v2244_v37, %v12905_v20  ;;  %11812 = vtanh.f32 %v2262_v27  ;;  %v2287_v50 = vmul.f32 %v2277_v13, %v2207_v56 }
 0x4e9   :  { %v11803_v51 = vpop.eup %11802  ;;  %v2286_v46 = vmul.f32 %v2276_v58, %v2206_v11  ;;  %v2265_v34 = vmul.f32 0.7978846, %v2255_v31  ;;  %v2213_v58 = vmul.f32 0.5, %v12889_v54 }
 0x4ea   :  { %v11805_v12 = vpop.eup %11804  ;;  %v2279_v57 = vadd.f32 1.0, %v11803_v51  ;;  %v2264_v48 = vmul.f32 0.7978846, %v2254_v2  ;;  %v2210_v51 = vmul.f32 0.5, %v12881_v29 }
 0x4eb   :  { %10228 = vmatprep.mubr.msk.f32.mxu0 %vm930_vm3, %v2286_v46  ;;  %v2278_v28 = vadd.f32 1.0, %v11805_v12  ;;  %11814 = vtanh.f32 %v2265_v34  ;;  %v2211_v46 = vmul.f32 0.5, %v12877_v18  ;;  %v2214_v18 = vmul.f32 0.5, %v12905_v20 }
 0x4ec   :  { %10229 = vmatmul.mubr.msk.f32.vlgmr.msra.gmra.mrb[40].mxu0 %vm930_vm3, %v2287_v50  ;;  %11816 = vtanh.f32 %v2264_v48  ;;  %v2289_v24 = vmul.f32 %v2279_v57, %v2209_v1  ;;  %v2212_v48 = vmul.f32 0.5, %v12893_v17 }
 0x4ed   :  { %v11807_v19 = vpop.eup %11806  ;;  %v2288_v26 = vmul.f32 %v2278_v28, %v2208_v14  ;;  %v2215_v14 = vmul.f32 0.5, %v12901_v52 }
 0x4ee   :  { %v11809_v59 = vpop.eup %11808  ;;  %v2281_v37 = vadd.f32 1.0, %v11807_v19 }
 0x4ef   :  { %10231 = vmatprep.mubr.msk.f32.mxu0 %vm930_vm3, %v2288_v26  ;;  %v2280_v13 = vadd.f32 1.0, %v11809_v59 }
 0x4f0   :  { %10232 = vmatmul.mubr.msk.f32.gmra.mrb[42].mxu0 %vm930_vm3, %v2289_v24  ;;  %v2291_v31 = vmul.f32 %v2281_v37, %v2211_v46 }
 0x4f1   :  { %v11811_v55 = vpop.eup %11810  ;;  %v2290_v27 = vmul.f32 %v2280_v13, %v2210_v51 }
 0x4f2   :  { %v11813_v50 = vpop.eup %11812  ;;  %v2283_v38 = vadd.f32 1.0, %v11811_v55 }
 0x4f3   :  { %10234 = vmatprep.mubr.msk.f32.mxu0 %vm930_vm3, %v2290_v27  ;;  %v2282_v11 = vadd.f32 1.0, %v11813_v50 }
 0x4f4   :  { %10235 = vmatmul.mubr.msk.f32.gmra.mrb[44].mxu0 %vm930_vm3, %v2291_v31  ;;  %v2293_v34 = vmul.f32 %v2283_v38, %v2213_v58 }
 0x4f5   :  { %v11815_v29 = vpop.eup %11814  ;;  %v2292_v56 = vmul.f32 %v2282_v11, %v2212_v48 }
 0x4f6   :  { %v11817_v2 = vpop.eup %11816  ;;  %v2285_v12 = vadd.f32 1.0, %v11815_v29 }
 0x4f7   :  { %10237 = vmatprep.mubr.msk.f32.mxu0 %vm930_vm3, %v2292_v56  ;;  %v2284_v57 = vadd.f32 1.0, %v11817_v2 }
 0x4f8   :  { %10238 = vmatmul.mubr.msk.f32.gmra.mrb[46].mxu0 %vm930_vm3, %v2293_v34  ;;  %v2295_v28 = vmul.f32 %v2285_v12, %v2215_v14 }
 0x4f9   :  { %v2294_v17 = vmul.f32 %v2284_v57, %v2214_v18 }
 0x4fb   :  { %10240 = vmatprep.mubr.msk.f32.mxu0 %vm930_vm3, %v2294_v17 }
 0x4fc   :  { %10241 = vmatmul.mubr.msk.f32.gmra.mrb[48].mxu0 %vm930_vm3, %v2295_v28 }
 0x4fd   :  { %10280 = vmatprep.mubr.msk.f32.mxu0 %vm14716_vm13, %v12909_v53 }
 0x53e   :  { %v10247_v54 = vpop.f32.mrb[40].mxu1 }
 0x53f   :  { %v2738_v1 = vsub.f32 %v12574_v32, %v10247_v54  ;;  %v2688_v19 = vpop.f32.mrb[41].mxu1 }
 0x540   :  { %v2737_v20 = vsub.f32 %v12578_v35, %v2688_v19 }
 0x541   :  { %v2749_v26 = vmul.f32 1.442695, %v2738_v1 }
 0x542   :  { %v2747_v59 = vmul.f32 1.442695, %v2737_v20  ;;  %v10250_v24 = vpop.f32.mrb[42].mxu1 }
 0x543   :  { %11818 = vpow2.f32 %v2749_v26  ;;  %v2740_v52 = vsub.f32 %v12580_v36, %v10250_v24  ;;  %v2698_v37 = vpop.f32.mrb[43].mxu1 }
 0x544   :  { %11820 = vpow2.f32 %v2747_v59  ;;  %v2739_v51 = vsub.f32 %v12584_v23, %v2698_v37 }
 0x545   :  { %v2753_v13 = vmul.f32 1.442695, %v2740_v52 }
 0x546   :  { %v2751_v46 = vmul.f32 1.442695, %v2739_v51  ;;  %v10253_v55 = vpop.f32.mrb[44].mxu1 }
 0x547   :  { %11822 = vpow2.f32 %v2753_v13  ;;  %v2742_v27 = vsub.f32 %v12590_v30, %v10253_v55  ;;  %v2708_v32 = vpop.f32.mrb[45].mxu1 }
 0x548   :  { %11824 = vpow2.f32 %v2751_v46  ;;  %v2741_v35 = vsub.f32 %v12595_v5, %v2708_v32 }
 0x549   :  { %v2757_v50 = vmul.f32 1.442695, %v2742_v27 }
 0x54a   :  { %v2755_v31 = vmul.f32 1.442695, %v2741_v35  ;;  %v10256_v38 = vpop.f32.mrb[46].mxu1  ;;  %v12985_v35 = vpop.trf.xlu1 }
 0x54b   :  { %11826 = vpow2.f32 %v2757_v50  ;;  %v2744_v36 = vsub.f32 %v12603_v25, %v10256_v38  ;;  %v2718_v48 = vpop.f32.mrb[47].mxu1  ;;  %14728 = vst [vmem:[#allocation10_spill] sm:$0xff] %v12985_v35  ;;  %v12990_v50 = vld [vmem:[%s12260_s3] sm:$0xff] }
 0x54c   :  { %11828 = vpow2.f32 %v2755_v31  ;;  %v2743_v23 = vsub.f32 %v12608_v6, %v2718_v48 }
 0x54d   :  { %v12953_v11 = vpop.eup %11818  ;;  %v2761_v58 = vmul.f32 1.442695, %v2744_v36 }
 0x54e   :  { %v12955_v29 = vpop.eup %11820  ;;  %v2759_v30 = vmul.f32 1.442695, %v2743_v23  ;;  %v10259_v56 = vpop.f32.mrb[48].mxu1  ;;  %v2768_v2 = vadd.f32 1e-12, %v12953_v11 }
 0x54f   :  { %11830 = vpow2.f32 %v2761_v58  ;;  %v2746_v5 = vsub.f32 %v12615_v8, %v10259_v56  ;;  %v2728_v34 = vpop.f32.mrb[49].mxu1  ;;  %v2767_v12 = vadd.f32 1e-12, %v12955_v29 }
 0x550   :  { %11832 = vpow2.f32 %v2759_v30  ;;  %v2745_v25 = vsub.f32 %v12610_v7, %v2728_v34 }
 0x551   :  { %v12961_v18 = vpop.eup %11822  ;;  %v2765_v6 = vmul.f32 1.442695, %v2746_v5  ;;  %v11148_v57 = vpack.c.bf16 %v2768_v2, %v2767_v12 }
 0x552   :  { %v12963_v14 = vpop.eup %11824  ;;  %v2763_v17 = vmul.f32 1.442695, %v2745_v25  ;;  %v2770_v28 = vadd.f32 1e-12, %v12961_v18 }
 0x553   :  { %11834 = vpow2.f32 %v2765_v6  ;;  %11149 = vmatprep.subr.bf16.mxu0 %v11148_v57  ;;  %v2769_v54 = vadd.f32 1e-12, %v12963_v14 }
 0x554   :  { %11836 = vpow2.f32 %v2763_v17  ;;  %11151 = vmatpush3.bf16.msra.mxu0 %v11148_v57 }
 0x555   :  { %v12967_v8 = vpop.eup %11826  ;;  %v11152_v1 = vpack.c.bf16 %v2770_v28, %v2769_v54 }
 0x556   :  { %v12969_v19 = vpop.eup %11828  ;;  %v2772_v7 = vadd.f32 1e-12, %v12967_v8 }
 0x557   :  { %11153 = vmatprep.subr.bf16.mxu0 %v11152_v1  ;;  %v2771_v20 = vadd.f32 1e-12, %v12969_v19 }
 0x558   :  { %11155 = vmatpush3.bf16.msra.mxu0 %v11152_v1 }
 0x559   :  { %v12973_v26 = vpop.eup %11830  ;;  %v11156_v59 = vpack.c.bf16 %v2772_v7, %v2771_v20 }
 0x55a   :  { %v12975_v24 = vpop.eup %11832  ;;  %v2774_v52 = vadd.f32 1e-12, %v12973_v26 }
 0x55b   :  { %11157 = vmatprep.subr.bf16.mxu0 %v11156_v59  ;;  %v2773_v37 = vadd.f32 1e-12, %v12975_v24 }
 0x55c   :  { %11159 = vmatpush3.bf16.msra.mxu0 %v11156_v59 }
 0x55d   :  { %v12979_v51 = vpop.eup %11834  ;;  %v11160_v13 = vpack.c.bf16 %v2774_v52, %v2773_v37 }
 0x55e   :  { %v12981_v46 = vpop.eup %11836  ;;  %v2776_v55 = vadd.f32 1e-12, %v12979_v51 }
 0x55f   :  { %11161 = vmatprep.subr.bf16.mxu0 %v11160_v13  ;;  %v2775_v27 = vadd.f32 1e-12, %v12981_v46 }
 0x560   :  { %11163 = vmatpush3.bf16.msra.mxu0 %v11160_v13 }
 0x561   :  { %v11164_v32 = vpack.c.bf16 %v2776_v55, %v2775_v27 }
 0x563   :  { %11165 = vmatprep.subr.bf16.mxu0 %v11164_v32 }
 0x564   :  { %11167 = vmatpush3.bf16.msra.mxu0 %v11164_v32 }
 0x567   :  { %10281 = vmatmul.mubr.msk.f32.vlgmr.msra.gmra.mrb[50].mxu0 %vm14716_vm13, %v12985_v35 }
 0x568   :  { %10287 = vmatprep.mubr.msk.f32.mxu0 %vm639_vm1, %v12990_v50 }
 0x5bf   :  { %v12994_v31 = vpop.f32.mrb[40].mxu0 }
 0x5c0   :  { %v12996_v38 = vpop.f32.mrb[41].mxu0 }
 0x5c3   :  { %v12998_v36 = vpop.f32.mrb[42].mxu0 }
 0x5c4   :  { %v13000_v48 = vpop.f32.mrb[43].mxu0 }
 0x5c7   :  { %v13002_v23 = vpop.f32.mrb[44].mxu0 }
 0x5c8   :  { %v13004_v58 = vpop.f32.mrb[45].mxu0 }
 0x5cb   :  { %v13006_v30 = vpop.f32.mrb[46].mxu0 }
 0x5cc   :  { %v13008_v56 = vpop.f32.mrb[47].mxu0 }
 0x5cf   :  { %v13010_v2 = vpop.f32.mrb[48].mxu0 }
 0x5d0   :  { %v13012_v5 = vpop.f32.mrb[49].mxu0 }
 0x63a   :  { %v10282_v34 = vpop.f32.mrb[50].mxu0 }
 0x63b   :  { %v2882_v12 = vpop.f32.mrb[51].mxu0 }
 0x63c   :  { %v11168_v25 = vpack.c.bf16 %v10282_v34, %v2882_v12 }
 0x63e   :  { %11169 = vmatprep.subr.bf16.mxu0 %v11168_v25 }
 0x63f   :  { %11171 = vmatpush3.bf16.msra.mxu0 %v11168_v25 }
 0x642   :  { %10288 = vmatmul.mubr.msk.f32.vlgmr.msra.gmra.mrb[52].mxu0 %vm639_vm1, %v12809_v9 }
 0x643   :  { %10290 = vmatprep.mubr.msk.f32.mxu0 %vm639_vm1, %v12814_v22 }
 0x646   :  { %10291 = vmatmul.mubr.msk.f32.gmra.mrb[54].mxu0 %vm639_vm1, %v12819_v10 }
 0x647   :  { %10293 = vmatprep.mubr.msk.f32.mxu0 %vm639_vm1, %v12824_v33 }
 0x64a   :  { %10294 = vmatmul.mubr.msk.f32.gmra.mrb[56].mxu0 %vm639_vm1, %v12829_v60 }
 0x64b   :  { %10296 = vmatprep.mubr.msk.f32.mxu0 %vm639_vm1, %v12834_v21 }
 0x64e   :  { %10297 = vmatmul.mubr.msk.f32.gmra.mrb[58].mxu0 %vm639_vm1, %v12839_v15 }
 0x64f   :  { %10299 = vmatprep.mubr.msk.f32.mxu0 %vm639_vm1, %v12844_v16 }
 0x652   :  { %10300 = vmatmul.mubr.msk.f32.gmra.mrb[60].mxu0 %vm639_vm1, %v12849_v61 }
 0x715   :  { %v10289_v9 = vpop.f32.mrb[52].mxu0 }
 0x716   :  { %11838 = vrcp.f32 %v10289_v9  ;;  %v2957_v22 = vpop.f32.mrb[53].mxu0 }
 0x717   :  { %11840 = vrcp.f32 %v2957_v22 }
 0x719   :  { %v10292_v10 = vpop.f32.mrb[54].mxu0 }
 0x71a   :  { %11842 = vrcp.f32 %v10292_v10  ;;  %v2967_v33 = vpop.f32.mrb[55].mxu0 }
 0x71b   :  { %11844 = vrcp.f32 %v2967_v33 }
 0x71d   :  { %v10295_v60 = vpop.f32.mrb[56].mxu0 }
 0x71e   :  { %v2977_v6 = vpop.f32.mrb[57].mxu0  ;;  %11846 = vrcp.f32 %v10295_v60 }
 0x71f   :  { %11848 = vrcp.f32 %v2977_v6 }
 0x720   :  { %v11839_v21 = vpop.eup %11838 }
 0x721   :  { %v11841_v57 = vpop.eup %11840  ;;  %v10298_v15 = vpop.f32.mrb[58].mxu0  ;;  %v3009_v17 = vmul.f32 %v11839_v21, %v12953_v11  ;;  %v8870_v21 = vld [vmem:[%s13055_s22] ss:$0 sm:$0xff] }
 0x722   :  { %v2987_v16 = vpop.f32.mrb[59].mxu0  ;;  %v3007_v28 = vmul.f32 %v11841_v57, %v12955_v29  ;;  %11850 = vrcp.f32 %v10298_v15  ;;  %v2404_v15 = vadd.f32 %v12994_v31, %v8870_v21 }
 0x723   :  { %v3030_v61 = vsel %vm14715_vm14, %v3009_v17, 0.0  ;;  %11852 = vrcp.f32 %v2987_v16  ;;  %v2399_v17 = vadd.f32 %v8870_v21, %v12996_v38 }
 0x724   :  { %v11843_v54 = vpop.eup %11842  ;;  %3031 = vadd.xlane.f32.xlu0 %v3030_v61  ;;  %v3027_v20 = vsel %vm14715_vm14, %v3007_v28, 0.0 }
 0x725   :  { %v10301_v1 = vpop.f32.mrb[60].mxu0  ;;  %v3013_v59 = vmul.f32 %v11843_v54, %v12961_v18  ;;  %v11845_v52 = vpop.eup %11844 }
 0x726   :  { %v2997_v7 = vpop.f32.mrb[61].mxu0  ;;  %v3011_v37 = vmul.f32 %v11845_v52, %v12963_v14 }
 0x727   :  { %v3036_v11 = vsel %vm14715_vm14, %v3013_v59, 0.0  ;;  %11854 = vrcp.f32 %v2997_v7  ;;  %v2409_v59 = vadd.f32 %v8870_v21, %v13000_v48 }
 0x728   :  { %3028 = vadd.xlane.f32.xlu0 %v3027_v20  ;;  %v11847_v13 = vpop.eup %11846  ;;  %v3033_v29 = vsel %vm14715_vm14, %v3011_v37, 0.0  ;;  %11856 = vrcp.f32 %v10301_v1  ;;  %v2414_v20 = vadd.f32 %v12998_v36, %v8870_v21 }
 0x729   :  { %v3017_v55 = vmul.f32 %v11847_v13, %v12967_v8  ;;  %v11849_v27 = vpop.eup %11848 }
 0x72a   :  { %v3015_v18 = vmul.f32 %v11849_v27, %v12969_v19  ;;  %v2419_v27 = vadd.f32 %v8870_v21, %v13004_v58 }
 0x72b   :  { %v3042_v32 = vsel %vm14715_vm14, %v3017_v55, 0.0  ;;  %v2424_v55 = vadd.f32 %v13002_v23, %v8870_v21 }
 0x72c   :  { %3037 = vadd.xlane.f32.xlu0 %v3036_v11  ;;  %v11851_v34 = vpop.eup %11850  ;;  %v3039_v12 = vsel %vm14715_vm14, %v3015_v18, 0.0 }
 0x72d   :  { %v3021_v14 = vmul.f32 %v11851_v34, %v12973_v26  ;;  %v11853_v25 = vpop.eup %11852 }
 0x72e   :  { %v3019_v8 = vmul.f32 %v11853_v25, %v12975_v24  ;;  %v2434_v25 = vadd.f32 %v13006_v30, %v8870_v21 }
 0x72f   :  { %v3048_v9 = vsel %vm14715_vm14, %v3021_v14, 0.0 }
 0x730   :  { %3034 = vadd.xlane.f32.xlu0 %v3033_v29  ;;  %v3045_v10 = vsel %vm14715_vm14, %v3019_v8, 0.0 }
 0x731   :  { %v11855_v22 = vpop.eup %11854 }
 0x732   :  { %v3023_v33 = vmul.f32 %v11855_v22, %v12981_v46  ;;  %v11857_v19 = vpop.eup %11856 }
 0x733   :  { %v3025_v6 = vmul.f32 %v11857_v19, %v12979_v51 }
 0x734   :  { %3043 = vadd.xlane.f32.xlu0 %v3042_v32  ;;  %v3051_v60 = vsel %vm14715_vm14, %v3023_v33, 0.0 }
 0x735   :  { %v3054_v26 = vsel %vm14715_vm14, %v3025_v6, 0.0  ;;  %v2439_v6 = vadd.f32 %v8870_v21, %v13012_v5 }
 0x738   :  { %3040 = vadd.xlane.f32.xlu0 %v3039_v12 }
 0x73c   :  { %3049 = vadd.xlane.f32.xlu0 %v3048_v9  ;;  %v2429_v9 = vadd.f32 %v8870_v21, %v13008_v56 }
 0x740   :  { %3046 = vadd.xlane.f32.xlu0 %v3045_v10 }
 0x744   :  { %3052 = vadd.xlane.f32.xlu0 %v3051_v60  ;;  %v2444_v60 = vadd.f32 %v13010_v2, %v8870_v21 }
 0x748   :  { %3055 = vadd.xlane.f32.xlu0 %v3054_v26 }
 0x7b1   :  { %v3032_v24 = vpop.xlane.xlu0 %3031 }
 0x7b2   :  { %v3059_v46 = vmul.f32 0.5, %v3032_v24 }
 0x7b4   :  { %v3069_v16 = vmul.f32 %v3059_v46, %v2404_v15  ;;  %v12092_v15 = vld [vmem:[%s12206_s17] sm:$0xff] }
 0x7b5   :  { %v3029_v57 = vpop.xlane.xlu0 %3028 }
 0x7b6   :  { %v3058_v51 = vmul.f32 0.5, %v3029_v57 }
 0x7b8   :  { %v3068_v61 = vmul.f32 %v3058_v51, %v2399_v17  ;;  %v12093_v51 = vld [vmem:[%s12206_s17 + $0x8] sm:$0xff]  ;;  %s12162_s17 = smov 19  }
 0x7b9   :  { %v3038_v28 = vpop.xlane.xlu0 %3037  ;;  %s13085_s27 = sld [smem:[%s14689_s0 + %s12162_s17]]   ;;  %s12170_s17 = smov 24  }
 0x7ba   :  { %v11172_v54 = vpack.c.bf16 %v3069_v16, %v3068_v61  ;;  %v3061_v1 = vmul.f32 0.5, %v3038_v28  ;;  %s13331_s29 = sld [smem:[%s14689_s0 + %s12170_s17]]  }
 0x7bc   :  { %11173 = vmatprep.subr.bf16.mxu1 %v11172_v54  ;;  %v3071_v11 = vmul.f32 %v3061_v1, %v2414_v20 }
 0x7bd   :  { %11175 = vmatpush3.bf16.msra.mxu1 %v11172_v54  ;;  %v3035_v7 = vpop.xlane.xlu0 %3034 }
 0x7be   :  { %v3060_v52 = vmul.f32 0.5, %v3035_v7 }
 0x7c0   :  { %v3070_v37 = vmul.f32 %v3060_v52, %v2409_v59 }
 0x7c1   :  { %v3044_v13 = vpop.xlane.xlu0 %3043 }
 0x7c2   :  { %v11176_v31 = vpack.c.bf16 %v3071_v11, %v3070_v37  ;;  %v3063_v29 = vmul.f32 0.5, %v3044_v13  ;;  %v590_v37 = vld [vmem:[%s13085_s27] sm:$0xff]  ;;  %v591_v13 = vld [vmem:[%s13085_s27 + $0x8] sm:$0xff] }
 0x7c4   :  { %11177 = vmatprep.subr.bf16.mxu1 %v11176_v31  ;;  %v3073_v18 = vmul.f32 %v3063_v29, %v2424_v55  ;;  %v592_v29 = vld [vmem:[%s13085_s27 + $0x10] sm:$0xff] }
 0x7c5   :  { %11179 = vmatpush3.bf16.msra.mxu1 %v11176_v31  ;;  %v3041_v38 = vpop.xlane.xlu0 %3040  ;;  %v11192_v31 = vpack.c.bf16 %v591_v13, %v590_v37  ;;  %v610_v37 = vld [vmem:[%s13094_s2 + $0x78] sm:$0xff] }
 0x7c6   :  { %v3062_v32 = vmul.f32 0.5, %v3041_v38  ;;  %v593_v38 = vld [vmem:[%s13085_s27 + $0x18] sm:$0xff] }
 0x7c7   :  { %v11196_v55 = vpack.c.bf16 %v593_v38, %v592_v29 }
 0x7c8   :  { %v3072_v34 = vmul.f32 %v3062_v32, %v2419_v27  ;;  %v595_v27 = vld [vmem:[%s13094_s2] sm:$0xff]  ;;  %v596_v32 = vld [vmem:[%s13094_s2 + $0x8] sm:$0xff] }
 0x7c9   :  { %v3050_v12 = vpop.xlane.xlu0 %3049 }
 0x7ca   :  { %v11180_v36 = vpack.c.bf16 %v3073_v18, %v3072_v34  ;;  %v3065_v14 = vmul.f32 0.5, %v3050_v12  ;;  %v11200_v18 = vpack.c.bf16 %v596_v32, %v595_v27 }
 0x7cc   :  { %11181 = vmatprep.subr.bf16.mxu1 %v11180_v36  ;;  %v3075_v22 = vmul.f32 %v3065_v14, %v2434_v25  ;;  %11201 = vmatprep.subr.bf16.mxu0 %v11200_v18 }
 0x7cd   :  { %11183 = vmatpush3.bf16.msra.mxu1 %v11180_v36  ;;  %v3047_v48 = vpop.xlane.xlu0 %3046  ;;  %11203 = vmatpush3.bf16.msra.mxu0 %v11200_v18 }
 0x7ce   :  { %v3064_v8 = vmul.f32 0.5, %v3047_v48 }
 0x7d0   :  { %v3074_v10 = vmul.f32 %v3064_v8, %v2429_v9  ;;  %v13109_v8 = vld [vmem:[%s13101_s9] ss:$0 sm:$0xff] }
 0x7d1   :  { %v3053_v33 = vpop.xlane.xlu0 %3052 }
 0x7d2   :  { %v11184_v23 = vpack.c.bf16 %v3075_v22, %v3074_v10  ;;  %v3066_v58 = vmul.f32 0.5, %v3053_v33  ;;  %v13112_v10 = vld [vmem:[%s13106_s16] ss:$0 sm:$0xff] }
 0x7d4   :  { %11185 = vmatprep.subr.bf16.mxu1 %v11184_v23  ;;  %v3076_v24 = vmul.f32 %v3066_v58, %v2439_v6 }
 0x7d5   :  { %11187 = vmatpush3.bf16.msra.mxu1 %v11184_v23  ;;  %v3056_v19 = vpop.xlane.xlu0 %3055 }
 0x7d6   :  { %v3067_v26 = vmul.f32 0.5, %v3056_v19 }
 0x7d8   :  { %v3077_v30 = vmul.f32 %v3067_v26, %v2444_v60  ;;  %v12094_v26 = vld [vmem:[%s12211_s21] sm:$0xff] }
 0x7da   :  { %v11188_v46 = vpack.c.bf16 %v3077_v30, %v3076_v24  ;;  %v597_v24 = vld [vmem:[%s13094_s2 + $0x10] sm:$0xff]  ;;  %v598_v30 = vld [vmem:[%s13094_s2 + $0x18] sm:$0xff] }
 0x7dc   :  { %11189 = vmatprep.subr.bf16.mxu1 %v11188_v46 }
 0x7dd   :  { %11191 = vmatpush3.bf16.msra.mxu1 %v11188_v46  ;;  %v11204_v46 = vpack.c.bf16 %v598_v30, %v597_v24  ;;  %v8911_v30 = vld [vmem:[%s13147_s1] ss:$0 sm:$0xff] }
 0x7de   :  { %11193 = vmatprep.subr.bf16.mxu1 %v11192_v31 }
 0x7df   :  { %11205 = vmatprep.subr.bf16.mxu0 %v11204_v46 }
 0x7e0   :  { %10323 = vmatmul.mubr.msk.f32.vlgmr.msra.gmra.mrb[50].mxu1 %vm14716_vm13, %v12985_v35  ;;  %11207 = vmatpush3.bf16.msra.mxu0 %v11204_v46 }
 0x7e1   :  { %11195 = vmatpush3.bf16.msra.mxu1 %v11192_v31  ;;  %v8908_v31 = vld [vmem:[%s13139_s23] ss:$0 sm:$0xff] }
 0x7e2   :  { %11197 = vmatprep.subr.bf16.mxu1 %v11196_v55 }
 0x7e5   :  { %11199 = vmatpush3.bf16.msra.mxu1 %v11196_v55 }
 0x8b3   :  { %v13070_v56 = vpop.f32.mrb[50].mxu1 }
 0x8b4   :  { %v13072_v57 = vpop.f32.mrb[51].mxu1  ;;  %v3154_v2 = vadd.f32 %v12093_v51, %v13070_v56 }
 0x8b5   :  { %v3153_v17 = vadd.f32 %v12092_v15, %v13072_v57  ;;  %v599_v15 = vld [vmem:[%s13094_s2 + $0x20] sm:$0xff] }
 0x8b6   :  { %v3158_v21 = vsel %vm930_vm3, %v3154_v2, 0.0 }
 0x8b7   :  { %v3155_v5 = vsel %vm930_vm3, %v3153_v17, 0.0 }
 0x8b8   :  { %3156 = vadd.xlane.f32.xlu0 %v3155_v5  ;;  %v602_v5 = vld [vmem:[%s13094_s2 + $0x38] sm:$0xff] }
 0x8bc   :  { %3159 = vadd.xlane.f32.xlu0 %v3158_v21 }
 0x945   :  { %v3157_v16 = vpop.xlane.xlu0 %3156 }
 0x946   :  { %v3162_v61 = vmul.f32 0.03125, %v3157_v16  ;;  %v603_v16 = vld [vmem:[%s13094_s2 + $0x40] sm:$0xff] }
 0x948   :  { %v3164_v28 = vsub.f32 %v3153_v17, %v3162_v61  ;;  %v600_v17 = vld [vmem:[%s13094_s2 + $0x28] sm:$0xff] }
 0x949   :  { %v3160_v54 = vpop.xlane.xlu0 %3159  ;;  %v11208_v51 = vpack.c.bf16 %v600_v17, %v599_v15  ;;  %v604_v61 = vld [vmem:[%s13094_s2 + $0x48] sm:$0xff] }
 0x94a   :  { %v3163_v1 = vmul.f32 0.03125, %v3160_v54  ;;  %v3166_v7 = vmul.f32 %v3164_v28, %v3164_v28  ;;  %v605_v54 = vld [vmem:[%s13094_s2 + $0x50] sm:$0xff] }
 0x94b   :  { %11209 = vmatprep.subr.bf16.mxu0 %v11208_v51 }
 0x94c   :  { %v3165_v20 = vsub.f32 %v3154_v2, %v3163_v1  ;;  %v3168_v59 = vsel %vm930_vm3, %v3166_v7, 0.0  ;;  %11211 = vmatpush3.bf16.msra.mxu0 %v11208_v51  ;;  %v601_v2 = vld [vmem:[%s13094_s2 + $0x30] sm:$0xff]  ;;  %v606_v1 = vld [vmem:[%s13094_s2 + $0x58] sm:$0xff]  ;;  %v607_v7 = vld [vmem:[%s13094_s2 + $0x60] sm:$0xff] }
 0x94d   :  { %3169 = vadd.xlane.f32.xlu1 %v3168_v59  ;;  %v11212_v21 = vpack.c.bf16 %v602_v5, %v601_v2  ;;  %v608_v59 = vld [vmem:[%s13094_s2 + $0x68] sm:$0xff] }
 0x94e   :  { %v3167_v52 = vmul.f32 %v3165_v20, %v3165_v20 }
 0x94f   :  { %11213 = vmatprep.subr.bf16.mxu0 %v11212_v21 }
 0x950   :  { %v3171_v11 = vsel %vm930_vm3, %v3167_v52, 0.0  ;;  %11215 = vmatpush3.bf16.msra.mxu0 %v11212_v21  ;;  %v11224_v52 = vpack.c.bf16 %v608_v59, %v607_v7 }
 0x951   :  { %3172 = vadd.xlane.f32.xlu0 %v3171_v11  ;;  %v609_v11 = vld [vmem:[%s13094_s2 + $0x70] sm:$0xff] }
 0x952   :  { %v11228_v13 = vpack.c.bf16 %v610_v37, %v609_v11 }
 0x9da   :  { %v3170_v34 = vpop.xlane.xlu1 %3169 }
 0x9db   :  { %v3174_v12 = vmul.f32 0.03125, %v3170_v34 }
 0x9dd   :  { %v3176_v36 = vadd.f32 1e-05, %v3174_v12 }
 0x9de   :  { %v3173_v14 = vpop.xlane.xlu0 %3172 }
 0x9df   :  { %11858 = vrsqrt.f32 %v3176_v36  ;;  %v3175_v48 = vmul.f32 0.03125, %v3173_v14 }
 0x9e1   :  { %v3177_v25 = vadd.f32 1e-05, %v3175_v48 }
 0x9e3   :  { %11860 = vrsqrt.f32 %v3177_v25 }
 0x9e9   :  { %v11859_v9 = vpop.eup %11858 }
 0x9ea   :  { %v3180_v22 = vmul.f32 %v11859_v9, %v3164_v28  ;;  %v11216_v28 = vpack.c.bf16 %v604_v61, %v603_v16 }
 0x9ec   :  { %v3188_v33 = vmul.f32 %v13109_v8, %v3180_v22  ;;  %11217 = vmatprep.subr.bf16.mxu0 %v11216_v28 }
 0x9ed   :  { %v11861_v23 = vpop.eup %11860  ;;  %11219 = vmatpush3.bf16.msra.mxu0 %v11216_v28 }
 0x9ee   :  { %v3181_v58 = vmul.f32 %v11861_v23, %v3165_v20  ;;  %v3196_v19 = vadd.f32 %v13112_v10, %v3188_v33  ;;  %v11220_v20 = vpack.c.bf16 %v606_v1, %v605_v54 }
 0x9f0   :  { %10333 = vmatprep.mubr.msk.f32.mxu1 %vm930_vm3, %v3196_v19  ;;  %v3189_v60 = vmul.f32 %v13109_v8, %v3181_v58  ;;  %11221 = vmatprep.subr.bf16.mxu0 %v11220_v20 }
 0x9f1   :  { %11223 = vmatpush3.bf16.msra.mxu0 %v11220_v20 }
 0x9f2   :  { %v3197_v6 = vadd.f32 %v13112_v10, %v3189_v60  ;;  %11225 = vmatprep.subr.bf16.mxu0 %v11224_v52 }
 0x9f4   :  { %10334 = vmatmul.mubr.msk.f32.vlgmr.msra.gmra.mrb[52].mxu1 %vm930_vm3, %v3197_v6 }
 0x9f5   :  { %10375 = vmatprep.mubr.msk.f32.mxu1 %vm639_vm1, %v12094_v26  ;;  %11227 = vmatpush3.bf16.msra.mxu0 %v11224_v52 }
 0x9f6   :  { %11229 = vmatprep.subr.bf16.mxu0 %v11228_v13 }
 0x9f9   :  { %11231 = vmatpush3.bf16.msra.mxu0 %v11228_v13 }
 0xac7   :  { %v10335_v29 = vpop.f32.mrb[52].mxu1 }
 0xac8   :  { %v3282_v38 = vadd.f32 %v10335_v29, %v8908_v31  ;;  %v3276_v55 = vpop.f32.mrb[53].mxu1 }
 0xac9   :  { %v3277_v27 = vadd.f32 %v8908_v31, %v3276_v55 }
 0xaca   :  { %v3288_v32 = vmul.f32 0.044715, %v3282_v38  ;;  %v3286_v6 = vmul.f32 0.5, %v3282_v38 }
 0xacb   :  { %v3287_v18 = vmul.f32 0.044715, %v3277_v27  ;;  %v3285_v19 = vmul.f32 0.5, %v3277_v27 }
 0xacc   :  { %v3290_v34 = vmul.f32 %v3288_v32, %v3282_v38 }
 0xacd   :  { %v3289_v12 = vmul.f32 %v3287_v18, %v3277_v27 }
 0xace   :  { %v3292_v36 = vmul.f32 %v3290_v34, %v3282_v38 }
 0xacf   :  { %v3291_v14 = vmul.f32 %v3289_v12, %v3277_v27  ;;  %v612_v12 = vld [vmem:[%s13159_s11] sm:$0xff] }
 0xad0   :  { %v3294_v48 = vadd.f32 %v3292_v36, %v3282_v38  ;;  %v613_v36 = vld [vmem:[%s13159_s11 + $0x8] sm:$0xff] }
 0xad1   :  { %v3293_v25 = vadd.f32 %v3291_v14, %v3277_v27 }
 0xad2   :  { %v3296_v9 = vmul.f32 0.7978846, %v3294_v48 }
 0xad3   :  { %v3295_v22 = vmul.f32 0.7978846, %v3293_v25 }
 0xad4   :  { %11862 = vtanh.f32 %v3296_v9  ;;  %v11240_v9 = vpack.c.bf16 %v613_v36, %v612_v12 }
 0xad5   :  { %11864 = vtanh.f32 %v3295_v22  ;;  %v614_v22 = vld [vmem:[%s13159_s11 + $0x10] sm:$0xff] }
 0xade   :  { %v11863_v33 = vpop.eup %11862 }
 0xadf   :  { %v11865_v23 = vpop.eup %11864  ;;  %v3300_v58 = vadd.f32 1.0, %v11863_v33 }
 0xae0   :  { %v3299_v60 = vadd.f32 1.0, %v11865_v23  ;;  %v12095_v23 = vld [vmem:[%s12211_s21 + $0x8] sm:$0xff] }
 0xae1   :  { %v3302_v24 = vmul.f32 %v3300_v58, %v3286_v6  ;;  %v12097_v58 = vld [vmem:[%s12211_s21 + $0x10] sm:$0xff]  ;;  %v12100_v6 = vld [vmem:[%s12260_s3 + $0x18] sm:$0xff] }
 0xae2   :  { %v3301_v26 = vmul.f32 %v3299_v60, %v3285_v19  ;;  %v12098_v19 = vld [vmem:[%s12260_s3 + $0x10] sm:$0xff]  ;;  %v12099_v60 = vld [vmem:[%s12211_s21 + $0x18] sm:$0xff] }
 0xae4   :  { %10368 = vmatprep.mubr.f32.mxu0 %v3301_v26  ;;  %v12101_v26 = vld [vmem:[%s12211_s21 + $0x20] sm:$0xff] }
 0xae5   :  { %10369 = vmatmul.mubr.f32.vlgmr.msra.gmra.mrb[62].mxu0 %v3302_v24  ;;  %v12102_v24 = vld [vmem:[%s12260_s3 + $0x20] sm:$0xff] }
 0xae6   :  { %10394 = vmatprep.mubr.msk.f32.mxu0 %vm639_vm1, %v12990_v50 }
 0xbb8   :  { %v10370_v46 = vpop.f32.mrb[62].mxu0 }
 0xbb9   :  { %v3381_v15 = vadd.f32 %v10370_v46, %v8911_v30  ;;  %v3375_v17 = vpop.f32.mrb[63].mxu0  ;;  %v12104_v46 = vld [vmem:[%s12260_s3 + $0x28] sm:$0xff] }
 0xbba   :  { %v3376_v51 = vadd.f32 %v8911_v30, %v3375_v17  ;;  %v12103_v30 = vld [vmem:[%s12211_s21 + $0x28] sm:$0xff]  ;;  %v12106_v17 = vld [vmem:[%s12260_s3 + $0x30] sm:$0xff] }
 0xbbb   :  { %v3385_v2 = vadd.f32 %v13070_v56, %v3381_v15  ;;  %v12105_v15 = vld [vmem:[%s12211_s21 + $0x30] sm:$0xff] }
 0xbbc   :  { %v3384_v5 = vadd.f32 %v3376_v51, %v13072_v57  ;;  %v12107_v51 = vld [vmem:[%s12211_s21 + $0x38] sm:$0xff] }
 0xbbd   :  { %v3389_v50 = vsel %vm930_vm3, %v3385_v2, 0.0 }
 0xbbe   :  { %v3386_v21 = vsel %vm930_vm3, %v3384_v5, 0.0 }
 0xbbf   :  { %3387 = vadd.xlane.f32.xlu0 %v3386_v21  ;;  %v12110_v21 = vld [vmem:[%s12260_s3 + $0x40] sm:$0xff] }
 0xbc3   :  { %3390 = vadd.xlane.f32.xlu0 %v3389_v50  ;;  %v12111_v50 = vld [vmem:[%s12211_s21 + $0x48] sm:$0xff] }
 0xc4c   :  { %v3388_v16 = vpop.xlane.xlu0 %3387 }
 0xc4d   :  { %v3392_v61 = vmul.f32 0.03125, %v3388_v16  ;;  %v12112_v16 = vld [vmem:[%s12260_s3 + $0x48] sm:$0xff] }
 0xc4f   :  { %v3394_v28 = vsub.f32 %v3384_v5, %v3392_v61  ;;  %v12109_v5 = vld [vmem:[%s12211_s21 + $0x40] sm:$0xff] }
 0xc50   :  { %v3391_v54 = vpop.xlane.xlu0 %3390  ;;  %v616_v61 = vld [vmem:[%s13159_s11 + $0x20] sm:$0xff] }
 0xc51   :  { %v3393_v1 = vmul.f32 0.03125, %v3391_v54  ;;  %v3396_v7 = vmul.f32 %v3394_v28, %v3394_v28 }
 0xc53   :  { %v3395_v20 = vsub.f32 %v3385_v2, %v3393_v1  ;;  %v3398_v59 = vsel %vm930_vm3, %v3396_v7, 0.0  ;;  %v12108_v2 = vld [vmem:[%s12260_s3 + $0x38] sm:$0xff]  ;;  %v618_v1 = vld [vmem:[%s13159_s11 + $0x30] sm:$0xff] }
 0xc54   :  { %3399 = vadd.xlane.f32.xlu0 %v3398_v59  ;;  %v619_v7 = vld [vmem:[%s13159_s11 + $0x38] sm:$0xff] }
 0xc55   :  { %v3397_v52 = vmul.f32 %v3395_v20, %v3395_v20 }
 0xc57   :  { %v3401_v56 = vsel %vm930_vm3, %v3397_v52, 0.0 }
 0xc58   :  { %3402 = vadd.xlane.f32.xlu0 %v3401_v56  ;;  %v11252_v56 = vpack.c.bf16 %v619_v7, %v618_v1 }
 0xce1   :  { %v3400_v57 = vpop.xlane.xlu0 %3399 }
 0xce2   :  { %v3404_v11 = vmul.f32 0.03125, %v3400_v57 }
 0xce4   :  { %v3406_v37 = vadd.f32 1e-05, %v3404_v11  ;;  %v620_v11 = vld [vmem:[%s13159_s11 + $0x40] sm:$0xff] }
 0xce5   :  { %v3403_v13 = vpop.xlane.xlu0 %3402 }
 0xce6   :  { %11866 = vrsqrt.f32 %v3406_v37  ;;  %v3405_v31 = vmul.f32 0.03125, %v3403_v13  ;;  %v621_v37 = vld [vmem:[%s13159_s11 + $0x48] sm:$0xff] }
 0xce8   :  { %v3407_v29 = vadd.f32 1e-05, %v3405_v31 }
 0xcea   :  { %11868 = vrsqrt.f32 %v3407_v29 }
 0xcf0   :  { %v11867_v38 = vpop.eup %11866 }
 0xcf1   :  { %v3410_v55 = vmul.f32 %v11867_v38, %v3394_v28  ;;  %v617_v28 = vld [vmem:[%s13159_s11 + $0x28] sm:$0xff] }
 0xcf2   :  { %v11248_v54 = vpack.c.bf16 %v617_v28, %v616_v61 }
 0xcf3   :  { %v3412_v18 = vmul.f32 %v13109_v8, %v3410_v55  ;;  %v11256_v55 = vpack.c.bf16 %v621_v37, %v620_v11 }
 0xcf4   :  { %v11869_v27 = vpop.eup %11868 }
 0xcf5   :  { %v3411_v32 = vmul.f32 %v11869_v27, %v3395_v20  ;;  %v13166_v14 = vadd.f32 %v13112_v10, %v3412_v18 }
 0xcf7   :  { %v3413_v34 = vmul.f32 %v13109_v8, %v3411_v32  ;;  %14729 = vst [vmem:[#allocation11_spill] sm:$0xff] %v13166_v14  ;;  %v615_v8 = vld [vmem:[%s13159_s11 + $0x18] sm:$0xff] }
 0xcf8   :  { %v11244_v33 = vpack.c.bf16 %v615_v8, %v614_v22 }
 0xcf9   :  { %v13169_v48 = vadd.f32 %v13112_v10, %v3413_v34  ;;  %v12096_v10 = vld [vmem:[%s12260_s3 + $0x8] sm:$0xff] }
 0xcfb   :  { %14730 = vst [vmem:[#allocation12_spill] sm:$0xff] %v13169_v48  ;;  %v11232_v25 = vpack.c.bf16 %v13169_v48, %v13166_v14 }
 0xcfd   :  { %11233 = vmatprep.subr.bf16.mxu1 %v11232_v25  ;;  %11237 = vmatprep.subr.bf16.mxu0 %v11232_v25 }
 0xcfe   :  { %11235 = vmatpush3.bf16.msra.mxu1 %v11232_v25  ;;  %11239 = vmatpush3.bf16.msra.mxu0 %v11232_v25 }
 0xcff   :  { %11241 = vmatprep.subr.bf16.mxu1 %v11240_v9 }
 0xd01   :  { %10376 = vmatmul.mubr.msk.f32.vlgmr.msra.gmra.mrb[54].mxu1 %vm639_vm1, %v12095_v23  ;;  %10395 = vmatmul.mubr.msk.f32.vlgmr.msra.gmra.mrb[64].mxu0 %vm639_vm1, %v12096_v10  ;;  %v622_v10 = vld [vmem:[%s13159_s11 + $0x50] sm:$0xff] }
 0xd02   :  { %10378 = vmatprep.mubr.msk.f32.mxu1 %vm639_vm1, %v12097_v58  ;;  %10397 = vmatprep.mubr.msk.f32.mxu0 %vm639_vm1, %v12098_v19  ;;  %v623_v58 = vld [vmem:[%s13159_s11 + $0x58] sm:$0xff] }
 0xd03   :  { %11243 = vmatpush3.bf16.msra.mxu1 %v11240_v9  ;;  %v11260_v19 = vpack.c.bf16 %v623_v58, %v622_v10 }
 0xd04   :  { %11245 = vmatprep.subr.bf16.mxu1 %v11244_v33 }
 0xd05   :  { %10379 = vmatmul.mubr.msk.f32.gmra.mrb[56].mxu1 %vm639_vm1, %v12099_v60  ;;  %10398 = vmatmul.mubr.msk.f32.gmra.mrb[66].mxu0 %vm639_vm1, %v12100_v6  ;;  %v625_v60 = vld [vmem:[%s13322_s19] sm:$0xff]  ;;  %v626_v6 = vld [vmem:[%s13322_s19 + $0x8] sm:$0xff] }
 0xd06   :  { %10381 = vmatprep.mubr.msk.f32.mxu1 %vm639_vm1, %v12101_v26  ;;  %10400 = vmatprep.mubr.msk.f32.mxu0 %vm639_vm1, %v12102_v24  ;;  %v11264_v26 = vpack.c.bf16 %v626_v6, %v625_v60  ;;  %v627_v24 = vld [vmem:[%s13322_s19 + $0x10] sm:$0xff] }
 0xd07   :  { %11247 = vmatpush3.bf16.msra.mxu1 %v11244_v33 }
 0xd08   :  { %11249 = vmatprep.subr.bf16.mxu1 %v11248_v54  ;;  %11265 = vmatprep.subr.bf16.mxu0 %v11264_v26 }
 0xd09   :  { %10382 = vmatmul.mubr.msk.f32.gmra.mrb[58].mxu1 %vm639_vm1, %v12103_v30  ;;  %10401 = vmatmul.mubr.msk.f32.gmra.mrb[68].mxu0 %vm639_vm1, %v12104_v46  ;;  %v628_v30 = vld [vmem:[%s13322_s19 + $0x18] sm:$0xff] }
 0xd0a   :  { %10384 = vmatprep.mubr.msk.f32.mxu1 %vm639_vm1, %v12105_v15  ;;  %10403 = vmatprep.mubr.msk.f32.mxu0 %vm639_vm1, %v12106_v17  ;;  %v11268_v46 = vpack.c.bf16 %v628_v30, %v627_v24  ;;  %v8942_v15 = vld [vmem:[%s13331_s29] ss:$0 sm:$0xff] }
 0xd0b   :  { %11267 = vmatpush3.bf16.msra.mxu0 %v11264_v26 }
 0xd0c   :  { %11269 = vmatprep.subr.bf16.mxu0 %v11268_v46 }
 0xd0d   :  { %10385 = vmatmul.mubr.msk.f32.gmra.mrb[60].mxu1 %vm639_vm1, %v12107_v51  ;;  %10404 = vmatmul.mubr.msk.f32.gmra.mrb[70].mxu0 %vm639_vm1, %v12108_v2 }
 0xd0e   :  { %10387 = vmatprep.mubr.msk.f32.mxu1 %vm639_vm1, %v12109_v5  ;;  %10406 = vmatprep.mubr.msk.f32.mxu0 %vm639_vm1, %v12110_v21 }
 0xd0f   :  { %11271 = vmatpush3.bf16.msra.mxu0 %v11268_v46 }
 0xd11   :  { %10388 = vmatmul.mubr.msk.f32.gmra.mrb[62].mxu1 %vm639_vm1, %v12111_v50  ;;  %10407 = vmatmul.mubr.msk.f32.gmra.mrb[72].mxu0 %vm639_vm1, %v12112_v16 }
 0xdd4   :  { %v13215_v20 = vpop.f32.mrb[54].mxu1  ;;  %v13217_v59 = vpop.f32.mrb[64].mxu0 }
 0xdd5   :  { %v13219_v52 = vpop.f32.mrb[55].mxu1  ;;  %v13221_v57 = vpop.f32.mrb[65].mxu0 }
 0xdd6   :  { %10417 = vmatprep.mubr.msk.f32.mxu1 %vm930_vm3, %v13219_v52 }
 0xdd7   :  { %10418 = vmatmul.mubr.msk.f32.vlgmr.msra.gmra.mrb[64].mxu1 %vm930_vm3, %v13215_v20 }
 0xdd8   :  { %v13229_v13 = vpop.f32.mrb[56].mxu1  ;;  %11251 = vmatpush3.bf16.msra.mxu1 %v11248_v54  ;;  %v13231_v31 = vpop.f32.mrb[66].mxu0 }
 0xdd9   :  { %v13233_v29 = vpop.f32.mrb[57].mxu1  ;;  %11253 = vmatprep.subr.bf16.mxu1 %v11252_v56  ;;  %v13235_v38 = vpop.f32.mrb[67].mxu0 }
 0xdda   :  { %10420 = vmatprep.mubr.msk.f32.mxu1 %vm930_vm3, %v13233_v29 }
 0xddb   :  { %10421 = vmatmul.mubr.msk.f32.gmra.mrb[66].mxu1 %vm930_vm3, %v13229_v13 }
 0xddc   :  { %v13241_v27 = vpop.f32.mrb[58].mxu1  ;;  %11255 = vmatpush3.bf16.msra.mxu1 %v11252_v56  ;;  %v13243_v32 = vpop.f32.mrb[68].mxu0 }
 0xddd   :  { %v13245_v18 = vpop.f32.mrb[59].mxu1  ;;  %v13247_v34 = vpop.f32.mrb[69].mxu0  ;;  %11257 = vmatprep.subr.bf16.mxu1 %v11256_v55 }
 0xdde   :  { %10423 = vmatprep.mubr.msk.f32.mxu1 %vm930_vm3, %v13245_v18 }
 0xddf   :  { %10424 = vmatmul.mubr.msk.f32.gmra.mrb[68].mxu1 %vm930_vm3, %v13241_v27 }
 0xde0   :  { %v13253_v12 = vpop.f32.mrb[60].mxu1  ;;  %v13255_v36 = vpop.f32.mrb[70].mxu0 }
 0xde1   :  { %v13257_v25 = vpop.f32.mrb[61].mxu1  ;;  %v13259_v9 = vpop.f32.mrb[71].mxu0 }
 0xde2   :  { %10426 = vmatprep.mubr.msk.f32.mxu1 %vm930_vm3, %v13257_v25 }
 0xde3   :  { %10427 = vmatmul.mubr.msk.f32.gmra.mrb[70].mxu1 %vm930_vm3, %v13253_v12 }
 0xde4   :  { %v13265_v22 = vpop.f32.mrb[62].mxu1  ;;  %v13267_v8 = vpop.f32.mrb[72].mxu0 }
 0xde5   :  { %v13269_v33 = vpop.f32.mrb[63].mxu1  ;;  %v13271_v23 = vpop.f32.mrb[73].mxu0 }
 0xde6   :  { %10429 = vmatprep.mubr.msk.f32.mxu1 %vm930_vm3, %v13269_v33 }
 0xde7   :  { %10430 = vmatmul.mubr.msk.f32.gmra.mrb[72].mxu1 %vm930_vm3, %v13265_v22 }
 0xde8   :  { %10440 = vmatprep.mubr.msk.f32.mxu1 %vm930_vm3, %v13221_v57 }
 0xdeb   :  { %10441 = vmatmul.mubr.msk.f32.vlgmr.msra.gmra.mrb[64].mxu1 %vm930_vm3, %v13217_v59 }
 0xdec   :  { %10443 = vmatprep.mubr.msk.f32.mxu1 %vm930_vm3, %v13235_v38  ;;  %11259 = vmatpush3.bf16.msra.mxu1 %v11256_v55 }
 0xded   :  { %11261 = vmatprep.subr.bf16.mxu1 %v11260_v19 }
 0xdef   :  { %10444 = vmatmul.mubr.msk.f32.gmra.mrb[66].mxu1 %vm930_vm3, %v13231_v31 }
 0xdf0   :  { %10446 = vmatprep.mubr.msk.f32.mxu1 %vm930_vm3, %v13247_v34  ;;  %11263 = vmatpush3.bf16.msra.mxu1 %v11260_v19 }
 0xdf3   :  { %10447 = vmatmul.mubr.msk.f32.gmra.mrb[68].mxu1 %vm930_vm3, %v13243_v32 }
 0xdf4   :  { %10449 = vmatprep.mubr.msk.f32.mxu1 %vm930_vm3, %v13259_v9 }
 0xdf7   :  { %10450 = vmatmul.mubr.msk.f32.gmra.mrb[70].mxu1 %vm930_vm3, %v13255_v36 }
 0xdf8   :  { %10452 = vmatprep.mubr.msk.f32.mxu1 %vm930_vm3, %v13271_v23 }
 0xdfb   :  { %10453 = vmatmul.mubr.msk.f32.gmra.mrb[72].mxu1 %vm930_vm3, %v13267_v8 }
 0xdfc   :  { %10463 = vmatprep.mubr.msk.f32.mxu1 %vm930_vm3, %v12414_v39 }
 0xdff   :  { %10464 = vmatmul.mubr.msk.f32.vlgmr.msra.gmra.mrb[64].mxu1 %vm930_vm3, %v12422_v40 }
 0xe00   :  { %10466 = vmatprep.mubr.msk.f32.mxu1 %vm930_vm3, %v12424_v41 }
 0xe03   :  { %10467 = vmatmul.mubr.msk.f32.gmra.mrb[66].mxu1 %vm930_vm3, %v12430_v42 }
 0xe04   :  { %10469 = vmatprep.mubr.msk.f32.mxu1 %vm930_vm3, %v12432_v43 }
 0xe07   :  { %10470 = vmatmul.mubr.msk.f32.gmra.mrb[68].mxu1 %vm930_vm3, %v12438_v62 }
 0xe08   :  { %10472 = vmatprep.mubr.msk.f32.mxu1 %vm930_vm3, %v12440_v63 }
 0xe0b   :  { %10473 = vmatmul.mubr.msk.f32.gmra.mrb[70].mxu1 %vm930_vm3, %v12446_v0 }
 0xe0c   :  { %10475 = vmatprep.mubr.msk.f32.mxu1 %vm930_vm3, %v12448_v3 }
 0xe0f   :  { %10476 = vmatmul.mubr.msk.f32.gmra.mrb[72].mxu1 %vm930_vm3, %v12454_v4 }
 0xed2   :  { %v10465_v17 = vpop.f32.mrb[64].mxu1 }
 0xed3   :  { %v13334_v51 = vadd.f32 %v10465_v17, %v8942_v15  ;;  %v4028_v2 = vpop.f32.mrb[65].mxu1 }
 0xed4   :  { %v13336_v5 = vadd.f32 %v8942_v15, %v4028_v2 }
 0xed5   :  { %v4098_v21 = vmul.f32 0.044715, %v13334_v51 }
 0xed6   :  { %v4097_v50 = vmul.f32 0.044715, %v13336_v5  ;;  %v10468_v16 = vpop.f32.mrb[66].mxu1 }
 0xed7   :  { %v4108_v61 = vmul.f32 %v13334_v51, %v4098_v21  ;;  %v13341_v28 = vadd.f32 %v10468_v16, %v8942_v15  ;;  %v4038_v54 = vpop.f32.mrb[67].mxu1 }
 0xed8   :  { %v4107_v1 = vmul.f32 %v13336_v5, %v4097_v50  ;;  %v13344_v7 = vadd.f32 %v8942_v15, %v4038_v54 }
 0xed9   :  { %v4118_v56 = vmul.f32 %v13334_v51, %v4108_v61  ;;  %v4100_v11 = vmul.f32 0.044715, %v13341_v28 }
 0xeda   :  { %v4117_v37 = vmul.f32 %v13336_v5, %v4107_v1  ;;  %v4099_v55 = vmul.f32 0.044715, %v13344_v7  ;;  %v10471_v10 = vpop.f32.mrb[68].mxu1 }
 0xedb   :  { %v4128_v58 = vadd.f32 %v13334_v51, %v4118_v56  ;;  %v4110_v19 = vmul.f32 %v13341_v28, %v4100_v11  ;;  %v13352_v60 = vadd.f32 %v10471_v10, %v8942_v15  ;;  %v4048_v6 = vpop.f32.mrb[69].mxu1 }
 0xedc   :  { %v4127_v26 = vadd.f32 %v13336_v5, %v4117_v37  ;;  %v4109_v24 = vmul.f32 %v13344_v7, %v4099_v55  ;;  %v13356_v30 = vadd.f32 %v8942_v15, %v4048_v6 }
 0xedd   :  { %v4138_v46 = vmul.f32 0.7978846, %v4128_v58  ;;  %v4120_v17 = vmul.f32 %v13341_v28, %v4110_v19  ;;  %v4102_v2 = vmul.f32 0.044715, %v13352_v60 }
 0xede   :  { %v4119_v21 = vmul.f32 %v13344_v7, %v4109_v24  ;;  %v4101_v50 = vmul.f32 0.044715, %v13356_v30  ;;  %v10474_v16 = vpop.f32.mrb[70].mxu1  ;;  %v4137_v61 = vmul.f32 0.7978846, %v4127_v26 }
 0xedf   :  { %11870 = vtanh.f32 %v4138_v46  ;;  %v4130_v54 = vadd.f32 %v13341_v28, %v4120_v17  ;;  %v4112_v1 = vmul.f32 %v13352_v60, %v4102_v2  ;;  %v13364_v56 = vadd.f32 %v10474_v16, %v8942_v15  ;;  %v4058_v11 = vpop.f32.mrb[71].mxu1 }
 0xee0   :  { %v4129_v37 = vadd.f32 %v13344_v7, %v4119_v21  ;;  %v4111_v55 = vmul.f32 %v13356_v30, %v4101_v50  ;;  %v13368_v10 = vadd.f32 %v8942_v15, %v4058_v11  ;;  %11872 = vtanh.f32 %v4137_v61 }
 0xee1   :  { %v4122_v58 = vmul.f32 %v13352_v60, %v4112_v1  ;;  %v4104_v19 = vmul.f32 0.044715, %v13364_v56  ;;  %v4140_v6 = vmul.f32 0.7978846, %v4130_v54 }
 0xee2   :  { %v4121_v26 = vmul.f32 %v13356_v30, %v4111_v55  ;;  %v4103_v24 = vmul.f32 0.044715, %v13368_v10  ;;  %v10477_v46 = vpop.f32.mrb[72].mxu1  ;;  %v4139_v17 = vmul.f32 0.7978846, %v4129_v37 }
 0xee3   :  { %v4132_v2 = vadd.f32 %v13352_v60, %v4122_v58  ;;  %v4114_v21 = vmul.f32 %v13364_v56, %v4104_v19  ;;  %v13376_v16 = vadd.f32 %v10477_v46, %v8942_v15  ;;  %v4068_v50 = vpop.f32.mrb[73].mxu1  ;;  %11874 = vtanh.f32 %v4140_v6 }
 0xee4   :  { %v4131_v61 = vadd.f32 %v13356_v30, %v4121_v26  ;;  %v4113_v1 = vmul.f32 %v13368_v10, %v4103_v24  ;;  %v13380_v11 = vadd.f32 %v8942_v15, %v4068_v50  ;;  %11876 = vtanh.f32 %v4139_v17 }
 0xee5   :  { %v4124_v54 = vmul.f32 %v13364_v56, %v4114_v21  ;;  %v4106_v55 = vmul.f32 0.044715, %v13376_v16  ;;  %v4142_v37 = vmul.f32 0.7978846, %v4132_v2 }
 0xee6   :  { %v4123_v58 = vmul.f32 %v13368_v10, %v4113_v1  ;;  %v4105_v19 = vmul.f32 0.044715, %v13380_v11  ;;  %v4141_v46 = vmul.f32 0.7978846, %v4131_v61 }
 0xee7   :  { %v4134_v14 = vadd.f32 %v13364_v56, %v4124_v54  ;;  %v4116_v6 = vmul.f32 %v13376_v16, %v4106_v55  ;;  %11878 = vtanh.f32 %v4142_v37  ;;  %v4087_v54 = vmul.f32 0.5, %v13336_v5 }
 0xee8   :  { %v4133_v26 = vadd.f32 %v13368_v10, %v4123_v58  ;;  %v4115_v15 = vmul.f32 %v13380_v11, %v4105_v19  ;;  %11880 = vtanh.f32 %v4141_v46  ;;  %v4088_v37 = vmul.f32 0.5, %v13334_v51 }
 0xee9   :  { %v11871_v24 = vpop.eup %11870  ;;  %v4126_v17 = vmul.f32 %v13376_v16, %v4116_v6  ;;  %v4144_v21 = vmul.f32 0.7978846, %v4134_v14  ;;  %v4090_v51 = vmul.f32 0.5, %v13341_v28 }
 0xeea   :  { %v11873_v2 = vpop.eup %11872  ;;  %v4158_v50 = vadd.f32 1.0, %v11871_v24  ;;  %v4125_v1 = vmul.f32 %v13380_v11, %v4115_v15  ;;  %v4143_v48 = vmul.f32 0.7978846, %v4133_v26  ;;  %v4089_v26 = vmul.f32 0.5, %v13344_v7 }
 0xeeb   :  { %v4136_v61 = vadd.f32 %v13376_v16, %v4126_v17  ;;  %v4157_v55 = vadd.f32 1.0, %v11873_v2  ;;  %11882 = vtanh.f32 %v4144_v21  ;;  %v4092_v7 = vmul.f32 0.5, %v13352_v60 }
 0xeec   :  { %v4135_v58 = vadd.f32 %v13380_v11, %v4125_v1  ;;  %11884 = vtanh.f32 %v4143_v48  ;;  %v4168_v35 = vmul.f32 %v4158_v50, %v4088_v37  ;;  %v4091_v50 = vmul.f32 0.5, %v13356_v30 }
 0xeed   :  { %v11875_v19 = vpop.eup %11874  ;;  %v4167_v46 = vmul.f32 %v4157_v55, %v4087_v54  ;;  %v4146_v6 = vmul.f32 0.7978846, %v4136_v61  ;;  %v4095_v60 = vmul.f32 0.5, %v13380_v11 }
 0xeee   :  { %v11877_v14 = vpop.eup %11876  ;;  %v4160_v24 = vadd.f32 1.0, %v11875_v19  ;;  %v4145_v53 = vmul.f32 0.7978846, %v4135_v58  ;;  %v4094_v58 = vmul.f32 0.5, %v13364_v56  ;;  %v630_v56 = vld [vmem:[%s13417_s12] sm:$0xff] }
 0xeef   :  { %10486 = vmatprep.mubr.msk.f32.mxu0 %vm930_vm3, %v4167_v46  ;;  %v4159_v15 = vadd.f32 1.0, %v11877_v14  ;;  %11886 = vtanh.f32 %v4146_v6 }
 0xef0   :  { %10487 = vmatmul.mubr.msk.f32.vlgmr.msra.gmra.mrb[74].mxu0 %vm930_vm3, %v4168_v35  ;;  %11888 = vtanh.f32 %v4145_v53  ;;  %v4170_v21 = vmul.f32 %v4160_v24, %v4090_v51  ;;  %v4093_v53 = vmul.f32 0.5, %v13368_v10  ;;  %v632_v51 = vld [vmem:[%s13417_s12 + $0x10] sm:$0xff] }
 0xef1   :  { %v11879_v5 = vpop.eup %11878  ;;  %v4169_v48 = vmul.f32 %v4159_v15, %v4089_v26  ;;  %v4096_v26 = vmul.f32 0.5, %v13376_v16  ;;  %v631_v16 = vld [vmem:[%s13417_s12 + $0x8] sm:$0xff] }
 0xef2   :  { %v11881_v17 = vpop.eup %11880  ;;  %v4162_v2 = vadd.f32 1.0, %v11879_v5  ;;  %v11272_v11 = vpack.c.bf16 %v631_v16, %v630_v56  ;;  %v633_v5 = vld [vmem:[%s13417_s12 + $0x18] sm:$0xff] }
 0xef3   :  { %10489 = vmatprep.mubr.msk.f32.mxu0 %vm930_vm3, %v4169_v48  ;;  %v4161_v1 = vadd.f32 1.0, %v11881_v17  ;;  %v11276_v48 = vpack.c.bf16 %v633_v5, %v632_v51  ;;  %v8987_v17 = vld [vmem:[%s12243_s25 + $0x60] sm:$0xff] }
 0xef4   :  { %10490 = vmatmul.mubr.msk.f32.gmra.mrb[76].mxu0 %vm930_vm3, %v4170_v21  ;;  %v4172_v55 = vmul.f32 %v4162_v2, %v4092_v7  ;;  %11273 = vmatprep.subr.bf16.mxu0 %v11272_v11  ;;  %v8988_v21 = vld [vmem:[%s12243_s25 + $0x68] sm:$0xff] }
 0xef5   :  { %v11883_v61 = vpop.eup %11882  ;;  %v4171_v54 = vmul.f32 %v4161_v1, %v4091_v50  ;;  %11275 = vmatpush3.bf16.msra.mxu0 %v11272_v11  ;;  %v13425_v2 = vpack.c.bf16 %v8988_v21, %v8987_v17  ;;  %v8963_v50 = vld [vmem:[%s13431_s24] ss:$0 sm:$0xff] }
 0xef6   :  { %v11885_v35 = vpop.eup %11884  ;;  %v4164_v28 = vadd.f32 1.0, %v11883_v61  ;;  %11277 = vmatprep.subr.bf16.mxu0 %v11276_v48 }
 0xef7   :  { %10492 = vmatprep.mubr.msk.f32.mxu0 %vm930_vm3, %v4171_v54  ;;  %v4163_v37 = vadd.f32 1.0, %v11885_v35 }
 0xef8   :  { %10493 = vmatmul.mubr.msk.f32.gmra.mrb[78].mxu0 %vm930_vm3, %v4172_v55  ;;  %v4174_v6 = vmul.f32 %v4164_v28, %v4094_v58 }
 0xef9   :  { %v11887_v30 = vpop.eup %11886  ;;  %v4173_v19 = vmul.f32 %v4163_v37, %v4093_v53  ;;  %11279 = vmatpush3.bf16.msra.mxu0 %v11276_v48 }
 0xefa   :  { %v11889_v46 = vpop.eup %11888  ;;  %v4166_v14 = vadd.f32 1.0, %v11887_v30  ;;  %11281 = vmatprep.subr.bf16.mxu0 %v13425_v2 }
 0xefb   :  { %10495 = vmatprep.mubr.msk.f32.mxu0 %vm930_vm3, %v4173_v19  ;;  %v4165_v24 = vadd.f32 1.0, %v11889_v46 }
 0xefc   :  { %10496 = vmatmul.mubr.msk.f32.gmra.mrb[80].mxu0 %vm930_vm3, %v4174_v6  ;;  %v4176_v15 = vmul.f32 %v4166_v14, %v4096_v26 }
 0xefd   :  { %v4175_v10 = vmul.f32 %v4165_v24, %v4095_v60 }
 0xeff   :  { %10498 = vmatprep.mubr.msk.f32.mxu0 %vm930_vm3, %v4175_v10 }
 0xf00   :  { %10499 = vmatmul.mubr.msk.f32.gmra.mrb[82].mxu0 %vm930_vm3, %v4176_v15 }
 0xfc3   :  { %v10488_v1 = vpop.f32.mrb[74].mxu0 }
 0xfc4   :  { %v13434_v7 = vadd.f32 %v10488_v1, %v8963_v50  ;;  %v4279_v61 = vpop.f32.mrb[75].mxu0 }
 0xfc5   :  { %v13436_v54 = vadd.f32 %v8963_v50, %v4279_v61 }
 0xfc6   :  { %v4339_v35 = vmul.f32 0.044715, %v13434_v7 }
 0xfc7   :  { %v4338_v55 = vmul.f32 0.044715, %v13436_v54  ;;  %v10491_v28 = vpop.f32.mrb[76].mxu0 }
 0xfc8   :  { %v4349_v53 = vmul.f32 %v4339_v35, %v13434_v7  ;;  %v13441_v37 = vadd.f32 %v10491_v28, %v8963_v50  ;;  %v4289_v58 = vpop.f32.mrb[77].mxu0 }
 0xfc9   :  { %v4348_v30 = vmul.f32 %v4338_v55, %v13436_v54  ;;  %v13444_v19 = vadd.f32 %v8963_v50, %v4289_v58 }
 0xfca   :  { %v4359_v46 = vmul.f32 %v4349_v53, %v13434_v7  ;;  %v4341_v6 = vmul.f32 0.044715, %v13441_v37 }
 0xfcb   :  { %v4358_v14 = vmul.f32 %v4348_v30, %v13436_v54  ;;  %v4340_v60 = vmul.f32 0.044715, %v13444_v19  ;;  %v10494_v24 = vpop.f32.mrb[78].mxu0 }
 0xfcc   :  { %v4369_v26 = vadd.f32 %v4359_v46, %v13434_v7  ;;  %v4351_v10 = vmul.f32 %v4341_v6, %v13441_v37  ;;  %v13452_v15 = vadd.f32 %v10494_v24, %v8963_v50  ;;  %v4299_v56 = vpop.f32.mrb[79].mxu0 }
 0xfcd   :  { %v4368_v16 = vadd.f32 %v4358_v14, %v13436_v54  ;;  %v4350_v11 = vmul.f32 %v4340_v60, %v13444_v19  ;;  %v13456_v51 = vadd.f32 %v8963_v50, %v4299_v56 }
 0xfce   :  { %v4379_v5 = vmul.f32 0.7978846, %v4369_v26  ;;  %v4361_v48 = vmul.f32 %v4351_v10, %v13441_v37  ;;  %v4343_v17 = vmul.f32 0.044715, %v13452_v15 }
 0xfcf   :  { %v4360_v21 = vmul.f32 %v4350_v11, %v13444_v19  ;;  %v4342_v1 = vmul.f32 0.044715, %v13456_v51  ;;  %v10497_v61 = vpop.f32.mrb[80].mxu0  ;;  %v4378_v35 = vmul.f32 0.7978846, %v4368_v16 }
 0xfd0   :  { %11890 = vtanh.f32 %v4379_v5  ;;  %v4371_v55 = vadd.f32 %v4361_v48, %v13441_v37  ;;  %v4353_v28 = vmul.f32 %v4343_v17, %v13452_v15  ;;  %v13464_v53 = vadd.f32 %v10497_v61, %v8963_v50  ;;  %v4309_v58 = vpop.f32.mrb[81].mxu0 }
 0xfd1   :  { %v4370_v30 = vadd.f32 %v4360_v21, %v13444_v19  ;;  %v4352_v46 = vmul.f32 %v4342_v1, %v13456_v51  ;;  %v13468_v6 = vadd.f32 %v8963_v50, %v4309_v58  ;;  %11892 = vtanh.f32 %v4378_v35 }
 0xfd2   :  { %v4363_v14 = vmul.f32 %v4353_v28, %v13452_v15  ;;  %v4345_v60 = vmul.f32 0.044715, %v13464_v53  ;;  %v4381_v24 = vmul.f32 0.7978846, %v4371_v55 }
 0xfd3   :  { %v4362_v26 = vmul.f32 %v4352_v46, %v13456_v51  ;;  %v4344_v10 = vmul.f32 0.044715, %v13468_v6  ;;  %v10500_v56 = vpop.f32.mrb[82].mxu0  ;;  %v4380_v16 = vmul.f32 0.7978846, %v4370_v30 }
 0xfd4   :  { %v4373_v11 = vadd.f32 %v4363_v14, %v13452_v15  ;;  %v4355_v5 = vmul.f32 %v4345_v60, %v13464_v53  ;;  %v13476_v48 = vadd.f32 %v10500_v56, %v8963_v50  ;;  %v4319_v17 = vpop.f32.mrb[83].mxu0  ;;  %11894 = vtanh.f32 %v4381_v24 }
 0xfd5   :  { %v4372_v21 = vadd.f32 %v4362_v26, %v13456_v51  ;;  %v4354_v1 = vmul.f32 %v4344_v10, %v13468_v6  ;;  %v13480_v61 = vadd.f32 %v8963_v50, %v4319_v17  ;;  %11896 = vtanh.f32 %v4380_v16 }
 0xfd6   :  { %v4365_v35 = vmul.f32 %v4355_v5, %v13464_v53  ;;  %v4347_v55 = vmul.f32 0.044715, %v13476_v48  ;;  %v4383_v28 = vmul.f32 0.7978846, %v4373_v11 }
 0xfd7   :  { %v4364_v58 = vmul.f32 %v4354_v1, %v13468_v6  ;;  %v4346_v30 = vmul.f32 0.044715, %v13480_v61  ;;  %v4382_v46 = vmul.f32 0.7978846, %v4372_v21  ;;  %v4328_v1 = vmul.f32 0.5, %v13436_v54 }
 0xfd8   :  { %v4375_v14 = vadd.f32 %v4365_v35, %v13464_v53  ;;  %v4357_v60 = vmul.f32 %v4347_v55, %v13476_v48  ;;  %11898 = vtanh.f32 %v4383_v28  ;;  %v8989_v55 = vld [vmem:[%s12243_s25 + $0x70] sm:$0xff]  ;;  %v8990_v28 = vld [vmem:[%s12243_s25 + $0x78] sm:$0xff]  ;;  %v4330_v54 = vmul.f32 0.5, %v13444_v19 }
 0xfd9   :  { %v4374_v50 = vadd.f32 %v4364_v58, %v13468_v6  ;;  %v4356_v24 = vmul.f32 %v4346_v30, %v13480_v61  ;;  %11900 = vtanh.f32 %v4382_v46  ;;  %v4329_v58 = vmul.f32 0.5, %v13434_v7  ;;  %v8992_v7 = vld [vmem:[%s12243_s25 + $0x88] sm:$0xff] }
 0xfda   :  { %v11891_v26 = vpop.eup %11890  ;;  %v4367_v10 = vmul.f32 %v4357_v60, %v13476_v48  ;;  %v4385_v56 = vmul.f32 0.7978846, %v4375_v14  ;;  %v11284_v47 = vpack.c.bf16 %v8990_v28, %v8989_v55  ;;  %v4332_v19 = vmul.f32 0.5, %v13456_v51 }
 0xfdb   :  { %v11893_v16 = vpop.eup %11892  ;;  %v4399_v11 = vadd.f32 1.0, %v11891_v26  ;;  %v4366_v5 = vmul.f32 %v4356_v24, %v13480_v61  ;;  %v4384_v17 = vmul.f32 0.7978846, %v4374_v50  ;;  %v4335_v51 = vmul.f32 0.5, %v13464_v53  ;;  %v8994_v53 = vld [vmem:[%s12243_s25 + $0x98] sm:$0xff] }
 0xfdc   :  { %v4377_v21 = vadd.f32 %v4367_v10, %v13476_v48  ;;  %v4398_v35 = vadd.f32 1.0, %v11893_v16  ;;  %11902 = vtanh.f32 %v4385_v56  ;;  %v8991_v16 = vld [vmem:[%s12243_s25 + $0x80] sm:$0xff] }
 0xfdd   :  { %v4376_v30 = vadd.f32 %v4366_v5, %v13480_v61  ;;  %11904 = vtanh.f32 %v4384_v17  ;;  %v4409_v50 = vmul.f32 %v4399_v11, %v4329_v58  ;;  %v4331_v5 = vmul.f32 0.5, %v13441_v37 }
 0xfde   :  { %v11895_v46 = vpop.eup %11894  ;;  %v4408_v14 = vmul.f32 %v4398_v35, %v4328_v1  ;;  %v4387_v60 = vmul.f32 0.7978846, %v4377_v21  ;;  %v11288_v55 = vpack.c.bf16 %v8992_v7, %v8991_v16  ;;  %v4333_v58 = vmul.f32 0.5, %v13452_v15 }
 0xfdf   :  { %v11897_v24 = vpop.eup %11896  ;;  %v4401_v26 = vadd.f32 1.0, %v11895_v46  ;;  %v4386_v10 = vmul.f32 0.7978846, %v4376_v30 }
 0xfe0   :  { %10509 = vmatprep.mubr.msk.f32.mxu0 %vm930_vm3, %v4408_v14  ;;  %v4400_v56 = vadd.f32 1.0, %v11897_v24  ;;  %11906 = vtanh.f32 %v4387_v60  ;;  %v4334_v60 = vmul.f32 0.5, %v13468_v6  ;;  %v4337_v6 = vmul.f32 0.5, %v13476_v48  ;;  %v8974_v48 = vld [vmem:[%s13564_s8] ss:$0 sm:$0xff]  ;;  %s13653_s8 = sld [smem:[%s14689_s0 + %s12175_s28]]  }
 0xfe1   :  { %10510 = vmatmul.mubr.msk.f32.vlgmr.msra.gmra.mrb[84].mxu0 %vm930_vm3, %v4409_v50  ;;  %11908 = vtanh.f32 %v4386_v10  ;;  %v4411_v1 = vmul.f32 %v4401_v26, %v4331_v5  ;;  %v8993_v5 = vld [vmem:[%s12243_s25 + $0x90] sm:$0xff] }
 0xfe2   :  { %v11899_v17 = vpop.eup %11898  ;;  %v4410_v21 = vmul.f32 %v4400_v56, %v4330_v54  ;;  %11283 = vmatpush3.bf16.msra.mxu0 %v13425_v2  ;;  %v4336_v54 = vmul.f32 0.5, %v13480_v61 }
 0xfe3   :  { %v11901_v11 = vpop.eup %11900  ;;  %v4403_v35 = vadd.f32 1.0, %v11899_v17  ;;  %11285 = vmatprep.subr.bf16.mxu0 %v11284_v47  ;;  %v11292_v17 = vpack.c.bf16 %v8994_v53, %v8993_v5 }
 0xfe4   :  { %10512 = vmatprep.mubr.msk.f32.mxu0 %vm930_vm3, %v4410_v21  ;;  %v4402_v28 = vadd.f32 1.0, %v11901_v11 }
 0xfe5   :  { %10513 = vmatmul.mubr.msk.f32.gmra.mrb[86].mxu0 %vm930_vm3, %v4411_v1  ;;  %v4413_v14 = vmul.f32 %v4403_v35, %v4333_v58 }
 0xfe6   :  { %v11903_v37 = vpop.eup %11902  ;;  %v4412_v30 = vmul.f32 %v4402_v28, %v4332_v19  ;;  %11287 = vmatpush3.bf16.msra.mxu0 %v11284_v47 }
 0xfe7   :  { %v11905_v46 = vpop.eup %11904  ;;  %v4405_v2 = vadd.f32 1.0, %v11903_v37  ;;  %11289 = vmatprep.subr.bf16.mxu0 %v11288_v55 }
 0xfe8   :  { %10515 = vmatprep.mubr.msk.f32.mxu0 %vm930_vm3, %v4412_v30  ;;  %v4404_v24 = vadd.f32 1.0, %v11905_v46 }
 0xfe9   :  { %10516 = vmatmul.mubr.msk.f32.gmra.mrb[88].mxu0 %vm930_vm3, %v4413_v14  ;;  %v4415_v10 = vmul.f32 %v4405_v2, %v4335_v51 }
 0xfea   :  { %v11907_v50 = vpop.eup %11906  ;;  %v4414_v15 = vmul.f32 %v4404_v24, %v4334_v60 }
 0xfeb   :  { %v11909_v26 = vpop.eup %11908  ;;  %v4407_v47 = vadd.f32 1.0, %v11907_v50 }
 0xfec   :  { %10518 = vmatprep.mubr.msk.f32.mxu0 %vm930_vm3, %v4414_v15  ;;  %v4406_v56 = vadd.f32 1.0, %v11909_v26 }
 0xfed   :  { %10519 = vmatmul.mubr.msk.f32.gmra.mrb[90].mxu0 %vm930_vm3, %v4415_v10  ;;  %v4417_v7 = vmul.f32 %v4407_v47, %v4337_v6 }
 0xfee   :  { %v4416_v16 = vmul.f32 %v4406_v56, %v4336_v54 }
 0xff0   :  { %10521 = vmatprep.mubr.msk.f32.mxu0 %vm930_vm3, %v4416_v16 }
 0xff1   :  { %10522 = vmatmul.mubr.msk.f32.gmra.mrb[92].mxu0 %vm930_vm3, %v4417_v7 }
 0xff2   :  { %10532 = vmatprep.mubr.msk.f32.mxu0 %vm930_vm3, %v13219_v52 }
 0xff5   :  { %10533 = vmatmul.mubr.msk.f32.vlgmr.msra.gmra.mrb[94].mxu0 %vm930_vm3, %v13215_v20 }
 0xff6   :  { %10535 = vmatprep.mubr.msk.f32.mxu0 %vm930_vm3, %v13233_v29  ;;  %11291 = vmatpush3.bf16.msra.mxu0 %v11288_v55 }
 0xff7   :  { %11293 = vmatprep.subr.bf16.mxu0 %v11292_v17 }
 0xff9   :  { %10536 = vmatmul.mubr.msk.f32.gmra.mrb[96].mxu0 %vm930_vm3, %v13229_v13 }
 0xffa   :  { %10538 = vmatprep.mubr.msk.f32.mxu0 %vm930_vm3, %v13245_v18  ;;  %11295 = vmatpush3.bf16.msra.mxu0 %v11292_v17 }
 0xffd   :  { %10539 = vmatmul.mubr.msk.f32.gmra.mrb[98].mxu0 %vm930_vm3, %v13241_v27 }
 0xffe   :  { %10541 = vmatprep.mubr.msk.f32.mxu0 %vm930_vm3, %v13257_v25 }
0x1001   :  { %10542 = vmatmul.mubr.msk.f32.gmra.mrb[100].mxu0 %vm930_vm3, %v13253_v12 }
0x1002   :  { %10544 = vmatprep.mubr.msk.f32.mxu0 %vm930_vm3, %v13269_v33 }
0x1005   :  { %10545 = vmatmul.mubr.msk.f32.gmra.mrb[102].mxu0 %vm930_vm3, %v13265_v22 }
0x1006   :  { %10555 = vmatprep.mubr.msk.f32.mxu0 %vm930_vm3, %v13221_v57 }
0x1009   :  { %10556 = vmatmul.mubr.msk.f32.vlgmr.msra.gmra.mrb[94].mxu0 %vm930_vm3, %v13217_v59 }
0x100a   :  { %10558 = vmatprep.mubr.msk.f32.mxu0 %vm930_vm3, %v13235_v38 }
0x100d   :  { %10559 = vmatmul.mubr.msk.f32.gmra.mrb[96].mxu0 %vm930_vm3, %v13231_v31 }
0x100e   :  { %10561 = vmatprep.mubr.msk.f32.mxu0 %vm930_vm3, %v13247_v34 }
0x1011   :  { %10562 = vmatmul.mubr.msk.f32.gmra.mrb[98].mxu0 %vm930_vm3, %v13243_v32 }
0x1012   :  { %10564 = vmatprep.mubr.msk.f32.mxu0 %vm930_vm3, %v13259_v9 }
0x1015   :  { %10565 = vmatmul.mubr.msk.f32.gmra.mrb[100].mxu0 %vm930_vm3, %v13255_v36 }
0x1016   :  { %10567 = vmatprep.mubr.msk.f32.mxu0 %vm930_vm3, %v13271_v23 }
0x1019   :  { %10568 = vmatmul.mubr.msk.f32.gmra.mrb[102].mxu0 %vm930_vm3, %v13267_v8 }
0x10b4   :  { %v10511_v61 = vpop.f32.mrb[84].mxu0 }
0x10b5   :  { %v4526_v21 = vadd.f32 %v10511_v61, %v8974_v48  ;;  %v4520_v11 = vpop.f32.mrb[85].mxu0 }
0x10b6   :  { %v4521_v1 = vadd.f32 %v8974_v48, %v4520_v11 }
0x10b7   :  { %v4570_v35 = vadd.f32 %v4526_v21, %v12422_v40 }
0x10b8   :  { %v10514_v55 = vpop.f32.mrb[86].mxu0  ;;  %v4569_v37 = vadd.f32 %v4521_v1, %v12414_v39 }
0x10b9   :  { %v4536_v19 = vadd.f32 %v10514_v55, %v8974_v48  ;;  %v4530_v28 = vpop.f32.mrb[87].mxu0  ;;  %v4582_v58 = vsel %vm930_vm3, %v4570_v35, 0.0 }
0x10ba   :  { %4583 = vadd.xlane.f32.xlu0 %v4582_v58  ;;  %v4531_v30 = vadd.f32 %v8974_v48, %v4530_v28  ;;  %v4579_v60 = vsel %vm930_vm3, %v4569_v37, 0.0 }
0x10bb   :  { %v4572_v24 = vadd.f32 %v4536_v19, %v12430_v42 }
0x10bc   :  { %v10517_v46 = vpop.f32.mrb[88].mxu0  ;;  %v4571_v50 = vadd.f32 %v4531_v30, %v12424_v41 }
0x10bd   :  { %v4546_v14 = vadd.f32 %v10517_v46, %v8974_v48  ;;  %v4540_v2 = vpop.f32.mrb[89].mxu0  ;;  %v4588_v47 = vsel %vm930_vm3, %v4572_v24, 0.0 }
0x10be   :  { %4580 = vadd.xlane.f32.xlu0 %v4579_v60  ;;  %v4541_v15 = vadd.f32 %v8974_v48, %v4540_v2  ;;  %v4585_v42 = vsel %vm930_vm3, %v4571_v50, 0.0 }
0x10bf   :  { %v4574_v51 = vadd.f32 %v4546_v14, %v12438_v62 }
0x10c0   :  { %v10520_v40 = vpop.f32.mrb[90].mxu0  ;;  %v4573_v41 = vadd.f32 %v4541_v15, %v12432_v43 }
0x10c1   :  { %v4556_v26 = vadd.f32 %v10520_v40, %v8974_v48  ;;  %v4550_v10 = vpop.f32.mrb[91].mxu0  ;;  %v4594_v39 = vsel %vm930_vm3, %v4574_v51, 0.0 }
0x10c2   :  { %4595 = vadd.xlane.f32.xlu1 %v4594_v39  ;;  %4589 = vadd.xlane.f32.xlu0 %v4588_v47  ;;  %v4551_v6 = vadd.f32 %v8974_v48, %v4550_v10  ;;  %v4591_v17 = vsel %vm930_vm3, %v4573_v41, 0.0 }
0x10c3   :  { %v4576_v54 = vadd.f32 %v4556_v26, %v12446_v0 }
0x10c4   :  { %v10523_v56 = vpop.f32.mrb[92].mxu0  ;;  %v4575_v0 = vadd.f32 %v4551_v6, %v12440_v63 }
0x10c5   :  { %v4566_v16 = vadd.f32 %v10523_v56, %v8974_v48  ;;  %v4560_v62 = vpop.f32.mrb[93].mxu0  ;;  %v4600_v7 = vsel %vm930_vm3, %v4576_v54, 0.0 }
0x10c6   :  { %4601 = vadd.xlane.f32.xlu1 %v4600_v7  ;;  %4586 = vadd.xlane.f32.xlu0 %v4585_v42  ;;  %v4561_v53 = vadd.f32 %v8974_v48, %v4560_v62  ;;  %v4597_v21 = vsel %vm930_vm3, %v4575_v0, 0.0 }
0x10c7   :  { %v4578_v5 = vadd.f32 %v4566_v16, %v12454_v4 }
0x10c8   :  { %v4577_v11 = vadd.f32 %v4561_v53, %v12448_v3 }
0x10c9   :  { %v4606_v61 = vsel %vm930_vm3, %v4578_v5, 0.0 }
0x10ca   :  { %4592 = vadd.xlane.f32.xlu0 %v4591_v17  ;;  %4607 = vadd.xlane.f32.xlu1 %v4606_v61  ;;  %v4603_v43 = vsel %vm930_vm3, %v4577_v11, 0.0 }
0x10ce   :  { %4598 = vadd.xlane.f32.xlu0 %v4597_v21 }
0x10d2   :  { %4604 = vadd.xlane.f32.xlu0 %v4603_v43 }
0x1147   :  { %v4584_v1 = vpop.xlane.xlu0 %4583 }
0x1148   :  { %v4610_v55 = vmul.f32 0.03125, %v4584_v1 }
0x114a   :  { %v13587_v4 = vsub.f32 %v4570_v35, %v4610_v55 }
0x114b   :  { %v4581_v48 = vpop.xlane.xlu0 %4580 }
0x114c   :  { %v4609_v19 = vmul.f32 0.03125, %v4581_v48  ;;  %v4630_v28 = vmul.f32 %v13587_v4, %v13587_v4 }
0x114e   :  { %v13591_v63 = vsub.f32 %v4569_v37, %v4609_v19  ;;  %v4642_v58 = vsel %vm930_vm3, %v4630_v28, 0.0 }
0x114f   :  { %v4596_v30 = vpop.xlane.xlu1 %4595  ;;  %v4590_v46 = vpop.xlane.xlu0 %4589  ;;  %4643 = vadd.xlane.f32.xlu1 %v4642_v58 }
0x1150   :  { %v4614_v3 = vmul.f32 0.03125, %v4596_v30  ;;  %v4612_v14 = vmul.f32 0.03125, %v4590_v46  ;;  %v4629_v2 = vmul.f32 %v13591_v63, %v13591_v63 }
0x1152   :  { %v13596_v60 = vsub.f32 %v4574_v51, %v4614_v3  ;;  %v13598_v35 = vsub.f32 %v4572_v24, %v4612_v14  ;;  %v4639_v40 = vsel %vm930_vm3, %v4629_v2, 0.0  ;;  %v8995_v2 = vld [vmem:[%s12243_s25 + $0xa0] sm:$0xff] }
0x1153   :  { %v4602_v15 = vpop.xlane.xlu1 %4601  ;;  %v4587_v26 = vpop.xlane.xlu0 %4586  ;;  %4640 = vadd.xlane.f32.xlu0 %v4639_v40  ;;  %v8996_v40 = vld [vmem:[%s12243_s25 + $0xa8] sm:$0xff] }
0x1154   :  { %v4616_v37 = vmul.f32 0.03125, %v4602_v15  ;;  %v4611_v10 = vmul.f32 0.03125, %v4587_v26  ;;  %v4632_v39 = vmul.f32 %v13598_v35, %v13598_v35  ;;  %v4634_v47 = vmul.f32 %v13596_v60, %v13596_v60  ;;  %v8997_v15 = vld [vmem:[%s12243_s25 + $0xb0] sm:$0xff]  ;;  %v8998_v26 = vld [vmem:[%s12243_s25 + $0xb8] sm:$0xff]  ;;  %s12174_s25 = smov 31  }
0x1155   :  { %s13648_s17 = sld [smem:[%s14689_s0 + %s12174_s25]]  }
0x1156   :  { %v13605_v56 = vsub.f32 %v4576_v54, %v4616_v37  ;;  %v13607_v42 = vsub.f32 %v4571_v50, %v4611_v10  ;;  %v4648_v24 = vsel %vm930_vm3, %v4632_v39, 0.0  ;;  %v4654_v53 = vsel %vm930_vm3, %v4634_v47, 0.0  ;;  %v9000_v10 = vld [vmem:[%s12367_s7 + $0x40] sm:$0xff]  ;;  %v9001_v39 = vld [vmem:[%s12367_s7 + $0x48] sm:$0xff]  ;;  %v9002_v47 = vld [vmem:[%s12367_s7 + $0x50] sm:$0xff] }
0x1157   :  { %v4593_v51 = vpop.xlane.xlu0 %4592  ;;  %4649 = vadd.xlane.f32.xlu1 %v4648_v24  ;;  %v4608_v6 = vpop.xlane.xlu1 %4607  ;;  %v11300_v37 = vpack.c.bf16 %v8998_v26, %v8997_v15  ;;  %v11304_v24 = vpack.c.bf16 %v9001_v39, %v9000_v10 }
0x1158   :  { %v4613_v16 = vmul.f32 0.03125, %v4593_v51  ;;  %v4618_v62 = vmul.f32 0.03125, %v4608_v6  ;;  %v4631_v7 = vmul.f32 %v13607_v42, %v13607_v42  ;;  %v4636_v50 = vmul.f32 %v13605_v56, %v13605_v56  ;;  %v9003_v51 = vld [vmem:[%s12367_s7 + $0x58] sm:$0xff] }
0x1159   :  { %v11308_v6 = vpack.c.bf16 %v9003_v51, %v9002_v47  ;;  %11305 = vmatprep.subr.bf16.mxu1 %v11304_v24 }
0x115a   :  { %v13613_v17 = vsub.f32 %v4573_v41, %v4613_v16  ;;  %v13615_v61 = vsub.f32 %v4578_v5, %v4618_v62  ;;  %v4645_v54 = vsel %vm930_vm3, %v4631_v7, 0.0  ;;  %v4660_v48 = vsel %vm930_vm3, %v4636_v50, 0.0  ;;  %11307 = vmatpush3.bf16.msra.mxu1 %v11304_v24 }
0x115b   :  { %v4599_v21 = vpop.xlane.xlu0 %4598  ;;  %4655 = vadd.xlane.f32.xlu1 %v4654_v53  ;;  %4646 = vadd.xlane.f32.xlu0 %v4645_v54 }
0x115c   :  { %v4615_v43 = vmul.f32 0.03125, %v4599_v21  ;;  %v4633_v1 = vmul.f32 %v13613_v17, %v13613_v17  ;;  %v4638_v5 = vmul.f32 %v13615_v61, %v13615_v61  ;;  %11309 = vmatprep.subr.bf16.mxu1 %v11308_v6 }
0x115e   :  { %v13622_v55 = vsub.f32 %v4575_v0, %v4615_v43  ;;  %v4651_v41 = vsel %vm930_vm3, %v4633_v1, 0.0  ;;  %v4666_v30 = vsel %vm930_vm3, %v4638_v5, 0.0  ;;  %11311 = vmatpush3.bf16.msra.mxu1 %v11308_v6 }
0x115f   :  { %4661 = vadd.xlane.f32.xlu1 %v4660_v48  ;;  %4652 = vadd.xlane.f32.xlu0 %v4651_v41  ;;  %v4605_v19 = vpop.xlane.xlu0 %4604 }
0x1160   :  { %v4617_v28 = vmul.f32 0.03125, %v4605_v19  ;;  %v4635_v58 = vmul.f32 %v13622_v55, %v13622_v55 }
0x1162   :  { %v13630_v0 = vsub.f32 %v4577_v11, %v4617_v28  ;;  %v4657_v46 = vsel %vm930_vm3, %v4635_v58, 0.0  ;;  %v11296_v11 = vpack.c.bf16 %v8996_v40, %v8995_v2 }
0x1163   :  { %4667 = vadd.xlane.f32.xlu1 %v4666_v30  ;;  %4658 = vadd.xlane.f32.xlu0 %v4657_v46 }
0x1164   :  { %v4637_v3 = vmul.f32 %v13630_v0, %v13630_v0  ;;  %11297 = vmatprep.subr.bf16.mxu0 %v11296_v11 }
0x1165   :  { %11299 = vmatpush3.bf16.msra.mxu0 %v11296_v11  ;;  %v8985_v11 = vld [vmem:[%s13648_s17] ss:$0 sm:$0xff] }
0x1166   :  { %v4663_v14 = vsel %vm930_vm3, %v4637_v3, 0.0  ;;  %11301 = vmatprep.subr.bf16.mxu0 %v11300_v37 }
0x1167   :  { %4664 = vadd.xlane.f32.xlu0 %v4663_v14 }
0x1169   :  { %11303 = vmatpush3.bf16.msra.mxu0 %v11300_v37 }
0x11dc   :  { %v4644_v16 = vpop.xlane.xlu1 %4643 }
0x11dd   :  { %v4670_v62 = vmul.f32 0.03125, %v4644_v16  ;;  %v8986_v16 = vld [vmem:[%s13653_s8] ss:$0 sm:$0xff] }
0x11df   :  { %v4680_v7 = vadd.f32 1e-05, %v4670_v62 }
0x11e0   :  { %v4641_v53 = vpop.xlane.xlu0 %4640 }
0x11e1   :  { %11910 = vrsqrt.f32 %v4680_v7  ;;  %v4669_v54 = vmul.f32 0.03125, %v4641_v53 }
0x11e3   :  { %v4679_v50 = vadd.f32 1e-05, %v4669_v54 }
0x11e4   :  { %v4650_v21 = vpop.xlane.xlu1 %4649 }
0x11e5   :  { %11912 = vrsqrt.f32 %v4679_v50  ;;  %v4672_v43 = vmul.f32 0.03125, %v4650_v21 }
0x11e7   :  { %v4682_v1 = vadd.f32 1e-05, %v4672_v43 }
0x11e8   :  { %v4656_v48 = vpop.xlane.xlu1 %4655  ;;  %v4647_v41 = vpop.xlane.xlu0 %4646 }
0x11e9   :  { %11914 = vrsqrt.f32 %v4682_v1  ;;  %v4674_v5 = vmul.f32 0.03125, %v4656_v48  ;;  %v4671_v19 = vmul.f32 0.03125, %v4647_v41 }
0x11eb   :  { %v11911_v28 = vpop.eup %11910  ;;  %v4684_v58 = vadd.f32 1e-05, %v4674_v5  ;;  %v4681_v30 = vadd.f32 1e-05, %v4671_v19 }
0x11ec   :  { %v4662_v46 = vpop.xlane.xlu1 %4661  ;;  %v4653_v3 = vpop.xlane.xlu0 %4652  ;;  %v4700_v14 = vmul.f32 %v11911_v28, %v13587_v4 }
0x11ed   :  { %11916 = vrsqrt.f32 %v4684_v58  ;;  %v4676_v2 = vmul.f32 0.03125, %v4662_v46  ;;  %v4673_v40 = vmul.f32 0.03125, %v4653_v3 }
0x11ee   :  { %11918 = vrsqrt.f32 %v4681_v30  ;;  %v4716_v24 = vmul.f32 %v8985_v11, %v4700_v14 }
0x11ef   :  { %v11913_v15 = vpop.eup %11912  ;;  %v4686_v26 = vadd.f32 1e-05, %v4676_v2  ;;  %v4683_v37 = vadd.f32 1e-05, %v4673_v40 }
0x11f0   :  { %v4668_v10 = vpop.xlane.xlu1 %4667  ;;  %v4659_v39 = vpop.xlane.xlu0 %4658  ;;  %v4699_v47 = vmul.f32 %v11913_v15, %v13591_v63  ;;  %v13661_v21 = vadd.f32 %v8986_v16, %v4716_v24 }
0x11f1   :  { %11920 = vrsqrt.f32 %v4686_v26  ;;  %v4678_v51 = vmul.f32 0.03125, %v4668_v10  ;;  %v4675_v6 = vmul.f32 0.03125, %v4659_v39 }
0x11f2   :  { %11922 = vrsqrt.f32 %v4683_v37  ;;  %v4715_v4 = vmul.f32 %v8985_v11, %v4699_v47 }
0x11f3   :  { %v11915_v62 = vpop.eup %11914  ;;  %v4688_v7 = vadd.f32 1e-05, %v4678_v51  ;;  %v4685_v53 = vadd.f32 1e-05, %v4675_v6 }
0x11f4   :  { %v4665_v54 = vpop.xlane.xlu0 %4664  ;;  %v13659_v50 = vadd.f32 %v8986_v16, %v4715_v4  ;;  %v4702_v63 = vmul.f32 %v11915_v62, %v13598_v35  ;;  %v9005_v62 = vld [vmem:[%s12367_s7 + $0x68] sm:$0xff] }
0x11f5   :  { %11924 = vrsqrt.f32 %v4688_v7  ;;  %v4677_v43 = vmul.f32 0.03125, %v4665_v54  ;;  %v9007_v54 = vld [vmem:[%s12367_s7 + $0x78] sm:$0xff] }
0x11f6   :  { %11926 = vrsqrt.f32 %v4685_v53  ;;  %10578 = vmatprep.mubr.msk.f32.mxu0 %vm930_vm3, %v13659_v50  ;;  %v4718_v19 = vmul.f32 %v8985_v11, %v4702_v63  ;;  %v9006_v53 = vld [vmem:[%s12367_s7 + $0x70] sm:$0xff]  ;;  %v9009_v63 = vld [vmem:[%s12465_s15 + $0x60] sm:$0xff] }
0x11f7   :  { %v11917_v1 = vpop.eup %11916  ;;  %v4687_v48 = vadd.f32 1e-05, %v4677_v43  ;;  %10579 = vmatmul.mubr.msk.f32.vlgmr.msra.gmra.mrb[94].mxu0 %vm930_vm3, %v13661_v21  ;;  %v11316_v43 = vpack.c.bf16 %v9007_v54, %v9006_v53 }
0x11f8   :  { %v11919_v41 = vpop.eup %11918  ;;  %v4704_v28 = vmul.f32 %v11917_v1, %v13596_v60  ;;  %v13673_v35 = vadd.f32 %v8986_v16, %v4718_v19  ;;  %v9010_v1 = vld [vmem:[%s12465_s15 + $0x68] sm:$0xff] }
0x11f9   :  { %11928 = vrsqrt.f32 %v4687_v48  ;;  %v4701_v5 = vmul.f32 %v11919_v41, %v13607_v42  ;;  %v9091_v48 = vld [vmem:[%s12472_s20 + $0x1] ss:$0 sm:$0xff] }
0x11fa   :  { %v4720_v2 = vmul.f32 %v8985_v11, %v4704_v28 }
0x11fb   :  { %v11921_v58 = vpop.eup %11920  ;;  %v4717_v30 = vmul.f32 %v8985_v11, %v4701_v5 }
0x11fc   :  { %v11923_v46 = vpop.eup %11922  ;;  %v4706_v40 = vmul.f32 %v11921_v58, %v13605_v56  ;;  %v13683_v10 = vadd.f32 %v8986_v16, %v4720_v2 }
0x11fd   :  { %v13670_v3 = vadd.f32 %v8986_v16, %v4717_v30  ;;  %v4703_v14 = vmul.f32 %v11923_v46, %v13613_v17  ;;  %v9011_v30 = vld [vmem:[%s12465_s15 + $0x70] sm:$0xff]  ;;  %v9012_v46 = vld [vmem:[%s12465_s15 + $0x78] sm:$0xff] }
0x11fe   :  { %v4722_v17 = vmul.f32 %v8985_v11, %v4706_v40  ;;  %v11324_v40 = vpack.c.bf16 %v9012_v46, %v9011_v30 }
0x11ff   :  { %v11925_v15 = vpop.eup %11924  ;;  %10581 = vmatprep.mubr.msk.f32.mxu0 %vm930_vm3, %v13670_v3  ;;  %v4719_v42 = vmul.f32 %v8985_v11, %v4703_v14 }
0x1200   :  { %v11927_v26 = vpop.eup %11926  ;;  %10582 = vmatmul.mubr.msk.f32.gmra.mrb[96].mxu0 %vm930_vm3, %v13673_v35  ;;  %v4708_v39 = vmul.f32 %v11925_v15, %v13615_v61 }
0x1201   :  { %v13680_v60 = vadd.f32 %v8986_v16, %v4719_v42  ;;  %v4705_v37 = vmul.f32 %v11927_v26, %v13622_v55  ;;  %v13693_v55 = vadd.f32 %v8986_v16, %v4722_v17  ;;  %v9013_v42 = vld [vmem:[%s12465_s15 + $0x80] sm:$0xff]  ;;  %v9014_v26 = vld [vmem:[%s12465_s15 + $0x88] sm:$0xff] }
0x1202   :  { %v4724_v61 = vmul.f32 %v8985_v11, %v4708_v39 }
0x1203   :  { %v11929_v56 = vpop.eup %11928  ;;  %10584 = vmatprep.mubr.msk.f32.mxu0 %vm930_vm3, %v13680_v60  ;;  %v4721_v47 = vmul.f32 %v8985_v11, %v4705_v37 }
0x1204   :  { %10585 = vmatmul.mubr.msk.f32.gmra.mrb[98].mxu0 %vm930_vm3, %v13683_v10  ;;  %v4707_v24 = vmul.f32 %v11929_v56, %v13630_v0  ;;  %v13703_v0 = vadd.f32 %v8986_v16, %v4724_v61  ;;  %v11328_v56 = vpack.c.bf16 %v9014_v26, %v9013_v42 }
0x1205   :  { %v13691_v51 = vadd.f32 %v8986_v16, %v4721_v47 }
0x1206   :  { %v4723_v6 = vmul.f32 %v8985_v11, %v4707_v24  ;;  %v9004_v11 = vld [vmem:[%s12367_s7 + $0x60] sm:$0xff]  ;;  %s12176_s7 = smov 33  }
0x1207   :  { %10587 = vmatprep.mubr.msk.f32.mxu0 %vm930_vm3, %v13691_v51  ;;  %v11312_v7 = vpack.c.bf16 %v9005_v62, %v9004_v11 }
0x1208   :  { %10588 = vmatmul.mubr.msk.f32.gmra.mrb[100].mxu0 %vm930_vm3, %v13693_v55  ;;  %v13699_v4 = vadd.f32 %v8986_v16, %v4723_v6  ;;  %v11320_v16 = vpack.c.bf16 %v9010_v1, %v9009_v63 }
0x1209   :  { %11313 = vmatprep.subr.bf16.mxu1 %v11312_v7 }
0x120a   :  { %10590 = vmatprep.mubr.msk.f32.mxu0 %vm930_vm3, %v13699_v4  ;;  %11315 = vmatpush3.bf16.msra.mxu1 %v11312_v7 }
0x120b   :  { %11317 = vmatprep.subr.bf16.mxu1 %v11316_v43 }
0x120c   :  { %10591 = vmatmul.mubr.msk.f32.gmra.mrb[102].mxu0 %vm930_vm3, %v13703_v0 }
0x120e   :  { %11319 = vmatpush3.bf16.msra.mxu1 %v11316_v43 }
0x120f   :  { %11321 = vmatprep.subr.bf16.mxu1 %v11320_v16 }
0x12ca   :  { %v10580_v41 = vpop.f32.mrb[94].mxu0 }
0x12cb   :  { %v11542_v5 = vadd.f32 %v10580_v41, %v9091_v48  ;;  %v5211_v19 = vpop.f32.mrb[95].mxu0 }
0x12cc   :  { %v11543_v28 = vadd.f32 %v9091_v48, %v5211_v19 }
0x12cd   :  { %v5281_v58 = vmul.f32 0.2, %v11542_v5  ;;  %vm5271_vm14 = vcmp.gt.f32.partialorder %v11542_v5, 0.0 }
0x12ce   :  { %vm5270_vm13 = vcmp.gt.f32.partialorder %v11543_v28, 0.0  ;;  %v5280_v14 = vmul.f32 0.2, %v11543_v28 }
0x12cf   :  { %v5291_v15 = vsel %vm5271_vm14, %v11542_v5, %v5281_v58 }
0x12d0   :  { %v5290_v2 = vsel %vm5270_vm13, %v11543_v28, %v5280_v14 }
0x12d1   :  { %10609 = vmatprep.mubr.msk.f32.mxu1 %vm1438_vm6, %v5290_v2 }
0x12d2   :  { %10610 = vmatmul.mubr.msk.f32.vlgmr.msra.gmra.mrb[74].mxu1 %vm1438_vm6, %v5291_v15 }
0x12d3   :  { %v10583_v37 = vpop.f32.mrb[96].mxu0  ;;  %11323 = vmatpush3.bf16.msra.mxu1 %v11320_v16 }
0x12d4   :  { %v11544_v17 = vadd.f32 %v10583_v37, %v9091_v48  ;;  %v5221_v39 = vpop.f32.mrb[97].mxu0  ;;  %11325 = vmatprep.subr.bf16.mxu1 %v11324_v40 }
0x12d5   :  { %v11545_v47 = vadd.f32 %v9091_v48, %v5221_v39 }
0x12d6   :  { %v5283_v24 = vmul.f32 0.2, %v11544_v17  ;;  %vm5273_vm12 = vcmp.gt.f32.partialorder %v11544_v17, 0.0 }
0x12d7   :  { %vm5272_vm10 = vcmp.gt.f32.partialorder %v11545_v47, 0.0  ;;  %v5282_v6 = vmul.f32 0.2, %v11545_v47  ;;  %v10586_v61 = vpop.f32.mrb[98].mxu0  ;;  %11327 = vmatpush3.bf16.msra.mxu1 %v11324_v40 }
0x12d8   :  { %v11546_v11 = vadd.f32 %v10586_v61, %v9091_v48  ;;  %v5231_v62 = vpop.f32.mrb[99].mxu0  ;;  %11329 = vmatprep.subr.bf16.mxu1 %v11328_v56  ;;  %v5293_v43 = vsel %vm5273_vm12, %v11544_v17, %v5283_v24  ;;  %v9016_v24 = vld [vmem:[%s12465_s15 + $0x98] sm:$0xff]  ;;  %v9018_v61 = vld [vmem:[%s12465_s15 + $0xa8] sm:$0xff] }
0x12d9   :  { %v11547_v7 = vadd.f32 %v9091_v48, %v5231_v62  ;;  %v5292_v53 = vsel %vm5272_vm10, %v11545_v47, %v5282_v6  ;;  %v9015_v47 = vld [vmem:[%s12465_s15 + $0x90] sm:$0xff]  ;;  %v9017_v6 = vld [vmem:[%s12465_s15 + $0xa0] sm:$0xff] }
0x12da   :  { %v5285_v54 = vmul.f32 0.2, %v11546_v11  ;;  %10612 = vmatprep.mubr.msk.f32.mxu1 %vm1438_vm6, %v5292_v53  ;;  %vm5275_vm13 = vcmp.gt.f32.partialorder %v11546_v11, 0.0 }
0x12db   :  { %vm5274_vm14 = vcmp.gt.f32.partialorder %v11547_v7, 0.0  ;;  %v5284_v63 = vmul.f32 0.2, %v11547_v7  ;;  %v10589_v1 = vpop.f32.mrb[100].mxu0  ;;  %10613 = vmatmul.mubr.msk.f32.gmra.mrb[76].mxu1 %vm1438_vm6, %v5293_v43 }
0x12dc   :  { %v11548_v16 = vadd.f32 %v10589_v1, %v9091_v48  ;;  %v5241_v41 = vpop.f32.mrb[101].mxu0  ;;  %v5295_v58 = vsel %vm5275_vm13, %v11546_v11, %v5285_v54  ;;  %v11336_v11 = vpack.c.bf16 %v9018_v61, %v9017_v6 }
0x12dd   :  { %v11549_v5 = vadd.f32 %v9091_v48, %v5241_v41  ;;  %v5294_v19 = vsel %vm5274_vm14, %v11547_v7, %v5284_v63  ;;  %v14733_v7 = vmov 0  }
0x12de   :  { %v5287_v28 = vmul.f32 0.2, %v11548_v16  ;;  %10615 = vmatprep.mubr.msk.f32.mxu1 %vm1438_vm6, %v5294_v19  ;;  %vm5277_vm11 = vcmp.gt.f32.partialorder %v11548_v16, 0.0 }
0x12df   :  { %vm5276_vm10 = vcmp.gt.f32.partialorder %v11549_v5, 0.0  ;;  %v5286_v30 = vmul.f32 0.2, %v11549_v5  ;;  %v10592_v46 = vpop.f32.mrb[102].mxu0  ;;  %10616 = vmatmul.mubr.msk.f32.gmra.mrb[78].mxu1 %vm1438_vm6, %v5295_v58  ;;  %v9133_v58 = vld [vmem:[%s12629_s5 + $0x1] ss:$0 sm:$0xff] }
0x12e0   :  { %v11550_v14 = vadd.f32 %v10592_v46, %v9091_v48  ;;  %v5251_v2 = vpop.f32.mrb[103].mxu0  ;;  %v5297_v26 = vsel %vm5277_vm11, %v11548_v16, %v5287_v28 }
0x12e1   :  { %v11551_v40 = vadd.f32 %v9091_v48, %v5251_v2  ;;  %v5296_v15 = vsel %vm5276_vm10, %v11549_v5, %v5286_v30  ;;  %v11332_v48 = vpack.c.bf16 %v9016_v24, %v9015_v47 }
0x12e2   :  { %v5289_v42 = vmul.f32 0.2, %v11550_v14  ;;  %10618 = vmatprep.mubr.msk.f32.mxu1 %vm1438_vm6, %v5296_v15  ;;  %vm5279_vm12 = vcmp.gt.f32.partialorder %v11550_v14, 0.0 }
0x12e3   :  { %vm5278_vm13 = vcmp.gt.f32.partialorder %v11551_v40, 0.0  ;;  %v5288_v37 = vmul.f32 0.2, %v11551_v40  ;;  %10619 = vmatmul.mubr.msk.f32.gmra.mrb[80].mxu1 %vm1438_vm6, %v5297_v26 }
0x12e4   :  { %v5299_v39 = vsel %vm5279_vm12, %v11550_v14, %v5289_v42 }
0x12e5   :  { %v5298_v17 = vsel %vm5278_vm13, %v11551_v40, %v5288_v37 }
0x12e6   :  { %10621 = vmatprep.mubr.msk.f32.mxu1 %vm1438_vm6, %v5298_v17 }
0x12e7   :  { %10622 = vmatmul.mubr.msk.f32.gmra.mrb[82].mxu1 %vm1438_vm6, %v5299_v39 }
0x12e8   :  { %10632 = vmatprep.mubr.msk.f32.mxu1 %vm930_vm3, %v13219_v52  ;;  %v9020_v52 = vld [vmem:[%s12465_s15 + $0xb8] sm:$0xff] }
0x12eb   :  { %10633 = vmatmul.mubr.msk.f32.vlgmr.msra.gmra.mrb[84].mxu1 %vm930_vm3, %v13215_v20  ;;  %v9019_v20 = vld [vmem:[%s12465_s15 + $0xb0] sm:$0xff] }
0x12ec   :  { %10635 = vmatprep.mubr.msk.f32.mxu1 %vm930_vm3, %v13233_v29  ;;  %11331 = vmatpush3.bf16.msra.mxu1 %v11328_v56 }
0x12ed   :  { %11333 = vmatprep.subr.bf16.mxu1 %v11332_v48 }
0x12ef   :  { %10636 = vmatmul.mubr.msk.f32.gmra.mrb[86].mxu1 %vm930_vm3, %v13229_v13  ;;  %v11340_v13 = vpack.c.bf16 %v9020_v52, %v9019_v20 }
0x12f0   :  { %10638 = vmatprep.mubr.msk.f32.mxu1 %vm930_vm3, %v13245_v18  ;;  %11335 = vmatpush3.bf16.msra.mxu1 %v11332_v48  ;;  %v9112_v18 = vld [vmem:[%s12571_s30 + $0x1] ss:$0 sm:$0xff] }
0x12f1   :  { %11337 = vmatprep.subr.bf16.mxu1 %v11336_v11 }
0x12f3   :  { %10639 = vmatmul.mubr.msk.f32.gmra.mrb[88].mxu1 %vm930_vm3, %v13241_v27  ;;  %v9025_v27 = vld [vmem:[%s12562_s26 + $0x38] sm:$0xff] }
0x12f4   :  { %10641 = vmatprep.mubr.msk.f32.mxu1 %vm930_vm3, %v13257_v25 }
0x12f7   :  { %10642 = vmatmul.mubr.msk.f32.gmra.mrb[90].mxu1 %vm930_vm3, %v13253_v12 }
0x12f8   :  { %10644 = vmatprep.mubr.msk.f32.mxu1 %vm930_vm3, %v13269_v33 }
0x12fb   :  { %10645 = vmatmul.mubr.msk.f32.gmra.mrb[92].mxu1 %vm930_vm3, %v13265_v22 }
0x12fc   :  { %10655 = vmatprep.mubr.msk.f32.mxu1 %vm930_vm3, %v13221_v57  ;;  %v9022_v57 = vld [vmem:[%s12562_s26 + $0x20] sm:$0xff] }
0x12ff   :  { %10656 = vmatmul.mubr.msk.f32.vlgmr.msra.gmra.mrb[84].mxu1 %vm930_vm3, %v13217_v59  ;;  %v13795_v59 = vld [vmem:[%s12260_s3] sm:$0xff] }
0x1300   :  { %10658 = vmatprep.mubr.msk.f32.mxu1 %vm930_vm3, %v13235_v38  ;;  %11339 = vmatpush3.bf16.msra.mxu1 %v11336_v11  ;;  %v9024_v38 = vld [vmem:[%s12562_s26 + $0x30] sm:$0xff] }
0x1301   :  { %11341 = vmatprep.subr.bf16.mxu1 %v11340_v13 }
0x1303   :  { %10659 = vmatmul.mubr.msk.f32.gmra.mrb[86].mxu1 %vm930_vm3, %v13231_v31  ;;  %v9023_v31 = vld [vmem:[%s12562_s26 + $0x28] sm:$0xff]  ;;  %s8742_s26 = sld [smem:[%s14689_s0 + %s12176_s7]]  }
0x1304   :  { %10661 = vmatprep.mubr.msk.f32.mxu1 %vm930_vm3, %v13247_v34  ;;  %11343 = vmatpush3.bf16.msra.mxu1 %v11340_v13  ;;  %v11344_v29 = vpack.c.bf16 %v9023_v31, %v9022_v57 }
0x1306   :  { %11345 = vmatprep.subr.bf16.mxu0 %v11344_v29 }
0x1307   :  { %10662 = vmatmul.mubr.msk.f32.gmra.mrb[88].mxu1 %vm930_vm3, %v13243_v32  ;;  %11347 = vmatpush3.bf16.msra.mxu0 %v11344_v29  ;;  %v11348_v32 = vpack.c.bf16 %v9025_v27, %v9024_v38 }
0x1308   :  { %10664 = vmatprep.mubr.msk.f32.mxu1 %vm930_vm3, %v13259_v9  ;;  %v14732_v9 = vmov 1  }
0x1309   :  { %11349 = vmatprep.subr.bf16.mxu0 %v11348_v32 }
0x130b   :  { %10665 = vmatmul.mubr.msk.f32.gmra.mrb[90].mxu1 %vm930_vm3, %v13255_v36  ;;  %11351 = vmatpush3.bf16.msra.mxu0 %v11348_v32 }
0x130c   :  { %10667 = vmatprep.mubr.msk.f32.mxu1 %vm930_vm3, %v13271_v23 }
0x130f   :  { %10668 = vmatmul.mubr.msk.f32.gmra.mrb[92].mxu1 %vm930_vm3, %v13267_v8 }
0x1310   :  { %10678 = vmatprep.mubr.msk.f32.mxu1 %vm930_vm3, %v13659_v50 }
0x1313   :  { %10679 = vmatmul.mubr.msk.f32.vlgmr.msra.gmra.mrb[84].mxu1 %vm930_vm3, %v13661_v21 }
0x1314   :  { %10681 = vmatprep.mubr.msk.f32.mxu1 %vm930_vm3, %v13670_v3 }
0x1317   :  { %10682 = vmatmul.mubr.msk.f32.gmra.mrb[86].mxu1 %vm930_vm3, %v13673_v35 }
0x1318   :  { %10684 = vmatprep.mubr.msk.f32.mxu1 %vm930_vm3, %v13680_v60 }
0x131b   :  { %10685 = vmatmul.mubr.msk.f32.gmra.mrb[88].mxu1 %vm930_vm3, %v13683_v10 }
0x131c   :  { %10687 = vmatprep.mubr.msk.f32.mxu1 %vm930_vm3, %v13691_v51 }
0x131f   :  { %10688 = vmatmul.mubr.msk.f32.gmra.mrb[90].mxu1 %vm930_vm3, %v13693_v55 }
0x1320   :  { %10690 = vmatprep.mubr.msk.f32.mxu1 %vm930_vm3, %v13699_v4 }
0x1323   :  { %10691 = vmatmul.mubr.msk.f32.gmra.mrb[92].mxu1 %vm930_vm3, %v13703_v0 }
0x1324   :  { %10741 = vmatprep.mubr.msk.f32.mxu1 %vm639_vm1, %v13795_v59 }
0x13a5   :  { %v10611_v34 = vpop.f32.mrb[74].mxu1 }
0x13a6   :  { %v13804_v12 = vadd.f32 %v10611_v34, %v9112_v18  ;;  %v5402_v36 = vpop.f32.mrb[75].mxu1 }
0x13a7   :  { %v13806_v25 = vadd.f32 %v9112_v18, %v5402_v36 }
0x13a8   :  { %6321 = vperm.xlu1 %11742, %v13804_v12  }
0x13a9   :  { %6316 = vperm.xlu0 %11744, %v13806_v25  }
0x13ac   :  { %11743 = vset.pattern.permute.xlu1 %v14732_v9 }
0x13ad   :  { %6404 = vperm.xlu1 %11743, %v13804_v12  }
0x13ae   :  { %v10614_v22 = vpop.f32.mrb[76].mxu1 }
0x13af   :  { %v13812_v8 = vadd.f32 %v10614_v22, %v9112_v18  ;;  %v5412_v33 = vpop.f32.mrb[77].mxu1 }
0x13b0   :  { %v13816_v62 = vadd.f32 %v9112_v18, %v5412_v33 }
0x13b1   :  { %6331 = vperm.xlu0 %11744, %v13812_v8   ;;  %6400 = vperm.xlu1 %11743, %v13806_v25  }
0x13b2   :  { %v10617_v23 = vpop.f32.mrb[78].mxu1 }
0x13b3   :  { %v5422_v56 = vpop.f32.mrb[79].mxu1  ;;  %v13830_v41 = vadd.f32 %v10617_v23, %v9112_v18 }
0x13b4   :  { %v13841_v19 = vadd.f32 %v9112_v18, %v5422_v56 }
0x13b5   :  { %11745 = vset.pattern.permute.xlu0 %v14732_v9  ;;  %11746 = vset.pattern.permute.xlu1 %v14733_v7 }
0x13b6   :  { %6412 = vperm.xlu0 %11745, %v13812_v8   ;;  %v10620_v53 = vpop.f32.mrb[80].mxu1  ;;  %6326 = vperm.xlu1 %11746, %v13816_v62  }
0x13b7   :  { %v5432_v54 = vpop.f32.mrb[81].mxu1  ;;  %v13822_v43 = vadd.f32 %v10620_v53, %v9112_v18 }
0x13b8   :  { %v13848_v28 = vadd.f32 %v9112_v18, %v5432_v54 }
0x13ba   :  { %11752 = vset.pattern.permute.xlu0 %v14733_v7  ;;  %v10623_v63 = vpop.f32.mrb[82].mxu1  ;;  %11747 = vset.pattern.permute.xlu1 %v14732_v9 }
0x13bb   :  { %6351 = vperm.xlu0 %11752, %v13822_v43   ;;  %v5442_v1 = vpop.f32.mrb[83].mxu1  ;;  %6408 = vperm.xlu1 %11747, %v13816_v62   ;;  %v13828_v16 = vadd.f32 %v10623_v63, %v9112_v18 }
0x13bc   :  { %v13835_v5 = vadd.f32 %v9112_v18, %v5442_v1 }
0x13bf   :  { %6361 = vperm.xlu0 %11752, %v13828_v16   ;;  %11748 = vset.pattern.permute.xlu1 %v14733_v7 }
0x13c0   :  { %6341 = vperm.xlu1 %11748, %v13830_v41  }
0x13c3   :  { %11756 = vset.pattern.permute.xlu0 %v14732_v9 }
0x13c4   :  { %6432 = vperm.xlu0 %11756, %v13835_v5   ;;  %11749 = vset.pattern.permute.xlu1 %v14732_v9 }
0x13c5   :  { %6420 = vperm.xlu1 %11749, %v13830_v41  }
0x13c9   :  { %11750 = vset.pattern.permute.xlu1 %v14733_v7 }
0x13ca   :  { %6336 = vperm.xlu1 %11750, %v13841_v19  }
0x13ce   :  { %11751 = vset.pattern.permute.xlu1 %v14732_v9 }
0x13cf   :  { %6416 = vperm.xlu1 %11751, %v13841_v19  }
0x13d3   :  { %6428 = vperm.xlu1 %11751, %v13822_v43  }
0x13d7   :  { %11753 = vset.pattern.permute.xlu1 %v14733_v7 }
0x13d8   :  { %6346 = vperm.xlu1 %11753, %v13848_v28  }
0x13dc   :  { %11754 = vset.pattern.permute.xlu1 %v14732_v9 }
0x13dd   :  { %6424 = vperm.xlu1 %11754, %v13848_v28  }
0x13e1   :  { %11755 = vset.pattern.permute.xlu1 %v14733_v7 }
0x13e2   :  { %6356 = vperm.xlu1 %11755, %v13835_v5  }
0x13e6   :  { %v10680_v30 = vpop.f32.mrb[84].mxu1  ;;  %11757 = vset.pattern.permute.xlu1 %v14732_v9 }
0x13e7   :  { %v13858_v46 = vadd.f32 %v10680_v30, %v9133_v58  ;;  %v5773_v14 = vpop.f32.mrb[85].mxu1  ;;  %6436 = vperm.xlu1 %11757, %v13828_v16  }
0x13e8   :  { %v13861_v2 = vadd.f32 %v9133_v58, %v5773_v14 }
0x13e9   :  { %v5843_v40 = vmul.f32 0.044715, %v13858_v46 }
0x13ea   :  { %v5842_v15 = vmul.f32 0.044715, %v13861_v2  ;;  %v10683_v42 = vpop.f32.mrb[86].mxu1 }
0x13eb   :  { %v5853_v26 = vmul.f32 %v13858_v46, %v5843_v40  ;;  %v13866_v37 = vadd.f32 %v10683_v42, %v9133_v58  ;;  %v5783_v17 = vpop.f32.mrb[87].mxu1 }
0x13ec   :  { %v5852_v39 = vmul.f32 %v13861_v2, %v5842_v15  ;;  %v13869_v47 = vadd.f32 %v9133_v58, %v5783_v17 }
0x13ed   :  { %v5863_v24 = vmul.f32 %v13858_v46, %v5853_v26  ;;  %v5845_v48 = vmul.f32 0.044715, %v13866_v37 }
0x13ee   :  { %v5862_v6 = vmul.f32 %v13861_v2, %v5852_v39  ;;  %v5844_v61 = vmul.f32 0.044715, %v13869_v47  ;;  %v10686_v11 = vpop.f32.mrb[88].mxu1 }
0x13ef   :  { %v5873_v20 = vadd.f32 %v13858_v46, %v5863_v24  ;;  %v5855_v52 = vmul.f32 %v13866_v37, %v5845_v48  ;;  %v13877_v13 = vadd.f32 %v10686_v11, %v9133_v58  ;;  %v5793_v57 = vpop.f32.mrb[89].mxu1 }
0x13f0   :  { %v5872_v31 = vadd.f32 %v13861_v2, %v5862_v6  ;;  %v5854_v29 = vmul.f32 %v13869_v47, %v5844_v61  ;;  %v13881_v38 = vadd.f32 %v9133_v58, %v5793_v57 }
0x13f1   :  { %v5883_v27 = vmul.f32 0.7978846, %v5873_v20  ;;  %v5865_v32 = vmul.f32 %v13866_v37, %v5855_v52  ;;  %v5847_v18 = vmul.f32 0.044715, %v13877_v13 }
0x13f2   :  { %v5864_v34 = vmul.f32 %v13869_v47, %v5854_v29  ;;  %v5846_v36 = vmul.f32 0.044715, %v13881_v38  ;;  %v10689_v9 = vpop.f32.mrb[90].mxu1  ;;  %v5882_v22 = vmul.f32 0.7978846, %v5872_v31 }
0x13f3   :  { %11930 = vtanh.f32 %v5883_v27  ;;  %v5875_v33 = vadd.f32 %v13866_v37, %v5865_v32  ;;  %v5857_v23 = vmul.f32 %v13877_v13, %v5847_v18  ;;  %v13889_v56 = vadd.f32 %v10689_v9, %v9133_v58  ;;  %v5803_v7 = vpop.f32.mrb[91].mxu1 }
0x13f4   :  { %v5874_v53 = vadd.f32 %v13869_v47, %v5864_v34  ;;  %v5856_v54 = vmul.f32 %v13881_v38, %v5846_v36  ;;  %v13893_v63 = vadd.f32 %v9133_v58, %v5803_v7  ;;  %11932 = vtanh.f32 %v5882_v22 }
0x13f5   :  { %v5867_v1 = vmul.f32 %v13877_v13, %v5857_v23  ;;  %v5849_v30 = vmul.f32 0.044715, %v13889_v56  ;;  %v5885_v14 = vmul.f32 0.7978846, %v5875_v33 }
0x13f6   :  { %v5866_v40 = vmul.f32 %v13881_v38, %v5856_v54  ;;  %v5848_v15 = vmul.f32 0.044715, %v13893_v63  ;;  %v10692_v42 = vpop.f32.mrb[92].mxu1  ;;  %v5884_v26 = vmul.f32 0.7978846, %v5874_v53 }
0x13f7   :  { %v5877_v17 = vadd.f32 %v13877_v13, %v5867_v1  ;;  %v5859_v39 = vmul.f32 %v13889_v56, %v5849_v30  ;;  %v13901_v24 = vadd.f32 %v10692_v42, %v9133_v58  ;;  %v5813_v48 = vpop.f32.mrb[93].mxu1  ;;  %11934 = vtanh.f32 %v5885_v14 }
0x13f8   :  { %v5876_v6 = vadd.f32 %v13881_v38, %v5866_v40  ;;  %v5858_v61 = vmul.f32 %v13893_v63, %v5848_v15  ;;  %v13905_v11 = vadd.f32 %v9133_v58, %v5813_v48  ;;  %11936 = vtanh.f32 %v5884_v26 }
0x13f9   :  { %v5869_v20 = vmul.f32 %v13889_v56, %v5859_v39  ;;  %v5851_v52 = vmul.f32 0.044715, %v13901_v24  ;;  %v5887_v57 = vmul.f32 0.7978846, %v5877_v17  ;;  %v5832_v1 = vmul.f32 0.5, %v13861_v2 }
0x13fa   :  { %v5868_v31 = vmul.f32 %v13893_v63, %v5858_v61  ;;  %v5850_v29 = vmul.f32 0.044715, %v13905_v11  ;;  %v5886_v27 = vmul.f32 0.7978846, %v5876_v6  ;;  %v5833_v14 = vmul.f32 0.5, %v13858_v46 }
0x13fb   :  { %v5879_v32 = vadd.f32 %v13889_v56, %v5869_v20  ;;  %v5861_v18 = vmul.f32 %v13901_v24, %v5851_v52  ;;  %11938 = vtanh.f32 %v5887_v57  ;;  %v5834_v61 = vmul.f32 0.5, %v13869_v47 }
0x13fc   :  { %v5878_v34 = vadd.f32 %v13893_v63, %v5868_v31  ;;  %v5860_v58 = vmul.f32 %v13905_v11, %v5850_v29  ;;  %11940 = vtanh.f32 %v5886_v27  ;;  %v5835_v46 = vmul.f32 0.5, %v13866_v37 }
0x13fd   :  { %v11931_v36 = vpop.eup %11930  ;;  %v5871_v9 = vmul.f32 %v13901_v24, %v5861_v18  ;;  %v5889_v22 = vmul.f32 0.7978846, %v5879_v32  ;;  %v5836_v27 = vmul.f32 0.5, %v13881_v38  ;;  %v5837_v47 = vmul.f32 0.5, %v13877_v13 }
0x13fe   :  { %v11933_v33 = vpop.eup %11932  ;;  %v5903_v23 = vadd.f32 1.0, %v11931_v36  ;;  %v5870_v7 = vmul.f32 %v13905_v11, %v5860_v58  ;;  %v5888_v53 = vmul.f32 0.7978846, %v5878_v34  ;;  %v5840_v13 = vmul.f32 0.5, %v13905_v11 }
0x13ff   :  { %v5881_v54 = vadd.f32 %v13901_v24, %v5871_v9  ;;  %v5902_v30 = vadd.f32 1.0, %v11933_v33  ;;  %11942 = vtanh.f32 %v5889_v22  ;;  %v5838_v9 = vmul.f32 0.5, %v13893_v63 }
0x1400   :  { %v5880_v40 = vadd.f32 %v13905_v11, %v5870_v7  ;;  %11944 = vtanh.f32 %v5888_v53  ;;  %v5913_v39 = vmul.f32 %v5903_v23, %v5833_v14  ;;  %v5839_v33 = vmul.f32 0.5, %v13889_v56 }
0x1401   :  { %v11935_v15 = vpop.eup %11934  ;;  %v5912_v42 = vmul.f32 %v5902_v30, %v5832_v1  ;;  %v5891_v26 = vmul.f32 0.7978846, %v5881_v54  ;;  %v5841_v30 = vmul.f32 0.5, %v13901_v24 }
0x1402   :  { %v11937_v17 = vpop.eup %11936  ;;  %v5905_v48 = vadd.f32 1.0, %v11935_v15  ;;  %v5890_v6 = vmul.f32 0.7978846, %v5880_v40 }
0x1403   :  { %10701 = vmatprep.mubr.msk.f32.mxu0 %vm930_vm3, %v5912_v42  ;;  %v5904_v20 = vadd.f32 1.0, %v11937_v17  ;;  %11946 = vtanh.f32 %v5891_v26 }
0x1404   :  { %10702 = vmatmul.mubr.msk.f32.vlgmr.msra.gmra.mrb[104].mxu0 %vm930_vm3, %v5913_v39  ;;  %11948 = vtanh.f32 %v5890_v6  ;;  %v5915_v31 = vmul.f32 %v5905_v48, %v5835_v46 }
0x1405   :  { %v11939_v2 = vpop.eup %11938  ;;  %v5914_v52 = vmul.f32 %v5904_v20, %v5834_v61 }
0x1406   :  { %v11941_v57 = vpop.eup %11940  ;;  %v5907_v29 = vadd.f32 1.0, %v11939_v2 }
0x1407   :  { %10704 = vmatprep.mubr.msk.f32.mxu0 %vm930_vm3, %v5914_v52  ;;  %v5906_v32 = vadd.f32 1.0, %v11941_v57 }
0x1408   :  { %10705 = vmatmul.mubr.msk.f32.gmra.mrb[106].mxu0 %vm930_vm3, %v5915_v31  ;;  %v5917_v36 = vmul.f32 %v5907_v29, %v5837_v47 }
0x1409   :  { %v11943_v18 = vpop.eup %11942  ;;  %v5916_v34 = vmul.f32 %v5906_v32, %v5836_v27 }
0x140a   :  { %v11945_v58 = vpop.eup %11944  ;;  %v5909_v37 = vadd.f32 1.0, %v11943_v18 }
0x140b   :  { %10707 = vmatprep.mubr.msk.f32.mxu0 %vm930_vm3, %v5916_v34  ;;  %v5908_v22 = vadd.f32 1.0, %v11945_v58 }
0x140c   :  { %10708 = vmatmul.mubr.msk.f32.gmra.mrb[108].mxu0 %vm930_vm3, %v5917_v36  ;;  %v5919_v53 = vmul.f32 %v5909_v37, %v5839_v33 }
0x140d   :  { %v11947_v38 = vpop.eup %11946  ;;  %v5918_v23 = vmul.f32 %v5908_v22, %v5838_v9 }
0x140e   :  { %v11949_v7 = vpop.eup %11948  ;;  %v5911_v54 = vadd.f32 1.0, %v11947_v38 }
0x140f   :  { %10710 = vmatprep.mubr.msk.f32.mxu0 %vm930_vm3, %v5918_v23  ;;  %v5910_v1 = vadd.f32 1.0, %v11949_v7 }
0x1410   :  { %10711 = vmatmul.mubr.msk.f32.gmra.mrb[110].mxu0 %vm930_vm3, %v5919_v53  ;;  %v5921_v14 = vmul.f32 %v5911_v54, %v5841_v30 }
0x1411   :  { %v5920_v63 = vmul.f32 %v5910_v1, %v5840_v13 }
0x1413   :  { %10713 = vmatprep.mubr.msk.f32.mxu0 %vm930_vm3, %v5920_v63 }
0x1414   :  { %10714 = vmatmul.mubr.msk.f32.gmra.mrb[112].mxu0 %vm930_vm3, %v5921_v14 }
0x1427   :  { %v6322_v56 = vpop.permute.xlu1 %6321 }
0x1428   :  { %v6317_v48 = vpop.permute.xlu0 %6316  ;;  %v6365_v57 = vsel %vm2448_vm0, %v6322_v56, -1e+30 }
0x1429   :  { %v6364_v31 = vsel %vm2447_vm4, %v6317_v48, -1e+30  ;;  %v6375_v7 = vsel %vm639_vm1, %v6365_v57, -inf }
0x142a   :  { %v6374_v44 = vsel %vm639_vm1, %v6364_v31, -inf }
0x142c   :  { %v6405_v40 = vpop.permute.xlu1 %6404 }
0x142d   :  { %v6440_v53 = vsel %vm2448_vm0, %v6405_v40, -1e+30 }
0x1430   :  { %v6401_v15 = vpop.permute.xlu1 %6400  ;;  %v6332_v6 = vpop.permute.xlu0 %6331 }
0x1431   :  { %v6367_v27 = vsel %vm2450_vm7, %v6332_v6, -1e+30  ;;  %v6439_v32 = vsel %vm2447_vm4, %v6401_v15, -1e+30  ;;  %v14739_v15 = vld [vmem:[#allocation8_spill] sm:$0xff]  ;;  %vm14745_vm4 = vcmask 1040384  }
0x1432   :  { %v6377_v54 = vsel %vm639_vm1, %v6367_v27, -inf  ;;  %v6449_v13 = vsel %vm639_vm1, %v6439_v32, -inf  ;;  %vm14740_vm6 = vcmp.gt.f32.partialorder %v14739_v15, 0.5 }
0x1435   :  { %v6327_v42 = vpop.permute.xlu1 %6326  ;;  %v6413_v20 = vpop.permute.xlu0 %6412 }
0x1436   :  { %v6366_v22 = vsel %vm2449_vm8, %v6327_v42, -1e+30  ;;  %v6442_v58 = vsel %vm2450_vm7, %v6413_v20, -1e+30 }
0x1437   :  { %v6376_v14 = vsel %vm639_vm1, %v6366_v22, -inf  ;;  %v6452_v20 = vsel %vm639_vm1, %v6442_v58, -inf  ;;  %v14022_v58 = vld [vmem:[%s12260_s3 + $0x20] sm:$0xff] }
0x143a   :  { %v6409_v26 = vpop.permute.xlu1 %6408  ;;  %v6352_v24 = vpop.permute.xlu0 %6351 }
0x143b   :  { %v6371_v38 = vsel %vm2454_vm9, %v6352_v24, -1e+30  ;;  %v6441_v40 = vsel %vm2449_vm8, %v6409_v26, -1e+30 }
0x143c   :  { %v6384_v56 = vsel %vm639_vm1, %v6371_v38, -inf  ;;  %v6451_v9 = vsel %vm639_vm1, %v6441_v40, -inf }
0x143d   :  { %v6385_v31 = vmax.f32 %v6377_v54, %v6384_v56  ;;  %v9028_v56 = vld [vmem:[%s12799_s10 + $0x28] sm:$0xff] }
0x143e   :  { %v6362_v47 = vpop.permute.xlu0 %6361 }
0x143f   :  { %v6342_v17 = vpop.permute.xlu1 %6341  ;;  %v6373_v42 = vsel %vm14740_vm6, %v6362_v47, -1e+30 }
0x1440   :  { %v6369_v52 = vsel %vm2452_vm15, %v6342_v17, -1e+30  ;;  %v6388_v27 = vsel %vm639_vm1, %v6373_v42, -inf }
0x1441   :  { %v6380_v23 = vsel %vm639_vm1, %v6369_v52, -inf  ;;  %v14741_v52 = vld [vmem:[#allocation7_spill] sm:$0xff] }
0x1442   :  { %v6381_v45 = vmax.f32 %v6375_v7, %v6380_v23  ;;  %vm14742_vm0 = vcmp.gt.f32.partialorder %v14741_v52, 0.5 }
0x1443   :  { %v6433_v6 = vpop.permute.xlu0 %6432 }
0x1444   :  { %v6421_v39 = vpop.permute.xlu1 %6420 }
0x1445   :  { %v6444_v17 = vsel %vm2452_vm15, %v6421_v39, -1e+30  ;;  %v6389_v39 = vmax.f32 %v6381_v45, %v6388_v27  ;;  %vm14743_vm15 = vmmov %vm14742_vm0 }
0x1446   :  { %v6455_v32 = vsel %vm639_vm1, %v6444_v17, -inf }
0x1449   :  { %v6337_v11 = vpop.permute.xlu1 %6336 }
0x144a   :  { %v6368_v34 = vsel %vm2451_vm2, %v6337_v11, -1e+30 }
0x144b   :  { %v6378_v1 = vsel %vm639_vm1, %v6368_v34, -inf  ;;  %v6450_v34 = vsel %vm639_vm1, %v6440_v53, -inf }
0x144c   :  { %v6456_v23 = vmax.f32 %v6450_v34, %v6455_v32  ;;  %v14017_v34 = vld [vmem:[%s12260_s3 + $0x18] sm:$0xff] }
0x144e   :  { %v6417_v61 = vpop.permute.xlu1 %6416 }
0x144f   :  { %v6443_v30 = vsel %vm2451_vm2, %v6417_v61, -1e+30  ;;  %v6379_v61 = vmax.f32 %v6374_v44, %v6378_v1  ;;  %vm14744_vm2 = vmmov %vm14740_vm6 }
0x1450   :  { %v6453_v24 = vsel %vm639_vm1, %v6443_v30, -inf }
0x1452   :  { %v6429_v46 = vpop.permute.xlu1 %6428 }
0x1453   :  { %v6446_v26 = vsel %vm2454_vm9, %v6429_v46, -1e+30  ;;  %vm14751_vm9 = vcmask 15360  }
0x1454   :  { %v6459_v46 = vsel %vm639_vm1, %v6446_v26, -inf  ;;  %vm14752_vm11 = vmmov %vm14751_vm9 }
0x1455   :  { %v6460_v1 = vmax.f32 %v6452_v20, %v6459_v46  ;;  %v14042_v46 = vld [vmem:[%s12260_s3 + $0x40] sm:$0xff]  ;;  %vm14753_vm14 = vmmov %vm14751_vm9 }
0x1456   :  { %vm14754_vm10 = vmmov %vm14751_vm9 }
0x1457   :  { %v6347_v2 = vpop.permute.xlu1 %6346  ;;  %vm14755_vm12 = vmmov %vm14751_vm9 }
0x1458   :  { %v6370_v36 = vsel %vm2453_vm5, %v6347_v2, -1e+30  ;;  %vm14756_vm13 = vmmov %vm14751_vm9 }
0x1459   :  { %v6382_v63 = vsel %vm639_vm1, %v6370_v36, -inf  ;;  %v6447_v36 = vsel %vm14743_vm15, %v6433_v6, -1e+30  ;;  %v9030_v6 = vld [vmem:[%s12799_s10 + $0x38] sm:$0xff]  ;;  %vm14757_vm6 = vmmov %vm14751_vm9 }
0x145a   :  { %v6383_v2 = vmax.f32 %v6376_v14, %v6382_v63  ;;  %v6461_v29 = vsel %vm639_vm1, %v6447_v36, -inf  ;;  %v9027_v14 = vld [vmem:[%s12799_s10 + $0x20] sm:$0xff]  ;;  %v14027_v36 = vld [vmem:[%s12260_s3 + $0x28] sm:$0xff] }
0x145b   :  { %v11352_v40 = vpack.c.bf16 %v9028_v56, %v9027_v14 }
0x145c   :  { %v6425_v37 = vpop.permute.xlu1 %6424  ;;  %v6391_v22 = vmax.f32 %v6383_v2, %v6385_v31 }
0x145d   :  { %v6445_v48 = vsel %vm2453_vm5, %v6425_v37, -1e+30  ;;  %v6454_v37 = vmax.f32 %v6449_v13, %v6453_v24  ;;  %11353 = vmatprep.subr.bf16.mxu0 %v11352_v40  ;;  %vm14747_vm5 = vcmask 654336  }
0x145e   :  { %v6457_v47 = vsel %vm639_vm1, %v6445_v48, -inf  ;;  %11355 = vmatpush3.bf16.msra.mxu0 %v11352_v40  ;;  %vm14749_vm7 = vmmov %vm14747_vm5 }
0x145f   :  { %v6458_v7 = vmax.f32 %v6451_v9, %v6457_v47  ;;  %v6462_v13 = vmax.f32 %v6454_v37, %v6461_v29  ;;  %v14007_v47 = vld [vmem:[%s12260_s3 + $0x8] sm:$0xff]  ;;  %v14032_v37 = vld [vmem:[%s12260_s3 + $0x30] sm:$0xff]  ;;  %v14037_v9 = vld [vmem:[%s12260_s3 + $0x38] sm:$0xff] }
0x1460   :  { %vm14750_vm8 = vmmov %vm14747_vm5 }
0x1461   :  { %v6357_v11 = vpop.permute.xlu1 %6356  ;;  %v6466_v42 = vmax.f32 %v6458_v7, %v6460_v1 }
0x1462   :  { %v6372_v57 = vsel %vm14742_vm0, %v6357_v11, -1e+30  ;;  %v9029_v11 = vld [vmem:[%s12799_s10 + $0x30] sm:$0xff]  ;;  %vm14758_vm0 = vmmov %vm14757_vm6 }
0x1463   :  { %v6386_v49 = vsel %vm639_vm1, %v6372_v57, -inf  ;;  %v11356_v24 = vpack.c.bf16 %v9030_v6, %v9029_v11  ;;  %vm14759_vm15 = vmmov %vm14758_vm0 }
0x1464   :  { %v6387_v18 = vmax.f32 %v6379_v61, %v6386_v49 }
0x1465   :  { %11357 = vmatprep.subr.bf16.mxu0 %v11356_v24 }
0x1466   :  { %v6390_v33 = vmax.f32 %v6387_v18, %v6389_v39  ;;  %v6437_v38 = vpop.permute.xlu1 %6436  ;;  %11359 = vmatpush3.bf16.msra.mxu0 %v11356_v24  ;;  %v14012_v18 = vld [vmem:[%s12260_s3 + $0x10] sm:$0xff] }
0x1467   :  { %v6448_v44 = vsel %vm14744_vm2, %v6437_v38, -1e+30  ;;  %vm14760_vm2 = vmmov %vm14758_vm0 }
0x1468   :  { %v6392_v53 = vmax.f32 %v6390_v33, %v6391_v22  ;;  %v6463_v54 = vsel %vm639_vm1, %v6448_v44, -inf  ;;  %v14047_v22 = vld [vmem:[%s12260_s3 + $0x48] sm:$0xff]  ;;  %v9154_v33 = vld [vmem:[%s12856_s14 + $0x1] ss:$0 sm:$0xff]  ;;  %s12178_s14 = smov 34  }
0x1469   :  { %v6464_v30 = vmax.f32 %v6456_v23, %v6463_v54 }
0x146a   :  { %v6393_v63 = vrot.slane %v6392_v53, 4 }
0x146b   :  { %v6465_v45 = vmax.f32 %v6462_v13, %v6464_v30 }
0x146c   :  { %v6394_v15 = vmax.f32 %v6392_v53, %v6393_v63 }
0x146d   :  { %v6467_v17 = vmax.f32 %v6465_v45, %v6466_v42 }
0x146e   :  { %v6395_v48 = vrot.slane %v6394_v15, 2 }
0x146f   :  { %v6468_v61 = vrot.slane %v6467_v17, 4 }
0x1470   :  { %v6396_v52 = vmax.f32 %v6394_v15, %v6395_v48 }
0x1471   :  { %v6469_v2 = vmax.f32 %v6467_v17, %v6468_v61 }
0x1472   :  { %v6397_v31 = vrot.slane %v6396_v52, 1 }
0x1473   :  { %v6470_v57 = vrot.slane %v6469_v2, 2 }
0x1474   :  { %v6398_v49 = vmax.f32 %v6396_v52, %v6397_v31 }
0x1475   :  { %v6471_v27 = vmax.f32 %v6469_v2, %v6470_v57 }
0x1477   :  { %v6472_v26 = vrot.slane %v6471_v27, 1 }
0x1479   :  { %v6473_v39 = vmax.f32 %v6471_v27, %v6472_v26 }
0x147b   :  { %v6474_v32 = vsel %vm14745_vm4, %v6398_v49, %v6473_v39  ;;  %vm14761_vm4 = vmmov %vm14747_vm5 }
0x147c   :  { %10739 = vmatprep.subr.msk.mxu1 %vm639_vm1, %v6474_v32 }
0x147d   :  { %10740 = vmatpush3.xpose.msk.msra.mxu1 %vm639_vm1, %v6474_v32 }
0x1480   :  { %10742 = vmatmul.mubr.msk.f32.vlgmr.msra.gmra.mrb[94].mxu1 %vm639_vm1, %v14007_v47 }
0x1481   :  { %10744 = vmatprep.mubr.msk.f32.mxu1 %vm639_vm1, %v14012_v18 }
0x1484   :  { %10745 = vmatmul.mubr.msk.f32.gmra.mrb[96].mxu1 %vm639_vm1, %v14017_v34 }
0x1485   :  { %10747 = vmatprep.mubr.msk.f32.mxu1 %vm639_vm1, %v14022_v58 }
0x1488   :  { %10748 = vmatmul.mubr.msk.f32.gmra.mrb[98].mxu1 %vm639_vm1, %v14027_v36 }
0x1489   :  { %10750 = vmatprep.mubr.msk.f32.mxu1 %vm639_vm1, %v14032_v37 }
0x148c   :  { %10751 = vmatmul.mubr.msk.f32.gmra.mrb[100].mxu1 %vm639_vm1, %v14037_v9 }
0x148d   :  { %10753 = vmatprep.mubr.msk.f32.mxu1 %vm639_vm1, %v14042_v46 }
0x1490   :  { %10754 = vmatmul.mubr.msk.f32.gmra.mrb[102].mxu1 %vm639_vm1, %v14047_v22 }
0x1491   :  { %10783 = vmatprep.mubr.msk.f32.mxu1 %vm639_vm1, %v13795_v59 }
0x14d7   :  { %v10703_v38 = vpop.f32.mrb[104].mxu0 }
0x14d8   :  { %v14054_v23 = vadd.f32 %v10703_v38, %v9154_v33  ;;  %v6024_v7 = vpop.f32.mrb[105].mxu0 }
0x14d9   :  { %v14056_v44 = vadd.f32 %v9154_v33, %v6024_v7 }
0x14da   :  { %v6084_v20 = vmul.f32 0.044715, %v14054_v23 }
0x14db   :  { %v6083_v29 = vmul.f32 0.044715, %v14056_v44  ;;  %v10706_v53 = vpop.f32.mrb[106].mxu0 }
0x14dc   :  { %v6094_v54 = vmul.f32 %v6084_v20, %v14054_v23  ;;  %v14061_v13 = vadd.f32 %v10706_v53, %v9154_v33  ;;  %v6034_v1 = vpop.f32.mrb[107].mxu0 }
0x14dd   :  { %v6093_v30 = vmul.f32 %v6083_v29, %v14056_v44  ;;  %v14064_v59 = vadd.f32 %v9154_v33, %v6034_v1 }
0x14de   :  { %v6104_v63 = vmul.f32 %v6094_v54, %v14054_v23  ;;  %v6086_v14 = vmul.f32 0.044715, %v14061_v13 }
0x14df   :  { %v6103_v56 = vmul.f32 %v6093_v30, %v14056_v44  ;;  %v6085_v42 = vmul.f32 0.044715, %v14064_v59  ;;  %v10709_v45 = vpop.f32.mrb[108].mxu0 }
0x14e0   :  { %v6114_v40 = vadd.f32 %v6104_v63, %v14054_v23  ;;  %v6096_v15 = vmul.f32 %v6086_v14, %v14061_v13  ;;  %v14072_v17 = vadd.f32 %v10709_v45, %v9154_v33  ;;  %v6044_v48 = vpop.f32.mrb[109].mxu0 }
0x14e1   :  { %v6113_v11 = vadd.f32 %v6103_v56, %v14056_v44  ;;  %v6095_v6 = vmul.f32 %v6085_v42, %v14064_v59  ;;  %v14076_v61 = vadd.f32 %v9154_v33, %v6044_v48 }
0x14e2   :  { %v6124_v24 = vmul.f32 0.7978846, %v6114_v40  ;;  %v6106_v2 = vmul.f32 %v6096_v15, %v14061_v13  ;;  %v6088_v52 = vmul.f32 0.044715, %v14072_v17 }
0x14e3   :  { %v6105_v57 = vmul.f32 %v6095_v6, %v14064_v59  ;;  %v6087_v31 = vmul.f32 0.044715, %v14076_v61  ;;  %v10712_v27 = vpop.f32.mrb[110].mxu0  ;;  %v6123_v26 = vmul.f32 0.7978846, %v6113_v11 }
0x14e4   :  { %11950 = vtanh.f32 %v6124_v24  ;;  %v6116_v49 = vadd.f32 %v6106_v2, %v14061_v13  ;;  %v6098_v39 = vmul.f32 %v6088_v52, %v14072_v17  ;;  %v14084_v32 = vadd.f32 %v10712_v27, %v9154_v33  ;;  %v6054_v38 = vpop.f32.mrb[111].mxu0 }
0x14e5   :  { %v6115_v7 = vadd.f32 %v6105_v57, %v14064_v59  ;;  %v6097_v20 = vmul.f32 %v6087_v31, %v14076_v61  ;;  %v14088_v29 = vadd.f32 %v9154_v33, %v6054_v38  ;;  %11952 = vtanh.f32 %v6123_v26 }
0x14e6   :  { %v6108_v53 = vmul.f32 %v6098_v39, %v14072_v17  ;;  %v6090_v54 = vmul.f32 0.044715, %v14084_v32  ;;  %v6126_v1 = vmul.f32 0.7978846, %v6116_v49 }
0x14e7   :  { %v6107_v30 = vmul.f32 %v6097_v20, %v14076_v61  ;;  %v6089_v63 = vmul.f32 0.044715, %v14088_v29  ;;  %v10715_v14 = vpop.f32.mrb[112].mxu0  ;;  %v6125_v56 = vmul.f32 0.7978846, %v6115_v7 }
0x14e8   :  { %v6118_v42 = vadd.f32 %v6108_v53, %v14072_v17  ;;  %v6100_v45 = vmul.f32 %v6090_v54, %v14084_v32  ;;  %v14096_v40 = vadd.f32 %v10715_v14, %v9154_v33  ;;  %v6064_v15 = vpop.f32.mrb[113].mxu0  ;;  %11954 = vtanh.f32 %v6126_v1 }
0x14e9   :  { %v6117_v48 = vadd.f32 %v6107_v30, %v14076_v61  ;;  %v6099_v11 = vmul.f32 %v6089_v63, %v14088_v29  ;;  %v14100_v6 = vadd.f32 %v9154_v33, %v6064_v15  ;;  %11956 = vtanh.f32 %v6125_v56 }
0x14ea   :  { %v6110_v24 = vmul.f32 %v6100_v45, %v14084_v32  ;;  %v6092_v2 = vmul.f32 0.044715, %v14096_v40  ;;  %v6128_v52 = vmul.f32 0.7978846, %v6118_v42  ;;  %v6073_v14 = vmul.f32 0.5, %v14056_v44 }
0x14eb   :  { %v6109_v57 = vmul.f32 %v6099_v11, %v14088_v29  ;;  %v6091_v31 = vmul.f32 0.044715, %v14100_v6  ;;  %v6127_v27 = vmul.f32 0.7978846, %v6117_v48  ;;  %v6074_v42 = vmul.f32 0.5, %v14054_v23 }
0x14ec   :  { %v6120_v26 = vadd.f32 %v6110_v24, %v14084_v32  ;;  %v6102_v49 = vmul.f32 %v6092_v2, %v14096_v40  ;;  %11958 = vtanh.f32 %v6128_v52  ;;  %v6076_v23 = vmul.f32 0.5, %v14061_v13 }
0x14ed   :  { %v6119_v39 = vadd.f32 %v6109_v57, %v14088_v29  ;;  %v6101_v33 = vmul.f32 %v6091_v31, %v14100_v6  ;;  %11960 = vtanh.f32 %v6127_v27  ;;  %v6075_v31 = vmul.f32 0.5, %v14064_v59 }
0x14ee   :  { %v11951_v38 = vpop.eup %11950  ;;  %v6112_v7 = vmul.f32 %v6102_v49, %v14096_v40  ;;  %v6130_v20 = vmul.f32 0.7978846, %v6120_v26  ;;  %v6078_v59 = vmul.f32 0.5, %v14072_v17  ;;  %v6081_v17 = vmul.f32 0.5, %v14100_v6 }
0x14ef   :  { %v11953_v53 = vpop.eup %11952  ;;  %v6144_v54 = vadd.f32 1.0, %v11951_v38  ;;  %v6111_v1 = vmul.f32 %v6101_v33, %v14100_v6  ;;  %v6129_v30 = vmul.f32 0.7978846, %v6119_v39  ;;  %v6077_v38 = vmul.f32 0.5, %v14076_v61 }
0x14f0   :  { %v6122_v63 = vadd.f32 %v6112_v7, %v14096_v40  ;;  %v6143_v56 = vadd.f32 1.0, %v11953_v53  ;;  %11962 = vtanh.f32 %v6130_v20 }
0x14f1   :  { %v6121_v45 = vadd.f32 %v6111_v1, %v14100_v6  ;;  %11964 = vtanh.f32 %v6129_v30  ;;  %v6154_v2 = vmul.f32 %v6144_v54, %v6074_v42  ;;  %v6079_v30 = vmul.f32 0.5, %v14088_v29 }
0x14f2   :  { %v11955_v15 = vpop.eup %11954  ;;  %v6153_v48 = vmul.f32 %v6143_v56, %v6073_v14  ;;  %v6132_v11 = vmul.f32 0.7978846, %v6122_v63  ;;  %v6080_v14 = vmul.f32 0.5, %v14084_v32  ;;  %v14746_v32 = vld [vmem:[#allocation9_spill] sm:$0xff] }
0x14f3   :  { %v11957_v24 = vpop.eup %11956  ;;  %v6146_v52 = vadd.f32 1.0, %v11955_v15  ;;  %v6131_v57 = vmul.f32 0.7978846, %v6121_v45 }
0x14f4   :  { %10724 = vmatprep.mubr.msk.f32.mxu0 %vm930_vm3, %v6153_v48  ;;  %v6145_v27 = vadd.f32 1.0, %v11957_v24  ;;  %11966 = vtanh.f32 %v6132_v11  ;;  %v6082_v11 = vmul.f32 0.5, %v14096_v40 }
0x14f5   :  { %10725 = vmatmul.mubr.msk.f32.vlgmr.msra.gmra.mrb[114].mxu0 %vm930_vm3, %v6154_v2  ;;  %11968 = vtanh.f32 %v6131_v57  ;;  %v6156_v39 = vmul.f32 %v6146_v52, %v6076_v23 }
0x14f6   :  { %v11959_v44 = vpop.eup %11958  ;;  %v6155_v26 = vmul.f32 %v6145_v27, %v6075_v31 }
0x14f7   :  { %v11961_v49 = vpop.eup %11960  ;;  %v6148_v33 = vadd.f32 1.0, %v11959_v44 }
0x14f8   :  { %10727 = vmatprep.mubr.msk.f32.mxu0 %vm930_vm3, %v6155_v26  ;;  %v6147_v7 = vadd.f32 1.0, %v11961_v49 }
0x14f9   :  { %10728 = vmatmul.mubr.msk.f32.gmra.mrb[116].mxu0 %vm930_vm3, %v6156_v39  ;;  %v6158_v1 = vmul.f32 %v6148_v33, %v6078_v59 }
0x14fa   :  { %v11963_v20 = vpop.eup %11962  ;;  %v6157_v53 = vmul.f32 %v6147_v7, %v6077_v38 }
0x14fb   :  { %v11965_v54 = vpop.eup %11964  ;;  %v6150_v13 = vadd.f32 1.0, %v11963_v20 }
0x14fc   :  { %10730 = vmatprep.mubr.msk.f32.mxu0 %vm930_vm3, %v6157_v53  ;;  %v6149_v63 = vadd.f32 1.0, %v11965_v54 }
0x14fd   :  { %10731 = vmatmul.mubr.msk.f32.gmra.mrb[118].mxu0 %vm930_vm3, %v6158_v1  ;;  %v6160_v45 = vmul.f32 %v6150_v13, %v6080_v14 }
0x14fe   :  { %v11967_v61 = vpop.eup %11966  ;;  %v6159_v56 = vmul.f32 %v6149_v63, %v6079_v30 }
0x14ff   :  { %v11969_v42 = vpop.eup %11968  ;;  %v6152_v15 = vadd.f32 1.0, %v11967_v61 }
0x1500   :  { %10733 = vmatprep.mubr.msk.f32.mxu0 %vm930_vm3, %v6159_v56  ;;  %v6151_v48 = vadd.f32 1.0, %v11969_v42 }
0x1501   :  { %10734 = vmatmul.mubr.msk.f32.gmra.mrb[120].mxu0 %vm930_vm3, %v6160_v45  ;;  %v6162_v24 = vmul.f32 %v6152_v15, %v6082_v11 }
0x1502   :  { %v6161_v29 = vmul.f32 %v6151_v48, %v6081_v17 }
0x1504   :  { %10736 = vmatprep.mubr.msk.f32.mxu0 %vm930_vm3, %v6161_v29 }
0x1505   :  { %10737 = vmatmul.mubr.msk.f32.gmra.mrb[122].mxu0 %vm930_vm3, %v6162_v24 }
0x1506   :  { %10776 = vmatprep.mubr.msk.f32.mxu0 %vm14747_vm5, %v14746_v32 }
0x1553   :  { %v10743_v2 = vpop.f32.mrb[94].mxu1 }
0x1554   :  { %v6594_v52 = vsub.f32 %v13804_v12, %v10743_v2  ;;  %v6544_v57 = vpop.f32.mrb[95].mxu1 }
0x1555   :  { %v6593_v6 = vsub.f32 %v13806_v25, %v6544_v57 }
0x1556   :  { %v6605_v31 = vmul.f32 1.442695, %v6594_v52 }
0x1557   :  { %v6603_v27 = vmul.f32 1.442695, %v6593_v6  ;;  %v10746_v23 = vpop.f32.mrb[96].mxu1 }
0x1558   :  { %11970 = vpow2.f32 %v6605_v31  ;;  %v6596_v40 = vsub.f32 %v13812_v8, %v10746_v23  ;;  %v6554_v44 = vpop.f32.mrb[97].mxu1 }
0x1559   :  { %11972 = vpow2.f32 %v6603_v27  ;;  %v6595_v26 = vsub.f32 %v13816_v62, %v6554_v44 }
0x155a   :  { %v6609_v49 = vmul.f32 1.442695, %v6596_v40 }
0x155b   :  { %v6607_v39 = vmul.f32 1.442695, %v6595_v26  ;;  %v10749_v33 = vpop.f32.mrb[98].mxu1 }
0x155c   :  { %11974 = vpow2.f32 %v6609_v49  ;;  %v6598_v38 = vsub.f32 %v13830_v41, %v10749_v33  ;;  %v6564_v12 = vpop.f32.mrb[99].mxu1 }
0x155d   :  { %11976 = vpow2.f32 %v6607_v39  ;;  %v6597_v25 = vsub.f32 %v13841_v19, %v6564_v12  ;;  %v14748_v39 = vld [vmem:[#allocation10_spill] sm:$0xff] }
0x155e   :  { %v6613_v7 = vmul.f32 1.442695, %v6598_v38 }
0x155f   :  { %v6611_v59 = vmul.f32 1.442695, %v6597_v25  ;;  %v10752_v20 = vpop.f32.mrb[100].mxu1 }
0x1560   :  { %11978 = vpow2.f32 %v6613_v7  ;;  %v6600_v8 = vsub.f32 %v13822_v43, %v10752_v20  ;;  %v6574_v53 = vpop.f32.mrb[101].mxu1 }
0x1561   :  { %11980 = vpow2.f32 %v6611_v59  ;;  %v6599_v62 = vsub.f32 %v13848_v28, %v6574_v53 }
0x1562   :  { %v14144_v54 = vpop.eup %11970  ;;  %v6617_v1 = vmul.f32 1.442695, %v6600_v8 }
0x1563   :  { %v14146_v13 = vpop.eup %11972  ;;  %v6615_v41 = vmul.f32 1.442695, %v6599_v62  ;;  %v10755_v30 = vpop.f32.mrb[102].mxu1  ;;  %v6624_v63 = vadd.f32 1e-12, %v14144_v54 }
0x1564   :  { %11982 = vpow2.f32 %v6617_v1  ;;  %v6602_v19 = vsub.f32 %v13828_v16, %v10755_v30  ;;  %v6584_v14 = vpop.f32.mrb[103].mxu1  ;;  %v6623_v61 = vadd.f32 1e-12, %v14146_v13 }
0x1565   :  { %11984 = vpow2.f32 %v6615_v41  ;;  %v6601_v43 = vsub.f32 %v13835_v5, %v6584_v14 }
0x1566   :  { %v14152_v56 = vpop.eup %11974  ;;  %v6621_v28 = vmul.f32 1.442695, %v6602_v19  ;;  %v11360_v42 = vpack.c.bf16 %v6624_v63, %v6623_v61 }
0x1567   :  { %v14154_v45 = vpop.eup %11976  ;;  %v6619_v15 = vmul.f32 1.442695, %v6601_v43  ;;  %v6626_v17 = vadd.f32 1e-12, %v14152_v56 }
0x1568   :  { %11986 = vpow2.f32 %v6621_v28  ;;  %11361 = vmatprep.subr.bf16.mxu0 %v11360_v42  ;;  %v6625_v48 = vadd.f32 1e-12, %v14154_v45 }
0x1569   :  { %11988 = vpow2.f32 %v6619_v15  ;;  %11363 = vmatpush3.bf16.msra.mxu0 %v11360_v42 }
0x156a   :  { %v14158_v16 = vpop.eup %11978  ;;  %v11364_v11 = vpack.c.bf16 %v6626_v17, %v6625_v48 }
0x156b   :  { %v14160_v29 = vpop.eup %11980  ;;  %v6628_v5 = vadd.f32 1e-12, %v14158_v16 }
0x156c   :  { %11365 = vmatprep.subr.bf16.mxu0 %v11364_v11  ;;  %v6627_v24 = vadd.f32 1e-12, %v14160_v29 }
0x156d   :  { %11367 = vmatpush3.bf16.msra.mxu0 %v11364_v11 }
0x156e   :  { %v14164_v2 = vpop.eup %11982  ;;  %v11368_v52 = vpack.c.bf16 %v6628_v5, %v6627_v24 }
0x156f   :  { %v14166_v57 = vpop.eup %11984  ;;  %v6630_v6 = vadd.f32 1e-12, %v14164_v2 }
0x1570   :  { %11369 = vmatprep.subr.bf16.mxu0 %v11368_v52  ;;  %v6629_v31 = vadd.f32 1e-12, %v14166_v57 }
0x1571   :  { %11371 = vmatpush3.bf16.msra.mxu0 %v11368_v52 }
0x1572   :  { %v14170_v27 = vpop.eup %11986  ;;  %v11372_v23 = vpack.c.bf16 %v6630_v6, %v6629_v31 }
0x1573   :  { %v14172_v40 = vpop.eup %11988  ;;  %v6632_v44 = vadd.f32 1e-12, %v14170_v27 }
0x1574   :  { %11373 = vmatprep.subr.bf16.mxu0 %v11372_v23  ;;  %v6631_v26 = vadd.f32 1e-12, %v14172_v40 }
0x1575   :  { %11375 = vmatpush3.bf16.msra.mxu0 %v11372_v23 }
0x1576   :  { %v11376_v49 = vpack.c.bf16 %v6632_v44, %v6631_v26 }
0x1578   :  { %11377 = vmatprep.subr.bf16.mxu0 %v11376_v49 }
0x1579   :  { %11379 = vmatpush3.bf16.msra.mxu0 %v11376_v49 }
0x157c   :  { %10777 = vmatmul.mubr.msk.f32.vlgmr.msra.gmra.mrb[124].mxu0 %vm14749_vm7, %v14748_v39 }
0x157d   :  { %10818 = vmatprep.mubr.msk.f32.mxu0 %vm14750_vm8, %v14746_v32 }
0x15c8   :  { %v14180_v33 = vpop.f32.mrb[114].mxu0 }
0x15c9   :  { %v14182_v38 = vpop.f32.mrb[115].mxu0 }
0x15cc   :  { %v14184_v12 = vpop.f32.mrb[116].mxu0 }
0x15cd   :  { %v14186_v25 = vpop.f32.mrb[117].mxu0 }
0x15d0   :  { %v14188_v7 = vpop.f32.mrb[118].mxu0 }
0x15d1   :  { %v14190_v59 = vpop.f32.mrb[119].mxu0 }
0x15d4   :  { %v14192_v20 = vpop.f32.mrb[120].mxu0 }
0x15d5   :  { %v14194_v8 = vpop.f32.mrb[121].mxu0 }
0x15d8   :  { %v14196_v53 = vpop.f32.mrb[122].mxu0 }
0x15d9   :  { %v14198_v62 = vpop.f32.mrb[123].mxu0 }
0x164f   :  { %v10778_v32 = vpop.f32.mrb[124].mxu0 }
0x1650   :  { %v6699_v1 = vpop.f32.mrb[125].mxu0 }
0x1651   :  { %v11380_v41 = vpack.c.bf16 %v10778_v32, %v6699_v1 }
0x1653   :  { %11381 = vmatprep.subr.bf16.mxu1 %v11380_v41 }
0x1654   :  { %11383 = vmatpush3.bf16.msra.mxu1 %v11380_v41 }
0x1657   :  { %10784 = vmatmul.mubr.msk.f32.vlgmr.msra.gmra.mrb[104].mxu1 %vm639_vm1, %v14007_v47 }
0x1658   :  { %10786 = vmatprep.mubr.msk.f32.mxu1 %vm639_vm1, %v14012_v18 }
0x165b   :  { %10787 = vmatmul.mubr.msk.f32.gmra.mrb[106].mxu1 %vm639_vm1, %v14017_v34 }
0x165c   :  { %10789 = vmatprep.mubr.msk.f32.mxu1 %vm639_vm1, %v14022_v58 }
0x165f   :  { %10790 = vmatmul.mubr.msk.f32.gmra.mrb[108].mxu1 %vm639_vm1, %v14027_v36 }
0x1660   :  { %10792 = vmatprep.mubr.msk.f32.mxu1 %vm639_vm1, %v14032_v37 }
0x1663   :  { %10793 = vmatmul.mubr.msk.f32.gmra.mrb[110].mxu1 %vm639_vm1, %v14037_v9 }
0x1664   :  { %10795 = vmatprep.mubr.msk.f32.mxu1 %vm639_vm1, %v14042_v46 }
0x1667   :  { %10796 = vmatmul.mubr.msk.f32.gmra.mrb[112].mxu1 %vm639_vm1, %v14047_v22 }
0x172a   :  { %v10785_v47 = vpop.f32.mrb[104].mxu1 }
0x172b   :  { %11990 = vrcp.f32 %v10785_v47  ;;  %v6774_v18 = vpop.f32.mrb[105].mxu1  ;;  %v9165_v47 = vld [vmem:[%s13055_s22 + $0x1] ss:$0 sm:$0xff] }
0x172c   :  { %11992 = vrcp.f32 %v6774_v18 }
0x172e   :  { %v10788_v34 = vpop.f32.mrb[106].mxu1 }
0x172f   :  { %11994 = vrcp.f32 %v10788_v34  ;;  %v6784_v58 = vpop.f32.mrb[107].mxu1 }
0x1730   :  { %11996 = vrcp.f32 %v6784_v58 }
0x1732   :  { %v10791_v36 = vpop.f32.mrb[108].mxu1 }
0x1733   :  { %11998 = vrcp.f32 %v10791_v36  ;;  %v6794_v37 = vpop.f32.mrb[109].mxu1  ;;  %v6266_v36 = vadd.f32 %v9165_v47, %v14182_v38 }
0x1734   :  { %12000 = vrcp.f32 %v6794_v37 }
0x1735   :  { %v11991_v30 = vpop.eup %11990 }
0x1736   :  { %v11993_v9 = vpop.eup %11992  ;;  %v10794_v63 = vpop.f32.mrb[110].mxu1  ;;  %v6826_v46 = vmul.f32 %v11991_v30, %v14144_v54 }
0x1737   :  { %12002 = vrcp.f32 %v10794_v63  ;;  %v6804_v19 = vpop.f32.mrb[111].mxu1  ;;  %v6824_v22 = vmul.f32 %v11993_v9, %v14146_v13 }
0x1738   :  { %12004 = vrcp.f32 %v6804_v19  ;;  %v6846_v14 = vsel %vm14751_vm9, %v6826_v46, 0.0 }
0x1739   :  { %v11995_v61 = vpop.eup %11994  ;;  %6847 = vadd.xlane.f32.xlu1 %v6846_v14  ;;  %v6843_v43 = vsel %vm14752_vm11, %v6824_v22, 0.0  ;;  %v6281_v22 = vadd.f32 %v14184_v12, %v9165_v47  ;;  %v6276_v14 = vadd.f32 %v9165_v47, %v14186_v25  ;;  %v6301_v25 = vadd.f32 %v14192_v20, %v9165_v47 }
0x173a   :  { %v11997_v28 = vpop.eup %11996  ;;  %6844 = vadd.xlane.f32.xlu0 %v6843_v43  ;;  %v10797_v42 = vpop.f32.mrb[112].mxu1  ;;  %v6830_v15 = vmul.f32 %v11995_v61, %v14152_v56 }
0x173b   :  { %12006 = vrcp.f32 %v10797_v42  ;;  %v6814_v17 = vpop.f32.mrb[113].mxu1  ;;  %v6828_v13 = vmul.f32 %v11997_v28, %v14154_v45 }
0x173c   :  { %12008 = vrcp.f32 %v6814_v17  ;;  %v6852_v54 = vsel %vm14753_vm14, %v6830_v15, 0.0  ;;  %v6291_v15 = vadd.f32 %v14188_v7, %v9165_v47  ;;  %v6286_v17 = vadd.f32 %v9165_v47, %v14190_v59 }
0x173d   :  { %v11999_v48 = vpop.eup %11998  ;;  %v6849_v52 = vsel %vm14754_vm10, %v6828_v13, 0.0 }
0x173e   :  { %v12001_v11 = vpop.eup %12000  ;;  %6853 = vadd.xlane.f32.xlu0 %v6852_v54  ;;  %v6834_v31 = vmul.f32 %v11999_v48, %v14158_v16 }
0x173f   :  { %v6832_v5 = vmul.f32 %v12001_v11, %v14160_v29 }
0x1740   :  { %v6858_v45 = vsel %vm14756_vm13, %v6834_v31, 0.0 }
0x1741   :  { %v12003_v24 = vpop.eup %12002  ;;  %v6855_v6 = vsel %vm14755_vm12, %v6832_v5, 0.0 }
0x1742   :  { %v12005_v56 = vpop.eup %12004  ;;  %6850 = vadd.xlane.f32.xlu0 %v6849_v52  ;;  %6856 = vadd.xlane.f32.xlu1 %v6855_v6  ;;  %v6838_v29 = vmul.f32 %v12003_v24, %v14164_v2  ;;  %v6271_v2 = vadd.f32 %v14180_v33, %v9165_v47  ;;  %v6296_v52 = vadd.f32 %v9165_v47, %v14194_v8 }
0x1743   :  { %v6836_v23 = vmul.f32 %v12005_v56, %v14166_v57 }
0x1744   :  { %v6864_v16 = vsel %vm14758_vm0, %v6838_v29, 0.0 }
0x1745   :  { %v12007_v44 = vpop.eup %12006  ;;  %v6861_v26 = vsel %vm14757_vm6, %v6836_v23, 0.0 }
0x1746   :  { %v12009_v49 = vpop.eup %12008  ;;  %6859 = vadd.xlane.f32.xlu0 %v6858_v45  ;;  %6862 = vadd.xlane.f32.xlu1 %v6861_v26  ;;  %v6842_v41 = vmul.f32 %v12007_v44, %v14170_v27  ;;  %v6311_v44 = vadd.f32 %v14196_v53, %v9165_v47  ;;  %v6306_v45 = vadd.f32 %v9165_v47, %v14198_v62  ;;  %v14763_v62 = vld [vmem:[#allocation11_spill] sm:$0xff] }
0x1747   :  { %v6840_v32 = vmul.f32 %v12009_v49, %v14172_v40 }
0x1748   :  { %v6870_v57 = vsel %vm14760_vm2, %v6842_v41, 0.0 }
0x1749   :  { %v6867_v1 = vsel %vm14759_vm15, %v6840_v32, 0.0 }
0x174a   :  { %6865 = vadd.xlane.f32.xlu0 %v6864_v16  ;;  %6868 = vadd.xlane.f32.xlu1 %v6867_v1  ;;  %v14762_v16 = vld [vmem:[#allocation12_spill] sm:$0xff] }
0x174e   :  { %6871 = vadd.xlane.f32.xlu0 %v6870_v57 }
0x17c6   :  { %v6848_v18 = vpop.xlane.xlu1 %6847 }
0x17c7   :  { %v6874_v34 = vmul.f32 0.5, %v6848_v18  ;;  %v6845_v58 = vpop.xlane.xlu0 %6844 }
0x17c8   :  { %v6873_v40 = vmul.f32 0.5, %v6845_v58 }
0x17c9   :  { %v6884_v37 = vmul.f32 %v6874_v34, %v6271_v2 }
0x17ca   :  { %v6883_v30 = vmul.f32 %v6873_v40, %v6266_v36 }
0x17cb   :  { %v6854_v9 = vpop.xlane.xlu0 %6853 }
0x17cc   :  { %v11384_v63 = vpack.c.bf16 %v6884_v37, %v6883_v30  ;;  %v6876_v46 = vmul.f32 0.5, %v6854_v9 }
0x17ce   :  { %11385 = vmatprep.subr.bf16.mxu0 %v11384_v63  ;;  %v6886_v33 = vmul.f32 %v6876_v46, %v6281_v22  ;;  %v9033_v46 = vld [vmem:[%s13085_s27 + $0x28] sm:$0xff]  ;;  %v9035_v22 = vld [vmem:[%s13085_s27 + $0x38] sm:$0xff] }
0x17cf   :  { %11387 = vmatpush3.bf16.msra.mxu0 %v11384_v63  ;;  %v6851_v27 = vpop.xlane.xlu0 %6850  ;;  %v6857_v19 = vpop.xlane.xlu1 %6856  ;;  %v9032_v63 = vld [vmem:[%s13085_s27 + $0x20] sm:$0xff] }
0x17d0   :  { %v6875_v61 = vmul.f32 0.5, %v6851_v27  ;;  %v6877_v28 = vmul.f32 0.5, %v6857_v19  ;;  %v11404_v27 = vpack.c.bf16 %v9033_v46, %v9032_v63  ;;  %v9034_v19 = vld [vmem:[%s13085_s27 + $0x30] sm:$0xff] }
0x17d2   :  { %v6885_v43 = vmul.f32 %v6875_v61, %v6276_v14  ;;  %v6887_v13 = vmul.f32 %v6877_v28, %v6286_v17  ;;  %11405 = vmatprep.subr.bf16.mxu1 %v11404_v27  ;;  %v11408_v14 = vpack.c.bf16 %v9035_v22, %v9034_v19  ;;  %v9037_v61 = vld [vmem:[%s13094_s2 + $0x80] sm:$0xff] }
0x17d3   :  { %v6860_v42 = vpop.xlane.xlu0 %6859  ;;  %v6863_v38 = vpop.xlane.xlu1 %6862  ;;  %11407 = vmatpush3.bf16.msra.mxu1 %v11404_v27 }
0x17d4   :  { %v6878_v54 = vmul.f32 0.5, %v6860_v42  ;;  %v11388_v48 = vpack.c.bf16 %v6886_v33, %v6885_v43  ;;  %v6879_v5 = vmul.f32 0.5, %v6863_v38  ;;  %11409 = vmatprep.subr.bf16.mxu1 %v11408_v14  ;;  %v9038_v33 = vld [vmem:[%s13094_s2 + $0x88] sm:$0xff] }
0x17d5   :  { %v11412_v43 = vpack.c.bf16 %v9038_v33, %v9037_v61 }
0x17d6   :  { %v6888_v11 = vmul.f32 %v6878_v54, %v6291_v15  ;;  %11389 = vmatprep.subr.bf16.mxu0 %v11388_v48  ;;  %v6889_v56 = vmul.f32 %v6879_v5, %v6296_v52 }
0x17d7   :  { %11391 = vmatpush3.bf16.msra.mxu0 %v11388_v48  ;;  %v6866_v12 = vpop.xlane.xlu0 %6865  ;;  %v6869_v24 = vpop.xlane.xlu1 %6868  ;;  %11411 = vmatpush3.bf16.msra.mxu1 %v11408_v14 }
0x17d8   :  { %v6880_v6 = vmul.f32 0.5, %v6866_v12  ;;  %v11392_v31 = vpack.c.bf16 %v6888_v11, %v6887_v13  ;;  %v6881_v7 = vmul.f32 0.5, %v6869_v24  ;;  %v14270_v13 = vld [vmem:[%s13101_s9 + $0x1] ss:$0 sm:$0xff] }
0x17d9   :  { %v14273_v24 = vld [vmem:[%s13106_s16 + $0x1] ss:$0 sm:$0xff] }
0x17da   :  { %v6890_v23 = vmul.f32 %v6880_v6, %v6301_v25  ;;  %11393 = vmatprep.subr.bf16.mxu0 %v11392_v31  ;;  %v6891_v49 = vmul.f32 %v6881_v7, %v6306_v45  ;;  %v9040_v7 = vld [vmem:[%s13094_s2 + $0x98] sm:$0xff]  ;;  %v9042_v45 = vld [vmem:[%s13094_s2 + $0xa8] sm:$0xff] }
0x17db   :  { %11395 = vmatpush3.bf16.msra.mxu0 %v11392_v31  ;;  %v6872_v59 = vpop.xlane.xlu0 %6871 }
0x17dc   :  { %v6882_v26 = vmul.f32 0.5, %v6872_v59  ;;  %v11396_v29 = vpack.c.bf16 %v6890_v23, %v6889_v56  ;;  %v12123_v56 = vld [vmem:[%s12211_s21] sm:$0xff]  ;;  %v9039_v23 = vld [vmem:[%s13094_s2 + $0x90] sm:$0xff] }
0x17dd   :  { %v11416_v59 = vpack.c.bf16 %v9040_v7, %v9039_v23 }
0x17de   :  { %v6892_v32 = vmul.f32 %v6882_v26, %v6311_v44  ;;  %11397 = vmatprep.subr.bf16.mxu0 %v11396_v29  ;;  %v9041_v44 = vld [vmem:[%s13094_s2 + $0xa0] sm:$0xff] }
0x17df   :  { %11399 = vmatpush3.bf16.msra.mxu0 %v11396_v29  ;;  %v11420_v26 = vpack.c.bf16 %v9042_v45, %v9041_v44  ;;  %v9043_v29 = vld [vmem:[%s13094_s2 + $0xb0] sm:$0xff] }
0x17e0   :  { %v11400_v20 = vpack.c.bf16 %v6892_v32, %v6891_v49  ;;  %v9044_v49 = vld [vmem:[%s13094_s2 + $0xb8] sm:$0xff] }
0x17e1   :  { %v11424_v32 = vpack.c.bf16 %v9044_v49, %v9043_v29 }
0x17e2   :  { %11401 = vmatprep.subr.bf16.mxu0 %v11400_v20 }
0x17e3   :  { %11403 = vmatpush3.bf16.msra.mxu0 %v11400_v20  ;;  %v9045_v20 = vld [vmem:[%s13094_s2 + $0xc0] sm:$0xff] }
0x17e4   :  { %11413 = vmatprep.subr.bf16.mxu0 %v11412_v43 }
0x17e6   :  { %10819 = vmatmul.mubr.msk.f32.vlgmr.msra.gmra.mrb[126].mxu0 %vm14761_vm4, %v14748_v39 }
0x17e7   :  { %11415 = vmatpush3.bf16.msra.mxu0 %v11412_v43 }
0x17e8   :  { %11417 = vmatprep.subr.bf16.mxu0 %v11416_v59 }
0x17eb   :  { %11419 = vmatpush3.bf16.msra.mxu0 %v11416_v59 }
0x17ec   :  { %11421 = vmatprep.subr.bf16.mxu0 %v11420_v26 }
0x17ef   :  { %11423 = vmatpush3.bf16.msra.mxu0 %v11420_v26 }
0x17f0   :  { %11425 = vmatprep.subr.bf16.mxu0 %v11424_v32 }
0x17f3   :  { %11427 = vmatpush3.bf16.msra.mxu0 %v11424_v32 }
0x18b9   :  { %v14251_v8 = vpop.f32.mrb[126].mxu0 }
0x18ba   :  { %v6969_v1 = vadd.f32 %v14251_v8, %v14762_v16  ;;  %v14255_v53 = vpop.f32.mrb[127].mxu0  ;;  %v9046_v16 = vld [vmem:[%s13094_s2 + $0xc8] sm:$0xff] }
0x18bb   :  { %v6968_v41 = vadd.f32 %v14255_v53, %v14763_v62  ;;  %v9047_v62 = vld [vmem:[%s13094_s2 + $0xd0] sm:$0xff] }
0x18bc   :  { %v6973_v57 = vsel %vm930_vm3, %v6969_v1, 0.0 }
0x18bd   :  { %6974 = vadd.xlane.f32.xlu0 %v6973_v57  ;;  %v6970_v47 = vsel %vm930_vm3, %v6968_v41, 0.0 }
0x18be   :  { %6971 = vadd.xlane.f32.xlu1 %v6970_v47  ;;  %v9049_v47 = vld [vmem:[%s13094_s2 + $0xe0] sm:$0xff] }
0x194a   :  { %v6975_v39 = vpop.xlane.xlu0 %6974 }
0x194b   :  { %v6977_v18 = vmul.f32 0.03125, %v6975_v39  ;;  %v6972_v2 = vpop.xlane.xlu1 %6971  ;;  %v9050_v39 = vld [vmem:[%s13094_s2 + $0xe8] sm:$0xff] }
0x194c   :  { %v6976_v34 = vmul.f32 0.03125, %v6972_v2  ;;  %v9051_v2 = vld [vmem:[%s13094_s2 + $0xf0] sm:$0xff] }
0x194d   :  { %v6979_v58 = vsub.f32 %v6969_v1, %v6977_v18  ;;  %v11428_v1 = vpack.c.bf16 %v9046_v16, %v9045_v20  ;;  %v11436_v18 = vpack.c.bf16 %v9050_v39, %v9049_v47  ;;  %v9057_v47 = vld [vmem:[%s13159_s11 + $0x78] sm:$0xff] }
0x194e   :  { %v6978_v36 = vsub.f32 %v6968_v41, %v6976_v34  ;;  %v9048_v41 = vld [vmem:[%s13094_s2 + $0xd8] sm:$0xff] }
0x194f   :  { %v6981_v40 = vmul.f32 %v6979_v58, %v6979_v58  ;;  %11429 = vmatprep.subr.bf16.mxu0 %v11428_v1  ;;  %v11432_v57 = vpack.c.bf16 %v9048_v41, %v9047_v62  ;;  %v9052_v34 = vld [vmem:[%s13094_s2 + $0xf8] sm:$0xff]  ;;  %v9055_v62 = vld [vmem:[%s13159_s11 + $0x68] sm:$0xff]  ;;  %v9056_v41 = vld [vmem:[%s13159_s11 + $0x70] sm:$0xff]  ;;  %s8743_s2 = sld [smem:[%s14689_s0 + %s12178_s14]]  }
0x1950   :  { %v6980_v37 = vmul.f32 %v6978_v36, %v6978_v36  ;;  %11431 = vmatpush3.bf16.msra.mxu0 %v11428_v1  ;;  %v9054_v1 = vld [vmem:[%s13159_s11 + $0x60] sm:$0xff]  ;;  %v11456_v39 = vpack.c.bf16 %v9057_v47, %v9056_v41 }
0x1951   :  { %v6985_v30 = vsel %vm930_vm3, %v6981_v40, 0.0  ;;  %11433 = vmatprep.subr.bf16.mxu0 %v11432_v57 }
0x1952   :  { %6986 = vadd.xlane.f32.xlu0 %v6985_v30  ;;  %v6982_v9 = vsel %vm930_vm3, %v6980_v37, 0.0 }
0x1953   :  { %6983 = vadd.xlane.f32.xlu1 %v6982_v9 }
0x1954   :  { %11435 = vmatpush3.bf16.msra.mxu0 %v11432_v57  ;;  %v11452_v57 = vpack.c.bf16 %v9055_v62, %v9054_v1 }
0x1955   :  { %11437 = vmatprep.subr.bf16.mxu0 %v11436_v18 }
0x1958   :  { %11439 = vmatpush3.bf16.msra.mxu0 %v11436_v18 }
0x19df   :  { %v6987_v28 = vpop.xlane.xlu0 %6986 }
0x19e0   :  { %v6989_v42 = vmul.f32 0.03125, %v6987_v28  ;;  %v6984_v38 = vpop.xlane.xlu1 %6983 }
0x19e1   :  { %v6988_v15 = vmul.f32 0.03125, %v6984_v38 }
0x19e2   :  { %v6991_v17 = vadd.f32 1e-05, %v6989_v42 }
0x19e3   :  { %v6990_v54 = vadd.f32 1e-05, %v6988_v15 }
0x19e4   :  { %12010 = vrsqrt.f32 %v6991_v17 }
0x19e5   :  { %12012 = vrsqrt.f32 %v6990_v54 }
0x19ee   :  { %v12011_v48 = vpop.eup %12010 }
0x19ef   :  { %v12013_v11 = vpop.eup %12012  ;;  %v6995_v5 = vmul.f32 %v12011_v48, %v6979_v58  ;;  %v11440_v58 = vpack.c.bf16 %v9052_v34, %v9051_v2 }
0x19f0   :  { %v6994_v12 = vmul.f32 %v12013_v11, %v6978_v36  ;;  %v9203_v36 = vld [vmem:[%s13139_s23 + $0x1] ss:$0 sm:$0xff] }
0x19f1   :  { %v7003_v25 = vmul.f32 %v14270_v13, %v6995_v5  ;;  %11441 = vmatprep.subr.bf16.mxu0 %v11440_v58 }
0x19f2   :  { %v7002_v52 = vmul.f32 %v14270_v13, %v6994_v12  ;;  %11443 = vmatpush3.bf16.msra.mxu0 %v11440_v58  ;;  %v9206_v12 = vld [vmem:[%s13147_s1 + $0x1] ss:$0 sm:$0xff] }
0x19f3   :  { %v7011_v31 = vadd.f32 %v14273_v24, %v7003_v25  ;;  %11453 = vmatprep.subr.bf16.mxu0 %v11452_v57 }
0x19f4   :  { %v7010_v6 = vadd.f32 %v14273_v24, %v7002_v52 }
0x19f6   :  { %10829 = vmatprep.mubr.msk.f32.mxu1 %vm930_vm3, %v7010_v6 }
0x19f7   :  { %10830 = vmatmul.mubr.msk.f32.vlgmr.msra.gmra.mrb[114].mxu1 %vm930_vm3, %v7011_v31 }
0x19f8   :  { %10871 = vmatprep.mubr.msk.f32.mxu1 %vm639_vm1, %v12123_v56 }
0x1aca   :  { %v10831_v40 = vpop.f32.mrb[114].mxu1 }
0x1acb   :  { %v7096_v37 = vadd.f32 %v10831_v40, %v9203_v36  ;;  %v7090_v30 = vpop.f32.mrb[115].mxu1 }
0x1acc   :  { %v7091_v9 = vadd.f32 %v9203_v36, %v7090_v30 }
0x1acd   :  { %v7102_v63 = vmul.f32 0.044715, %v7096_v37  ;;  %v7100_v48 = vmul.f32 0.5, %v7096_v37 }
0x1ace   :  { %v7101_v46 = vmul.f32 0.044715, %v7091_v9  ;;  %v7099_v17 = vmul.f32 0.5, %v7091_v9 }
0x1acf   :  { %v7104_v27 = vmul.f32 %v7102_v63, %v7096_v37 }
0x1ad0   :  { %v7103_v19 = vmul.f32 %v7101_v46, %v7091_v9 }
0x1ad1   :  { %v7106_v22 = vmul.f32 %v7104_v27, %v7096_v37 }
0x1ad2   :  { %v7105_v14 = vmul.f32 %v7103_v19, %v7091_v9 }
0x1ad3   :  { %v7108_v61 = vadd.f32 %v7106_v22, %v7096_v37 }
0x1ad4   :  { %v7107_v33 = vadd.f32 %v7105_v14, %v7091_v9 }
0x1ad5   :  { %v7110_v43 = vmul.f32 0.7978846, %v7108_v61  ;;  %v12124_v61 = vld [vmem:[%s12211_s21 + $0x8] sm:$0xff] }
0x1ad6   :  { %v7109_v28 = vmul.f32 0.7978846, %v7107_v33  ;;  %v12127_v33 = vld [vmem:[%s12211_s21 + $0x20] sm:$0xff] }
0x1ad7   :  { %12014 = vtanh.f32 %v7110_v43  ;;  %v12128_v43 = vld [vmem:[%s12211_s21 + $0x28] sm:$0xff] }
0x1ad8   :  { %12016 = vtanh.f32 %v7109_v28  ;;  %v12129_v28 = vld [vmem:[%s12211_s21 + $0x30] sm:$0xff] }
0x1ae1   :  { %v12015_v42 = vpop.eup %12014 }
0x1ae2   :  { %v12017_v38 = vpop.eup %12016  ;;  %v7114_v15 = vadd.f32 1.0, %v12015_v42  ;;  %v12130_v42 = vld [vmem:[%s12211_s21 + $0x38] sm:$0xff] }
0x1ae3   :  { %v7113_v54 = vadd.f32 1.0, %v12017_v38  ;;  %v12131_v38 = vld [vmem:[%s12211_s21 + $0x40] sm:$0xff] }
0x1ae4   :  { %v7116_v5 = vmul.f32 %v7114_v15, %v7100_v48  ;;  %v12132_v15 = vld [vmem:[%s12211_s21 + $0x48] sm:$0xff]  ;;  %v12135_v48 = vld [vmem:[%s12260_s3 + $0x10] sm:$0xff] }
0x1ae5   :  { %v7115_v11 = vmul.f32 %v7113_v54, %v7099_v17  ;;  %v12133_v17 = vld [vmem:[%s12260_s3] sm:$0xff]  ;;  %v12134_v54 = vld [vmem:[%s12260_s3 + $0x8] sm:$0xff] }
0x1ae7   :  { %10864 = vmatprep.mubr.f32.mxu0 %v7115_v11  ;;  %v12136_v11 = vld [vmem:[%s12260_s3 + $0x18] sm:$0xff] }
0x1ae8   :  { %10865 = vmatmul.mubr.f32.vlgmr.msra.gmra.mrb[128].mxu0 %v7116_v5  ;;  %v12137_v5 = vld [vmem:[%s12260_s3 + $0x20] sm:$0xff] }
0x1ae9   :  { %11455 = vmatpush3.bf16.msra.mxu0 %v11452_v57 }
0x1aea   :  { %11457 = vmatprep.subr.bf16.mxu0 %v11456_v39 }
0x1aed   :  { %11459 = vmatpush3.bf16.msra.mxu0 %v11456_v39  ;;  %v9064_v39 = vld [vmem:[%s13159_s11 + $0xb0] sm:$0xff] }
0x1bbb   :  { %v10866_v25 = vpop.f32.mrb[128].mxu0 }
0x1bbc   :  { %v7195_v52 = vadd.f32 %v10866_v25, %v9206_v12  ;;  %v7189_v6 = vpop.f32.mrb[129].mxu0  ;;  %v12139_v25 = vld [vmem:[%s12260_s3 + $0x30] sm:$0xff] }
0x1bbd   :  { %v7190_v31 = vadd.f32 %v9206_v12, %v7189_v6  ;;  %v12138_v12 = vld [vmem:[%s12260_s3 + $0x28] sm:$0xff]  ;;  %v12141_v6 = vld [vmem:[%s12260_s3 + $0x40] sm:$0xff] }
0x1bbe   :  { %v7199_v56 = vadd.f32 %v14251_v8, %v7195_v52  ;;  %v12140_v52 = vld [vmem:[%s12260_s3 + $0x38] sm:$0xff] }
0x1bbf   :  { %v7198_v23 = vadd.f32 %v7190_v31, %v14255_v53  ;;  %v12142_v31 = vld [vmem:[%s12260_s3 + $0x48] sm:$0xff]  ;;  %s12177_s3 = smov 8  }
0x1bc0   :  { %v7203_v7 = vsel %vm930_vm3, %v7199_v56, 0.0  ;;  %s14648_s10 = sld [smem:[%s14689_s0 + %s12177_s3]]  }
0x1bc1   :  { %7204 = vadd.xlane.f32.xlu0 %v7203_v7  ;;  %v7200_v59 = vsel %vm930_vm3, %v7198_v23, 0.0 }
0x1bc2   :  { %7201 = vadd.xlane.f32.xlu1 %v7200_v59  ;;  %v9060_v59 = vld [vmem:[%s13159_s11 + $0x90] sm:$0xff] }
0x1c4e   :  { %v7205_v44 = vpop.xlane.xlu0 %7204 }
0x1c4f   :  { %v7207_v45 = vmul.f32 0.03125, %v7205_v44  ;;  %v7202_v26 = vpop.xlane.xlu1 %7201  ;;  %v9061_v44 = vld [vmem:[%s13159_s11 + $0x98] sm:$0xff] }
0x1c50   :  { %v7206_v29 = vmul.f32 0.03125, %v7202_v26 }
0x1c51   :  { %v7209_v49 = vsub.f32 %v7199_v56, %v7207_v45  ;;  %v9058_v56 = vld [vmem:[%s13159_s11 + $0x80] sm:$0xff] }
0x1c52   :  { %v7208_v32 = vsub.f32 %v7198_v23, %v7206_v29  ;;  %v9059_v23 = vld [vmem:[%s13159_s11 + $0x88] sm:$0xff]  ;;  %v11464_v29 = vpack.c.bf16 %v9061_v44, %v9060_v59 }
0x1c53   :  { %v7211_v20 = vmul.f32 %v7209_v49, %v7209_v49  ;;  %v11460_v7 = vpack.c.bf16 %v9059_v23, %v9058_v56 }
0x1c54   :  { %v7210_v8 = vmul.f32 %v7208_v32, %v7208_v32 }
0x1c55   :  { %v7215_v53 = vsel %vm930_vm3, %v7211_v20, 0.0  ;;  %11461 = vmatprep.subr.bf16.mxu0 %v11460_v7 }
0x1c56   :  { %7216 = vadd.xlane.f32.xlu0 %v7215_v53  ;;  %v7212_v16 = vsel %vm930_vm3, %v7210_v8, 0.0 }
0x1c57   :  { %7213 = vadd.xlane.f32.xlu1 %v7212_v16 }
0x1ce3   :  { %v7217_v18 = vpop.xlane.xlu0 %7216 }
0x1ce4   :  { %v7219_v2 = vmul.f32 0.03125, %v7217_v18  ;;  %v7214_v34 = vpop.xlane.xlu1 %7213  ;;  %v9065_v18 = vld [vmem:[%s13159_s11 + $0xb8] sm:$0xff] }
0x1ce5   :  { %v7218_v58 = vmul.f32 0.03125, %v7214_v34 }
0x1ce6   :  { %v7221_v36 = vadd.f32 1e-05, %v7219_v2 }
0x1ce7   :  { %v7220_v40 = vadd.f32 1e-05, %v7218_v58  ;;  %v11472_v58 = vpack.c.bf16 %v9065_v18, %v9064_v39 }
0x1ce8   :  { %12018 = vrsqrt.f32 %v7221_v36 }
0x1ce9   :  { %12020 = vrsqrt.f32 %v7220_v40 }
0x1cf2   :  { %v12019_v37 = vpop.eup %12018 }
0x1cf3   :  { %v12021_v30 = vpop.eup %12020  ;;  %v7225_v9 = vmul.f32 %v12019_v37, %v7209_v49  ;;  %v9062_v49 = vld [vmem:[%s13159_s11 + $0xa0] sm:$0xff] }
0x1cf4   :  { %v7224_v63 = vmul.f32 %v12021_v30, %v7208_v32  ;;  %v9063_v32 = vld [vmem:[%s13159_s11 + $0xa8] sm:$0xff] }
0x1cf5   :  { %v7227_v46 = vmul.f32 %v14270_v13, %v7225_v9  ;;  %v11468_v53 = vpack.c.bf16 %v9063_v32, %v9062_v49 }
0x1cf6   :  { %v7226_v27 = vmul.f32 %v14270_v13, %v7224_v63  ;;  %v12125_v13 = vld [vmem:[%s12211_s21 + $0x10] sm:$0xff] }
0x1cf7   :  { %v7229_v19 = vadd.f32 %v14273_v24, %v7227_v46 }
0x1cf8   :  { %v7228_v22 = vadd.f32 %v14273_v24, %v7226_v27  ;;  %v12126_v24 = vld [vmem:[%s12211_s21 + $0x18] sm:$0xff]  ;;  %s14764_s21 = sld [smem:[#allocation13_spill]] }
0x1cf9   :  { %8556 = vst.msk [vmem:[%s8742_s26 + $0x8] sm:$0xff] %vm930_vm3, %v7229_v19 }
0x1cfa   :  { %v11444_v14 = vpack.c.bf16 %v7229_v19, %v7228_v22  ;;  %8555 = vst.msk [vmem:[%s8742_s26] sm:$0xff] %vm930_vm3, %v7228_v22  ;;  %v9067_v19 = vld [vmem:[%s13322_s19 + $0x20] sm:$0xff]  ;;  %v9068_v22 = vld [vmem:[%s13322_s19 + $0x28] sm:$0xff] }
0x1cfc   :  { %11445 = vmatprep.subr.bf16.mxu1 %v11444_v14 }
0x1cfd   :  { %11447 = vmatpush3.bf16.msra.mxu1 %v11444_v14 }
0x1cfe   :  { %11449 = vmatprep.subr.bf16.mxu1 %v11444_v14 }
0x1d00   :  { %10872 = vmatmul.mubr.msk.f32.vlgmr.msra.gmra.mrb[116].mxu1 %vm639_vm1, %v12124_v61  ;;  %v9069_v61 = vld [vmem:[%s13322_s19 + $0x30] sm:$0xff] }
0x1d01   :  { %11451 = vmatpush3.bf16.msra.mxu1 %v11444_v14  ;;  %10874 = vmatprep.mubr.msk.f32.mxu1 %vm639_vm1, %v12125_v13  ;;  %v11476_v14 = vpack.c.bf16 %v9068_v22, %v9067_v19  ;;  %v9070_v13 = vld [vmem:[%s13322_s19 + $0x38] sm:$0xff] }
0x1d03   :  { %11477 = vmatprep.subr.bf16.mxu1 %v11476_v14 }
0x1d04   :  { %10875 = vmatmul.mubr.msk.f32.gmra.mrb[118].mxu1 %vm639_vm1, %v12126_v24  ;;  %v11480_v24 = vpack.c.bf16 %v9070_v13, %v9069_v61 }
0x1d05   :  { %10877 = vmatprep.mubr.msk.f32.mxu1 %vm639_vm1, %v12127_v33  ;;  %v9237_v33 = vld [vmem:[%s13331_s29 + $0x1] ss:$0 sm:$0xff] }
0x1d08   :  { %10878 = vmatmul.mubr.msk.f32.gmra.mrb[120].mxu1 %vm639_vm1, %v12128_v43 }
0x1d09   :  { %10880 = vmatprep.mubr.msk.f32.mxu1 %vm639_vm1, %v12129_v28 }
0x1d0c   :  { %10881 = vmatmul.mubr.msk.f32.gmra.mrb[122].mxu1 %vm639_vm1, %v12130_v42 }
0x1d0d   :  { %10883 = vmatprep.mubr.msk.f32.mxu1 %vm639_vm1, %v12131_v38 }
0x1d10   :  { %10884 = vmatmul.mubr.msk.f32.gmra.mrb[124].mxu1 %vm639_vm1, %v12132_v15 }
0x1d11   :  { %10890 = vmatprep.mubr.msk.f32.mxu1 %vm639_vm1, %v12133_v17 }
0x1d14   :  { %10891 = vmatmul.mubr.msk.f32.vlgmr.msra.gmra.mrb[126].mxu1 %vm639_vm1, %v12134_v54 }
0x1d15   :  { %10893 = vmatprep.mubr.msk.f32.mxu1 %vm639_vm1, %v12135_v48  ;;  %11479 = vmatpush3.bf16.msra.mxu1 %v11476_v14 }
0x1d16   :  { %11481 = vmatprep.subr.bf16.mxu1 %v11480_v24 }
0x1d18   :  { %10894 = vmatmul.mubr.msk.f32.gmra.mrb[128].mxu1 %vm639_vm1, %v12136_v11 }
0x1d19   :  { %10896 = vmatprep.mubr.msk.f32.mxu1 %vm639_vm1, %v12137_v5  ;;  %11483 = vmatpush3.bf16.msra.mxu1 %v11480_v24 }
0x1d1c   :  { %10897 = vmatmul.mubr.msk.f32.gmra.mrb[130].mxu1 %vm639_vm1, %v12138_v12 }
0x1d1d   :  { %10899 = vmatprep.mubr.msk.f32.mxu1 %vm639_vm1, %v12139_v25 }
0x1d20   :  { %10900 = vmatmul.mubr.msk.f32.gmra.mrb[132].mxu1 %vm639_vm1, %v12140_v52 }
0x1d21   :  { %10902 = vmatprep.mubr.msk.f32.mxu1 %vm639_vm1, %v12141_v6 }
0x1d24   :  { %10903 = vmatmul.mubr.msk.f32.gmra.mrb[134].mxu1 %vm639_vm1, %v12142_v31  ;;  %vm14765_vm1 = vmmov %vm14761_vm4 }
0x1d25   :  { %vm14766_vm5 = vmmov %vm14765_vm1 }
0x1d26   :  { %vm14767_vm7 = vmmov %vm14765_vm1 }
0x1d27   :  { %vm14768_vm8 = vmmov %vm14765_vm1 }
0x1d28   :  { %vm14769_vm9 = vmmov %vm14765_vm1 }
0x1d29   :  { %vm14770_vm11 = vmmov %vm14765_vm1 }
0x1d2a   :  { %vm14771_vm14 = vmmov %vm14765_vm1 }
0x1d2b   :  { %vm14772_vm10 = vmmov %vm14765_vm1 }
0x1dd3   :  { %v10873_v45 = vpop.f32.mrb[116].mxu1 }
0x1dd4   :  { %v7296_v26 = vpop.f32.mrb[117].mxu1 }
0x1dd5   :  { %10913 = vmatprep.mubr.msk.f32.mxu0 %vm930_vm3, %v7296_v26 }
0x1dd6   :  { %10914 = vmatmul.mubr.msk.f32.vlgmr.msra.gmra.mrb[130].mxu0 %vm930_vm3, %v10873_v45 }
0x1dd7   :  { %v10876_v20 = vpop.f32.mrb[118].mxu1  ;;  %11463 = vmatpush3.bf16.msra.mxu0 %v11460_v7 }
0x1dd8   :  { %v7306_v8 = vpop.f32.mrb[119].mxu1  ;;  %11465 = vmatprep.subr.bf16.mxu0 %v11464_v29 }
0x1dd9   :  { %10916 = vmatprep.mubr.msk.f32.mxu0 %vm930_vm3, %v7306_v8 }
0x1dda   :  { %10917 = vmatmul.mubr.msk.f32.gmra.mrb[132].mxu0 %vm930_vm3, %v10876_v20 }
0x1ddb   :  { %v10879_v16 = vpop.f32.mrb[120].mxu1  ;;  %11467 = vmatpush3.bf16.msra.mxu0 %v11464_v29 }
0x1ddc   :  { %v7316_v1 = vpop.f32.mrb[121].mxu1  ;;  %11469 = vmatprep.subr.bf16.mxu0 %v11468_v53 }
0x1ddd   :  { %10919 = vmatprep.mubr.msk.f32.mxu0 %vm930_vm3, %v7316_v1 }
0x1dde   :  { %10920 = vmatmul.mubr.msk.f32.gmra.mrb[134].mxu0 %vm930_vm3, %v10879_v16 }
0x1ddf   :  { %v10882_v62 = vpop.f32.mrb[122].mxu1 }
0x1de0   :  { %v7326_v41 = vpop.f32.mrb[123].mxu1 }
0x1de1   :  { %10922 = vmatprep.mubr.msk.f32.mxu0 %vm930_vm3, %v7326_v41 }
0x1de2   :  { %10923 = vmatmul.mubr.msk.f32.gmra.mrb[136].mxu0 %vm930_vm3, %v10882_v62 }
0x1de3   :  { %v10885_v57 = vpop.f32.mrb[124].mxu1 }
0x1de4   :  { %v7336_v47 = vpop.f32.mrb[125].mxu1 }
0x1de5   :  { %10925 = vmatprep.mubr.msk.f32.mxu0 %vm930_vm3, %v7336_v47 }
0x1de6   :  { %10926 = vmatmul.mubr.msk.f32.gmra.mrb[138].mxu0 %vm930_vm3, %v10885_v57 }
0x1de7   :  { %v10892_v2 = vpop.f32.mrb[126].mxu1 }
0x1de8   :  { %v7411_v34 = vpop.f32.mrb[127].mxu1 }
0x1de9   :  { %10936 = vmatprep.mubr.msk.f32.mxu0 %vm930_vm3, %v7411_v34 }
0x1dea   :  { %10937 = vmatmul.mubr.msk.f32.vlgmr.msra.gmra.mrb[130].mxu0 %vm930_vm3, %v10892_v2 }
0x1deb   :  { %v10895_v36 = vpop.f32.mrb[128].mxu1  ;;  %11471 = vmatpush3.bf16.msra.mxu0 %v11468_v53 }
0x1dec   :  { %v7421_v40 = vpop.f32.mrb[129].mxu1  ;;  %11473 = vmatprep.subr.bf16.mxu0 %v11472_v58 }
0x1ded   :  { %10939 = vmatprep.mubr.msk.f32.mxu0 %vm930_vm3, %v7421_v40 }
0x1dee   :  { %10940 = vmatmul.mubr.msk.f32.gmra.mrb[132].mxu0 %vm930_vm3, %v10895_v36 }
0x1def   :  { %v10898_v37 = vpop.f32.mrb[130].mxu1  ;;  %11475 = vmatpush3.bf16.msra.mxu0 %v11472_v58 }
0x1df0   :  { %v7431_v30 = vpop.f32.mrb[131].mxu1 }
0x1df1   :  { %10942 = vmatprep.mubr.msk.f32.mxu0 %vm930_vm3, %v7431_v30 }
0x1df2   :  { %10943 = vmatmul.mubr.msk.f32.gmra.mrb[134].mxu0 %vm930_vm3, %v10898_v37 }
0x1df3   :  { %v10901_v9 = vpop.f32.mrb[132].mxu1 }
0x1df4   :  { %v7441_v63 = vpop.f32.mrb[133].mxu1 }
0x1df5   :  { %10945 = vmatprep.mubr.msk.f32.mxu0 %vm930_vm3, %v7441_v63 }
0x1df6   :  { %10946 = vmatmul.mubr.msk.f32.gmra.mrb[136].mxu0 %vm930_vm3, %v10901_v9 }
0x1df7   :  { %v10904_v46 = vpop.f32.mrb[134].mxu1 }
0x1df8   :  { %v7451_v27 = vpop.f32.mrb[135].mxu1 }
0x1df9   :  { %10948 = vmatprep.mubr.msk.f32.mxu0 %vm930_vm3, %v7451_v27 }
0x1dfa   :  { %10949 = vmatmul.mubr.msk.f32.gmra.mrb[138].mxu0 %vm930_vm3, %v10904_v46 }
0x1dfb   :  { %10959 = vmatprep.mubr.msk.f32.mxu0 %vm930_vm3, %v13659_v50 }
0x1dfe   :  { %10960 = vmatmul.mubr.msk.f32.vlgmr.msra.gmra.mrb[130].mxu0 %vm930_vm3, %v13661_v21 }
0x1dff   :  { %10962 = vmatprep.mubr.msk.f32.mxu0 %vm930_vm3, %v13670_v3 }
0x1e02   :  { %10963 = vmatmul.mubr.msk.f32.gmra.mrb[132].mxu0 %vm930_vm3, %v13673_v35 }
0x1e03   :  { %10965 = vmatprep.mubr.msk.f32.mxu0 %vm930_vm3, %v13680_v60 }
0x1e06   :  { %10966 = vmatmul.mubr.msk.f32.gmra.mrb[134].mxu0 %vm930_vm3, %v13683_v10 }
0x1e07   :  { %10968 = vmatprep.mubr.msk.f32.mxu0 %vm930_vm3, %v13691_v51 }
0x1e0a   :  { %10969 = vmatmul.mubr.msk.f32.gmra.mrb[136].mxu0 %vm930_vm3, %v13693_v55 }
0x1e0b   :  { %10971 = vmatprep.mubr.msk.f32.mxu0 %vm930_vm3, %v13699_v4 }
0x1e0e   :  { %10972 = vmatmul.mubr.msk.f32.gmra.mrb[138].mxu0 %vm930_vm3, %v13703_v0 }
0x1ed1   :  { %v10961_v43 = vpop.f32.mrb[130].mxu0 }
0x1ed2   :  { %v14409_v28 = vadd.f32 %v10961_v43, %v9237_v33  ;;  %v7842_v42 = vpop.f32.mrb[131].mxu0 }
0x1ed3   :  { %v14411_v38 = vadd.f32 %v9237_v33, %v7842_v42 }
0x1ed4   :  { %v7912_v15 = vmul.f32 0.044715, %v14409_v28 }
0x1ed5   :  { %v7911_v17 = vmul.f32 0.044715, %v14411_v38  ;;  %v10964_v54 = vpop.f32.mrb[132].mxu0 }
0x1ed6   :  { %v7922_v48 = vmul.f32 %v14409_v28, %v7912_v15  ;;  %v14416_v11 = vadd.f32 %v10964_v54, %v9237_v33  ;;  %v7852_v5 = vpop.f32.mrb[133].mxu0 }
0x1ed7   :  { %v7921_v12 = vmul.f32 %v14411_v38, %v7911_v17  ;;  %v14419_v25 = vadd.f32 %v9237_v33, %v7852_v5 }
0x1ed8   :  { %v7932_v52 = vmul.f32 %v14409_v28, %v7922_v48  ;;  %v7914_v6 = vmul.f32 0.044715, %v14416_v11 }
0x1ed9   :  { %v7931_v31 = vmul.f32 %v14411_v38, %v7921_v12  ;;  %v7913_v56 = vmul.f32 0.044715, %v14419_v25  ;;  %v10967_v23 = vpop.f32.mrb[134].mxu0 }
0x1eda   :  { %v7942_v7 = vadd.f32 %v14409_v28, %v7932_v52  ;;  %v7924_v59 = vmul.f32 %v14416_v11, %v7914_v6  ;;  %v14427_v44 = vadd.f32 %v10967_v23, %v9237_v33  ;;  %v7862_v45 = vpop.f32.mrb[135].mxu0 }
0x1edb   :  { %v7941_v26 = vadd.f32 %v14411_v38, %v7931_v31  ;;  %v7923_v29 = vmul.f32 %v14419_v25, %v7913_v56  ;;  %v14431_v49 = vadd.f32 %v9237_v33, %v7862_v45 }
0x1edc   :  { %v7952_v32 = vmul.f32 0.7978846, %v7942_v7  ;;  %v7934_v20 = vmul.f32 %v14416_v11, %v7924_v59  ;;  %v7916_v8 = vmul.f32 0.044715, %v14427_v44 }
0x1edd   :  { %v7933_v53 = vmul.f32 %v14419_v25, %v7923_v29  ;;  %v7915_v16 = vmul.f32 0.044715, %v14431_v49  ;;  %v10970_v1 = vpop.f32.mrb[136].mxu0  ;;  %v7951_v62 = vmul.f32 0.7978846, %v7941_v26  ;;  %v7901_v26 = vmul.f32 0.5, %v14411_v38 }
0x1ede   :  { %12022 = vtanh.f32 %v7952_v32  ;;  %v7944_v41 = vadd.f32 %v14416_v11, %v7934_v20  ;;  %v7926_v57 = vmul.f32 %v14427_v44, %v7916_v8  ;;  %v14439_v47 = vadd.f32 %v10970_v1, %v9237_v33  ;;  %v7872_v39 = vpop.f32.mrb[137].mxu0 }
0x1edf   :  { %v7943_v18 = vadd.f32 %v14419_v25, %v7933_v53  ;;  %v7925_v2 = vmul.f32 %v14431_v49, %v7915_v16  ;;  %v14443_v34 = vadd.f32 %v9237_v33, %v7872_v39  ;;  %12024 = vtanh.f32 %v7951_v62 }
0x1ee0   :  { %v7936_v58 = vmul.f32 %v14427_v44, %v7926_v57  ;;  %v7918_v36 = vmul.f32 0.044715, %v14439_v47  ;;  %v7954_v40 = vmul.f32 0.7978846, %v7944_v41  ;;  %v7902_v32 = vmul.f32 0.5, %v14409_v28 }
0x1ee1   :  { %v7935_v37 = vmul.f32 %v14431_v49, %v7925_v2  ;;  %v7917_v30 = vmul.f32 0.044715, %v14443_v34  ;;  %v10973_v9 = vpop.f32.mrb[138].mxu0  ;;  %v7953_v63 = vmul.f32 0.7978846, %v7943_v18  ;;  %v7903_v39 = vmul.f32 0.5, %v14419_v25 }
0x1ee2   :  { %v7946_v46 = vadd.f32 %v14427_v44, %v7936_v58  ;;  %v7928_v27 = vmul.f32 %v14439_v47, %v7918_v36  ;;  %v14451_v19 = vadd.f32 %v10973_v9, %v9237_v33  ;;  %v7882_v22 = vpop.f32.mrb[139].mxu0  ;;  %12026 = vtanh.f32 %v7954_v40 }
0x1ee3   :  { %v7945_v14 = vadd.f32 %v14431_v49, %v7935_v37  ;;  %v7927_v61 = vmul.f32 %v14443_v34, %v7917_v30  ;;  %v14455_v13 = vadd.f32 %v9237_v33, %v7882_v22  ;;  %12028 = vtanh.f32 %v7953_v63 }
0x1ee4   :  { %v7938_v24 = vmul.f32 %v14439_v47, %v7928_v27  ;;  %v7920_v43 = vmul.f32 0.044715, %v14451_v19  ;;  %v7956_v42 = vmul.f32 0.7978846, %v7946_v46  ;;  %v7904_v28 = vmul.f32 0.5, %v14416_v11 }
0x1ee5   :  { %v7937_v15 = vmul.f32 %v14443_v34, %v7927_v61  ;;  %v7919_v17 = vmul.f32 0.044715, %v14455_v13  ;;  %v7955_v54 = vmul.f32 0.7978846, %v7945_v14  ;;  %v7905_v37 = vmul.f32 0.5, %v14431_v49 }
0x1ee6   :  { %v7948_v48 = vadd.f32 %v14439_v47, %v7938_v24  ;;  %v7930_v5 = vmul.f32 %v14451_v19, %v7920_v43  ;;  %12030 = vtanh.f32 %v7956_v42  ;;  %v7906_v25 = vmul.f32 0.5, %v14427_v44 }
0x1ee7   :  { %v7947_v12 = vadd.f32 %v14443_v34, %v7937_v15  ;;  %v7929_v33 = vmul.f32 %v14455_v13, %v7919_v17  ;;  %12032 = vtanh.f32 %v7955_v54  ;;  %v7907_v22 = vmul.f32 0.5, %v14443_v34 }
0x1ee8   :  { %v12023_v52 = vpop.eup %12022  ;;  %v7940_v6 = vmul.f32 %v14451_v19, %v7930_v5  ;;  %v7958_v31 = vmul.f32 0.7978846, %v7948_v48  ;;  %v7908_v49 = vmul.f32 0.5, %v14439_v47  ;;  %v7909_v15 = vmul.f32 0.5, %v14455_v13  ;;  %v9072_v48 = vld [vmem:[%s13417_s12 + $0x20] sm:$0xff]  ;;  %v9073_v5 = vld [vmem:[%s13417_s12 + $0x28] sm:$0xff] }
0x1ee9   :  { %v12025_v56 = vpop.eup %12024  ;;  %v7972_v23 = vadd.f32 1.0, %v12023_v52  ;;  %v7939_v7 = vmul.f32 %v14455_v13, %v7929_v33  ;;  %v7957_v59 = vmul.f32 0.7978846, %v7947_v12  ;;  %v7910_v34 = vmul.f32 0.5, %v14451_v19  ;;  %v9074_v33 = vld [vmem:[%s13417_s12 + $0x30] sm:$0xff]  ;;  %v9075_v52 = vld [vmem:[%s13417_s12 + $0x38] sm:$0xff] }
0x1eea   :  { %v7950_v45 = vadd.f32 %v14451_v19, %v7940_v6  ;;  %v7971_v29 = vadd.f32 1.0, %v12025_v56  ;;  %12034 = vtanh.f32 %v7958_v31  ;;  %v11484_v12 = vpack.c.bf16 %v9073_v5, %v9072_v48  ;;  %v9258_v6 = vld [vmem:[%s13431_s24 + $0x1] ss:$0 sm:$0xff] }
0x1eeb   :  { %v7949_v20 = vadd.f32 %v14455_v13, %v7939_v7  ;;  %12036 = vtanh.f32 %v7957_v59  ;;  %v7982_v62 = vmul.f32 %v7972_v23, %v7902_v32  ;;  %v11488_v13 = vpack.c.bf16 %v9075_v52, %v9074_v33 }
0x1eec   :  { %v12027_v8 = vpop.eup %12026  ;;  %v7981_v53 = vmul.f32 %v7971_v29, %v7901_v26  ;;  %v7960_v16 = vmul.f32 0.7978846, %v7950_v45  ;;  %11485 = vmatprep.subr.bf16.mxu1 %v11484_v12 }
0x1eed   :  { %v12029_v1 = vpop.eup %12028  ;;  %v7974_v41 = vadd.f32 1.0, %v12027_v8  ;;  %v7959_v57 = vmul.f32 0.7978846, %v7949_v20 }
0x1eee   :  { %10982 = vmatprep.mubr.msk.f32.mxu1 %vm930_vm3, %v7981_v53  ;;  %v7973_v18 = vadd.f32 1.0, %v12029_v1  ;;  %12038 = vtanh.f32 %v7960_v16 }
0x1eef   :  { %10983 = vmatmul.mubr.msk.f32.vlgmr.msra.gmra.mrb[136].mxu1 %vm930_vm3, %v7982_v62  ;;  %12040 = vtanh.f32 %v7959_v57  ;;  %v7984_v36 = vmul.f32 %v7974_v41, %v7904_v28 }
0x1ef0   :  { %v12031_v38 = vpop.eup %12030  ;;  %v7983_v2 = vmul.f32 %v7973_v18, %v7903_v39  ;;  %11487 = vmatpush3.bf16.msra.mxu1 %v11484_v12 }
0x1ef1   :  { %v12033_v58 = vpop.eup %12032  ;;  %v7976_v40 = vadd.f32 1.0, %v12031_v38  ;;  %11489 = vmatprep.subr.bf16.mxu1 %v11488_v13 }
0x1ef2   :  { %10985 = vmatprep.mubr.msk.f32.mxu1 %vm930_vm3, %v7983_v2  ;;  %v7975_v30 = vadd.f32 1.0, %v12033_v58 }
0x1ef3   :  { %10986 = vmatmul.mubr.msk.f32.gmra.mrb[138].mxu1 %vm930_vm3, %v7984_v36  ;;  %v7986_v27 = vmul.f32 %v7976_v40, %v7906_v25 }
0x1ef4   :  { %v12035_v9 = vpop.eup %12034  ;;  %v7985_v63 = vmul.f32 %v7975_v30, %v7905_v37  ;;  %11491 = vmatpush3.bf16.msra.mxu1 %v11488_v13 }
0x1ef5   :  { %v12037_v46 = vpop.eup %12036  ;;  %v7978_v11 = vadd.f32 1.0, %v12035_v9 }
0x1ef6   :  { %10988 = vmatprep.mubr.msk.f32.mxu1 %vm930_vm3, %v7985_v63  ;;  %v7977_v14 = vadd.f32 1.0, %v12037_v46 }
0x1ef7   :  { %10989 = vmatmul.mubr.msk.f32.gmra.mrb[140].mxu1 %vm930_vm3, %v7986_v27  ;;  %v7988_v44 = vmul.f32 %v7978_v11, %v7908_v49 }
0x1ef8   :  { %v12039_v61 = vpop.eup %12038  ;;  %v7987_v24 = vmul.f32 %v7977_v14, %v7907_v22 }
0x1ef9   :  { %v12041_v43 = vpop.eup %12040  ;;  %v7980_v42 = vadd.f32 1.0, %v12039_v61 }
0x1efa   :  { %10991 = vmatprep.mubr.msk.f32.mxu1 %vm930_vm3, %v7987_v24  ;;  %v7979_v17 = vadd.f32 1.0, %v12041_v43 }
0x1efb   :  { %10992 = vmatmul.mubr.msk.f32.gmra.mrb[142].mxu1 %vm930_vm3, %v7988_v44  ;;  %v7990_v47 = vmul.f32 %v7980_v42, %v7910_v34 }
0x1efc   :  { %v7989_v54 = vmul.f32 %v7979_v17, %v7909_v15 }
0x1efe   :  { %10994 = vmatprep.mubr.msk.f32.mxu1 %vm930_vm3, %v7989_v54 }
0x1eff   :  { %10995 = vmatmul.mubr.msk.f32.gmra.mrb[144].mxu1 %vm930_vm3, %v7990_v47 }
0x1fc2   :  { %v10984_v31 = vpop.f32.mrb[136].mxu1 }
0x1fc3   :  { %v14494_v56 = vadd.f32 %v10984_v31, %v9258_v6  ;;  %v8093_v19 = vpop.f32.mrb[137].mxu1 }
0x1fc4   :  { %v14496_v23 = vadd.f32 %v9258_v6, %v8093_v19 }
0x1fc5   :  { %v8153_v7 = vmul.f32 0.044715, %v14494_v56 }
0x1fc6   :  { %v8152_v59 = vmul.f32 0.044715, %v14496_v23  ;;  %v10987_v45 = vpop.f32.mrb[138].mxu1 }
0x1fc7   :  { %v8163_v26 = vmul.f32 %v8153_v7, %v14494_v56  ;;  %v14501_v29 = vadd.f32 %v10987_v45, %v9258_v6  ;;  %v8103_v32 = vpop.f32.mrb[139].mxu1 }
0x1fc8   :  { %v8162_v20 = vmul.f32 %v8152_v59, %v14496_v23  ;;  %v14504_v8 = vadd.f32 %v9258_v6, %v8103_v32 }
0x1fc9   :  { %v8173_v53 = vmul.f32 %v8163_v26, %v14494_v56  ;;  %v8155_v16 = vmul.f32 0.044715, %v14501_v29 }
0x1fca   :  { %v8172_v1 = vmul.f32 %v8162_v20, %v14496_v23  ;;  %v8154_v62 = vmul.f32 0.044715, %v14504_v8  ;;  %v10990_v41 = vpop.f32.mrb[140].mxu1 }
0x1fcb   :  { %v8183_v57 = vadd.f32 %v8173_v53, %v14494_v56  ;;  %v8165_v39 = vmul.f32 %v8155_v16, %v14501_v29  ;;  %v14512_v18 = vadd.f32 %v10990_v41, %v9258_v6  ;;  %v8113_v28 = vpop.f32.mrb[141].mxu1 }
0x1fcc   :  { %v8182_v38 = vadd.f32 %v8172_v1, %v14496_v23  ;;  %v8164_v2 = vmul.f32 %v8154_v62, %v14504_v8  ;;  %v14516_v58 = vadd.f32 %v9258_v6, %v8113_v28 }
0x1fcd   :  { %v8193_v36 = vmul.f32 0.7978846, %v8183_v57  ;;  %v8175_v40 = vmul.f32 %v8165_v39, %v14501_v29  ;;  %v8157_v37 = vmul.f32 0.044715, %v14512_v18 }
0x1fce   :  { %v8174_v30 = vmul.f32 %v8164_v2, %v14504_v8  ;;  %v8156_v25 = vmul.f32 0.044715, %v14516_v58  ;;  %v10993_v9 = vpop.f32.mrb[142].mxu1  ;;  %v8192_v63 = vmul.f32 0.7978846, %v8182_v38  ;;  %v8142_v38 = vmul.f32 0.5, %v14496_v23 }
0x1fcf   :  { %12042 = vtanh.f32 %v8193_v36  ;;  %v8185_v46 = vadd.f32 %v8175_v40, %v14501_v29  ;;  %v8167_v27 = vmul.f32 %v8157_v37, %v14512_v18  ;;  %v14524_v11 = vadd.f32 %v10993_v9, %v9258_v6  ;;  %v8123_v22 = vpop.f32.mrb[143].mxu1 }
0x1fd0   :  { %v8184_v14 = vadd.f32 %v8174_v30, %v14504_v8  ;;  %v8166_v49 = vmul.f32 %v8156_v25, %v14516_v58  ;;  %v14528_v61 = vadd.f32 %v9258_v6, %v8123_v22  ;;  %12044 = vtanh.f32 %v8192_v63 }
0x1fd1   :  { %v8177_v24 = vmul.f32 %v8167_v27, %v14512_v18  ;;  %v8159_v43 = vmul.f32 0.044715, %v14524_v11  ;;  %v8195_v44 = vmul.f32 0.7978846, %v8185_v46  ;;  %v8143_v36 = vmul.f32 0.5, %v14494_v56 }
0x1fd2   :  { %v8176_v42 = vmul.f32 %v8166_v49, %v14516_v58  ;;  %v8158_v15 = vmul.f32 0.044715, %v14528_v61  ;;  %v10996_v17 = vpop.f32.mrb[144].mxu1  ;;  %v8194_v34 = vmul.f32 0.7978846, %v8184_v14  ;;  %v8144_v22 = vmul.f32 0.5, %v14504_v8 }
0x1fd3   :  { %v8187_v54 = vadd.f32 %v8177_v24, %v14512_v18  ;;  %v8169_v47 = vmul.f32 %v8159_v43, %v14524_v11  ;;  %v14536_v48 = vadd.f32 %v10996_v17, %v9258_v6  ;;  %v8133_v5 = vpop.f32.mrb[145].mxu1  ;;  %12046 = vtanh.f32 %v8195_v44 }
0x1fd4   :  { %v8186_v12 = vadd.f32 %v8176_v42, %v14516_v58  ;;  %v8168_v33 = vmul.f32 %v8158_v15, %v14528_v61  ;;  %v14540_v52 = vadd.f32 %v9258_v6, %v8133_v5  ;;  %12048 = vtanh.f32 %v8194_v34 }
0x1fd5   :  { %v8179_v13 = vmul.f32 %v8169_v47, %v14524_v11  ;;  %v8161_v31 = vmul.f32 0.044715, %v14536_v48  ;;  %v8197_v19 = vmul.f32 0.7978846, %v8187_v54  ;;  %v8145_v56 = vmul.f32 0.5, %v14501_v29 }
0x1fd6   :  { %v8178_v7 = vmul.f32 %v8168_v33, %v14528_v61  ;;  %v8160_v59 = vmul.f32 0.044715, %v14540_v52  ;;  %v8196_v45 = vmul.f32 0.7978846, %v8186_v12  ;;  %v8146_v42 = vmul.f32 0.5, %v14516_v58 }
0x1fd7   :  { %v8189_v26 = vadd.f32 %v8179_v13, %v14524_v11  ;;  %v8171_v32 = vmul.f32 %v8161_v31, %v14536_v48  ;;  %12050 = vtanh.f32 %v8197_v19  ;;  %v8147_v8 = vmul.f32 0.5, %v14512_v18 }
0x1fd8   :  { %v8188_v20 = vadd.f32 %v8178_v7, %v14528_v61  ;;  %v8170_v6 = vmul.f32 %v8160_v59, %v14540_v52  ;;  %12052 = vtanh.f32 %v8196_v45  ;;  %v8148_v5 = vmul.f32 0.5, %v14528_v61 }
0x1fd9   :  { %v12043_v53 = vpop.eup %12042  ;;  %v8181_v16 = vmul.f32 %v8171_v32, %v14536_v48  ;;  %v8199_v1 = vmul.f32 0.7978846, %v8189_v26  ;;  %v8149_v58 = vmul.f32 0.5, %v14524_v11  ;;  %v8150_v7 = vmul.f32 0.5, %v14540_v52  ;;  %v9269_v11 = vld [vmem:[%s14764_s21 + $0x1] ss:$0 sm:$0xff] }
0x1fda   :  { %v12045_v62 = vpop.eup %12044  ;;  %v8213_v41 = vadd.f32 1.0, %v12043_v53  ;;  %v8180_v57 = vmul.f32 %v8170_v6, %v14540_v52  ;;  %v8198_v39 = vmul.f32 0.7978846, %v8188_v20  ;;  %v8151_v61 = vmul.f32 0.5, %v14536_v48 }
0x1fdb   :  { %v8191_v28 = vadd.f32 %v8181_v16, %v14536_v48  ;;  %v8212_v2 = vadd.f32 1.0, %v12045_v62  ;;  %12054 = vtanh.f32 %v8199_v1 }
0x1fdc   :  { %v8190_v40 = vadd.f32 %v8180_v57, %v14540_v52  ;;  %12056 = vtanh.f32 %v8198_v39  ;;  %v8223_v63 = vmul.f32 %v8213_v41, %v8143_v36 }
0x1fdd   :  { %v12047_v37 = vpop.eup %12046  ;;  %v8222_v30 = vmul.f32 %v8212_v2, %v8142_v38  ;;  %v8201_v25 = vmul.f32 0.7978846, %v8191_v28 }
0x1fde   :  { %v12049_v9 = vpop.eup %12048  ;;  %v8215_v46 = vadd.f32 1.0, %v12047_v37  ;;  %v8200_v27 = vmul.f32 0.7978846, %v8190_v40 }
0x1fdf   :  { %11005 = vmatprep.mubr.msk.f32.mxu1 %vm930_vm3, %v8222_v30  ;;  %v8214_v14 = vadd.f32 1.0, %v12049_v9  ;;  %12058 = vtanh.f32 %v8201_v25 }
0x1fe0   :  { %11006 = vmatmul.mubr.msk.f32.vlgmr.msra.gmra.mrb[146].mxu1 %vm930_vm3, %v8223_v63  ;;  %12060 = vtanh.f32 %v8200_v27  ;;  %v8225_v43 = vmul.f32 %v8215_v46, %v8145_v56 }
0x1fe1   :  { %v12051_v23 = vpop.eup %12050  ;;  %v8224_v49 = vmul.f32 %v8214_v14, %v8144_v22 }
0x1fe2   :  { %v12053_v24 = vpop.eup %12052  ;;  %v8217_v44 = vadd.f32 1.0, %v12051_v23 }
0x1fe3   :  { %11008 = vmatprep.mubr.msk.f32.mxu1 %vm930_vm3, %v8224_v49  ;;  %v8216_v15 = vadd.f32 1.0, %v12053_v24 }
0x1fe4   :  { %11009 = vmatmul.mubr.msk.f32.gmra.mrb[148].mxu1 %vm930_vm3, %v8225_v43  ;;  %v8227_v47 = vmul.f32 %v8217_v44, %v8147_v8 }
0x1fe5   :  { %v12055_v17 = vpop.eup %12054  ;;  %v8226_v34 = vmul.f32 %v8216_v15, %v8146_v42 }
0x1fe6   :  { %v12057_v54 = vpop.eup %12056  ;;  %v8219_v29 = vadd.f32 1.0, %v12055_v17 }
0x1fe7   :  { %11011 = vmatprep.mubr.msk.f32.mxu1 %vm930_vm3, %v8226_v34  ;;  %v8218_v12 = vadd.f32 1.0, %v12057_v54 }
0x1fe8   :  { %11012 = vmatmul.mubr.msk.f32.gmra.mrb[150].mxu1 %vm930_vm3, %v8227_v47  ;;  %v8229_v19 = vmul.f32 %v8219_v29, %v8149_v58 }
0x1fe9   :  { %v12059_v33 = vpop.eup %12058  ;;  %v8228_v13 = vmul.f32 %v8218_v12, %v8148_v5 }
0x1fea   :  { %v12061_v31 = vpop.eup %12060  ;;  %v8221_v18 = vadd.f32 1.0, %v12059_v33 }
0x1feb   :  { %11014 = vmatprep.mubr.msk.f32.mxu1 %vm930_vm3, %v8228_v13  ;;  %v8220_v59 = vadd.f32 1.0, %v12061_v31 }
0x1fec   :  { %11015 = vmatmul.mubr.msk.f32.gmra.mrb[152].mxu1 %vm930_vm3, %v8229_v19  ;;  %v8231_v26 = vmul.f32 %v8221_v18, %v8151_v61 }
0x1fed   :  { %v8230_v45 = vmul.f32 %v8220_v59, %v8150_v7 }
0x1fef   :  { %11017 = vmatprep.mubr.msk.f32.mxu1 %vm930_vm3, %v8230_v45 }
0x1ff0   :  { %11018 = vmatmul.mubr.msk.f32.gmra.mrb[154].mxu1 %vm930_vm3, %v8231_v26 }
0x20b3   :  { %v11007_v32 = vpop.f32.mrb[146].mxu1 }
0x20b4   :  { %v8340_v20 = vadd.f32 %v11007_v32, %v9269_v11  ;;  %v8334_v6 = vpop.f32.mrb[147].mxu1 }
0x20b5   :  { %v8335_v53 = vadd.f32 %v9269_v11, %v8334_v6 }
0x20b6   :  { %v8384_v16 = vadd.f32 %v8340_v20, %v13661_v21 }
0x20b7   :  { %v11010_v1 = vpop.f32.mrb[148].mxu1  ;;  %v8383_v52 = vadd.f32 %v8335_v53, %v13659_v50 }
0x20b8   :  { %v8350_v62 = vadd.f32 %v11010_v1, %v9269_v11  ;;  %v8344_v41 = vpop.f32.mrb[149].mxu1  ;;  %v8396_v48 = vsel %vm930_vm3, %v8384_v16, 0.0 }
0x20b9   :  { %v8345_v57 = vadd.f32 %v9269_v11, %v8344_v41  ;;  %8397 = vadd.xlane.f32.xlu0 %v8396_v48  ;;  %v8393_v39 = vsel %vm930_vm3, %v8383_v52, 0.0 }
0x20ba   :  { %v8386_v28 = vadd.f32 %v8350_v62, %v13673_v35  ;;  %8394 = vadd.xlane.f32.xlu1 %v8393_v39 }
0x20bb   :  { %v11013_v38 = vpop.f32.mrb[150].mxu1  ;;  %v8385_v2 = vadd.f32 %v8345_v57, %v13670_v3 }
0x20bc   :  { %v8360_v36 = vadd.f32 %v11013_v38, %v9269_v11  ;;  %v8354_v40 = vpop.f32.mrb[151].mxu1  ;;  %v8402_v21 = vsel %vm930_vm3, %v8386_v28, 0.0 }
0x20bd   :  { %v8355_v37 = vadd.f32 %v9269_v11, %v8354_v40  ;;  %8403 = vadd.xlane.f32.xlu0 %v8402_v21  ;;  %v8399_v50 = vsel %vm930_vm3, %v8385_v2, 0.0 }
0x20be   :  { %v8388_v30 = vadd.f32 %v8360_v36, %v13683_v10  ;;  %8400 = vadd.xlane.f32.xlu1 %v8399_v50 }
0x20bf   :  { %v11016_v25 = vpop.f32.mrb[152].mxu1  ;;  %v8387_v9 = vadd.f32 %v8355_v37, %v13680_v60 }
0x20c0   :  { %v8370_v63 = vadd.f32 %v11016_v25, %v9269_v11  ;;  %v8364_v35 = vpop.f32.mrb[153].mxu1  ;;  %v8408_v46 = vsel %vm930_vm3, %v8388_v30, 0.0 }
0x20c1   :  { %v8365_v27 = vadd.f32 %v9269_v11, %v8364_v35  ;;  %8409 = vadd.xlane.f32.xlu0 %v8408_v46  ;;  %v8405_v3 = vsel %vm930_vm3, %v8387_v9, 0.0 }
0x20c2   :  { %v8390_v22 = vadd.f32 %v8370_v63, %v13693_v55  ;;  %8406 = vadd.xlane.f32.xlu1 %v8405_v3 }
0x20c3   :  { %v11019_v14 = vpop.f32.mrb[154].mxu1  ;;  %v8389_v56 = vadd.f32 %v8365_v27, %v13691_v51  ;;  %v8557_v27 = vld [vmem:[%s14648_s10] sm:$0xff] }
0x20c4   :  { %v8380_v23 = vadd.f32 %v11019_v14, %v9269_v11  ;;  %v8374_v10 = vpop.f32.mrb[155].mxu1  ;;  %v8414_v49 = vsel %vm930_vm3, %v8390_v22, 0.0  ;;  %11040 = vmatprep.mubr.msk.f32.mxu1 %vm14765_vm1, %v8557_v27 }
0x20c5   :  { %v8375_v24 = vadd.f32 %v9269_v11, %v8374_v10  ;;  %8415 = vadd.xlane.f32.xlu0 %v8414_v49  ;;  %v8411_v60 = vsel %vm930_vm3, %v8389_v56, 0.0 }
0x20c6   :  { %v8392_v43 = vadd.f32 %v8380_v23, %v13703_v0  ;;  %8412 = vadd.xlane.f32.xlu1 %v8411_v60 }
0x20c7   :  { %v8391_v44 = vadd.f32 %v8375_v24, %v13699_v4 }
0x20c8   :  { %v8420_v42 = vsel %vm930_vm3, %v8392_v43, 0.0 }
0x20c9   :  { %8421 = vadd.xlane.f32.xlu0 %v8420_v42  ;;  %v8417_v55 = vsel %vm930_vm3, %v8391_v44, 0.0 }
0x20ca   :  { %8418 = vadd.xlane.f32.xlu1 %v8417_v55 }
0x2146   :  { %v8398_v51 = vpop.xlane.xlu0 %8397 }
0x2147   :  { %v8424_v15 = vmul.f32 0.03125, %v8398_v51  ;;  %v8395_v8 = vpop.xlane.xlu1 %8394 }
0x2148   :  { %v8423_v17 = vmul.f32 0.03125, %v8395_v8 }
0x2149   :  { %v14595_v34 = vsub.f32 %v8384_v16, %v8424_v15 }
0x214a   :  { %v14597_v54 = vsub.f32 %v8383_v52, %v8423_v17  ;;  %v8404_v47 = vpop.xlane.xlu0 %8403 }
0x214b   :  { %v8426_v29 = vmul.f32 0.03125, %v8404_v47  ;;  %v8401_v0 = vpop.xlane.xlu1 %8400  ;;  %v8444_v4 = vmul.f32 %v14595_v34, %v14595_v34 }
0x214c   :  { %v8425_v5 = vmul.f32 0.03125, %v8401_v0  ;;  %v8443_v12 = vmul.f32 %v14597_v54, %v14597_v54 }
0x214d   :  { %v14603_v58 = vsub.f32 %v8386_v28, %v8426_v29  ;;  %v8456_v33 = vsel %vm930_vm3, %v8444_v4, 0.0 }
0x214e   :  { %v14606_v13 = vsub.f32 %v8385_v2, %v8425_v5  ;;  %v8410_v31 = vpop.xlane.xlu0 %8409  ;;  %8457 = vadd.xlane.f32.xlu0 %v8456_v33  ;;  %v8453_v19 = vsel %vm930_vm3, %v8443_v12, 0.0 }
0x214f   :  { %v8428_v18 = vmul.f32 0.03125, %v8410_v31  ;;  %v8407_v7 = vpop.xlane.xlu1 %8406  ;;  %8454 = vadd.xlane.f32.xlu1 %v8453_v19  ;;  %v8446_v59 = vmul.f32 %v14603_v58, %v14603_v58  ;;  %v9280_v31 = vld [vmem:[%s13648_s17 + $0x1] ss:$0 sm:$0xff] }
0x2150   :  { %v8427_v61 = vmul.f32 0.03125, %v8407_v7  ;;  %v8445_v45 = vmul.f32 %v14606_v13, %v14606_v13 }
0x2151   :  { %v14613_v26 = vsub.f32 %v8388_v30, %v8428_v18  ;;  %v8462_v11 = vsel %vm930_vm3, %v8446_v59, 0.0 }
0x2152   :  { %v14616_v32 = vsub.f32 %v8387_v9, %v8427_v61  ;;  %v8416_v20 = vpop.xlane.xlu0 %8415  ;;  %8463 = vadd.xlane.f32.xlu0 %v8462_v11  ;;  %v8459_v6 = vsel %vm930_vm3, %v8445_v45, 0.0  ;;  %v9281_v11 = vld [vmem:[%s13653_s8 + $0x1] ss:$0 sm:$0xff] }
0x2153   :  { %v8430_v53 = vmul.f32 0.03125, %v8416_v20  ;;  %v8413_v16 = vpop.xlane.xlu1 %8412  ;;  %8460 = vadd.xlane.f32.xlu1 %v8459_v6  ;;  %v8448_v1 = vmul.f32 %v14613_v26, %v14613_v26 }
0x2154   :  { %v8429_v52 = vmul.f32 0.03125, %v8413_v16  ;;  %v8447_v62 = vmul.f32 %v14616_v32, %v14616_v32 }
0x2155   :  { %v14623_v41 = vsub.f32 %v8390_v22, %v8430_v53  ;;  %v8468_v48 = vsel %vm930_vm3, %v8448_v1, 0.0 }
0x2156   :  { %v14626_v57 = vsub.f32 %v8389_v56, %v8429_v52  ;;  %8469 = vadd.xlane.f32.xlu0 %v8468_v48  ;;  %v8422_v39 = vpop.xlane.xlu0 %8421  ;;  %v8465_v28 = vsel %vm930_vm3, %v8447_v62, 0.0 }
0x2157   :  { %v8432_v38 = vmul.f32 0.03125, %v8422_v39  ;;  %8466 = vadd.xlane.f32.xlu1 %v8465_v28  ;;  %v8419_v2 = vpop.xlane.xlu1 %8418  ;;  %v8450_v36 = vmul.f32 %v14623_v41, %v14623_v41 }
0x2158   :  { %v8431_v40 = vmul.f32 0.03125, %v8419_v2  ;;  %v8449_v21 = vmul.f32 %v14626_v57, %v14626_v57 }
0x2159   :  { %v14633_v37 = vsub.f32 %v8392_v43, %v8432_v38  ;;  %v8474_v50 = vsel %vm930_vm3, %v8450_v36, 0.0 }
0x215a   :  { %v14636_v30 = vsub.f32 %v8391_v44, %v8431_v40  ;;  %8475 = vadd.xlane.f32.xlu0 %v8474_v50  ;;  %v8471_v25 = vsel %vm930_vm3, %v8449_v21, 0.0 }
0x215b   :  { %8472 = vadd.xlane.f32.xlu1 %v8471_v25  ;;  %v8452_v9 = vmul.f32 %v14633_v37, %v14633_v37 }
0x215c   :  { %v8451_v63 = vmul.f32 %v14636_v30, %v14636_v30 }
0x215d   :  { %v8480_v35 = vsel %vm930_vm3, %v8452_v9, 0.0 }
0x215e   :  { %8481 = vadd.xlane.f32.xlu0 %v8480_v35  ;;  %v8477_v46 = vsel %vm930_vm3, %v8451_v63, 0.0 }
0x215f   :  { %8478 = vadd.xlane.f32.xlu1 %v8477_v46 }
0x21db   :  { %v8458_v3 = vpop.xlane.xlu0 %8457 }
0x21dc   :  { %v8484_v22 = vmul.f32 0.03125, %v8458_v3  ;;  %v8455_v14 = vpop.xlane.xlu1 %8454 }
0x21dd   :  { %v8483_v56 = vmul.f32 0.03125, %v8455_v14 }
0x21de   :  { %v8494_v23 = vadd.f32 1e-05, %v8484_v22 }
0x21df   :  { %v8493_v10 = vadd.f32 1e-05, %v8483_v56  ;;  %v8464_v49 = vpop.xlane.xlu0 %8463 }
0x21e0   :  { %12062 = vrsqrt.f32 %v8494_v23  ;;  %v8486_v24 = vmul.f32 0.03125, %v8464_v49  ;;  %v8461_v60 = vpop.xlane.xlu1 %8460 }
0x21e1   :  { %12064 = vrsqrt.f32 %v8493_v10  ;;  %v8485_v43 = vmul.f32 0.03125, %v8461_v60 }
0x21e2   :  { %v8496_v44 = vadd.f32 1e-05, %v8486_v24 }
0x21e3   :  { %v8495_v42 = vadd.f32 1e-05, %v8485_v43  ;;  %v8470_v55 = vpop.xlane.xlu0 %8469 }
0x21e4   :  { %12066 = vrsqrt.f32 %v8496_v44  ;;  %v8488_v51 = vmul.f32 0.03125, %v8470_v55  ;;  %v8467_v15 = vpop.xlane.xlu1 %8466 }
0x21e5   :  { %12068 = vrsqrt.f32 %v8495_v42  ;;  %v8487_v8 = vmul.f32 0.03125, %v8467_v15 }
0x21e6   :  { %v8498_v17 = vadd.f32 1e-05, %v8488_v51 }
0x21e7   :  { %v8497_v47 = vadd.f32 1e-05, %v8487_v8  ;;  %v8476_v29 = vpop.xlane.xlu0 %8475  ;;  %v8559_v8 = vld [vmem:[%s14648_s10 + $0x10] sm:$0xff] }
0x21e8   :  { %12070 = vrsqrt.f32 %v8498_v17  ;;  %v8490_v0 = vmul.f32 0.03125, %v8476_v29  ;;  %v8473_v4 = vpop.xlane.xlu1 %8472  ;;  %v8561_v17 = vld [vmem:[%s14648_s10 + $0x20] sm:$0xff]  ;;  %v8563_v29 = vld [vmem:[%s14648_s10 + $0x30] sm:$0xff] }
0x21e9   :  { %12072 = vrsqrt.f32 %v8497_v47  ;;  %v8489_v5 = vmul.f32 0.03125, %v8473_v4  ;;  %v8562_v47 = vld [vmem:[%s14648_s10 + $0x28] sm:$0xff] }
0x21ea   :  { %v12063_v12 = vpop.eup %12062  ;;  %v8500_v33 = vadd.f32 1e-05, %v8490_v0  ;;  %v8564_v0 = vld [vmem:[%s14648_s10 + $0x38] sm:$0xff] }
0x21eb   :  { %v12065_v19 = vpop.eup %12064  ;;  %v8499_v18 = vadd.f32 1e-05, %v8489_v5  ;;  %v8482_v7 = vpop.xlane.xlu0 %8481  ;;  %v8514_v59 = vmul.f32 %v12063_v12, %v14595_v34 }
0x21ec   :  { %12074 = vrsqrt.f32 %v8500_v33  ;;  %v8492_v61 = vmul.f32 0.03125, %v8482_v7  ;;  %v8479_v45 = vpop.xlane.xlu1 %8478  ;;  %v8513_v20 = vmul.f32 %v12065_v19, %v14597_v54 }
0x21ed   :  { %12076 = vrsqrt.f32 %v8499_v18  ;;  %v8491_v6 = vmul.f32 0.03125, %v8479_v45  ;;  %v8530_v53 = vmul.f32 %v9280_v31, %v8514_v59 }
0x21ee   :  { %v12067_v16 = vpop.eup %12066  ;;  %v8502_v1 = vadd.f32 1e-05, %v8492_v61  ;;  %v8529_v52 = vmul.f32 %v9280_v31, %v8513_v20 }
0x21ef   :  { %v12069_v62 = vpop.eup %12068  ;;  %v8501_v48 = vadd.f32 1e-05, %v8491_v6  ;;  %v8546_v39 = vadd.f32 %v9281_v11, %v8530_v53  ;;  %v8516_v28 = vmul.f32 %v12067_v16, %v14603_v58 }
0x21f0   :  { %12078 = vrsqrt.f32 %v8502_v1  ;;  %v8545_v38 = vadd.f32 %v9281_v11, %v8529_v52  ;;  %v8515_v34 = vmul.f32 %v12069_v62, %v14606_v13 }
0x21f1   :  { %12080 = vrsqrt.f32 %v8501_v48  ;;  %v8532_v2 = vmul.f32 %v9280_v31, %v8516_v28 }
0x21f2   :  { %v12071_v36 = vpop.eup %12070  ;;  %v11492_v40 = vpack.c.bf16 %v8546_v39, %v8545_v38  ;;  %v8531_v54 = vmul.f32 %v9280_v31, %v8515_v34 }
0x21f3   :  { %v12073_v21 = vpop.eup %12072  ;;  %v8548_v50 = vadd.f32 %v9281_v11, %v8532_v2  ;;  %v8518_v25 = vmul.f32 %v12071_v36, %v14613_v26 }
0x21f4   :  { %11493 = vmatprep.subr.bf16.mxu1 %v11492_v40  ;;  %v8547_v9 = vadd.f32 %v9281_v11, %v8531_v54  ;;  %v8517_v63 = vmul.f32 %v12073_v21, %v14616_v32 }
0x21f5   :  { %11495 = vmatpush3.bf16.msra.mxu1 %v11492_v40  ;;  %v8534_v35 = vmul.f32 %v9280_v31, %v8518_v25 }
0x21f6   :  { %v12075_v58 = vpop.eup %12074  ;;  %v11496_v46 = vpack.c.bf16 %v8548_v50, %v8547_v9  ;;  %v8533_v27 = vmul.f32 %v9280_v31, %v8517_v63 }
0x21f7   :  { %v12077_v3 = vpop.eup %12076  ;;  %v8550_v13 = vadd.f32 %v9281_v11, %v8534_v35  ;;  %v8520_v22 = vmul.f32 %v12075_v58, %v14623_v41 }
0x21f8   :  { %11497 = vmatprep.subr.bf16.mxu1 %v11496_v46  ;;  %v8549_v14 = vadd.f32 %v9281_v11, %v8533_v27  ;;  %v8519_v56 = vmul.f32 %v12077_v3, %v14626_v57 }
0x21f9   :  { %11499 = vmatpush3.bf16.msra.mxu1 %v11496_v46  ;;  %v8536_v23 = vmul.f32 %v9280_v31, %v8520_v22 }
0x21fa   :  { %v12079_v26 = vpop.eup %12078  ;;  %v11500_v10 = vpack.c.bf16 %v8550_v13, %v8549_v14  ;;  %v8535_v49 = vmul.f32 %v9280_v31, %v8519_v56 }
0x21fb   :  { %v12081_v24 = vpop.eup %12080  ;;  %v8552_v32 = vadd.f32 %v9281_v11, %v8536_v23  ;;  %v8522_v60 = vmul.f32 %v12079_v26, %v14633_v37  ;;  %v8558_v37 = vld [vmem:[%s14648_s10 + $0x8] sm:$0xff] }
0x21fc   :  { %11501 = vmatprep.subr.bf16.mxu1 %v11500_v10  ;;  %v8551_v43 = vadd.f32 %v9281_v11, %v8535_v49  ;;  %v8521_v44 = vmul.f32 %v12081_v24, %v14636_v30  ;;  %v8560_v30 = vld [vmem:[%s14648_s10 + $0x18] sm:$0xff] }
0x21fd   :  { %11503 = vmatpush3.bf16.msra.mxu1 %v11500_v10  ;;  %v8538_v41 = vmul.f32 %v9280_v31, %v8522_v60 }
0x21fe   :  { %v11504_v57 = vpack.c.bf16 %v8552_v32, %v8551_v43  ;;  %v8537_v42 = vmul.f32 %v9280_v31, %v8521_v44 }
0x21ff   :  { %v8554_v55 = vadd.f32 %v9281_v11, %v8538_v41 }
0x2200   :  { %11505 = vmatprep.subr.bf16.mxu1 %v11504_v57  ;;  %v8553_v51 = vadd.f32 %v9281_v11, %v8537_v42 }
0x2201   :  { %11507 = vmatpush3.bf16.msra.mxu1 %v11504_v57 }
0x2202   :  { %v11508_v15 = vpack.c.bf16 %v8554_v55, %v8553_v51 }
0x2204   :  { %11509 = vmatprep.subr.bf16.mxu1 %v11508_v15 }
0x2205   :  { %11511 = vmatpush3.bf16.msra.mxu1 %v11508_v15 }
0x2208   :  { %11041 = vmatmul.mubr.msk.f32.vlgmr.msra.gmra.mrb[156].mxu1 %vm14766_vm5, %v8558_v37 }
0x2209   :  { %11043 = vmatprep.mubr.msk.f32.mxu1 %vm14767_vm7, %v8559_v8 }
0x220c   :  { %11044 = vmatmul.mubr.msk.f32.gmra.mrb[158].mxu1 %vm14768_vm8, %v8560_v30 }
0x220d   :  { %11046 = vmatprep.mubr.msk.f32.mxu1 %vm14769_vm9, %v8561_v17 }
0x2210   :  { %11047 = vmatmul.mubr.msk.f32.gmra.mrb[160].mxu1 %vm14770_vm11, %v8562_v47 }
0x2211   :  { %11049 = vmatprep.mubr.msk.f32.mxu1 %vm14771_vm14, %v8563_v29 }
0x2214   :  { %11050 = vmatmul.mubr.msk.f32.gmra.mrb[162].mxu1 %vm14772_vm10, %v8564_v0 }
0x22db   :  { %v11042_v4 = vpop.f32.mrb[156].mxu1 }
0x22dc   :  { %8695 = vst.msk [vmem:[%s8743_s2 + $0x8] sm:$0xff] %vm930_vm3, %v11042_v4  ;;  %v8655_v5 = vpop.f32.mrb[157].mxu1 }
0x22dd   :  { %8694 = vst.msk [vmem:[%s8743_s2] sm:$0xff] %vm930_vm3, %v8655_v5 }
0x22df   :  { %v11045_v12 = vpop.f32.mrb[158].mxu1 }
0x22e0   :  { %8697 = vst.msk [vmem:[%s8743_s2 + $0x18] sm:$0xff] %vm930_vm3, %v11045_v12  ;;  %v8665_v33 = vpop.f32.mrb[159].mxu1 }
0x22e1   :  { %8696 = vst.msk [vmem:[%s8743_s2 + $0x10] sm:$0xff] %vm930_vm3, %v8665_v33 }
0x22e3   :  { %v11048_v31 = vpop.f32.mrb[160].mxu1 }
0x22e4   :  { %8699 = vst.msk [vmem:[%s8743_s2 + $0x28] sm:$0xff] %vm930_vm3, %v11048_v31  ;;  %v8675_v19 = vpop.f32.mrb[161].mxu1 }
0x22e5   :  { %8698 = vst.msk [vmem:[%s8743_s2 + $0x20] sm:$0xff] %vm930_vm3, %v8675_v19 }
0x22e7   :  { %v11051_v18 = vpop.f32.mrb[162].mxu1 }
0x22e8   :  { %8701 = vst.msk [vmem:[%s8743_s2 + $0x38] sm:$0xff] %vm930_vm3, %v11051_v18  ;;  %v8685_v7 = vpop.f32.mrb[163].mxu1 }
0x22e9   :  { %8700 = vst.msk [vmem:[%s8743_s2 + $0x30] sm:$0xff] %vm930_vm3, %v8685_v7 }

</bundles_post_ra>
